<compile_context>
chip_gen: v6e
topology: v6e:2x2x1
jax: 0.10.0
libtpu: 0.0.40
codegen_flags: <defaults>
</compile_context>

<pallas_src>
import jax
import jax.numpy as jnp
from jax.experimental import pallas as pl
from jax.experimental.pallas import tpu as pltpu


def _pos_embed_kernel(p_ref, s_ref, o_ref):
    # p_ref: (tile_r, 6) [p0 | p1], s_ref: (3, 3*dim_v), o_ref: (tile_r, 3*dim_v)
    p = p_ref[...].astype(jnp.float32)
    d = 0.1 * (p[:, 3:6] - p[:, 0:3])                 # (tile_r, 3), VPU
    # out[r, j*3+c] = sum_c' d[r, c'] * s[c', j*3+c] = d[r, c] * W[j]  (MXU, K=3)
    out = jnp.dot(d, s_ref[...], preferred_element_type=jnp.float32)
    o_ref[...] = out.astype(o_ref.dtype)


def _normalize_weight(w):
    """Accepts (dim_v,) or the PyTorch nn.Linear(1, dim_v) layout (dim_v, 1)."""
    w = jnp.asarray(w)
    if w.ndim == 1:
        return w
    if w.ndim == 2 and w.shape[1] == 1:               # (dim_v, 1)
        return w[:, 0]
    raise ValueError(f"weight must be (dim_v,) or (dim_v, 1); got {w.shape}")


def _vmem_block_bytes(tile_r, L, out_dtype):
    """Double-buffered VMEM footprint of the pipeline's blocks."""
    in_b = 2 * tile_r * 128 * 4                       # (tile_r, 6) pads to 128 lanes
    w_b = 2 * 8 * L * 4                               # (3, L) pads to 8 sublanes
    out_b = 2 * tile_r * L * jnp.dtype(out_dtype).itemsize
    return in_b + w_b + out_b


def pos_embed(pos_0, pos_1, w, *, tile_r=None, out_dtype=jnp.float32,
              vmem_budget_bytes=32 * 1024 * 1024):
    """pos_0, pos_1: (B, N, 3); w: (dim_v,) or (dim_v, 1).

    Returns (B, N, dim_v, 3) = 0.1 * (pos_1 - pos_0)[..., None, :] * W[:, None].
    """
    B, N, three = pos_0.shape
    assert three == 3, pos_0.shape
    assert pos_1.shape == pos_0.shape, (pos_0.shape, pos_1.shape)

    w_flat = _normalize_weight(w).astype(jnp.float32)
    dim_v = w_flat.shape[0]
    L = 3 * dim_v                      # output lane width, index k = j*3 + c
    M = B * N                          # one row per node

    # Single (M, 6) input: [p0 | p1] per row (halves narrow-row VMEM/DMA count).
    p01 = jnp.concatenate(
        [pos_0.reshape(M, 3), pos_1.reshape(M, 3)], axis=-1)

    # Scatter+scale weight: s[c, j*3 + c'] = W[j] if c == c' else 0.  Tiny (3, L).
    w_rep = jnp.repeat(w_flat, 3)                                   # (L,), W[k // 3]
    col_c = jax.lax.broadcasted_iota(jnp.int32, (3, L), 1) % 3      # k % 3
    row_c = jax.lax.broadcasted_iota(jnp.int32, (3, L), 0)          # c
    s = jnp.where(col_c == row_c, w_rep[None, :], 0.0).astype(jnp.float32)

    # Row tile: derive from VMEM budget if not given (largest <= 4096 that fits),
    # then clamp to a multiple of 8 no larger than the (8-rounded) row count.
    if tile_r is None:
        tile_r = 4096
        while tile_r > 512 and _vmem_block_bytes(tile_r, L, out_dtype) > vmem_budget_bytes:
            tile_r //= 2
    tile_r = max(8, (int(tile_r) // 8) * 8)
    tile_r = min(tile_r, ((M + 7) // 8) * 8)
    grid = (pl.cdiv(M, tile_r),)

    # VMEM limit from actual block sizes (+ headroom), capped at v7x physical.
    vmem_limit = _vmem_block_bytes(tile_r, L, out_dtype) + 4 * 1024 * 1024
    vmem_limit = int(min(max(vmem_limit, 16 * 1024 * 1024), 64 * 1024 * 1024))

    out_flat = pl.pallas_call(
        _pos_embed_kernel,
        out_shape=jax.ShapeDtypeStruct((M, L), out_dtype),
        grid=grid,
        in_specs=[
            pl.BlockSpec((tile_r, 6), lambda i: (i, 0)),
            pl.BlockSpec((3, L), lambda i: (0, 0)),
        ],
        out_specs=pl.BlockSpec((tile_r, L), lambda i: (i, 0)),
        compiler_params=pltpu.CompilerParams(
            dimension_semantics=("parallel",),
            vmem_limit_bytes=vmem_limit,
        ),
    )(p01, s)

    # (M, 3*dim_v) with lane index j*3+c  ->  (B, N, dim_v, 3): pure view, no copy.
    return out_flat.reshape(B, N, dim_v, 3)


def pos_embed_ref(pos_0, pos_1, w):
    w_flat = _normalize_weight(w).astype(jnp.float32)
    dpos = 0.1 * (pos_1.astype(jnp.float32) - pos_0.astype(jnp.float32))    # (B,N,3)
    return dpos[:, :, None, :] * w_flat[None, None, :, None]                # (B,N,dim_v,3)


if __name__ == "__main__":
    key = jax.random.PRNGKey(0)
    k0, k1, kw = jax.random.split(key, 3)

    # Small demo: dim_v=128 -> 384-wide lane-dense output rows; M = 2400 rows.
    B, N, dim_v = 2, 1200, 128
    pos_0 = jax.random.normal(k0, (B, N, 3), dtype=jnp.float32)
    pos_1 = jax.random.normal(k1, (B, N, 3), dtype=jnp.float32)
    # PyTorch nn.Linear(1, dim_v) weight layout (dim_v, 1).
    w = jax.random.uniform(kw, (dim_v, 1), minval=-1.0, maxval=1.0,
                           dtype=jnp.float32)

    ref = pos_embed_ref(pos_0, pos_1, w)
    fn = jax.jit(pos_embed, static_argnames=("tile_r", "out_dtype"))

    # 1) Default path: auto tile (single step here), f32 output, tight tolerance.
    out = jax.block_until_ready(fn(pos_0, pos_1, w))
    assert out.shape == (B, N, dim_v, 3), out.shape
    assert jnp.allclose(out, ref, atol=1e-5, rtol=1e-5), "f32 mismatch vs reference"

    # 2) Multi-step grid (4 steps, ragged last block) + bf16 output (looser tol).
    out_bf16 = jax.block_until_ready(
        fn(pos_0, pos_1, w, tile_r=640, out_dtype=jnp.bfloat16))
    assert out_bf16.shape == (B, N, dim_v, 3), out_bf16.shape
    assert out_bf16.dtype == jnp.bfloat16
    assert jnp.allclose(out_bf16.astype(jnp.float32), ref, atol=1e-2, rtol=1e-2), \
        "bf16 mismatch vs reference"

    print("KERNEL_OK")
</pallas_src>

<mosaic_0001>
module attributes {stable_mosaic.version = 11 : i64} {
  func.func @_pos_embed_kernel(%arg0: i32, %arg1: memref<2400x6xf32, #tpu.memory_space<vmem>>, %arg2: memref<3x384xf32, #tpu.memory_space<vmem>>, %arg3: memref<2400x384xf32, #tpu.memory_space<vmem>>) attributes {dimension_semantics = [#tpu.dimension_semantics<parallel>], iteration_bounds = array<i64: 1>, scalar_prefetch = 0 : i64, scratch_operands = 0 : i64, tpu.core_type = #tpu.core_type<tc>, window_params = [{transform_indices = @transform_0, window_bounds = array<i64: 2400, 6>}, {pipeline_mode = #tpu.pipeline_mode<synchronous>, transform_indices = @transform_1, window_bounds = array<i64: 3, 384>}, {transform_indices = @transform_2, window_bounds = array<i64: 2400, 384>}]} {
    %c0 = arith.constant 0 : index
    %c0_0 = arith.constant 0 : index
    %0 = vector.load %arg1[%c0, %c0_0] : memref<2400x6xf32, #tpu.memory_space<vmem>>, vector<2400x6xf32>
    %1 = vector.extract_strided_slice %0 {offsets = [0, 3], sizes = [2400, 3], strides = [1, 1]} : vector<2400x6xf32> to vector<2400x3xf32>
    %2 = vector.extract_strided_slice %0 {offsets = [0, 0], sizes = [2400, 3], strides = [1, 1]} : vector<2400x6xf32> to vector<2400x3xf32>
    %3 = arith.subf %1, %2 : vector<2400x3xf32>
    %cst = arith.constant 1.000000e-01 : f32
    %4 = vector.broadcast %cst : f32 to vector<2400x3xf32>
    %5 = arith.mulf %4, %3 : vector<2400x3xf32>
    %c0_1 = arith.constant 0 : index
    %c0_2 = arith.constant 0 : index
    %6 = vector.load %arg2[%c0_1, %c0_2] : memref<3x384xf32, #tpu.memory_space<vmem>>, vector<3x384xf32>
    %cst_3 = arith.constant dense<0.000000e+00> : vector<2400x384xf32>
    %7 = tpu.matmul %5, %6, %cst_3 {dimension_numbers = #tpu.dot_dimension_numbers<[1], [0], [0], [1], [0, 0, 1, 1], [], []>} : vector<2400x3xf32>, vector<3x384xf32>, vector<2400x384xf32> -> vector<2400x384xf32>
    %c0_4 = arith.constant 0 : index
    %c0_5 = arith.constant 0 : index
    %8 = vector.load %arg3[%c0_4, %c0_5] : memref<2400x384xf32, #tpu.memory_space<vmem>>, vector<2400x384xf32>
    tpu.vector_store %arg3[%c0_4, %c0_5], %7 {strides = array<i32>} : memref<2400x384xf32, #tpu.memory_space<vmem>>, vector<2400x384xf32>,
    return
  }
  func.func @transform_0(%arg0: i32) -> (i32, i32) {
    %c0_i32 = arith.constant 0 : i32
    %c0_i32_0 = arith.constant 0 : i32
    return %arg0, %c0_i32 : i32, i32
  }
  func.func @transform_1(%arg0: i32) -> (i32, i32) {
    %c0_i32 = arith.constant 0 : i32
    %c0_i32_0 = arith.constant 0 : i32
    %c0_i32_1 = arith.constant 0 : i32
    return %c0_i32, %c0_i32_0 : i32, i32
  }
  func.func @transform_2(%arg0: i32) -> (i32, i32) {
    %c0_i32 = arith.constant 0 : i32
    %c0_i32_0 = arith.constant 0 : i32
    return %arg0, %c0_i32 : i32, i32
  }
}

</mosaic_0001>

<bundles_post_ra>
// kernel: pos_embed.1
= control target key start
LH: loop header
LB: loop body
LE: loop exit
PB: predicated region body
PF: predicated region fallthrough
CT: control target
= control target key end

     0   :  { %s9333_s13 = smov 3   ;;  %vm3617_vm0 = vcmask 1042432   ;;  %v16546_v48 = vmov 0.0   ;;  %s9335_s23 = smov 125   ;;  %vm3016_vm1 = vcmask 23552   ;;  %s16460_s0 = inlined_call_operand.vmem [shape: f32[2400,6], index: 0, kind: input, shape index: {}]   ;;  %s16461_s1 = inlined_call_operand.vmem [shape: f32[3,384], index: 1, kind: input, shape index: {}]   ;;  %s16462_s2 = inlined_call_operand.vmem [shape: f32[2400,384], index: 2, kind: output, shape index: {}]  }
   0x1   :  { %v9354_v0 = vld [vmem:[%s16460_s0] sm:$0xff]  ;;  %v9359_v1 = vld [vmem:[%s16460_s0 + $0x8] sm:$0xff]  ;;  %v9373_v3 = vld [vmem:[%s16460_s0 + $0x710] sm:$0xff]  ;;  %3688 = vmatprep.mubr.f32.mxu0 %v16546_v48  ;;  %5038 = vmatprep.mubr.f32.mxu1 %v16546_v48 }
   0x2   :  { %611 = vrot.lane.b32.xlu0 %v9354_v0, %s9333_s13  ;;  %613 = vrot.lane.b32.xlu1 %v9359_v1, %s9333_s13  ;;  %v9368_v2 = vld [vmem:[%s16460_s0 + $0x708] sm:$0xff]  ;;  %v9382_v4 = vld [vmem:[%s16460_s0 + $0x10] sm:$0xff] }
   0x3   :  { %v9387_v5 = vld [vmem:[%s16460_s0 + $0x718] sm:$0xff]  ;;  %v9401_v7 = vld [vmem:[%s16460_s0 + $0x720] sm:$0xff]  ;;  %v9415_v9 = vld [vmem:[%s16460_s0 + $0x728] sm:$0xff] }
   0x4   :  { %v9396_v6 = vld [vmem:[%s16460_s0 + $0x18] sm:$0xff]  ;;  %v9410_v8 = vld [vmem:[%s16460_s0 + $0x20] sm:$0xff]  ;;  %v9424_v10 = vld [vmem:[%s16460_s0 + $0x28] sm:$0xff] }
   0x5   :  { %v9429_v11 = vld [vmem:[%s16460_s0 + $0x730] sm:$0xff]  ;;  %v9443_v13 = vld [vmem:[%s16460_s0 + $0x738] sm:$0xff]  ;;  %v9457_v15 = vld [vmem:[%s16460_s0 + $0x740] sm:$0xff] }
   0x6   :  { %1061 = vrot.lane.b32.xlu0 %v9368_v2, %s9333_s13  ;;  %1063 = vrot.lane.b32.xlu1 %v9373_v3, %s9333_s13  ;;  %v9438_v12 = vld [vmem:[%s16460_s0 + $0x30] sm:$0xff]  ;;  %v9452_v14 = vld [vmem:[%s16460_s0 + $0x38] sm:$0xff] }
   0x7   :  { %v9466_v16 = vld [vmem:[%s16460_s0 + $0x40] sm:$0xff]  ;;  %v9471_v17 = vld [vmem:[%s16460_s0 + $0x748] sm:$0xff]  ;;  %v9485_v19 = vld [vmem:[%s16460_s0 + $0x750] sm:$0xff] }
   0x8   :  { %v9480_v18 = vld [vmem:[%s16460_s0 + $0x48] sm:$0xff]  ;;  %v9494_v20 = vld [vmem:[%s16460_s0 + $0x50] sm:$0xff]  ;;  %v9499_v21 = vld [vmem:[%s16460_s0 + $0x758] sm:$0xff] }
   0x9   :  { %v9508_v22 = vld [vmem:[%s16460_s0 + $0x58] sm:$0xff]  ;;  %v9513_v23 = vld [vmem:[%s16460_s0 + $0x760] sm:$0xff]  ;;  %v9527_v25 = vld [vmem:[%s16460_s0 + $0x768] sm:$0xff] }
   0xa   :  { %615 = vrot.lane.b32.xlu0 %v9382_v4, %s9333_s13  ;;  %1065 = vrot.lane.b32.xlu1 %v9387_v5, %s9333_s13  ;;  %v9522_v24 = vld [vmem:[%s16460_s0 + $0x60] sm:$0xff]  ;;  %v9536_v26 = vld [vmem:[%s16460_s0 + $0x68] sm:$0xff] }
   0xb   :  { %v9541_v27 = vld [vmem:[%s16460_s0 + $0x770] sm:$0xff]  ;;  %v9555_v29 = vld [vmem:[%s16460_s0 + $0x778] sm:$0xff]  ;;  %v9569_v31 = vld [vmem:[%s16460_s0 + $0x780] sm:$0xff] }
   0xc   :  { %v9550_v28 = vld [vmem:[%s16460_s0 + $0x70] sm:$0xff]  ;;  %v9564_v30 = vld [vmem:[%s16460_s0 + $0x78] sm:$0xff]  ;;  %v9578_v32 = vld [vmem:[%s16460_s0 + $0x80] sm:$0xff] }
   0xd   :  { %v9583_v33 = vld [vmem:[%s16460_s0 + $0x788] sm:$0xff]  ;;  %v9597_v35 = vld [vmem:[%s16460_s0 + $0x790] sm:$0xff]  ;;  %v9611_v37 = vld [vmem:[%s16460_s0 + $0x798] sm:$0xff] }
   0xe   :  { %617 = vrot.lane.b32.xlu0 %v9396_v6, %s9333_s13  ;;  %1067 = vrot.lane.b32.xlu1 %v9401_v7, %s9333_s13  ;;  %v9592_v34 = vld [vmem:[%s16460_s0 + $0x88] sm:$0xff]  ;;  %v9606_v36 = vld [vmem:[%s16460_s0 + $0x90] sm:$0xff] }
   0xf   :  { %v9620_v38 = vld [vmem:[%s16460_s0 + $0x98] sm:$0xff]  ;;  %v9625_v39 = vld [vmem:[%s16460_s0 + $0x7a0] sm:$0xff]  ;;  %v9639_v41 = vld [vmem:[%s16460_s0 + $0x7a8] sm:$0xff] }
  0x10   :  { %v9634_v40 = vld [vmem:[%s16460_s0 + $0xa0] sm:$0xff]  ;;  %v9648_v42 = vld [vmem:[%s16460_s0 + $0xa8] sm:$0xff]  ;;  %v9653_v43 = vld [vmem:[%s16460_s0 + $0x7b0] sm:$0xff] }
  0x11   :  { %v9662_v44 = vld [vmem:[%s16460_s0 + $0xb0] sm:$0xff]  ;;  %v9667_v45 = vld [vmem:[%s16460_s0 + $0x7b8] sm:$0xff]  ;;  %v2111_v46 = vld [vmem:[%s16461_s1] sm:$0x77] }
  0x12   :  { %619 = vrot.lane.b32.xlu0 %v9410_v8, %s9333_s13  ;;  %1069 = vrot.lane.b32.xlu1 %v9415_v9, %s9333_s13  ;;  %v3015_v47 = vcombine.high %v2111_v46, %v2111_v46 }
  0x14   :  { %7958 = vmatprep.subr.msk.mxu0 %vm3617_vm0, %v3015_v47  ;;  %9314 = vmatprep.subr.msk.mxu1 %vm3617_vm0, %v3015_v47 }
  0x15   :  { %7959 = vmatpush1.msk.msra.mxu0 %vm3617_vm0, %v2111_v46  ;;  %9315 = vmatpush1.msk.msra.mxu1 %vm3617_vm0, %v2111_v46 }
  0x16   :  { %621 = vrot.lane.b32.xlu0 %v9424_v10, %s9333_s13  ;;  %1071 = vrot.lane.b32.xlu1 %v9429_v11, %s9333_s13 }
  0x1a   :  { %623 = vrot.lane.b32.xlu0 %v9438_v12, %s9333_s13  ;;  %1073 = vrot.lane.b32.xlu1 %v9443_v13, %s9333_s13 }
  0x1e   :  { %625 = vrot.lane.b32.xlu0 %v9452_v14, %s9333_s13  ;;  %1075 = vrot.lane.b32.xlu1 %v9457_v15, %s9333_s13 }
  0x22   :  { %627 = vrot.lane.b32.xlu0 %v9466_v16, %s9333_s13  ;;  %1077 = vrot.lane.b32.xlu1 %v9471_v17, %s9333_s13 }
  0x26   :  { %629 = vrot.lane.b32.xlu0 %v9480_v18, %s9333_s13  ;;  %1079 = vrot.lane.b32.xlu1 %v9485_v19, %s9333_s13 }
  0x2a   :  { %631 = vrot.lane.b32.xlu0 %v9494_v20, %s9333_s13  ;;  %1081 = vrot.lane.b32.xlu1 %v9499_v21, %s9333_s13 }
  0x2e   :  { %633 = vrot.lane.b32.xlu0 %v9508_v22, %s9333_s13  ;;  %1083 = vrot.lane.b32.xlu1 %v9513_v23, %s9333_s13 }
  0x32   :  { %635 = vrot.lane.b32.xlu0 %v9522_v24, %s9333_s13  ;;  %1085 = vrot.lane.b32.xlu1 %v9527_v25, %s9333_s13 }
  0x36   :  { %637 = vrot.lane.b32.xlu0 %v9536_v26, %s9333_s13  ;;  %1087 = vrot.lane.b32.xlu1 %v9541_v27, %s9333_s13 }
  0x3a   :  { %639 = vrot.lane.b32.xlu0 %v9550_v28, %s9333_s13  ;;  %1089 = vrot.lane.b32.xlu1 %v9555_v29, %s9333_s13 }
  0x3e   :  { %641 = vrot.lane.b32.xlu0 %v9564_v30, %s9333_s13  ;;  %1091 = vrot.lane.b32.xlu1 %v9569_v31, %s9333_s13 }
  0x42   :  { %643 = vrot.lane.b32.xlu0 %v9578_v32, %s9333_s13  ;;  %1093 = vrot.lane.b32.xlu1 %v9583_v33, %s9333_s13 }
  0x46   :  { %645 = vrot.lane.b32.xlu0 %v9592_v34, %s9333_s13  ;;  %1095 = vrot.lane.b32.xlu1 %v9597_v35, %s9333_s13 }
  0x4a   :  { %647 = vrot.lane.b32.xlu0 %v9606_v36, %s9333_s13  ;;  %1097 = vrot.lane.b32.xlu1 %v9611_v37, %s9333_s13 }
  0x4e   :  { %649 = vrot.lane.b32.xlu0 %v9620_v38, %s9333_s13  ;;  %1099 = vrot.lane.b32.xlu1 %v9625_v39, %s9333_s13 }
  0x52   :  { %651 = vrot.lane.b32.xlu0 %v9634_v40, %s9333_s13  ;;  %1101 = vrot.lane.b32.xlu1 %v9639_v41, %s9333_s13 }
  0x56   :  { %653 = vrot.lane.b32.xlu0 %v9648_v42, %s9333_s13  ;;  %1103 = vrot.lane.b32.xlu1 %v9653_v43, %s9333_s13 }
  0x5a   :  { %655 = vrot.lane.b32.xlu0 %v9662_v44, %s9333_s13  ;;  %1105 = vrot.lane.b32.xlu1 %v9667_v45, %s9333_s13 }
  0x74   :  { %v612_v49 = vpop.permute.xlu0 %611  ;;  %v614_v50 = vpop.permute.xlu1 %613 }
  0x75   :  { %v1511_v51 = vsub.f32 %v9354_v0, %v612_v49  ;;  %v1512_v52 = vsub.f32 %v9359_v1, %v614_v50 }
  0x77   :  { %v1811_v53 = vmul.f32 0.1, %v1511_v51  ;;  %v1812_v56 = vmul.f32 0.1, %v1512_v52 }
  0x78   :  { %v1062_v54 = vpop.permute.xlu0 %1061  ;;  %v1064_v55 = vpop.permute.xlu1 %1063 }
  0x79   :  { %v1736_v57 = vsub.f32 %v9368_v2, %v1062_v54  ;;  %2413 = vrot.lane.b32.xlu0 %v1811_v53, %s9335_s23  ;;  %v1737_v58 = vsub.f32 %v9373_v3, %v1064_v55 }
  0x7b   :  { %v2036_v59 = vmul.f32 0.1, %v1736_v57  ;;  %v2037_v62 = vmul.f32 0.1, %v1737_v58 }
  0x7c   :  { %v616_v60 = vpop.permute.xlu0 %615  ;;  %v1066_v61 = vpop.permute.xlu1 %1065 }
  0x7d   :  { %v1513_v63 = vsub.f32 %v9382_v4, %v616_v60  ;;  %2415 = vrot.lane.b32.xlu0 %v1812_v56, %s9335_s23  ;;  %2863 = vrot.lane.b32.xlu1 %v2036_v59, %s9335_s23  ;;  %v1738_v0 = vsub.f32 %v9387_v5, %v1066_v61 }
  0x7f   :  { %v1813_v1 = vmul.f32 0.1, %v1513_v63  ;;  %v2038_v47 = vmul.f32 0.1, %v1738_v0 }
  0x80   :  { %v618_v46 = vpop.permute.xlu0 %617  ;;  %v1068_v2 = vpop.permute.xlu1 %1067 }
  0x81   :  { %v1514_v49 = vsub.f32 %v9396_v6, %v618_v46  ;;  %2865 = vrot.lane.b32.xlu1 %v2037_v62, %s9335_s23  ;;  %2417 = vrot.lane.b32.xlu0 %v1813_v1, %s9335_s23  ;;  %v1739_v3 = vsub.f32 %v9401_v7, %v1068_v2 }
  0x83   :  { %v1814_v50 = vmul.f32 0.1, %v1514_v49  ;;  %v2039_v52 = vmul.f32 0.1, %v1739_v3  ;;  %v9726_v3 = vld [vmem:[%s16460_s0 + $0x7c0] sm:$0xff] }
  0x84   :  { %v620_v4 = vpop.permute.xlu0 %619  ;;  %v1070_v51 = vpop.permute.xlu1 %1069 }
  0x85   :  { %v1515_v53 = vsub.f32 %v9410_v8, %v620_v4  ;;  %2867 = vrot.lane.b32.xlu1 %v2038_v47, %s9335_s23  ;;  %2419 = vrot.lane.b32.xlu0 %v1814_v50, %s9335_s23  ;;  %v1740_v5 = vsub.f32 %v9415_v9, %v1070_v51  ;;  %v9717_v47 = vld [vmem:[%s16460_s0 + $0xb8] sm:$0xff]  ;;  %v9735_v51 = vld [vmem:[%s16460_s0 + $0xc0] sm:$0xff] }
  0x87   :  { %v1815_v54 = vmul.f32 0.1, %v1515_v53  ;;  %v2040_v56 = vmul.f32 0.1, %v1740_v5  ;;  %v9744_v5 = vld [vmem:[%s16460_s0 + $0x7c8] sm:$0xff] }
  0x88   :  { %v622_v6 = vpop.permute.xlu0 %621  ;;  %v1072_v55 = vpop.permute.xlu1 %1071 }
  0x89   :  { %v1516_v57 = vsub.f32 %v9424_v10, %v622_v6  ;;  %2869 = vrot.lane.b32.xlu1 %v2039_v52, %s9335_s23  ;;  %2421 = vrot.lane.b32.xlu0 %v1815_v54, %s9335_s23  ;;  %v1741_v7 = vsub.f32 %v9429_v11, %v1072_v55  ;;  %v9753_v55 = vld [vmem:[%s16460_s0 + $0xc8] sm:$0xff] }
  0x8b   :  { %v1816_v58 = vmul.f32 0.1, %v1516_v57  ;;  %v2041_v60 = vmul.f32 0.1, %v1741_v7 }
  0x8c   :  { %v624_v8 = vpop.permute.xlu0 %623  ;;  %v1074_v59 = vpop.permute.xlu1 %1073 }
  0x8d   :  { %v1517_v61 = vsub.f32 %v9438_v12, %v624_v8  ;;  %2871 = vrot.lane.b32.xlu1 %v2040_v56, %s9335_s23  ;;  %2423 = vrot.lane.b32.xlu0 %v1816_v58, %s9335_s23  ;;  %v1742_v9 = vsub.f32 %v9443_v13, %v1074_v59  ;;  %v9762_v58 = vld [vmem:[%s16460_s0 + $0x7d0] sm:$0xff] }
  0x8f   :  { %v1817_v62 = vmul.f32 0.1, %v1517_v61  ;;  %v2042_v0 = vmul.f32 0.1, %v1742_v9 }
  0x90   :  { %v626_v10 = vpop.permute.xlu0 %625  ;;  %v1076_v63 = vpop.permute.xlu1 %1075 }
  0x91   :  { %v1518_v1 = vsub.f32 %v9452_v14, %v626_v10  ;;  %2873 = vrot.lane.b32.xlu1 %v2041_v60, %s9335_s23  ;;  %2425 = vrot.lane.b32.xlu0 %v1817_v62, %s9335_s23  ;;  %v1743_v11 = vsub.f32 %v9457_v15, %v1076_v63 }
  0x93   :  { %v1818_v46 = vmul.f32 0.1, %v1518_v1  ;;  %v2043_v2 = vmul.f32 0.1, %v1743_v11 }
  0x94   :  { %v628_v12 = vpop.permute.xlu0 %627  ;;  %v1078_v14 = vpop.permute.xlu1 %1077 }
  0x95   :  { %2875 = vrot.lane.b32.xlu1 %v2042_v0, %s9335_s23  ;;  %2427 = vrot.lane.b32.xlu0 %v1818_v46, %s9335_s23  ;;  %v1519_v13 = vsub.f32 %v9466_v16, %v628_v12  ;;  %v1744_v15 = vsub.f32 %v9471_v17, %v1078_v14 }
  0x97   :  { %v1819_v49 = vmul.f32 0.1, %v1519_v13  ;;  %v2044_v50 = vmul.f32 0.1, %v1744_v15  ;;  %v9807_v15 = vld [vmem:[%s16460_s0 + $0xe0] sm:$0xff] }
  0x98   :  { %v630_v16 = vpop.permute.xlu0 %629  ;;  %v1080_v17 = vpop.permute.xlu1 %1079 }
  0x99   :  { %2877 = vrot.lane.b32.xlu1 %v2043_v2, %s9335_s23  ;;  %657 = vrot.lane.b32.xlu0 %v9717_v47, %s9333_s13  ;;  %v1520_v4 = vsub.f32 %v9480_v18, %v630_v16  ;;  %v1745_v53 = vsub.f32 %v9485_v19, %v1080_v17  ;;  %v9816_v17 = vld [vmem:[%s16460_s0 + $0x7e8] sm:$0xff] }
  0x9b   :  { %v1820_v52 = vmul.f32 0.1, %v1520_v4  ;;  %v2045_v54 = vmul.f32 0.1, %v1745_v53 }
  0x9c   :  { %v632_v18 = vpop.permute.xlu0 %631  ;;  %v1082_v19 = vpop.permute.xlu1 %1081 }
  0x9d   :  { %1107 = vrot.lane.b32.xlu1 %v9726_v3, %s9333_s13  ;;  %2429 = vrot.lane.b32.xlu0 %v1819_v49, %s9335_s23  ;;  %v1521_v6 = vsub.f32 %v9494_v20, %v632_v18  ;;  %v1746_v57 = vsub.f32 %v9499_v21, %v1082_v19  ;;  %v9771_v21 = vld [vmem:[%s16460_s0 + $0xd0] sm:$0xff]  ;;  %v9825_v18 = vld [vmem:[%s16460_s0 + $0xe8] sm:$0xff] }
  0x9e   :  { %v9834_v19 = vld [vmem:[%s16460_s0 + $0x7f0] sm:$0xff] }
  0x9f   :  { %v1821_v56 = vmul.f32 0.1, %v1521_v6  ;;  %v2046_v20 = vmul.f32 0.1, %v1746_v57 }
  0xa0   :  { %v634_v7 = vpop.permute.xlu0 %633  ;;  %v1084_v59 = vpop.permute.xlu1 %1083 }
  0xa1   :  { %2879 = vrot.lane.b32.xlu1 %v2044_v50, %s9335_s23  ;;  %659 = vrot.lane.b32.xlu0 %v9735_v51, %s9333_s13  ;;  %v1522_v8 = vsub.f32 %v9508_v22, %v634_v7  ;;  %v1747_v9 = vsub.f32 %v9513_v23, %v1084_v59  ;;  %v9780_v22 = vld [vmem:[%s16460_s0 + $0x7d8] sm:$0xff]  ;;  %v9842_v7 = vld [vmem:[%s16460_s0 + $0xf0] sm:$0xff] }
  0xa2   :  { %v9789_v23 = vld [vmem:[%s16460_s0 + $0xd8] sm:$0xff] }
  0xa3   :  { %v1822_v61 = vmul.f32 0.1, %v1522_v8  ;;  %v2047_v63 = vmul.f32 0.1, %v1747_v9  ;;  %v9851_v8 = vld [vmem:[%s16460_s0 + $0x7f8] sm:$0xff] }
  0xa4   :  { %v636_v60 = vpop.permute.xlu0 %635  ;;  %v1086_v62 = vpop.permute.xlu1 %1085 }
  0xa5   :  { %1109 = vrot.lane.b32.xlu1 %v9744_v5, %s9333_s13  ;;  %2431 = vrot.lane.b32.xlu0 %v1820_v52, %s9335_s23  ;;  %v1523_v0 = vsub.f32 %v9522_v24, %v636_v60  ;;  %v1748_v12 = vsub.f32 %v9527_v25, %v1086_v62  ;;  %v9798_v24 = vld [vmem:[%s16460_s0 + $0x7e0] sm:$0xff] }
  0xa7   :  { %v1823_v46 = vmul.f32 0.1, %v1523_v0  ;;  %v2048_v14 = vmul.f32 0.1, %v1748_v12 }
  0xa8   :  { %v638_v10 = vpop.permute.xlu0 %637  ;;  %v1088_v1 = vpop.permute.xlu1 %1087 }
  0xa9   :  { %2881 = vrot.lane.b32.xlu1 %v2045_v54, %s9335_s23  ;;  %661 = vrot.lane.b32.xlu0 %v9753_v55, %s9333_s13  ;;  %v1524_v49 = vsub.f32 %v9536_v26, %v638_v10  ;;  %v1749_v50 = vsub.f32 %v9541_v27, %v1088_v1 }
  0xab   :  { %v1824_v16 = vmul.f32 0.1, %v1524_v49  ;;  %v2049_v26 = vmul.f32 0.1, %v1749_v50 }
  0xac   :  { %v640_v11 = vpop.permute.xlu0 %639  ;;  %v1090_v2 = vpop.permute.xlu1 %1089 }
  0xad   :  { %1111 = vrot.lane.b32.xlu1 %v9762_v58, %s9333_s13  ;;  %2433 = vrot.lane.b32.xlu0 %v1821_v56, %s9335_s23  ;;  %v1525_v52 = vsub.f32 %v9550_v28, %v640_v11  ;;  %v1750_v6 = vsub.f32 %v9555_v29, %v1090_v2  ;;  %v9882_v11 = vld [vmem:[%s16460_s0 + $0x100] sm:$0xff] }
  0xaf   :  { %v1825_v54 = vmul.f32 0.1, %v1525_v52  ;;  %v2050_v56 = vmul.f32 0.1, %v1750_v6 }
  0xb0   :  { %v642_v13 = vpop.permute.xlu0 %641  ;;  %v1092_v25 = vpop.permute.xlu1 %1091 }
  0xb1   :  { %2883 = vrot.lane.b32.xlu1 %v2046_v20, %s9335_s23  ;;  %663 = vrot.lane.b32.xlu0 %v9771_v21, %s9333_s13  ;;  %v1526_v29 = vsub.f32 %v9564_v30, %v642_v13  ;;  %v1751_v60 = vsub.f32 %v9569_v31, %v1092_v25  ;;  %v9860_v30 = vld [vmem:[%s16460_s0 + $0xf8] sm:$0xff]  ;;  %v9906_v25 = vld [vmem:[%s16460_s0 + $0x108] sm:$0xff] }
  0xb3   :  { %v1826_v59 = vmul.f32 0.1, %v1526_v29  ;;  %v2051_v9 = vmul.f32 0.1, %v1751_v60 }
  0xb4   :  { %v644_v4 = vpop.permute.xlu0 %643  ;;  %v1094_v53 = vpop.permute.xlu1 %1093 }
  0xb5   :  { %1113 = vrot.lane.b32.xlu1 %v9780_v22, %s9333_s13  ;;  %2435 = vrot.lane.b32.xlu0 %v1822_v61, %s9335_s23  ;;  %v1527_v62 = vsub.f32 %v9578_v32, %v644_v4  ;;  %v1752_v1 = vsub.f32 %v9583_v33, %v1094_v53  ;;  %v9893_v33 = vld [vmem:[%s16460_s0 + $0x808] sm:$0xff]  ;;  %v9917_v4 = vld [vmem:[%s16460_s0 + $0x810] sm:$0xff] }
  0xb7   :  { %v1827_v0 = vmul.f32 0.1, %v1527_v62 }
  0xb8   :  { %v646_v27 = vpop.permute.xlu0 %645  ;;  %v1096_v28 = vpop.permute.xlu1 %1095 }
  0xb9   :  { %2885 = vrot.lane.b32.xlu1 %v2047_v63, %s9335_s23  ;;  %665 = vrot.lane.b32.xlu0 %v9789_v23, %s9333_s13  ;;  %v9871_v63 = vld [vmem:[%s16460_s0 + $0x800] sm:$0xff]  ;;  %v1528_v12 = vsub.f32 %v9592_v34, %v646_v27 }
  0xbb   :  { %v1828_v13 = vmul.f32 0.1, %v1528_v12 }
  0xbc   :  { %v648_v57 = vpop.permute.xlu0 %647  ;;  %v1098_v20 = vpop.permute.xlu1 %1097 }
  0xbd   :  { %1115 = vrot.lane.b32.xlu1 %v9798_v24, %s9333_s13  ;;  %2437 = vrot.lane.b32.xlu0 %v1823_v46, %s9335_s23  ;;  %v2052_v46 = vmul.f32 0.1, %v1752_v1  ;;  %v1529_v50 = vsub.f32 %v9606_v36, %v648_v57  ;;  %v1754_v52 = vsub.f32 %v9611_v37, %v1098_v20  ;;  %v9931_v36 = vld [vmem:[%s16460_s0 + $0x110] sm:$0xff] }
  0xbf   :  { %v2054_v27 = vmul.f32 0.1, %v1754_v52 }
  0xc0   :  { %v650_v61 = vpop.permute.xlu0 %649  ;;  %v1100_v10 = vpop.permute.xlu1 %1099 }
  0xc1   :  { %2887 = vrot.lane.b32.xlu1 %v2048_v14, %s9335_s23  ;;  %667 = vrot.lane.b32.xlu0 %v9807_v15, %s9333_s13  ;;  %v1753_v14 = vsub.f32 %v9597_v35, %v1096_v28  ;;  %v1530_v37 = vsub.f32 %v9620_v38, %v650_v61  ;;  %v9950_v38 = vld [vmem:[%s16460_s0 + $0x818] sm:$0xff] }
  0xc3   :  { %v1830_v28 = vmul.f32 0.1, %v1530_v37 }
  0xc4   :  { %v9866_v31 = vpop.permute.xlu0 %651  ;;  %v9877_v32 = vpop.permute.xlu1 %1101 }
  0xc5   :  { %1117 = vrot.lane.b32.xlu1 %v9816_v17, %s9333_s13  ;;  %2439 = vrot.lane.b32.xlu0 %v1824_v16, %s9335_s23  ;;  %v2053_v16 = vmul.f32 0.1, %v1753_v14  ;;  %v1756_v62 = vsub.f32 %v9639_v41, %v9877_v32  ;;  %v10009_v41 = vld [vmem:[%s16460_s0 + $0x120] sm:$0xff] }
  0xc8   :  { %v9885_v2 = vpop.permute.xlu0 %653  ;;  %v9896_v49 = vpop.permute.xlu1 %1103 }
  0xc9   :  { %2889 = vrot.lane.b32.xlu1 %v2049_v26, %s9335_s23  ;;  %669 = vrot.lane.b32.xlu0 %v9825_v18, %s9333_s13  ;;  %v1829_v26 = vmul.f32 0.1, %v1529_v50  ;;  %v1532_v1 = vsub.f32 %v9648_v42, %v9885_v2  ;;  %v10029_v42 = vld [vmem:[%s16460_s0 + $0x828] sm:$0xff]  ;;  %v1757_v2 = vsub.f32 %v9653_v43, %v9896_v49 }
  0xca   :  { %v10049_v43 = vld [vmem:[%s16460_s0 + $0x128] sm:$0xff] }
  0xcb   :  { %v1832_v12 = vmul.f32 0.1, %v1532_v1  ;;  %v2057_v49 = vmul.f32 0.1, %v1757_v2  ;;  %v10111_v1 = vld [vmem:[%s16460_s0 + $0x138] sm:$0xff] }
  0xcc   :  { %v9901_v34 = vpop.permute.xlu0 %655  ;;  %v9912_v35 = vpop.permute.xlu1 %1105 }
  0xcd   :  { %1119 = vrot.lane.b32.xlu1 %v9834_v19, %s9333_s13  ;;  %2441 = vrot.lane.b32.xlu0 %v1825_v54, %s9335_s23  ;;  %v1758_v52 = vsub.f32 %v9667_v45, %v9912_v35 }
  0xd1   :  { %2891 = vrot.lane.b32.xlu1 %v2050_v56, %s9335_s23  ;;  %671 = vrot.lane.b32.xlu0 %v9842_v7, %s9333_s13  ;;  %v1755_v56 = vsub.f32 %v9625_v39, %v1100_v10  ;;  %v9969_v39 = vld [vmem:[%s16460_s0 + $0x118] sm:$0xff] }
  0xd3   :  { %v2055_v20 = vmul.f32 0.1, %v1755_v56  ;;  %v2058_v56 = vmul.f32 0.1, %v1758_v52 }
  0xd5   :  { %1121 = vrot.lane.b32.xlu1 %v9851_v8, %s9333_s13  ;;  %2443 = vrot.lane.b32.xlu0 %v1826_v59, %s9335_s23  ;;  %v1531_v59 = vsub.f32 %v9634_v40, %v9866_v31  ;;  %v9989_v40 = vld [vmem:[%s16460_s0 + $0x820] sm:$0xff] }
  0xd9   :  { %2893 = vrot.lane.b32.xlu1 %v2051_v9, %s9335_s23  ;;  %673 = vrot.lane.b32.xlu0 %v9860_v30, %s9333_s13  ;;  %v1831_v9 = vmul.f32 0.1, %v1531_v59  ;;  %v10097_v59 = vld [vmem:[%s16460_s0 + $0x838] sm:$0xff] }
  0xdd   :  { %1123 = vrot.lane.b32.xlu1 %v9871_v63, %s9333_s13  ;;  %2445 = vrot.lane.b32.xlu0 %v1827_v0, %s9335_s23  ;;  %v2056_v0 = vmul.f32 0.1, %v1756_v62 }
  0xe1   :  { %2895 = vrot.lane.b32.xlu1 %v2052_v46, %s9335_s23  ;;  %675 = vrot.lane.b32.xlu0 %v9882_v11, %s9333_s13 }
  0xe5   :  { %1125 = vrot.lane.b32.xlu1 %v9893_v33, %s9333_s13  ;;  %2447 = vrot.lane.b32.xlu0 %v1828_v13, %s9335_s23 }
  0xe9   :  { %2897 = vrot.lane.b32.xlu1 %v2053_v16, %s9335_s23  ;;  %677 = vrot.lane.b32.xlu0 %v9906_v25, %s9333_s13  ;;  %v1533_v16 = vsub.f32 %v9662_v44, %v9901_v34  ;;  %v10068_v44 = vld [vmem:[%s16460_s0 + $0x830] sm:$0xff] }
  0xeb   :  { %v9920_v53 = vpop.permute.xlu0 %2413  ;;  %v1833_v34 = vmul.f32 0.1, %v1533_v16  ;;  %v10125_v16 = vld [vmem:[%s16460_s0 + $0x840] sm:$0xff] }
  0xec   :  { %7960 = vmatmul.mubr.msk.f32.vlgmr.msra.gmra.mxu0 %vm3016_vm1, %v9920_v53 }
  0xed   :  { %1127 = vrot.lane.b32.xlu1 %v9917_v4, %s9333_s13  ;;  %2449 = vrot.lane.b32.xlu0 %v1829_v26, %s9335_s23 }
  0xee   :  { %3694 = vmatprep.mubr.f32.mxu0 %v16546_v48 }
  0xef   :  { %v9934_v54 = vpop.permute.xlu1 %2863  ;;  %v9936_v6 = vpop.permute.xlu0 %2415 }
  0xf0   :  { %16588 = vst [vmem:[#allocation2_spill] sm:$0xff] %v9934_v54  ;;  %7961 = vmatmul.mubr.msk.f32.gmra.mxu0 %vm3016_vm1, %v9936_v6  ;;  %8185 = vmatmul.mubr.msk.f32.vlgmr.msra.gmra.mxu1 %vm3016_vm1, %v9934_v54 }
  0xf1   :  { %2899 = vrot.lane.b32.xlu1 %v2054_v27, %s9335_s23  ;;  %679 = vrot.lane.b32.xlu0 %v9931_v36, %s9333_s13 }
  0xf2   :  { %5044 = vmatprep.mubr.f32.mxu1 %v16546_v48  ;;  %3700 = vmatprep.mubr.f32.mxu0 %v16546_v48 }
  0xf3   :  { %v9953_v57 = vpop.permute.xlu1 %2865  ;;  %v9955_v29 = vpop.permute.xlu0 %2417 }
  0xf4   :  { %16589 = vst [vmem:[#allocation3_spill] sm:$0xff] %v9953_v57  ;;  %7962 = vmatmul.mubr.msk.f32.gmra.mxu0 %vm3016_vm1, %v9955_v29  ;;  %8186 = vmatmul.mubr.msk.f32.gmra.mxu1 %vm3016_vm1, %v9953_v57 }
  0xf5   :  { %1129 = vrot.lane.b32.xlu1 %v9950_v38, %s9333_s13  ;;  %2451 = vrot.lane.b32.xlu0 %v1830_v28, %s9335_s23  ;;  %v10083_v28 = vld [vmem:[%s16460_s0 + $0x130] sm:$0xff] }
  0xf6   :  { %5050 = vmatprep.mubr.f32.mxu1 %v16546_v48  ;;  %3706 = vmatprep.mubr.f32.mxu0 %v16546_v48 }
  0xf7   :  { %v9973_v60 = vpop.permute.xlu1 %2867  ;;  %v9975_v61 = vpop.permute.xlu0 %2419 }
  0xf8   :  { %16590 = vst [vmem:[#allocation4_spill] sm:$0xff] %v9973_v60  ;;  %7963 = vmatmul.mubr.msk.f32.gmra.mxu0 %vm3016_vm1, %v9975_v61  ;;  %8187 = vmatmul.mubr.msk.f32.gmra.mxu1 %vm3016_vm1, %v9973_v60 }
  0xf9   :  { %2901 = vrot.lane.b32.xlu1 %v2055_v20, %s9335_s23  ;;  %681 = vrot.lane.b32.xlu0 %v9969_v39, %s9333_s13 }
  0xfa   :  { %5056 = vmatprep.mubr.f32.mxu1 %v16546_v48  ;;  %3712 = vmatprep.mubr.f32.mxu0 %v16546_v48 }
  0xfb   :  { %v9993_v10 = vpop.permute.xlu1 %2869  ;;  %v9995_v31 = vpop.permute.xlu0 %2421 }
  0xfc   :  { %16591 = vst [vmem:[#allocation5_spill] sm:$0xff] %v9993_v10  ;;  %7964 = vmatmul.mubr.msk.f32.gmra.mxu0 %vm3016_vm1, %v9995_v31  ;;  %8188 = vmatmul.mubr.msk.f32.gmra.mxu1 %vm3016_vm1, %v9993_v10 }
  0xfd   :  { %1131 = vrot.lane.b32.xlu1 %v9989_v40, %s9333_s13  ;;  %2453 = vrot.lane.b32.xlu0 %v1831_v9, %s9335_s23 }
  0xfe   :  { %5062 = vmatprep.mubr.f32.mxu1 %v16546_v48  ;;  %3718 = vmatprep.mubr.f32.mxu0 %v16546_v48 }
  0xff   :  { %v10013_v32 = vpop.permute.xlu1 %2871  ;;  %v10015_v46 = vpop.permute.xlu0 %2423 }
 0x100   :  { %16592 = vst [vmem:[#allocation6_spill] sm:$0xff] %v10013_v32  ;;  %7965 = vmatmul.mubr.msk.f32.gmra.mxu0 %vm3016_vm1, %v10015_v46  ;;  %8189 = vmatmul.mubr.msk.f32.gmra.mxu1 %vm3016_vm1, %v10013_v32 }
 0x101   :  { %2903 = vrot.lane.b32.xlu1 %v2056_v0, %s9335_s23  ;;  %683 = vrot.lane.b32.xlu0 %v10009_v41, %s9333_s13 }
 0x102   :  { %5068 = vmatprep.mubr.f32.mxu1 %v16546_v48  ;;  %3724 = vmatprep.mubr.f32.mxu0 %v16546_v48 }
 0x103   :  { %v10033_v13 = vpop.permute.xlu1 %2873  ;;  %v10035_v14 = vpop.permute.xlu0 %2425 }
 0x104   :  { %16593 = vst [vmem:[#allocation7_spill] sm:$0xff] %v10033_v13  ;;  %7966 = vmatmul.mubr.msk.f32.gmra.mxu0 %vm3016_vm1, %v10035_v14  ;;  %8190 = vmatmul.mubr.msk.f32.gmra.mxu1 %vm3016_vm1, %v10033_v13 }
 0x105   :  { %1133 = vrot.lane.b32.xlu1 %v10029_v42, %s9333_s13  ;;  %2455 = vrot.lane.b32.xlu0 %v1832_v12, %s9335_s23 }
 0x106   :  { %5074 = vmatprep.mubr.f32.mxu1 %v16546_v48  ;;  %3730 = vmatprep.mubr.f32.mxu0 %v16546_v48 }
 0x107   :  { %v10053_v50 = vpop.permute.xlu1 %2875  ;;  %v10055_v26 = vpop.permute.xlu0 %2427 }
 0x108   :  { %16594 = vst [vmem:[#allocation8_spill] sm:$0xff] %v10053_v50  ;;  %7967 = vmatmul.mubr.msk.f32.gmra.mxu0 %vm3016_vm1, %v10055_v26  ;;  %8191 = vmatmul.mubr.msk.f32.gmra.mxu1 %vm3016_vm1, %v10053_v50 }
 0x109   :  { %2905 = vrot.lane.b32.xlu1 %v2057_v49, %s9335_s23  ;;  %685 = vrot.lane.b32.xlu0 %v10049_v43, %s9333_s13 }
 0x10a   :  { %5080 = vmatprep.mubr.f32.mxu1 %v16546_v48  ;;  %3736 = vmatprep.mubr.f32.mxu0 %v16546_v48 }
 0x10b   :  { %v10073_v27 = vpop.permute.xlu1 %2877  ;;  %v658_v37 = vpop.permute.xlu0 %657 }
 0x10c   :  { %16595 = vst [vmem:[#allocation9_spill] sm:$0xff] %v10073_v27  ;;  %8192 = vmatmul.mubr.msk.f32.gmra.mxu1 %vm3016_vm1, %v10073_v27  ;;  %v1534_v45 = vsub.f32 %v9717_v47, %v658_v37 }
 0x10d   :  { %1135 = vrot.lane.b32.xlu1 %v10068_v44, %s9333_s13  ;;  %2457 = vrot.lane.b32.xlu0 %v1833_v34, %s9335_s23 }
 0x10e   :  { %5086 = vmatprep.mubr.f32.mxu1 %v16546_v48  ;;  %v1834_v9 = vmul.f32 0.1, %v1534_v45 }
 0x10f   :  { %v1108_v35 = vpop.permute.xlu1 %1107  ;;  %v10087_v20 = vpop.permute.xlu0 %2429 }
 0x110   :  { %7968 = vmatmul.mubr.msk.f32.gmra.mxu0 %vm3016_vm1, %v10087_v20  ;;  %v1759_v47 = vsub.f32 %v9726_v3, %v1108_v35 }
 0x111   :  { %2907 = vrot.lane.b32.xlu1 %v2058_v56, %s9335_s23  ;;  %687 = vrot.lane.b32.xlu0 %v10083_v28, %s9333_s13  ;;  %v10139_v56 = vld [vmem:[%s16460_s0 + $0x140] sm:$0xff] }
 0x112   :  { %3742 = vmatprep.mubr.f32.mxu0 %v16546_v48  ;;  %v2059_v12 = vmul.f32 0.1, %v1759_v47  ;;  %v10153_v47 = vld [vmem:[%s16460_s0 + $0x848] sm:$0xff] }
 0x113   :  { %v10101_v62 = vpop.permute.xlu1 %2879  ;;  %v660_v0 = vpop.permute.xlu0 %659 }
 0x114   :  { %16596 = vst [vmem:[#allocation10_spill] sm:$0xff] %v10101_v62  ;;  %8193 = vmatmul.mubr.msk.f32.gmra.mxu1 %vm3016_vm1, %v10101_v62  ;;  %v1535_v3 = vsub.f32 %v9735_v51, %v660_v0 }
 0x115   :  { %1137 = vrot.lane.b32.xlu1 %v10097_v59, %s9333_s13  ;;  %2459 = vrot.lane.b32.xlu0 %v1834_v9, %s9335_s23 }
 0x116   :  { %5092 = vmatprep.mubr.f32.mxu1 %v16546_v48  ;;  %v1835_v34 = vmul.f32 0.1, %v1535_v3 }
 0x117   :  { %v1110_v2 = vpop.permute.xlu1 %1109  ;;  %v10115_v49 = vpop.permute.xlu0 %2431 }
 0x118   :  { %7969 = vmatmul.mubr.msk.f32.gmra.mxu0 %vm3016_vm1, %v10115_v49  ;;  %v1760_v51 = vsub.f32 %v9744_v5, %v1110_v2  ;;  %v10167_v2 = vld [vmem:[%s16460_s0 + $0x148] sm:$0xff] }
 0x119   :  { %2909 = vrot.lane.b32.xlu1 %v2059_v12, %s9335_s23  ;;  %689 = vrot.lane.b32.xlu0 %v10111_v1, %s9333_s13 }
 0x11a   :  { %3748 = vmatprep.mubr.f32.mxu0 %v16546_v48  ;;  %v2060_v45 = vmul.f32 0.1, %v1760_v51 }
 0x11b   :  { %v10129_v52 = vpop.permute.xlu1 %2881  ;;  %v662_v37 = vpop.permute.xlu0 %661 }
 0x11c   :  { %16597 = vst [vmem:[#allocation11_spill] sm:$0xff] %v10129_v52  ;;  %8194 = vmatmul.mubr.msk.f32.gmra.mxu1 %vm3016_vm1, %v10129_v52  ;;  %v1536_v5 = vsub.f32 %v9753_v55, %v662_v37 }
 0x11d   :  { %1139 = vrot.lane.b32.xlu1 %v10125_v16, %s9333_s13  ;;  %2461 = vrot.lane.b32.xlu0 %v1835_v34, %s9335_s23 }
 0x11e   :  { %5098 = vmatprep.mubr.f32.mxu1 %v16546_v48  ;;  %v1836_v0 = vmul.f32 0.1, %v1536_v5 }
 0x11f   :  { %v1112_v35 = vpop.permute.xlu1 %1111  ;;  %v10143_v9 = vpop.permute.xlu0 %2433 }
 0x120   :  { %7970 = vmatmul.mubr.msk.f32.gmra.mxu0 %vm3016_vm1, %v10143_v9  ;;  %v1761_v55 = vsub.f32 %v9762_v58, %v1112_v35 }
 0x121   :  { %2911 = vrot.lane.b32.xlu1 %v2060_v45, %s9335_s23  ;;  %691 = vrot.lane.b32.xlu0 %v10139_v56, %s9333_s13  ;;  %v10181_v45 = vld [vmem:[%s16460_s0 + $0x850] sm:$0xff] }
 0x122   :  { %3754 = vmatprep.mubr.f32.mxu0 %v16546_v48  ;;  %v2061_v34 = vmul.f32 0.1, %v1761_v55  ;;  %v10195_v55 = vld [vmem:[%s16460_s0 + $0x150] sm:$0xff] }
 0x123   :  { %v10157_v12 = vpop.permute.xlu1 %2883  ;;  %v664_v3 = vpop.permute.xlu0 %663 }
 0x124   :  { %16598 = vst [vmem:[#allocation12_spill] sm:$0xff] %v10157_v12  ;;  %8195 = vmatmul.mubr.msk.f32.gmra.mxu1 %vm3016_vm1, %v10157_v12  ;;  %v1537_v58 = vsub.f32 %v9771_v21, %v664_v3 }
 0x125   :  { %1141 = vrot.lane.b32.xlu1 %v10153_v47, %s9333_s13  ;;  %2463 = vrot.lane.b32.xlu0 %v1836_v0, %s9335_s23 }
 0x126   :  { %5104 = vmatprep.mubr.f32.mxu1 %v16546_v48  ;;  %v1837_v5 = vmul.f32 0.1, %v1537_v58 }
 0x127   :  { %v1114_v51 = vpop.permute.xlu1 %1113  ;;  %v10171_v37 = vpop.permute.xlu0 %2435 }
 0x128   :  { %7971 = vmatmul.mubr.msk.f32.gmra.mxu0 %vm3016_vm1, %v10171_v37  ;;  %v1762_v21 = vsub.f32 %v9780_v22, %v1114_v51  ;;  %v10209_v51 = vld [vmem:[%s16460_s0 + $0x858] sm:$0xff] }
 0x129   :  { %2913 = vrot.lane.b32.xlu1 %v2061_v34, %s9335_s23  ;;  %693 = vrot.lane.b32.xlu0 %v10167_v2, %s9333_s13 }
 0x12a   :  { %3760 = vmatprep.mubr.f32.mxu0 %v16546_v48  ;;  %v2062_v3 = vmul.f32 0.1, %v1762_v21 }
 0x12b   :  { %v10185_v35 = vpop.permute.xlu1 %2885  ;;  %v666_v0 = vpop.permute.xlu0 %665 }
 0x12c   :  { %16599 = vst [vmem:[#allocation13_spill] sm:$0xff] %v10185_v35  ;;  %8196 = vmatmul.mubr.msk.f32.gmra.mxu1 %vm3016_vm1, %v10185_v35  ;;  %v1538_v22 = vsub.f32 %v9789_v23, %v666_v0 }
 0x12d   :  { %1143 = vrot.lane.b32.xlu1 %v10181_v45, %s9333_s13  ;;  %2465 = vrot.lane.b32.xlu0 %v1837_v5, %s9335_s23 }
 0x12e   :  { %5110 = vmatprep.mubr.f32.mxu1 %v16546_v48  ;;  %v1838_v5 = vmul.f32 0.1, %v1538_v22 }
 0x12f   :  { %v1116_v34 = vpop.permute.xlu1 %1115  ;;  %v10199_v58 = vpop.permute.xlu0 %2437 }
 0x130   :  { %7972 = vmatmul.mubr.msk.f32.gmra.mxu0 %vm3016_vm1, %v10199_v58  ;;  %v1763_v23 = vsub.f32 %v9798_v24, %v1116_v34 }
 0x131   :  { %2915 = vrot.lane.b32.xlu1 %v2062_v3, %s9335_s23  ;;  %695 = vrot.lane.b32.xlu0 %v10195_v55, %s9333_s13  ;;  %v10223_v3 = vld [vmem:[%s16460_s0 + $0x158] sm:$0xff] }
 0x132   :  { %3766 = vmatprep.mubr.f32.mxu0 %v16546_v48  ;;  %v2063_v22 = vmul.f32 0.1, %v1763_v23 }
 0x133   :  { %v10213_v21 = vpop.permute.xlu1 %2887  ;;  %v668_v0 = vpop.permute.xlu0 %667 }
 0x134   :  { %16600 = vst [vmem:[#allocation14_spill] sm:$0xff] %v10213_v21  ;;  %8197 = vmatmul.mubr.msk.f32.gmra.mxu1 %vm3016_vm1, %v10213_v21  ;;  %v1539_v24 = vsub.f32 %v9807_v15, %v668_v0 }
 0x135   :  { %1145 = vrot.lane.b32.xlu1 %v10209_v51, %s9333_s13  ;;  %2467 = vrot.lane.b32.xlu0 %v1838_v5, %s9335_s23  ;;  %v10237_v5 = vld [vmem:[%s16460_s0 + $0x860] sm:$0xff] }
 0x136   :  { %5116 = vmatprep.mubr.f32.mxu1 %v16546_v48  ;;  %v1839_v23 = vmul.f32 0.1, %v1539_v24 }
 0x137   :  { %v1118_v34 = vpop.permute.xlu1 %1117  ;;  %v10227_v35 = vpop.permute.xlu0 %2439 }
 0x138   :  { %7973 = vmatmul.mubr.msk.f32.gmra.mxu0 %vm3016_vm1, %v10227_v35  ;;  %v1764_v15 = vsub.f32 %v9816_v17, %v1118_v34 }
 0x139   :  { %2917 = vrot.lane.b32.xlu1 %v2063_v22, %s9335_s23  ;;  %697 = vrot.lane.b32.xlu0 %v10223_v3, %s9333_s13  ;;  %v10251_v22 = vld [vmem:[%s16460_s0 + $0x160] sm:$0xff] }
 0x13a   :  { %3772 = vmatprep.mubr.f32.mxu0 %v16546_v48  ;;  %v2064_v24 = vmul.f32 0.1, %v1764_v15 }
 0x13b   :  { %v10241_v0 = vpop.permute.xlu1 %2889  ;;  %v670_v21 = vpop.permute.xlu0 %669 }
 0x13c   :  { %16601 = vst [vmem:[#allocation15_spill] sm:$0xff] %v10241_v0  ;;  %8198 = vmatmul.mubr.msk.f32.gmra.mxu1 %vm3016_vm1, %v10241_v0  ;;  %v1540_v17 = vsub.f32 %v9825_v18, %v670_v21 }
 0x13d   :  { %1147 = vrot.lane.b32.xlu1 %v10237_v5, %s9333_s13  ;;  %2469 = vrot.lane.b32.xlu0 %v1839_v23, %s9335_s23  ;;  %v10265_v23 = vld [vmem:[%s16460_s0 + $0x868] sm:$0xff] }
 0x13e   :  { %5122 = vmatprep.mubr.f32.mxu1 %v16546_v48  ;;  %v1840_v15 = vmul.f32 0.1, %v1540_v17 }
 0x13f   :  { %v1120_v34 = vpop.permute.xlu1 %1119  ;;  %v10255_v12 = vpop.permute.xlu0 %2441 }
 0x140   :  { %7974 = vmatmul.mubr.msk.f32.gmra.mxu0 %vm3016_vm1, %v10255_v12  ;;  %v1765_v18 = vsub.f32 %v9834_v19, %v1120_v34 }
 0x141   :  { %2919 = vrot.lane.b32.xlu1 %v2064_v24, %s9335_s23  ;;  %699 = vrot.lane.b32.xlu0 %v10251_v22, %s9333_s13  ;;  %v10279_v24 = vld [vmem:[%s16460_s0 + $0x168] sm:$0xff] }
 0x142   :  { %3778 = vmatprep.mubr.f32.mxu0 %v16546_v48  ;;  %v2065_v17 = vmul.f32 0.1, %v1765_v18 }
 0x143   :  { %v10269_v21 = vpop.permute.xlu1 %2891  ;;  %v672_v0 = vpop.permute.xlu0 %671 }
 0x144   :  { %16602 = vst [vmem:[#allocation16_spill] sm:$0xff] %v10269_v21  ;;  %8199 = vmatmul.mubr.msk.f32.gmra.mxu1 %vm3016_vm1, %v10269_v21  ;;  %v1541_v19 = vsub.f32 %v9842_v7, %v672_v0 }
 0x145   :  { %1149 = vrot.lane.b32.xlu1 %v10265_v23, %s9333_s13  ;;  %2471 = vrot.lane.b32.xlu0 %v1840_v15, %s9335_s23  ;;  %v10293_v15 = vld [vmem:[%s16460_s0 + $0x870] sm:$0xff] }
 0x146   :  { %5128 = vmatprep.mubr.f32.mxu1 %v16546_v48  ;;  %v1841_v18 = vmul.f32 0.1, %v1541_v19 }
 0x147   :  { %v1122_v34 = vpop.permute.xlu1 %1121  ;;  %v10283_v52 = vpop.permute.xlu0 %2443 }
 0x148   :  { %7975 = vmatmul.mubr.msk.f32.gmra.mxu0 %vm3016_vm1, %v10283_v52  ;;  %v1766_v7 = vsub.f32 %v9851_v8, %v1122_v34 }
 0x149   :  { %2921 = vrot.lane.b32.xlu1 %v2065_v17, %s9335_s23  ;;  %701 = vrot.lane.b32.xlu0 %v10279_v24, %s9333_s13  ;;  %v10307_v17 = vld [vmem:[%s16460_s0 + $0x170] sm:$0xff] }
 0x14a   :  { %3784 = vmatprep.mubr.f32.mxu0 %v16546_v48  ;;  %v2066_v19 = vmul.f32 0.1, %v1766_v7 }
 0x14b   :  { %v10297_v0 = vpop.permute.xlu1 %2893  ;;  %v674_v21 = vpop.permute.xlu0 %673 }
 0x14c   :  { %16603 = vst [vmem:[#allocation17_spill] sm:$0xff] %v10297_v0  ;;  %8200 = vmatmul.mubr.msk.f32.gmra.mxu1 %vm3016_vm1, %v10297_v0  ;;  %v1542_v8 = vsub.f32 %v9860_v30, %v674_v21 }
 0x14d   :  { %1151 = vrot.lane.b32.xlu1 %v10293_v15, %s9333_s13  ;;  %2473 = vrot.lane.b32.xlu0 %v1841_v18, %s9335_s23  ;;  %v10321_v18 = vld [vmem:[%s16460_s0 + $0x878] sm:$0xff] }
 0x14e   :  { %5134 = vmatprep.mubr.f32.mxu1 %v16546_v48  ;;  %v1842_v7 = vmul.f32 0.1, %v1542_v8 }
 0x14f   :  { %v1124_v34 = vpop.permute.xlu1 %1123  ;;  %v10311_v62 = vpop.permute.xlu0 %2445 }
 0x150   :  { %7976 = vmatmul.mubr.msk.f32.gmra.mxu0 %vm3016_vm1, %v10311_v62  ;;  %v1767_v30 = vsub.f32 %v9871_v63, %v1124_v34 }
 0x151   :  { %2923 = vrot.lane.b32.xlu1 %v2066_v19, %s9335_s23  ;;  %703 = vrot.lane.b32.xlu0 %v10307_v17, %s9333_s13  ;;  %v10335_v19 = vld [vmem:[%s16460_s0 + $0x178] sm:$0xff] }
 0x152   :  { %3790 = vmatprep.mubr.f32.mxu0 %v16546_v48  ;;  %v2067_v8 = vmul.f32 0.1, %v1767_v30 }
 0x153   :  { %v10325_v21 = vpop.permute.xlu1 %2895  ;;  %v676_v0 = vpop.permute.xlu0 %675 }
 0x154   :  { %16604 = vst [vmem:[#allocation18_spill] sm:$0xff] %v10325_v21  ;;  %8201 = vmatmul.mubr.msk.f32.gmra.mxu1 %vm3016_vm1, %v10325_v21  ;;  %v1543_v63 = vsub.f32 %v9882_v11, %v676_v0 }
 0x155   :  { %1153 = vrot.lane.b32.xlu1 %v10321_v18, %s9333_s13  ;;  %2475 = vrot.lane.b32.xlu0 %v1842_v7, %s9335_s23  ;;  %v10349_v7 = vld [vmem:[%s16460_s0 + $0x880] sm:$0xff] }
 0x156   :  { %5140 = vmatprep.mubr.f32.mxu1 %v16546_v48  ;;  %v1843_v30 = vmul.f32 0.1, %v1543_v63 }
 0x157   :  { %v1126_v34 = vpop.permute.xlu1 %1125  ;;  %v10339_v27 = vpop.permute.xlu0 %2447 }
 0x158   :  { %7977 = vmatmul.mubr.msk.f32.gmra.mxu0 %vm3016_vm1, %v10339_v27  ;;  %v1768_v11 = vsub.f32 %v9893_v33, %v1126_v34 }
 0x159   :  { %2925 = vrot.lane.b32.xlu1 %v2067_v8, %s9335_s23  ;;  %705 = vrot.lane.b32.xlu0 %v10335_v19, %s9333_s13  ;;  %v10363_v8 = vld [vmem:[%s16460_s0 + $0x180] sm:$0xff] }
 0x15a   :  { %3796 = vmatprep.mubr.f32.mxu0 %v16546_v48  ;;  %v2068_v63 = vmul.f32 0.1, %v1768_v11 }
 0x15b   :  { %v10353_v0 = vpop.permute.xlu1 %2897  ;;  %v678_v21 = vpop.permute.xlu0 %677 }
 0x15c   :  { %16605 = vst [vmem:[#allocation19_spill] sm:$0xff] %v10353_v0  ;;  %8202 = vmatmul.mubr.msk.f32.gmra.mxu1 %vm3016_vm1, %v10353_v0  ;;  %v1544_v33 = vsub.f32 %v9906_v25, %v678_v21 }
 0x15d   :  { %1155 = vrot.lane.b32.xlu1 %v10349_v7, %s9333_s13  ;;  %2477 = vrot.lane.b32.xlu0 %v1843_v30, %s9335_s23  ;;  %v10377_v30 = vld [vmem:[%s16460_s0 + $0x888] sm:$0xff] }
 0x15e   :  { %5146 = vmatprep.mubr.f32.mxu1 %v16546_v48  ;;  %v1844_v11 = vmul.f32 0.1, %v1544_v33 }
 0x15f   :  { %v1128_v34 = vpop.permute.xlu1 %1127  ;;  %v10367_v50 = vpop.permute.xlu0 %2449 }
 0x160   :  { %7978 = vmatmul.mubr.msk.f32.gmra.mxu0 %vm3016_vm1, %v10367_v50  ;;  %v1769_v25 = vsub.f32 %v9917_v4, %v1128_v34 }
 0x161   :  { %2927 = vrot.lane.b32.xlu1 %v2068_v63, %s9335_s23  ;;  %707 = vrot.lane.b32.xlu0 %v10363_v8, %s9333_s13  ;;  %v10391_v63 = vld [vmem:[%s16460_s0 + $0x188] sm:$0xff] }
 0x162   :  { %3802 = vmatprep.mubr.f32.mxu0 %v16546_v48  ;;  %v2069_v33 = vmul.f32 0.1, %v1769_v25 }
 0x163   :  { %v10381_v21 = vpop.permute.xlu1 %2899  ;;  %v680_v0 = vpop.permute.xlu0 %679 }
 0x164   :  { %16606 = vst [vmem:[#allocation20_spill] sm:$0xff] %v10381_v21  ;;  %8203 = vmatmul.mubr.msk.f32.gmra.mxu1 %vm3016_vm1, %v10381_v21  ;;  %v1545_v4 = vsub.f32 %v9931_v36, %v680_v0 }
 0x165   :  { %1157 = vrot.lane.b32.xlu1 %v10377_v30, %s9333_s13  ;;  %2479 = vrot.lane.b32.xlu0 %v1844_v11, %s9335_s23  ;;  %v10405_v11 = vld [vmem:[%s16460_s0 + $0x890] sm:$0xff] }
 0x166   :  { %5152 = vmatprep.mubr.f32.mxu1 %v16546_v48  ;;  %v1845_v25 = vmul.f32 0.1, %v1545_v4 }
 0x167   :  { %v1130_v34 = vpop.permute.xlu1 %1129  ;;  %v10395_v13 = vpop.permute.xlu0 %2451 }
 0x168   :  { %7979 = vmatmul.mubr.msk.f32.gmra.mxu0 %vm3016_vm1, %v10395_v13  ;;  %v1770_v36 = vsub.f32 %v9950_v38, %v1130_v34 }
 0x169   :  { %2929 = vrot.lane.b32.xlu1 %v2069_v33, %s9335_s23  ;;  %709 = vrot.lane.b32.xlu0 %v10391_v63, %s9333_s13  ;;  %v10419_v33 = vld [vmem:[%s16460_s0 + $0x190] sm:$0xff] }
 0x16a   :  { %3808 = vmatprep.mubr.f32.mxu0 %v16546_v48  ;;  %v2070_v4 = vmul.f32 0.1, %v1770_v36 }
 0x16b   :  { %v10409_v0 = vpop.permute.xlu1 %2901  ;;  %v682_v21 = vpop.permute.xlu0 %681 }
 0x16c   :  { %16607 = vst [vmem:[#allocation21_spill] sm:$0xff] %v10409_v0  ;;  %8204 = vmatmul.mubr.msk.f32.gmra.mxu1 %vm3016_vm1, %v10409_v0  ;;  %v1546_v38 = vsub.f32 %v9969_v39, %v682_v21 }
 0x16d   :  { %1159 = vrot.lane.b32.xlu1 %v10405_v11, %s9333_s13  ;;  %2481 = vrot.lane.b32.xlu0 %v1845_v25, %s9335_s23  ;;  %v10433_v25 = vld [vmem:[%s16460_s0 + $0x898] sm:$0xff] }
 0x16e   :  { %5158 = vmatprep.mubr.f32.mxu1 %v16546_v48  ;;  %v1846_v36 = vmul.f32 0.1, %v1546_v38 }
 0x16f   :  { %v1132_v34 = vpop.permute.xlu1 %1131  ;;  %v10423_v32 = vpop.permute.xlu0 %2453 }
 0x170   :  { %7980 = vmatmul.mubr.msk.f32.gmra.mxu0 %vm3016_vm1, %v10423_v32  ;;  %v1771_v39 = vsub.f32 %v9989_v40, %v1132_v34 }
 0x171   :  { %2931 = vrot.lane.b32.xlu1 %v2070_v4, %s9335_s23  ;;  %711 = vrot.lane.b32.xlu0 %v10419_v33, %s9333_s13  ;;  %v10447_v4 = vld [vmem:[%s16460_s0 + $0x198] sm:$0xff] }
 0x172   :  { %3814 = vmatprep.mubr.f32.mxu0 %v16546_v48  ;;  %v2071_v38 = vmul.f32 0.1, %v1771_v39 }
 0x173   :  { %v10437_v21 = vpop.permute.xlu1 %2903  ;;  %v684_v0 = vpop.permute.xlu0 %683 }
 0x174   :  { %16608 = vst [vmem:[#allocation22_spill] sm:$0xff] %v10437_v21  ;;  %8205 = vmatmul.mubr.msk.f32.gmra.mxu1 %vm3016_vm1, %v10437_v21  ;;  %v1547_v40 = vsub.f32 %v10009_v41, %v684_v0 }
 0x175   :  { %1161 = vrot.lane.b32.xlu1 %v10433_v25, %s9333_s13  ;;  %2483 = vrot.lane.b32.xlu0 %v1846_v36, %s9335_s23  ;;  %v10461_v36 = vld [vmem:[%s16460_s0 + $0x8a0] sm:$0xff] }
 0x176   :  { %5164 = vmatprep.mubr.f32.mxu1 %v16546_v48  ;;  %v1847_v39 = vmul.f32 0.1, %v1547_v40 }
 0x177   :  { %v1134_v34 = vpop.permute.xlu1 %1133  ;;  %v10451_v10 = vpop.permute.xlu0 %2455 }
 0x178   :  { %7981 = vmatmul.mubr.msk.f32.gmra.mxu0 %vm3016_vm1, %v10451_v10  ;;  %v1772_v41 = vsub.f32 %v10029_v42, %v1134_v34 }
 0x179   :  { %2933 = vrot.lane.b32.xlu1 %v2071_v38, %s9335_s23  ;;  %713 = vrot.lane.b32.xlu0 %v10447_v4, %s9333_s13  ;;  %v10475_v38 = vld [vmem:[%s16460_s0 + $0x1a0] sm:$0xff] }
 0x17a   :  { %3820 = vmatprep.mubr.f32.mxu0 %v16546_v48  ;;  %v2072_v40 = vmul.f32 0.1, %v1772_v41 }
 0x17b   :  { %v10465_v0 = vpop.permute.xlu1 %2905  ;;  %v686_v21 = vpop.permute.xlu0 %685 }
 0x17c   :  { %16609 = vst [vmem:[#allocation23_spill] sm:$0xff] %v10465_v0  ;;  %8206 = vmatmul.mubr.msk.f32.gmra.mxu1 %vm3016_vm1, %v10465_v0  ;;  %v1548_v42 = vsub.f32 %v10049_v43, %v686_v21 }
 0x17d   :  { %1163 = vrot.lane.b32.xlu1 %v10461_v36, %s9333_s13  ;;  %2485 = vrot.lane.b32.xlu0 %v1847_v39, %s9335_s23  ;;  %v10489_v39 = vld [vmem:[%s16460_s0 + $0x8a8] sm:$0xff] }
 0x17e   :  { %5170 = vmatprep.mubr.f32.mxu1 %v16546_v48  ;;  %v1848_v41 = vmul.f32 0.1, %v1548_v42 }
 0x17f   :  { %v1136_v34 = vpop.permute.xlu1 %1135  ;;  %v10479_v60 = vpop.permute.xlu0 %2457 }
 0x180   :  { %16610 = vst [vmem:[#allocation24_spill] sm:$0xff] %v10479_v60  ;;  %7982 = vmatmul.mubr.msk.f32.gmra.mxu0 %vm3016_vm1, %v10479_v60  ;;  %v1773_v43 = vsub.f32 %v10068_v44, %v1136_v34 }
 0x181   :  { %2935 = vrot.lane.b32.xlu1 %v2072_v40, %s9335_s23  ;;  %715 = vrot.lane.b32.xlu0 %v10475_v38, %s9333_s13  ;;  %v10503_v40 = vld [vmem:[%s16460_s0 + $0x1a8] sm:$0xff] }
 0x182   :  { %3826 = vmatprep.mubr.f32.mxu0 %v16546_v48  ;;  %v2073_v42 = vmul.f32 0.1, %v1773_v43 }
 0x183   :  { %v10493_v21 = vpop.permute.xlu1 %2907  ;;  %v688_v0 = vpop.permute.xlu0 %687 }
 0x184   :  { %16611 = vst [vmem:[#allocation25_spill] sm:$0xff] %v10493_v21  ;;  %8207 = vmatmul.mubr.msk.f32.gmra.mxu1 %vm3016_vm1, %v10493_v21  ;;  %v1549_v44 = vsub.f32 %v10083_v28, %v688_v0 }
 0x185   :  { %1165 = vrot.lane.b32.xlu1 %v10489_v39, %s9333_s13  ;;  %2487 = vrot.lane.b32.xlu0 %v1848_v41, %s9335_s23  ;;  %v10517_v41 = vld [vmem:[%s16460_s0 + $0x8b0] sm:$0xff] }
 0x186   :  { %5176 = vmatprep.mubr.f32.mxu1 %v16546_v48  ;;  %v1849_v43 = vmul.f32 0.1, %v1549_v44 }
 0x187   :  { %v1138_v34 = vpop.permute.xlu1 %1137  ;;  %v10507_v57 = vpop.permute.xlu0 %2459 }
 0x188   :  { %16612 = vst [vmem:[#allocation26_spill] sm:$0xff] %v10507_v57  ;;  %7983 = vmatmul.mubr.msk.f32.gmra.mxu0 %vm3016_vm1, %v10507_v57  ;;  %v1774_v28 = vsub.f32 %v10097_v59, %v1138_v34 }
 0x189   :  { %2937 = vrot.lane.b32.xlu1 %v2073_v42, %s9335_s23  ;;  %717 = vrot.lane.b32.xlu0 %v10503_v40, %s9333_s13  ;;  %v10531_v42 = vld [vmem:[%s16460_s0 + $0x1b0] sm:$0xff] }
 0x18a   :  { %3832 = vmatprep.mubr.f32.mxu0 %v16546_v48  ;;  %v2074_v44 = vmul.f32 0.1, %v1774_v28 }
 0x18b   :  { %v10521_v0 = vpop.permute.xlu1 %2909  ;;  %v690_v21 = vpop.permute.xlu0 %689 }
 0x18c   :  { %16613 = vst [vmem:[#allocation27_spill] sm:$0xff] %v10521_v0  ;;  %8208 = vmatmul.mubr.msk.f32.gmra.mxu1 %vm3016_vm1, %v10521_v0  ;;  %v1550_v59 = vsub.f32 %v10111_v1, %v690_v21 }
 0x18d   :  { %1167 = vrot.lane.b32.xlu1 %v10517_v41, %s9333_s13  ;;  %2489 = vrot.lane.b32.xlu0 %v1849_v43, %s9335_s23  ;;  %v10545_v43 = vld [vmem:[%s16460_s0 + $0x8b8] sm:$0xff] }
 0x18e   :  { %5182 = vmatprep.mubr.f32.mxu1 %v16546_v48  ;;  %v1850_v28 = vmul.f32 0.1, %v1550_v59 }
 0x18f   :  { %v1140_v34 = vpop.permute.xlu1 %1139  ;;  %v10535_v54 = vpop.permute.xlu0 %2461 }
 0x190   :  { %16614 = vst [vmem:[#allocation28_spill] sm:$0xff] %v10535_v54  ;;  %7984 = vmatmul.mubr.msk.f32.gmra.mxu0 %vm3016_vm1, %v10535_v54  ;;  %v1775_v1 = vsub.f32 %v10125_v16, %v1140_v34 }
 0x191   :  { %2939 = vrot.lane.b32.xlu1 %v2074_v44, %s9335_s23  ;;  %719 = vrot.lane.b32.xlu0 %v10531_v42, %s9333_s13  ;;  %v10559_v44 = vld [vmem:[%s16460_s0 + $0x1b8] sm:$0xff] }
 0x192   :  { %3838 = vmatprep.mubr.f32.mxu0 %v16546_v48  ;;  %v2075_v59 = vmul.f32 0.1, %v1775_v1 }
 0x193   :  { %v10549_v21 = vpop.permute.xlu1 %2911  ;;  %v692_v0 = vpop.permute.xlu0 %691 }
 0x194   :  { %16615 = vst [vmem:[#allocation29_spill] sm:$0xff] %v10549_v21  ;;  %8209 = vmatmul.mubr.msk.f32.gmra.mxu1 %vm3016_vm1, %v10549_v21  ;;  %v1551_v16 = vsub.f32 %v10139_v56, %v692_v0 }
 0x195   :  { %1169 = vrot.lane.b32.xlu1 %v10545_v43, %s9333_s13  ;;  %2491 = vrot.lane.b32.xlu0 %v1850_v28, %s9335_s23  ;;  %v10573_v28 = vld [vmem:[%s16460_s0 + $0x8c0] sm:$0xff] }
 0x196   :  { %5188 = vmatprep.mubr.f32.mxu1 %v16546_v48  ;;  %v1851_v1 = vmul.f32 0.1, %v1551_v16 }
 0x197   :  { %v1142_v34 = vpop.permute.xlu1 %1141  ;;  %v10563_v54 = vpop.permute.xlu0 %2463 }
 0x198   :  { %16616 = vst [vmem:[#allocation30_spill] sm:$0xff] %v10563_v54  ;;  %7985 = vmatmul.mubr.msk.f32.gmra.mxu0 %vm3016_vm1, %v10563_v54  ;;  %v1776_v56 = vsub.f32 %v10153_v47, %v1142_v34 }
 0x199   :  { %2941 = vrot.lane.b32.xlu1 %v2075_v59, %s9335_s23  ;;  %721 = vrot.lane.b32.xlu0 %v10559_v44, %s9333_s13  ;;  %v10587_v59 = vld [vmem:[%s16460_s0 + $0x1c0] sm:$0xff] }
 0x19a   :  { %3844 = vmatprep.mubr.f32.mxu0 %v16546_v48  ;;  %v2076_v16 = vmul.f32 0.1, %v1776_v56 }
 0x19b   :  { %v10577_v0 = vpop.permute.xlu1 %2913  ;;  %v694_v21 = vpop.permute.xlu0 %693 }
 0x19c   :  { %16617 = vst [vmem:[#allocation31_spill] sm:$0xff] %v10577_v0  ;;  %8210 = vmatmul.mubr.msk.f32.gmra.mxu1 %vm3016_vm1, %v10577_v0  ;;  %v1552_v47 = vsub.f32 %v10167_v2, %v694_v21 }
 0x19d   :  { %1171 = vrot.lane.b32.xlu1 %v10573_v28, %s9333_s13  ;;  %2493 = vrot.lane.b32.xlu0 %v1851_v1, %s9335_s23  ;;  %v10601_v1 = vld [vmem:[%s16460_s0 + $0x8c8] sm:$0xff] }
 0x19e   :  { %5194 = vmatprep.mubr.f32.mxu1 %v16546_v48  ;;  %v1852_v56 = vmul.f32 0.1, %v1552_v47 }
 0x19f   :  { %v1144_v34 = vpop.permute.xlu1 %1143  ;;  %v10591_v54 = vpop.permute.xlu0 %2465 }
 0x1a0   :  { %16618 = vst [vmem:[#allocation32_spill] sm:$0xff] %v10591_v54  ;;  %7986 = vmatmul.mubr.msk.f32.gmra.mxu0 %vm3016_vm1, %v10591_v54  ;;  %v1777_v2 = vsub.f32 %v10181_v45, %v1144_v34 }
 0x1a1   :  { %2943 = vrot.lane.b32.xlu1 %v2076_v16, %s9335_s23  ;;  %723 = vrot.lane.b32.xlu0 %v10587_v59, %s9333_s13  ;;  %v10615_v16 = vld [vmem:[%s16460_s0 + $0x1c8] sm:$0xff] }
 0x1a2   :  { %3850 = vmatprep.mubr.f32.mxu0 %v16546_v48  ;;  %v2077_v47 = vmul.f32 0.1, %v1777_v2 }
 0x1a3   :  { %v10605_v21 = vpop.permute.xlu1 %2915  ;;  %v696_v0 = vpop.permute.xlu0 %695 }
 0x1a4   :  { %16619 = vst [vmem:[#allocation33_spill] sm:$0xff] %v10605_v21  ;;  %8211 = vmatmul.mubr.msk.f32.gmra.mxu1 %vm3016_vm1, %v10605_v21  ;;  %v1553_v45 = vsub.f32 %v10195_v55, %v696_v0 }
 0x1a5   :  { %1173 = vrot.lane.b32.xlu1 %v10601_v1, %s9333_s13  ;;  %2495 = vrot.lane.b32.xlu0 %v1852_v56, %s9335_s23  ;;  %v10629_v56 = vld [vmem:[%s16460_s0 + $0x8d0] sm:$0xff] }
 0x1a6   :  { %5200 = vmatprep.mubr.f32.mxu1 %v16546_v48  ;;  %v1853_v2 = vmul.f32 0.1, %v1553_v45 }
 0x1a7   :  { %v1146_v34 = vpop.permute.xlu1 %1145  ;;  %v10619_v54 = vpop.permute.xlu0 %2467 }
 0x1a8   :  { %16620 = vst [vmem:[#allocation34_spill] sm:$0xff] %v10619_v54  ;;  %7987 = vmatmul.mubr.msk.f32.gmra.mxu0 %vm3016_vm1, %v10619_v54  ;;  %v1778_v55 = vsub.f32 %v10209_v51, %v1146_v34  ;;  %v10646_v51 = vld [vmem:[%s16460_s0 + $0x1d0] sm:$0xff] }
 0x1a9   :  { %2945 = vrot.lane.b32.xlu1 %v2077_v47, %s9335_s23  ;;  %725 = vrot.lane.b32.xlu0 %v10615_v16, %s9333_s13 }
 0x1aa   :  { %3856 = vmatprep.mubr.f32.mxu0 %v16546_v48  ;;  %v2078_v45 = vmul.f32 0.1, %v1778_v55  ;;  %v10669_v55 = vld [vmem:[%s16460_s0 + $0x8d8] sm:$0xff] }
 0x1ab   :  { %v10633_v0 = vpop.permute.xlu1 %2917  ;;  %v698_v21 = vpop.permute.xlu0 %697 }
 0x1ac   :  { %16621 = vst [vmem:[#allocation35_spill] sm:$0xff] %v10633_v0  ;;  %v3690_v57 = vpop.f32.mrf.mxu0  ;;  %8212 = vmatmul.mubr.msk.f32.gmra.mxu1 %vm3016_vm1, %v10633_v0  ;;  %v1554_v34 = vsub.f32 %v10223_v3, %v698_v21 }
 0x1ad   :  { %7054 = vst [vmem:[%s16462_s2] sm:$0xff] %v3690_v57  ;;  %1175 = vrot.lane.b32.xlu1 %v10629_v56, %s9333_s13  ;;  %2497 = vrot.lane.b32.xlu0 %v1853_v2, %s9335_s23 }
 0x1ae   :  { %v3692_v47 = vpop.f32.mrf.mxu0  ;;  %5206 = vmatprep.mubr.f32.mxu1 %v16546_v48 }
 0x1af   :  { %7055 = vst [vmem:[%s16462_s2 + $0x8] sm:$0xff] %v3692_v47  ;;  %v1148_v57 = vpop.permute.xlu1 %1147  ;;  %v10653_v0 = vpop.permute.xlu0 %2469  ;;  %v1854_v47 = vmul.f32 0.1, %v1554_v34 }
 0x1b0   :  { %16622 = vst [vmem:[#allocation36_spill] sm:$0xff] %v10653_v0  ;;  %v3696_v54 = vpop.f32.mrf.mxu0  ;;  %7988 = vmatmul.mubr.msk.f32.gmra.mxu0 %vm3016_vm1, %v10653_v0  ;;  %v5040_v2 = vpop.f32.mrf.mxu1 }
 0x1b1   :  { %7057 = vst [vmem:[%s16462_s2 + $0x18] sm:$0xff] %v3696_v54  ;;  %7729 = vst [vmem:[%s16462_s2 + $0x1518] sm:$0xff] %v5040_v2  ;;  %2947 = vrot.lane.b32.xlu1 %v2078_v45, %s9335_s23  ;;  %727 = vrot.lane.b32.xlu0 %v10646_v51, %s9333_s13  ;;  %v1779_v54 = vsub.f32 %v10237_v5, %v1148_v57 }
 0x1b2   :  { %v3698_v3 = vpop.f32.mrf.mxu0  ;;  %v5042_v21 = vpop.f32.mrf.mxu1  ;;  %3862 = vmatprep.mubr.f32.mxu0 %v16546_v48  ;;  %v10695_v57 = vld [vmem:[%s16460_s0 + $0x1d8] sm:$0xff] }
 0x1b3   :  { %7058 = vst [vmem:[%s16462_s2 + $0x20] sm:$0xff] %v3698_v3  ;;  %7730 = vst [vmem:[%s16462_s2 + $0x1520] sm:$0xff] %v5042_v21  ;;  %v10679_v45 = vpop.permute.xlu1 %2919  ;;  %v700_v2 = vpop.permute.xlu0 %699  ;;  %v2079_v3 = vmul.f32 0.1, %v1779_v54 }
 0x1b4   :  { %16623 = vst [vmem:[#allocation37_spill] sm:$0xff] %v10679_v45  ;;  %v3702_v0 = vpop.f32.mrf.mxu0  ;;  %v5046_v60 = vpop.f32.mrf.mxu1  ;;  %8213 = vmatmul.mubr.msk.f32.gmra.mxu1 %vm3016_vm1, %v10679_v45 }
 0x1b5   :  { %7060 = vst [vmem:[%s16462_s2 + $0x30] sm:$0xff] %v3702_v0  ;;  %7732 = vst [vmem:[%s16462_s2 + $0x1530] sm:$0xff] %v5046_v60  ;;  %1177 = vrot.lane.b32.xlu1 %v10669_v55, %s9333_s13  ;;  %2499 = vrot.lane.b32.xlu0 %v1854_v47, %s9335_s23  ;;  %v1555_v0 = vsub.f32 %v10251_v22, %v700_v2 }
 0x1b6   :  { %v3704_v5 = vpop.f32.mrf.mxu0  ;;  %v5048_v34 = vpop.f32.mrf.mxu1  ;;  %5212 = vmatprep.mubr.f32.mxu1 %v16546_v48  ;;  %v10721_v2 = vld [vmem:[%s16460_s0 + $0x8e0] sm:$0xff] }
 0x1b7   :  { %7061 = vst [vmem:[%s16462_s2 + $0x38] sm:$0xff] %v3704_v5  ;;  %7733 = vst [vmem:[%s16462_s2 + $0x1538] sm:$0xff] %v5048_v34  ;;  %v1150_v60 = vpop.permute.xlu1 %1149  ;;  %v10705_v21 = vpop.permute.xlu0 %2471  ;;  %v1855_v5 = vmul.f32 0.1, %v1555_v0 }
 0x1b8   :  { %16624 = vst [vmem:[#allocation38_spill] sm:$0xff] %v10705_v21  ;;  %v3708_v47 = vpop.f32.mrf.mxu0  ;;  %7989 = vmatmul.mubr.msk.f32.gmra.mxu0 %vm3016_vm1, %v10705_v21  ;;  %v5052_v45 = vpop.f32.mrf.mxu1  ;;  %v1780_v34 = vsub.f32 %v10265_v23, %v1150_v60  ;;  %v10747_v60 = vld [vmem:[%s16460_s0 + $0x1e0] sm:$0xff] }
 0x1b9   :  { %7063 = vst [vmem:[%s16462_s2 + $0x48] sm:$0xff] %v3708_v47  ;;  %7735 = vst [vmem:[%s16462_s2 + $0x1548] sm:$0xff] %v5052_v45  ;;  %2949 = vrot.lane.b32.xlu1 %v2079_v3, %s9335_s23  ;;  %729 = vrot.lane.b32.xlu0 %v10695_v57, %s9333_s13 }
 0x1ba   :  { %v3710_v22 = vpop.f32.mrf.mxu0  ;;  %v5054_v54 = vpop.f32.mrf.mxu1  ;;  %3868 = vmatprep.mubr.f32.mxu0 %v16546_v48 }
 0x1bb   :  { %7064 = vst [vmem:[%s16462_s2 + $0x50] sm:$0xff] %v3710_v22  ;;  %7736 = vst [vmem:[%s16462_s2 + $0x1550] sm:$0xff] %v5054_v54  ;;  %v10731_v45 = vpop.permute.xlu1 %2921  ;;  %v702_v3 = vpop.permute.xlu0 %701  ;;  %v2080_v22 = vmul.f32 0.1, %v1780_v34 }
 0x1bc   :  { %16625 = vst [vmem:[#allocation39_spill] sm:$0xff] %v10731_v45  ;;  %v3714_v47 = vpop.f32.mrf.mxu0  ;;  %v5058_v21 = vpop.f32.mrf.mxu1  ;;  %8214 = vmatmul.mubr.msk.f32.gmra.mxu1 %vm3016_vm1, %v10731_v45  ;;  %v1556_v54 = vsub.f32 %v10279_v24, %v702_v3  ;;  %v10773_v3 = vld [vmem:[%s16460_s0 + $0x8e8] sm:$0xff] }
 0x1bd   :  { %7066 = vst [vmem:[%s16462_s2 + $0x60] sm:$0xff] %v3714_v47  ;;  %7738 = vst [vmem:[%s16462_s2 + $0x1560] sm:$0xff] %v5058_v21  ;;  %1179 = vrot.lane.b32.xlu1 %v10721_v2, %s9333_s13  ;;  %2501 = vrot.lane.b32.xlu0 %v1855_v5, %s9335_s23 }
 0x1be   :  { %v3716_v23 = vpop.f32.mrf.mxu0  ;;  %v5060_v0 = vpop.f32.mrf.mxu1  ;;  %5218 = vmatprep.mubr.f32.mxu1 %v16546_v48 }
 0x1bf   :  { %7067 = vst [vmem:[%s16462_s2 + $0x68] sm:$0xff] %v3716_v23  ;;  %7739 = vst [vmem:[%s16462_s2 + $0x1568] sm:$0xff] %v5060_v0  ;;  %v1152_v21 = vpop.permute.xlu1 %1151  ;;  %v10757_v5 = vpop.permute.xlu0 %2473  ;;  %v1856_v23 = vmul.f32 0.1, %v1556_v54 }
 0x1c0   :  { %16626 = vst [vmem:[#allocation40_spill] sm:$0xff] %v10757_v5  ;;  %v3720_v47 = vpop.f32.mrf.mxu0  ;;  %7990 = vmatmul.mubr.msk.f32.gmra.mxu0 %vm3016_vm1, %v10757_v5  ;;  %v5064_v45 = vpop.f32.mrf.mxu1  ;;  %v1781_v0 = vsub.f32 %v10293_v15, %v1152_v21  ;;  %v10799_v21 = vld [vmem:[%s16460_s0 + $0x1e8] sm:$0xff] }
 0x1c1   :  { %7069 = vst [vmem:[%s16462_s2 + $0x78] sm:$0xff] %v3720_v47  ;;  %7741 = vst [vmem:[%s16462_s2 + $0x1578] sm:$0xff] %v5064_v45  ;;  %2951 = vrot.lane.b32.xlu1 %v2080_v22, %s9335_s23  ;;  %731 = vrot.lane.b32.xlu0 %v10747_v60, %s9333_s13 }
 0x1c2   :  { %v3722_v24 = vpop.f32.mrf.mxu0  ;;  %v5066_v34 = vpop.f32.mrf.mxu1  ;;  %3874 = vmatprep.mubr.f32.mxu0 %v16546_v48 }
 0x1c3   :  { %7070 = vst [vmem:[%s16462_s2 + $0x80] sm:$0xff] %v3722_v24  ;;  %7742 = vst [vmem:[%s16462_s2 + $0x1580] sm:$0xff] %v5066_v34  ;;  %v10783_v45 = vpop.permute.xlu1 %2923  ;;  %v704_v22 = vpop.permute.xlu0 %703  ;;  %v2081_v24 = vmul.f32 0.1, %v1781_v0 }
 0x1c4   :  { %16627 = vst [vmem:[#allocation41_spill] sm:$0xff] %v10783_v45  ;;  %v3726_v47 = vpop.f32.mrf.mxu0  ;;  %v5070_v5 = vpop.f32.mrf.mxu1  ;;  %8215 = vmatmul.mubr.msk.f32.gmra.mxu1 %vm3016_vm1, %v10783_v45  ;;  %v1557_v34 = vsub.f32 %v10307_v17, %v704_v22  ;;  %v10825_v22 = vld [vmem:[%s16460_s0 + $0x8f0] sm:$0xff] }
 0x1c5   :  { %7072 = vst [vmem:[%s16462_s2 + $0x90] sm:$0xff] %v3726_v47  ;;  %7744 = vst [vmem:[%s16462_s2 + $0x1590] sm:$0xff] %v5070_v5  ;;  %1181 = vrot.lane.b32.xlu1 %v10773_v3, %s9333_s13  ;;  %2503 = vrot.lane.b32.xlu0 %v1856_v23, %s9335_s23 }
 0x1c6   :  { %v3728_v15 = vpop.f32.mrf.mxu0  ;;  %v5072_v54 = vpop.f32.mrf.mxu1  ;;  %5224 = vmatprep.mubr.f32.mxu1 %v16546_v48 }
 0x1c7   :  { %7073 = vst [vmem:[%s16462_s2 + $0x98] sm:$0xff] %v3728_v15  ;;  %7745 = vst [vmem:[%s16462_s2 + $0x1598] sm:$0xff] %v5072_v54  ;;  %v1154_v5 = vpop.permute.xlu1 %1153  ;;  %v10809_v23 = vpop.permute.xlu0 %2475  ;;  %v1857_v15 = vmul.f32 0.1, %v1557_v34  ;;  %v10848_v34 = vld [vmem:[%s16460_s0 + $0x1f0] sm:$0xff] }
 0x1c8   :  { %v3732_v47 = vpop.f32.mrf.mxu0  ;;  %7991 = vmatmul.mubr.msk.f32.gmra.mxu0 %vm3016_vm1, %v10809_v23  ;;  %v5076_v45 = vpop.f32.mrf.mxu1  ;;  %v1782_v54 = vsub.f32 %v10321_v18, %v1154_v5 }
 0x1c9   :  { %7075 = vst [vmem:[%s16462_s2 + $0xa8] sm:$0xff] %v3732_v47  ;;  %7747 = vst [vmem:[%s16462_s2 + $0x15a8] sm:$0xff] %v5076_v45  ;;  %2953 = vrot.lane.b32.xlu1 %v2081_v24, %s9335_s23  ;;  %733 = vrot.lane.b32.xlu0 %v10799_v21, %s9333_s13 }
 0x1ca   :  { %v3734_v17 = vpop.f32.mrf.mxu0  ;;  %v5078_v0 = vpop.f32.mrf.mxu1  ;;  %3880 = vmatprep.mubr.f32.mxu0 %v16546_v48  ;;  %v2082_v5 = vmul.f32 0.1, %v1782_v54 }
 0x1cb   :  { %7076 = vst [vmem:[%s16462_s2 + $0xb0] sm:$0xff] %v3734_v17  ;;  %7748 = vst [vmem:[%s16462_s2 + $0x15b0] sm:$0xff] %v5078_v0  ;;  %v10835_v45 = vpop.permute.xlu1 %2925  ;;  %v706_v24 = vpop.permute.xlu0 %705 }
 0x1cc   :  { %16628 = vst [vmem:[#allocation42_spill] sm:$0xff] %v10835_v45  ;;  %v5082_v47 = vpop.f32.mrf.mxu1  ;;  %8216 = vmatmul.mubr.msk.f32.gmra.mxu1 %vm3016_vm1, %v10835_v45  ;;  %v1558_v17 = vsub.f32 %v10335_v19, %v706_v24 }
 0x1cd   :  { %7750 = vst [vmem:[%s16462_s2 + $0x15c0] sm:$0xff] %v5082_v47  ;;  %1183 = vrot.lane.b32.xlu1 %v10825_v22, %s9333_s13  ;;  %2505 = vrot.lane.b32.xlu0 %v1857_v15, %s9335_s23  ;;  %v10868_v15 = vld [vmem:[%s16460_s0 + $0x8f8] sm:$0xff] }
 0x1ce   :  { %v5084_v18 = vpop.f32.mrf.mxu1  ;;  %5230 = vmatprep.mubr.f32.mxu1 %v16546_v48  ;;  %v1858_v54 = vmul.f32 0.1, %v1558_v17  ;;  %v10888_v17 = vld [vmem:[%s16460_s0 + $0x1f8] sm:$0xff] }
 0x1cf   :  { %7751 = vst [vmem:[%s16462_s2 + $0x15c8] sm:$0xff] %v5084_v18  ;;  %v1156_v0 = vpop.permute.xlu1 %1155  ;;  %v10855_v47 = vpop.permute.xlu0 %2477 }
 0x1d0   :  { %16629 = vst [vmem:[#allocation43_spill] sm:$0xff] %v10855_v47  ;;  %v3738_v45 = vpop.f32.mrf.mxu0  ;;  %7992 = vmatmul.mubr.msk.f32.gmra.mxu0 %vm3016_vm1, %v10855_v47  ;;  %v1783_v24 = vsub.f32 %v10349_v7, %v1156_v0 }
 0x1d1   :  { %7078 = vst [vmem:[%s16462_s2 + $0xc0] sm:$0xff] %v3738_v45  ;;  %2955 = vrot.lane.b32.xlu1 %v2082_v5, %s9335_s23  ;;  %735 = vrot.lane.b32.xlu0 %v10848_v34, %s9333_s13 }
 0x1d2   :  { %v3740_v19 = vpop.f32.mrf.mxu0  ;;  %3886 = vmatprep.mubr.f32.mxu0 %v16546_v48  ;;  %v2083_v0 = vmul.f32 0.1, %v1783_v24 }
 0x1d3   :  { %7079 = vst [vmem:[%s16462_s2 + $0xc8] sm:$0xff] %v3740_v19  ;;  %v10875_v45 = vpop.permute.xlu1 %2927  ;;  %v708_v18 = vpop.permute.xlu0 %707 }
 0x1d4   :  { %16630 = vst [vmem:[#allocation44_spill] sm:$0xff] %v10875_v45  ;;  %v5088_v5 = vpop.f32.mrf.mxu1  ;;  %8217 = vmatmul.mubr.msk.f32.gmra.mxu1 %vm3016_vm1, %v10875_v45  ;;  %v1559_v19 = vsub.f32 %v10363_v8, %v708_v18 }
 0x1d5   :  { %7753 = vst [vmem:[%s16462_s2 + $0x15d8] sm:$0xff] %v5088_v5  ;;  %1185 = vrot.lane.b32.xlu1 %v10868_v15, %s9333_s13  ;;  %2507 = vrot.lane.b32.xlu0 %v1858_v54, %s9335_s23  ;;  %v10908_v54 = vld [vmem:[%s16460_s0 + $0x900] sm:$0xff] }
 0x1d6   :  { %v5090_v7 = vpop.f32.mrf.mxu1  ;;  %5236 = vmatprep.mubr.f32.mxu1 %v16546_v48  ;;  %v1859_v24 = vmul.f32 0.1, %v1559_v19  ;;  %v10928_v19 = vld [vmem:[%s16460_s0 + $0x200] sm:$0xff] }
 0x1d7   :  { %7754 = vst [vmem:[%s16462_s2 + $0x15e0] sm:$0xff] %v5090_v7  ;;  %v1158_v5 = vpop.permute.xlu1 %1157  ;;  %v10895_v45 = vpop.permute.xlu0 %2479 }
 0x1d8   :  { %16631 = vst [vmem:[#allocation45_spill] sm:$0xff] %v10895_v45  ;;  %v3744_v47 = vpop.f32.mrf.mxu0  ;;  %7993 = vmatmul.mubr.msk.f32.gmra.mxu0 %vm3016_vm1, %v10895_v45  ;;  %v1784_v18 = vsub.f32 %v10377_v30, %v1158_v5 }
 0x1d9   :  { %7081 = vst [vmem:[%s16462_s2 + $0xd8] sm:$0xff] %v3744_v47  ;;  %2957 = vrot.lane.b32.xlu1 %v2083_v0, %s9335_s23  ;;  %737 = vrot.lane.b32.xlu0 %v10888_v17, %s9333_s13 }
 0x1da   :  { %v3746_v8 = vpop.f32.mrf.mxu0  ;;  %3892 = vmatprep.mubr.f32.mxu0 %v16546_v48  ;;  %v2084_v5 = vmul.f32 0.1, %v1784_v18 }
 0x1db   :  { %7082 = vst [vmem:[%s16462_s2 + $0xe0] sm:$0xff] %v3746_v8  ;;  %v10915_v47 = vpop.permute.xlu1 %2929  ;;  %v710_v7 = vpop.permute.xlu0 %709 }
 0x1dc   :  { %16632 = vst [vmem:[#allocation46_spill] sm:$0xff] %v10915_v47  ;;  %v5094_v0 = vpop.f32.mrf.mxu1  ;;  %8218 = vmatmul.mubr.msk.f32.gmra.mxu1 %vm3016_vm1, %v10915_v47  ;;  %v1560_v8 = vsub.f32 %v10391_v63, %v710_v7 }
 0x1dd   :  { %7756 = vst [vmem:[%s16462_s2 + $0x15f0] sm:$0xff] %v5094_v0  ;;  %1187 = vrot.lane.b32.xlu1 %v10908_v54, %s9333_s13  ;;  %2509 = vrot.lane.b32.xlu0 %v1859_v24, %s9335_s23  ;;  %v10948_v24 = vld [vmem:[%s16460_s0 + $0x908] sm:$0xff] }
 0x1de   :  { %v5096_v30 = vpop.f32.mrf.mxu1  ;;  %5242 = vmatprep.mubr.f32.mxu1 %v16546_v48  ;;  %v1860_v18 = vmul.f32 0.1, %v1560_v8  ;;  %v10968_v8 = vld [vmem:[%s16460_s0 + $0x208] sm:$0xff] }
 0x1df   :  { %7757 = vst [vmem:[%s16462_s2 + $0x15f8] sm:$0xff] %v5096_v30  ;;  %v1160_v0 = vpop.permute.xlu1 %1159  ;;  %v10935_v47 = vpop.permute.xlu0 %2481 }
 0x1e0   :  { %16633 = vst [vmem:[#allocation47_spill] sm:$0xff] %v10935_v47  ;;  %v3750_v45 = vpop.f32.mrf.mxu0  ;;  %7994 = vmatmul.mubr.msk.f32.gmra.mxu0 %vm3016_vm1, %v10935_v47  ;;  %v1785_v7 = vsub.f32 %v10405_v11, %v1160_v0 }
 0x1e1   :  { %7084 = vst [vmem:[%s16462_s2 + $0xf0] sm:$0xff] %v3750_v45  ;;  %2959 = vrot.lane.b32.xlu1 %v2084_v5, %s9335_s23  ;;  %739 = vrot.lane.b32.xlu0 %v10928_v19, %s9333_s13 }
 0x1e2   :  { %v3752_v63 = vpop.f32.mrf.mxu0  ;;  %3898 = vmatprep.mubr.f32.mxu0 %v16546_v48  ;;  %v2085_v0 = vmul.f32 0.1, %v1785_v7 }
 0x1e3   :  { %7085 = vst [vmem:[%s16462_s2 + $0xf8] sm:$0xff] %v3752_v63  ;;  %v10955_v45 = vpop.permute.xlu1 %2931  ;;  %v712_v30 = vpop.permute.xlu0 %711 }
 0x1e4   :  { %16634 = vst [vmem:[#allocation48_spill] sm:$0xff] %v10955_v45  ;;  %v5100_v5 = vpop.f32.mrf.mxu1  ;;  %8219 = vmatmul.mubr.msk.f32.gmra.mxu1 %vm3016_vm1, %v10955_v45  ;;  %v1561_v63 = vsub.f32 %v10419_v33, %v712_v30 }
 0x1e5   :  { %7759 = vst [vmem:[%s16462_s2 + $0x1608] sm:$0xff] %v5100_v5  ;;  %1189 = vrot.lane.b32.xlu1 %v10948_v24, %s9333_s13  ;;  %2511 = vrot.lane.b32.xlu0 %v1860_v18, %s9335_s23  ;;  %v10988_v18 = vld [vmem:[%s16460_s0 + $0x910] sm:$0xff] }
 0x1e6   :  { %v5102_v11 = vpop.f32.mrf.mxu1  ;;  %5248 = vmatprep.mubr.f32.mxu1 %v16546_v48  ;;  %v1861_v7 = vmul.f32 0.1, %v1561_v63  ;;  %v11008_v63 = vld [vmem:[%s16460_s0 + $0x210] sm:$0xff] }
 0x1e7   :  { %7760 = vst [vmem:[%s16462_s2 + $0x1610] sm:$0xff] %v5102_v11  ;;  %v1162_v5 = vpop.permute.xlu1 %1161  ;;  %v10975_v45 = vpop.permute.xlu0 %2483 }
 0x1e8   :  { %16635 = vst [vmem:[#allocation49_spill] sm:$0xff] %v10975_v45  ;;  %v3756_v47 = vpop.f32.mrf.mxu0  ;;  %7995 = vmatmul.mubr.msk.f32.gmra.mxu0 %vm3016_vm1, %v10975_v45  ;;  %v1786_v30 = vsub.f32 %v10433_v25, %v1162_v5 }
 0x1e9   :  { %7087 = vst [vmem:[%s16462_s2 + $0x108] sm:$0xff] %v3756_v47  ;;  %2961 = vrot.lane.b32.xlu1 %v2085_v0, %s9335_s23  ;;  %741 = vrot.lane.b32.xlu0 %v10968_v8, %s9333_s13 }
 0x1ea   :  { %v3758_v33 = vpop.f32.mrf.mxu0  ;;  %3904 = vmatprep.mubr.f32.mxu0 %v16546_v48  ;;  %v2086_v5 = vmul.f32 0.1, %v1786_v30 }
 0x1eb   :  { %7088 = vst [vmem:[%s16462_s2 + $0x110] sm:$0xff] %v3758_v33  ;;  %v10995_v47 = vpop.permute.xlu1 %2933  ;;  %v714_v11 = vpop.permute.xlu0 %713 }
 0x1ec   :  { %16636 = vst [vmem:[#allocation50_spill] sm:$0xff] %v10995_v47  ;;  %v5106_v0 = vpop.f32.mrf.mxu1  ;;  %8220 = vmatmul.mubr.msk.f32.gmra.mxu1 %vm3016_vm1, %v10995_v47  ;;  %v1562_v33 = vsub.f32 %v10447_v4, %v714_v11 }
 0x1ed   :  { %7762 = vst [vmem:[%s16462_s2 + $0x1620] sm:$0xff] %v5106_v0  ;;  %1191 = vrot.lane.b32.xlu1 %v10988_v18, %s9333_s13  ;;  %2513 = vrot.lane.b32.xlu0 %v1861_v7, %s9335_s23  ;;  %v11028_v7 = vld [vmem:[%s16460_s0 + $0x918] sm:$0xff] }
 0x1ee   :  { %v5108_v25 = vpop.f32.mrf.mxu1  ;;  %5254 = vmatprep.mubr.f32.mxu1 %v16546_v48  ;;  %v1862_v30 = vmul.f32 0.1, %v1562_v33  ;;  %v11048_v33 = vld [vmem:[%s16460_s0 + $0x218] sm:$0xff] }
 0x1ef   :  { %7763 = vst [vmem:[%s16462_s2 + $0x1628] sm:$0xff] %v5108_v25  ;;  %v1164_v0 = vpop.permute.xlu1 %1163  ;;  %v11015_v47 = vpop.permute.xlu0 %2485 }
 0x1f0   :  { %16637 = vst [vmem:[#allocation51_spill] sm:$0xff] %v11015_v47  ;;  %v3762_v45 = vpop.f32.mrf.mxu0  ;;  %7996 = vmatmul.mubr.msk.f32.gmra.mxu0 %vm3016_vm1, %v11015_v47  ;;  %v1787_v11 = vsub.f32 %v10461_v36, %v1164_v0 }
 0x1f1   :  { %7090 = vst [vmem:[%s16462_s2 + $0x120] sm:$0xff] %v3762_v45  ;;  %2963 = vrot.lane.b32.xlu1 %v2086_v5, %s9335_s23  ;;  %743 = vrot.lane.b32.xlu0 %v11008_v63, %s9333_s13 }
 0x1f2   :  { %v3764_v4 = vpop.f32.mrf.mxu0  ;;  %3910 = vmatprep.mubr.f32.mxu0 %v16546_v48  ;;  %v2087_v0 = vmul.f32 0.1, %v1787_v11 }
 0x1f3   :  { %7091 = vst [vmem:[%s16462_s2 + $0x128] sm:$0xff] %v3764_v4  ;;  %v11035_v45 = vpop.permute.xlu1 %2935  ;;  %v716_v25 = vpop.permute.xlu0 %715 }
 0x1f4   :  { %16638 = vst [vmem:[#allocation52_spill] sm:$0xff] %v11035_v45  ;;  %v5112_v5 = vpop.f32.mrf.mxu1  ;;  %8221 = vmatmul.mubr.msk.f32.gmra.mxu1 %vm3016_vm1, %v11035_v45  ;;  %v1563_v4 = vsub.f32 %v10475_v38, %v716_v25 }
 0x1f5   :  { %7765 = vst [vmem:[%s16462_s2 + $0x1638] sm:$0xff] %v5112_v5  ;;  %1193 = vrot.lane.b32.xlu1 %v11028_v7, %s9333_s13  ;;  %2515 = vrot.lane.b32.xlu0 %v1862_v30, %s9335_s23  ;;  %v11068_v30 = vld [vmem:[%s16460_s0 + $0x920] sm:$0xff] }
 0x1f6   :  { %v5114_v36 = vpop.f32.mrf.mxu1  ;;  %5260 = vmatprep.mubr.f32.mxu1 %v16546_v48  ;;  %v1863_v11 = vmul.f32 0.1, %v1563_v4  ;;  %v11088_v4 = vld [vmem:[%s16460_s0 + $0x220] sm:$0xff] }
 0x1f7   :  { %7766 = vst [vmem:[%s16462_s2 + $0x1640] sm:$0xff] %v5114_v36  ;;  %v1166_v5 = vpop.permute.xlu1 %1165  ;;  %v11055_v45 = vpop.permute.xlu0 %2487 }
 0x1f8   :  { %16639 = vst [vmem:[#allocation53_spill] sm:$0xff] %v11055_v45  ;;  %v3768_v47 = vpop.f32.mrf.mxu0  ;;  %7997 = vmatmul.mubr.msk.f32.gmra.mxu0 %vm3016_vm1, %v11055_v45  ;;  %v1788_v25 = vsub.f32 %v10489_v39, %v1166_v5 }
 0x1f9   :  { %7093 = vst [vmem:[%s16462_s2 + $0x138] sm:$0xff] %v3768_v47  ;;  %2965 = vrot.lane.b32.xlu1 %v2087_v0, %s9335_s23  ;;  %745 = vrot.lane.b32.xlu0 %v11048_v33, %s9333_s13 }
 0x1fa   :  { %v3770_v38 = vpop.f32.mrf.mxu0  ;;  %3916 = vmatprep.mubr.f32.mxu0 %v16546_v48  ;;  %v2088_v5 = vmul.f32 0.1, %v1788_v25 }
 0x1fb   :  { %7094 = vst [vmem:[%s16462_s2 + $0x140] sm:$0xff] %v3770_v38  ;;  %v11075_v47 = vpop.permute.xlu1 %2937  ;;  %v718_v36 = vpop.permute.xlu0 %717 }
 0x1fc   :  { %16640 = vst [vmem:[#allocation54_spill] sm:$0xff] %v11075_v47  ;;  %v5118_v0 = vpop.f32.mrf.mxu1  ;;  %8222 = vmatmul.mubr.msk.f32.gmra.mxu1 %vm3016_vm1, %v11075_v47  ;;  %v1564_v38 = vsub.f32 %v10503_v40, %v718_v36 }
 0x1fd   :  { %7768 = vst [vmem:[%s16462_s2 + $0x1650] sm:$0xff] %v5118_v0  ;;  %1195 = vrot.lane.b32.xlu1 %v11068_v30, %s9333_s13  ;;  %2517 = vrot.lane.b32.xlu0 %v1863_v11, %s9335_s23  ;;  %v11108_v11 = vld [vmem:[%s16460_s0 + $0x928] sm:$0xff] }
 0x1fe   :  { %v5120_v39 = vpop.f32.mrf.mxu1  ;;  %5266 = vmatprep.mubr.f32.mxu1 %v16546_v48  ;;  %v1864_v25 = vmul.f32 0.1, %v1564_v38  ;;  %v11128_v38 = vld [vmem:[%s16460_s0 + $0x228] sm:$0xff] }
 0x1ff   :  { %7769 = vst [vmem:[%s16462_s2 + $0x1658] sm:$0xff] %v5120_v39  ;;  %v1168_v0 = vpop.permute.xlu1 %1167  ;;  %v11095_v47 = vpop.permute.xlu0 %2489 }
 0x200   :  { %16641 = vst [vmem:[#allocation55_spill] sm:$0xff] %v11095_v47  ;;  %v3774_v45 = vpop.f32.mrf.mxu0  ;;  %7998 = vmatmul.mubr.msk.f32.gmra.mxu0 %vm3016_vm1, %v11095_v47  ;;  %v1789_v36 = vsub.f32 %v10517_v41, %v1168_v0 }
 0x201   :  { %7096 = vst [vmem:[%s16462_s2 + $0x150] sm:$0xff] %v3774_v45  ;;  %2967 = vrot.lane.b32.xlu1 %v2088_v5, %s9335_s23  ;;  %747 = vrot.lane.b32.xlu0 %v11088_v4, %s9333_s13 }
 0x202   :  { %v3776_v40 = vpop.f32.mrf.mxu0  ;;  %3922 = vmatprep.mubr.f32.mxu0 %v16546_v48  ;;  %v2089_v0 = vmul.f32 0.1, %v1789_v36 }
 0x203   :  { %7097 = vst [vmem:[%s16462_s2 + $0x158] sm:$0xff] %v3776_v40  ;;  %v11115_v45 = vpop.permute.xlu1 %2939  ;;  %v720_v39 = vpop.permute.xlu0 %719 }
 0x204   :  { %16642 = vst [vmem:[#allocation56_spill] sm:$0xff] %v11115_v45  ;;  %v5124_v5 = vpop.f32.mrf.mxu1  ;;  %8223 = vmatmul.mubr.msk.f32.gmra.mxu1 %vm3016_vm1, %v11115_v45  ;;  %v1565_v40 = vsub.f32 %v10531_v42, %v720_v39 }
 0x205   :  { %7771 = vst [vmem:[%s16462_s2 + $0x1668] sm:$0xff] %v5124_v5  ;;  %1197 = vrot.lane.b32.xlu1 %v11108_v11, %s9333_s13  ;;  %2519 = vrot.lane.b32.xlu0 %v1864_v25, %s9335_s23  ;;  %v11148_v25 = vld [vmem:[%s16460_s0 + $0x930] sm:$0xff] }
 0x206   :  { %v5126_v41 = vpop.f32.mrf.mxu1  ;;  %5272 = vmatprep.mubr.f32.mxu1 %v16546_v48  ;;  %v1865_v36 = vmul.f32 0.1, %v1565_v40  ;;  %v11168_v40 = vld [vmem:[%s16460_s0 + $0x230] sm:$0xff] }
 0x207   :  { %7772 = vst [vmem:[%s16462_s2 + $0x1670] sm:$0xff] %v5126_v41  ;;  %v1170_v5 = vpop.permute.xlu1 %1169  ;;  %v11135_v45 = vpop.permute.xlu0 %2491 }
 0x208   :  { %16643 = vst [vmem:[#allocation57_spill] sm:$0xff] %v11135_v45  ;;  %v3780_v47 = vpop.f32.mrf.mxu0  ;;  %7999 = vmatmul.mubr.msk.f32.gmra.mxu0 %vm3016_vm1, %v11135_v45  ;;  %v1790_v39 = vsub.f32 %v10545_v43, %v1170_v5 }
 0x209   :  { %7099 = vst [vmem:[%s16462_s2 + $0x168] sm:$0xff] %v3780_v47  ;;  %2969 = vrot.lane.b32.xlu1 %v2089_v0, %s9335_s23  ;;  %749 = vrot.lane.b32.xlu0 %v11128_v38, %s9333_s13 }
 0x20a   :  { %v3782_v42 = vpop.f32.mrf.mxu0  ;;  %3928 = vmatprep.mubr.f32.mxu0 %v16546_v48  ;;  %v2090_v5 = vmul.f32 0.1, %v1790_v39 }
 0x20b   :  { %7100 = vst [vmem:[%s16462_s2 + $0x170] sm:$0xff] %v3782_v42  ;;  %v11155_v47 = vpop.permute.xlu1 %2941  ;;  %v722_v41 = vpop.permute.xlu0 %721 }
 0x20c   :  { %16644 = vst [vmem:[#allocation58_spill] sm:$0xff] %v11155_v47  ;;  %v5130_v0 = vpop.f32.mrf.mxu1  ;;  %8224 = vmatmul.mubr.msk.f32.gmra.mxu1 %vm3016_vm1, %v11155_v47  ;;  %v1566_v42 = vsub.f32 %v10559_v44, %v722_v41 }
 0x20d   :  { %7774 = vst [vmem:[%s16462_s2 + $0x1680] sm:$0xff] %v5130_v0  ;;  %1199 = vrot.lane.b32.xlu1 %v11148_v25, %s9333_s13  ;;  %2521 = vrot.lane.b32.xlu0 %v1865_v36, %s9335_s23  ;;  %v11188_v36 = vld [vmem:[%s16460_s0 + $0x938] sm:$0xff] }
 0x20e   :  { %v5132_v43 = vpop.f32.mrf.mxu1  ;;  %5278 = vmatprep.mubr.f32.mxu1 %v16546_v48  ;;  %v1866_v39 = vmul.f32 0.1, %v1566_v42  ;;  %v11208_v42 = vld [vmem:[%s16460_s0 + $0x238] sm:$0xff] }
 0x20f   :  { %7775 = vst [vmem:[%s16462_s2 + $0x1688] sm:$0xff] %v5132_v43  ;;  %v1172_v0 = vpop.permute.xlu1 %1171  ;;  %v11175_v47 = vpop.permute.xlu0 %2493 }
 0x210   :  { %16645 = vst [vmem:[#allocation59_spill] sm:$0xff] %v11175_v47  ;;  %v3786_v45 = vpop.f32.mrf.mxu0  ;;  %8000 = vmatmul.mubr.msk.f32.gmra.mxu0 %vm3016_vm1, %v11175_v47  ;;  %v1791_v41 = vsub.f32 %v10573_v28, %v1172_v0 }
 0x211   :  { %7102 = vst [vmem:[%s16462_s2 + $0x180] sm:$0xff] %v3786_v45  ;;  %2971 = vrot.lane.b32.xlu1 %v2090_v5, %s9335_s23  ;;  %751 = vrot.lane.b32.xlu0 %v11168_v40, %s9333_s13 }
 0x212   :  { %v3788_v44 = vpop.f32.mrf.mxu0  ;;  %3934 = vmatprep.mubr.f32.mxu0 %v16546_v48  ;;  %v2091_v0 = vmul.f32 0.1, %v1791_v41 }
 0x213   :  { %7103 = vst [vmem:[%s16462_s2 + $0x188] sm:$0xff] %v3788_v44  ;;  %v11195_v45 = vpop.permute.xlu1 %2943  ;;  %v724_v43 = vpop.permute.xlu0 %723 }
 0x214   :  { %16646 = vst [vmem:[#allocation60_spill] sm:$0xff] %v11195_v45  ;;  %v5136_v5 = vpop.f32.mrf.mxu1  ;;  %8225 = vmatmul.mubr.msk.f32.gmra.mxu1 %vm3016_vm1, %v11195_v45  ;;  %v1567_v44 = vsub.f32 %v10587_v59, %v724_v43 }
 0x215   :  { %7777 = vst [vmem:[%s16462_s2 + $0x1698] sm:$0xff] %v5136_v5  ;;  %1201 = vrot.lane.b32.xlu1 %v11188_v36, %s9333_s13  ;;  %2523 = vrot.lane.b32.xlu0 %v1866_v39, %s9335_s23  ;;  %v11228_v39 = vld [vmem:[%s16460_s0 + $0x940] sm:$0xff] }
 0x216   :  { %v5138_v28 = vpop.f32.mrf.mxu1  ;;  %5284 = vmatprep.mubr.f32.mxu1 %v16546_v48  ;;  %v1867_v41 = vmul.f32 0.1, %v1567_v44  ;;  %v11248_v44 = vld [vmem:[%s16460_s0 + $0x240] sm:$0xff] }
 0x217   :  { %7778 = vst [vmem:[%s16462_s2 + $0x16a0] sm:$0xff] %v5138_v28  ;;  %v1174_v5 = vpop.permute.xlu1 %1173  ;;  %v11215_v45 = vpop.permute.xlu0 %2495 }
 0x218   :  { %16647 = vst [vmem:[#allocation61_spill] sm:$0xff] %v11215_v45  ;;  %v3792_v47 = vpop.f32.mrf.mxu0  ;;  %8001 = vmatmul.mubr.msk.f32.gmra.mxu0 %vm3016_vm1, %v11215_v45  ;;  %v1792_v43 = vsub.f32 %v10601_v1, %v1174_v5 }
 0x219   :  { %7105 = vst [vmem:[%s16462_s2 + $0x198] sm:$0xff] %v3792_v47  ;;  %2973 = vrot.lane.b32.xlu1 %v2091_v0, %s9335_s23  ;;  %753 = vrot.lane.b32.xlu0 %v11208_v42, %s9333_s13 }
 0x21a   :  { %v3794_v59 = vpop.f32.mrf.mxu0  ;;  %3940 = vmatprep.mubr.f32.mxu0 %v16546_v48  ;;  %v2092_v5 = vmul.f32 0.1, %v1792_v43 }
 0x21b   :  { %7106 = vst [vmem:[%s16462_s2 + $0x1a0] sm:$0xff] %v3794_v59  ;;  %v11235_v47 = vpop.permute.xlu1 %2945  ;;  %v726_v28 = vpop.permute.xlu0 %725 }
 0x21c   :  { %16648 = vst [vmem:[#allocation62_spill] sm:$0xff] %v11235_v47  ;;  %v5142_v0 = vpop.f32.mrf.mxu1  ;;  %8226 = vmatmul.mubr.msk.f32.gmra.mxu1 %vm3016_vm1, %v11235_v47  ;;  %v1568_v59 = vsub.f32 %v10615_v16, %v726_v28 }
 0x21d   :  { %7780 = vst [vmem:[%s16462_s2 + $0x16b0] sm:$0xff] %v5142_v0  ;;  %1203 = vrot.lane.b32.xlu1 %v11228_v39, %s9333_s13  ;;  %2525 = vrot.lane.b32.xlu0 %v1867_v41, %s9335_s23  ;;  %v11268_v41 = vld [vmem:[%s16460_s0 + $0x948] sm:$0xff] }
 0x21e   :  { %v5144_v1 = vpop.f32.mrf.mxu1  ;;  %5290 = vmatprep.mubr.f32.mxu1 %v16546_v48  ;;  %v1868_v43 = vmul.f32 0.1, %v1568_v59  ;;  %v11288_v59 = vld [vmem:[%s16460_s0 + $0x248] sm:$0xff] }
 0x21f   :  { %7781 = vst [vmem:[%s16462_s2 + $0x16b8] sm:$0xff] %v5144_v1  ;;  %v1176_v0 = vpop.permute.xlu1 %1175  ;;  %v11255_v47 = vpop.permute.xlu0 %2497 }
 0x220   :  { %16649 = vst [vmem:[#allocation63_spill] sm:$0xff] %v11255_v47  ;;  %v3798_v45 = vpop.f32.mrf.mxu0  ;;  %8002 = vmatmul.mubr.msk.f32.gmra.mxu0 %vm3016_vm1, %v11255_v47  ;;  %v1793_v28 = vsub.f32 %v10629_v56, %v1176_v0 }
 0x221   :  { %7108 = vst [vmem:[%s16462_s2 + $0x1b0] sm:$0xff] %v3798_v45  ;;  %2975 = vrot.lane.b32.xlu1 %v2092_v5, %s9335_s23  ;;  %755 = vrot.lane.b32.xlu0 %v11248_v44, %s9333_s13 }
 0x222   :  { %v3800_v16 = vpop.f32.mrf.mxu0  ;;  %3946 = vmatprep.mubr.f32.mxu0 %v16546_v48  ;;  %v2093_v0 = vmul.f32 0.1, %v1793_v28 }
 0x223   :  { %7109 = vst [vmem:[%s16462_s2 + $0x1b8] sm:$0xff] %v3800_v16  ;;  %v11275_v45 = vpop.permute.xlu1 %2947  ;;  %v728_v1 = vpop.permute.xlu0 %727 }
 0x224   :  { %16650 = vst [vmem:[#allocation64_spill] sm:$0xff] %v11275_v45  ;;  %v5148_v5 = vpop.f32.mrf.mxu1  ;;  %8227 = vmatmul.mubr.msk.f32.gmra.mxu1 %vm3016_vm1, %v11275_v45  ;;  %v1569_v16 = vsub.f32 %v10646_v51, %v728_v1 }
 0x225   :  { %7783 = vst [vmem:[%s16462_s2 + $0x16c8] sm:$0xff] %v5148_v5  ;;  %1205 = vrot.lane.b32.xlu1 %v11268_v41, %s9333_s13  ;;  %2527 = vrot.lane.b32.xlu0 %v1868_v43, %s9335_s23  ;;  %v11308_v43 = vld [vmem:[%s16460_s0 + $0x950] sm:$0xff] }
 0x226   :  { %v5150_v56 = vpop.f32.mrf.mxu1  ;;  %5296 = vmatprep.mubr.f32.mxu1 %v16546_v48  ;;  %v1869_v28 = vmul.f32 0.1, %v1569_v16  ;;  %v11328_v16 = vld [vmem:[%s16460_s0 + $0x250] sm:$0xff] }
 0x227   :  { %7784 = vst [vmem:[%s16462_s2 + $0x16d0] sm:$0xff] %v5150_v56  ;;  %v1178_v5 = vpop.permute.xlu1 %1177  ;;  %v11295_v45 = vpop.permute.xlu0 %2499 }
 0x228   :  { %16651 = vst [vmem:[#allocation65_spill] sm:$0xff] %v11295_v45  ;;  %v3804_v47 = vpop.f32.mrf.mxu0  ;;  %8003 = vmatmul.mubr.msk.f32.gmra.mxu0 %vm3016_vm1, %v11295_v45  ;;  %v1794_v1 = vsub.f32 %v10669_v55, %v1178_v5 }
 0x229   :  { %7111 = vst [vmem:[%s16462_s2 + $0x1c8] sm:$0xff] %v3804_v47  ;;  %2977 = vrot.lane.b32.xlu1 %v2093_v0, %s9335_s23  ;;  %757 = vrot.lane.b32.xlu0 %v11288_v59, %s9333_s13 }
 0x22a   :  { %v3806_v51 = vpop.f32.mrf.mxu0  ;;  %3952 = vmatprep.mubr.f32.mxu0 %v16546_v48  ;;  %v2094_v5 = vmul.f32 0.1, %v1794_v1 }
 0x22b   :  { %7112 = vst [vmem:[%s16462_s2 + $0x1d0] sm:$0xff] %v3806_v51  ;;  %v11315_v47 = vpop.permute.xlu1 %2949  ;;  %v730_v56 = vpop.permute.xlu0 %729 }
 0x22c   :  { %16652 = vst [vmem:[#allocation66_spill] sm:$0xff] %v11315_v47  ;;  %v5154_v0 = vpop.f32.mrf.mxu1  ;;  %8228 = vmatmul.mubr.msk.f32.gmra.mxu1 %vm3016_vm1, %v11315_v47  ;;  %v1570_v51 = vsub.f32 %v10695_v57, %v730_v56 }
 0x22d   :  { %7786 = vst [vmem:[%s16462_s2 + $0x16e0] sm:$0xff] %v5154_v0  ;;  %1207 = vrot.lane.b32.xlu1 %v11308_v43, %s9333_s13  ;;  %2529 = vrot.lane.b32.xlu0 %v1869_v28, %s9335_s23  ;;  %v11348_v28 = vld [vmem:[%s16460_s0 + $0x958] sm:$0xff] }
 0x22e   :  { %v5156_v55 = vpop.f32.mrf.mxu1  ;;  %5302 = vmatprep.mubr.f32.mxu1 %v16546_v48  ;;  %v1870_v1 = vmul.f32 0.1, %v1570_v51  ;;  %v11368_v51 = vld [vmem:[%s16460_s0 + $0x258] sm:$0xff] }
 0x22f   :  { %7787 = vst [vmem:[%s16462_s2 + $0x16e8] sm:$0xff] %v5156_v55  ;;  %v1180_v0 = vpop.permute.xlu1 %1179  ;;  %v11335_v47 = vpop.permute.xlu0 %2501 }
 0x230   :  { %16653 = vst [vmem:[#allocation67_spill] sm:$0xff] %v11335_v47  ;;  %v3810_v45 = vpop.f32.mrf.mxu0  ;;  %8004 = vmatmul.mubr.msk.f32.gmra.mxu0 %vm3016_vm1, %v11335_v47  ;;  %v1795_v56 = vsub.f32 %v10721_v2, %v1180_v0 }
 0x231   :  { %7114 = vst [vmem:[%s16462_s2 + $0x1e0] sm:$0xff] %v3810_v45  ;;  %2979 = vrot.lane.b32.xlu1 %v2094_v5, %s9335_s23  ;;  %759 = vrot.lane.b32.xlu0 %v11328_v16, %s9333_s13 }
 0x232   :  { %v3812_v57 = vpop.f32.mrf.mxu0  ;;  %3958 = vmatprep.mubr.f32.mxu0 %v16546_v48  ;;  %v2095_v0 = vmul.f32 0.1, %v1795_v56 }
 0x233   :  { %7115 = vst [vmem:[%s16462_s2 + $0x1e8] sm:$0xff] %v3812_v57  ;;  %v11355_v45 = vpop.permute.xlu1 %2951  ;;  %v732_v55 = vpop.permute.xlu0 %731 }
 0x234   :  { %16654 = vst [vmem:[#allocation68_spill] sm:$0xff] %v11355_v45  ;;  %v5160_v5 = vpop.f32.mrf.mxu1  ;;  %8229 = vmatmul.mubr.msk.f32.gmra.mxu1 %vm3016_vm1, %v11355_v45  ;;  %v1571_v57 = vsub.f32 %v10747_v60, %v732_v55 }
 0x235   :  { %7789 = vst [vmem:[%s16462_s2 + $0x16f8] sm:$0xff] %v5160_v5  ;;  %1209 = vrot.lane.b32.xlu1 %v11348_v28, %s9333_s13  ;;  %2531 = vrot.lane.b32.xlu0 %v1870_v1, %s9335_s23 }
 0x236   :  { %v5162_v2 = vpop.f32.mrf.mxu1  ;;  %5308 = vmatprep.mubr.f32.mxu1 %v16546_v48  ;;  %v1871_v55 = vmul.f32 0.1, %v1571_v57 }
 0x237   :  { %7790 = vst [vmem:[%s16462_s2 + $0x1700] sm:$0xff] %v5162_v2  ;;  %v1182_v5 = vpop.permute.xlu1 %1181  ;;  %v11375_v45 = vpop.permute.xlu0 %2503 }
 0x238   :  { %v1796_v1 = vsub.f32 %v10773_v3, %v1182_v5  ;;  %v3816_v47 = vpop.f32.mrf.mxu0  ;;  %8005 = vmatmul.mubr.msk.f32.gmra.mxu0 %vm3016_vm1, %v11375_v45 }
 0x239   :  { %7117 = vst [vmem:[%s16462_s2 + $0x1f8] sm:$0xff] %v3816_v47  ;;  %2981 = vrot.lane.b32.xlu1 %v2095_v0, %s9335_s23  ;;  %761 = vrot.lane.b32.xlu0 %v11368_v51, %s9333_s13 }
 0x23a   :  { %v2096_v60 = vmul.f32 0.1, %v1796_v1  ;;  %v3818_v56 = vpop.f32.mrf.mxu0  ;;  %3964 = vmatprep.mubr.f32.mxu0 %v16546_v48  ;;  %v11403_v1 = vld [vmem:[%s16460_s0 + $0x260] sm:$0xff] }
 0x23b   :  { %7118 = vst [vmem:[%s16462_s2 + $0x200] sm:$0xff] %v3818_v56  ;;  %v11390_v3 = vpop.permute.xlu1 %2953  ;;  %v734_v2 = vpop.permute.xlu0 %733 }
 0x23c   :  { %16655 = vst [vmem:[#allocation69_spill] sm:$0xff] %v11390_v3  ;;  %v1572_v5 = vsub.f32 %v10799_v21, %v734_v2  ;;  %v5166_v47 = vpop.f32.mrf.mxu1  ;;  %8230 = vmatmul.mubr.msk.f32.gmra.mxu1 %vm3016_vm1, %v11390_v3  ;;  %v11921_v3 = vld [vmem:[%s16460_s0 + $0x2e8] sm:$0xff] }
 0x23d   :  { %7792 = vst [vmem:[%s16462_s2 + $0x1710] sm:$0xff] %v5166_v47  ;;  %2983 = vrot.lane.b32.xlu0 %v2096_v60, %s9335_s23  ;;  %2533 = vrot.lane.b32.xlu1 %v1871_v55, %s9335_s23 }
 0x23e   :  { %v1872_v0 = vmul.f32 0.1, %v1572_v5  ;;  %v5168_v57 = vpop.f32.mrf.mxu1  ;;  %5314 = vmatprep.mubr.f32.mxu1 %v16546_v48 }
 0x23f   :  { %7793 = vst [vmem:[%s16462_s2 + $0x1718] sm:$0xff] %v5168_v57  ;;  %v1184_v21 = vpop.permute.xlu1 %1183  ;;  %v11409_v56 = vpop.permute.xlu0 %2505 }
 0x240   :  { %v1797_v60 = vsub.f32 %v10825_v22, %v1184_v21  ;;  %v3822_v2 = vpop.f32.mrf.mxu0  ;;  %8006 = vmatmul.mubr.msk.f32.gmra.mxu0 %vm3016_vm1, %v11409_v56  ;;  %v11424_v22 = vld [vmem:[%s16460_s0 + $0x268] sm:$0xff] }
 0x241   :  { %7120 = vst [vmem:[%s16462_s2 + $0x210] sm:$0xff] %v3822_v2  ;;  %763 = vrot.lane.b32.xlu1 %v11403_v1, %s9333_s13  ;;  %2535 = vrot.lane.b32.xlu0 %v1872_v0, %s9335_s23 }
 0x242   :  { %v2097_v55 = vmul.f32 0.1, %v1797_v60  ;;  %v3824_v5 = vpop.f32.mrf.mxu0  ;;  %3970 = vmatprep.mubr.f32.mxu0 %v16546_v48 }
 0x243   :  { %7121 = vst [vmem:[%s16462_s2 + $0x218] sm:$0xff] %v3824_v5  ;;  %v11429_v47 = vpop.permute.xlu1 %2955  ;;  %v736_v57 = vpop.permute.xlu0 %735 }
 0x244   :  { %16656 = vst [vmem:[#allocation70_spill] sm:$0xff] %v11429_v47  ;;  %v1573_v21 = vsub.f32 %v10848_v34, %v736_v57  ;;  %v5172_v2 = vpop.f32.mrf.mxu1  ;;  %8231 = vmatmul.mubr.msk.f32.gmra.mxu1 %vm3016_vm1, %v11429_v47 }
 0x245   :  { %7795 = vst [vmem:[%s16462_s2 + $0x1728] sm:$0xff] %v5172_v2  ;;  %2985 = vrot.lane.b32.xlu1 %v2097_v55, %s9335_s23  ;;  %765 = vrot.lane.b32.xlu0 %v11424_v22, %s9333_s13  ;;  %v11457_v2 = vld [vmem:[%s16460_s0 + $0x270] sm:$0xff] }
 0x246   :  { %v1873_v0 = vmul.f32 0.1, %v1573_v21  ;;  %v5174_v60 = vpop.f32.mrf.mxu1  ;;  %5320 = vmatprep.mubr.f32.mxu1 %v16546_v48 }
 0x247   :  { %7796 = vst [vmem:[%s16462_s2 + $0x1730] sm:$0xff] %v5174_v60  ;;  %v1186_v34 = vpop.permute.xlu1 %1185  ;;  %v11444_v5 = vpop.permute.xlu0 %2507 }
 0x248   :  { %v1798_v57 = vsub.f32 %v10868_v15, %v1186_v34  ;;  %v3828_v47 = vpop.f32.mrf.mxu0  ;;  %8007 = vmatmul.mubr.msk.f32.gmra.mxu0 %vm3016_vm1, %v11444_v5 }
 0x249   :  { %7123 = vst [vmem:[%s16462_s2 + $0x228] sm:$0xff] %v3828_v47  ;;  %2537 = vrot.lane.b32.xlu1 %v1873_v0, %s9335_s23  ;;  %3976 = vmatprep.mubr.f32.mxu0 %v16546_v48 }
 0x24a   :  { %v2098_v55 = vmul.f32 0.1, %v1798_v57  ;;  %v3830_v21 = vpop.f32.mrf.mxu0 }
 0x24b   :  { %7124 = vst [vmem:[%s16462_s2 + $0x230] sm:$0xff] %v3830_v21  ;;  %v11462_v15 = vpop.permute.xlu1 %2957  ;;  %v738_v60 = vpop.permute.xlu0 %737 }
 0x24c   :  { %16657 = vst [vmem:[#allocation71_spill] sm:$0xff] %v11462_v15  ;;  %v1574_v47 = vsub.f32 %v10888_v17, %v738_v60  ;;  %v5178_v34 = vpop.f32.mrf.mxu1  ;;  %8232 = vmatmul.mubr.msk.f32.gmra.mxu1 %vm3016_vm1, %v11462_v15  ;;  %2987 = vrot.lane.b32.xlu0 %v2098_v55, %s9335_s23 }
 0x24d   :  { %7798 = vst [vmem:[%s16462_s2 + $0x1740] sm:$0xff] %v5178_v34  ;;  %767 = vrot.lane.b32.xlu1 %v11457_v2, %s9333_s13  ;;  %5326 = vmatprep.mubr.f32.mxu1 %v16546_v48 }
 0x24e   :  { %v1874_v0 = vmul.f32 0.1, %v1574_v47  ;;  %v5180_v57 = vpop.f32.mrf.mxu1 }
 0x24f   :  { %7799 = vst [vmem:[%s16462_s2 + $0x1748] sm:$0xff] %v5180_v57  ;;  %v1188_v17 = vpop.permute.xlu1 %1187  ;;  %v11477_v21 = vpop.permute.xlu0 %2509  ;;  %v11490_v57 = vld [vmem:[%s16460_s0 + $0x278] sm:$0xff] }
 0x250   :  { %v1799_v55 = vsub.f32 %v10908_v54, %v1188_v17  ;;  %v3834_v60 = vpop.f32.mrf.mxu0  ;;  %2539 = vrot.lane.b32.xlu0 %v1874_v0, %s9335_s23  ;;  %8008 = vmatmul.mubr.msk.f32.gmra.mxu0 %vm3016_vm1, %v11477_v21 }
 0x251   :  { %7126 = vst [vmem:[%s16462_s2 + $0x240] sm:$0xff] %v3834_v60  ;;  %3982 = vmatprep.mubr.f32.mxu0 %v16546_v48 }
 0x252   :  { %v2099_v47 = vmul.f32 0.1, %v1799_v55  ;;  %v3836_v34 = vpop.f32.mrf.mxu0 }
 0x253   :  { %7127 = vst [vmem:[%s16462_s2 + $0x248] sm:$0xff] %v3836_v34  ;;  %v11495_v54 = vpop.permute.xlu1 %2959  ;;  %v740_v0 = vpop.permute.xlu0 %739 }
 0x254   :  { %16658 = vst [vmem:[#allocation72_spill] sm:$0xff] %v11495_v54  ;;  %v1575_v17 = vsub.f32 %v10928_v19, %v740_v0  ;;  %v5184_v15 = vpop.f32.mrf.mxu1  ;;  %8233 = vmatmul.mubr.msk.f32.gmra.mxu1 %vm3016_vm1, %v11495_v54  ;;  %2989 = vrot.lane.b32.xlu1 %v2099_v47, %s9335_s23 }
 0x255   :  { %7801 = vst [vmem:[%s16462_s2 + $0x1758] sm:$0xff] %v5184_v15  ;;  %769 = vrot.lane.b32.xlu0 %v11490_v57, %s9333_s13  ;;  %5332 = vmatprep.mubr.f32.mxu1 %v16546_v48 }
 0x256   :  { %v1875_v55 = vmul.f32 0.1, %v1575_v17  ;;  %v5186_v60 = vpop.f32.mrf.mxu1 }
 0x257   :  { %7802 = vst [vmem:[%s16462_s2 + $0x1760] sm:$0xff] %v5186_v60  ;;  %v1190_v19 = vpop.permute.xlu1 %1189  ;;  %v11510_v34 = vpop.permute.xlu0 %2511  ;;  %v11523_v60 = vld [vmem:[%s16460_s0 + $0x280] sm:$0xff] }
 0x258   :  { %16659 = vst [vmem:[#allocation73_spill] sm:$0xff] %v11510_v34  ;;  %v1800_v47 = vsub.f32 %v10948_v24, %v1190_v19  ;;  %v3840_v0 = vpop.f32.mrf.mxu0  ;;  %2541 = vrot.lane.b32.xlu1 %v1875_v55, %s9335_s23  ;;  %8009 = vmatmul.mubr.msk.f32.gmra.mxu0 %vm3016_vm1, %v11510_v34 }
 0x259   :  { %7129 = vst [vmem:[%s16462_s2 + $0x258] sm:$0xff] %v3840_v0  ;;  %3988 = vmatprep.mubr.f32.mxu0 %v16546_v48 }
 0x25a   :  { %v2100_v15 = vmul.f32 0.1, %v1800_v47  ;;  %v3842_v17 = vpop.f32.mrf.mxu0 }
 0x25b   :  { %7130 = vst [vmem:[%s16462_s2 + $0x260] sm:$0xff] %v3842_v17  ;;  %v11528_v24 = vpop.permute.xlu1 %2961  ;;  %v742_v55 = vpop.permute.xlu0 %741 }
 0x25c   :  { %16660 = vst [vmem:[#allocation74_spill] sm:$0xff] %v11528_v24  ;;  %v1576_v19 = vsub.f32 %v10968_v8, %v742_v55  ;;  %v5190_v54 = vpop.f32.mrf.mxu1  ;;  %8234 = vmatmul.mubr.msk.f32.gmra.mxu1 %vm3016_vm1, %v11528_v24  ;;  %2991 = vrot.lane.b32.xlu0 %v2100_v15, %s9335_s23 }
 0x25d   :  { %7804 = vst [vmem:[%s16462_s2 + $0x1770] sm:$0xff] %v5190_v54  ;;  %771 = vrot.lane.b32.xlu1 %v11523_v60, %s9333_s13  ;;  %5338 = vmatprep.mubr.f32.mxu1 %v16546_v48 }
 0x25e   :  { %v1876_v47 = vmul.f32 0.1, %v1576_v19  ;;  %v5192_v0 = vpop.f32.mrf.mxu1 }
 0x25f   :  { %7805 = vst [vmem:[%s16462_s2 + $0x1778] sm:$0xff] %v5192_v0  ;;  %v1192_v8 = vpop.permute.xlu1 %1191  ;;  %v11543_v17 = vpop.permute.xlu0 %2513  ;;  %v11556_v0 = vld [vmem:[%s16460_s0 + $0x288] sm:$0xff] }
 0x260   :  { %16661 = vst [vmem:[#allocation75_spill] sm:$0xff] %v11543_v17  ;;  %v1801_v15 = vsub.f32 %v10988_v18, %v1192_v8  ;;  %v3846_v55 = vpop.f32.mrf.mxu0  ;;  %2543 = vrot.lane.b32.xlu0 %v1876_v47, %s9335_s23  ;;  %8010 = vmatmul.mubr.msk.f32.gmra.mxu0 %vm3016_vm1, %v11543_v17 }
 0x261   :  { %7132 = vst [vmem:[%s16462_s2 + $0x270] sm:$0xff] %v3846_v55  ;;  %3994 = vmatprep.mubr.f32.mxu0 %v16546_v48 }
 0x262   :  { %v2101_v54 = vmul.f32 0.1, %v1801_v15  ;;  %v3848_v19 = vpop.f32.mrf.mxu0 }
 0x263   :  { %7133 = vst [vmem:[%s16462_s2 + $0x278] sm:$0xff] %v3848_v19  ;;  %v11561_v18 = vpop.permute.xlu1 %2963  ;;  %v744_v47 = vpop.permute.xlu0 %743 }
 0x264   :  { %16662 = vst [vmem:[#allocation76_spill] sm:$0xff] %v11561_v18  ;;  %v1577_v8 = vsub.f32 %v11008_v63, %v744_v47  ;;  %v5196_v24 = vpop.f32.mrf.mxu1  ;;  %8235 = vmatmul.mubr.msk.f32.gmra.mxu1 %vm3016_vm1, %v11561_v18  ;;  %2993 = vrot.lane.b32.xlu1 %v2101_v54, %s9335_s23 }
 0x265   :  { %7807 = vst [vmem:[%s16462_s2 + $0x1788] sm:$0xff] %v5196_v24  ;;  %773 = vrot.lane.b32.xlu0 %v11556_v0, %s9333_s13  ;;  %5344 = vmatprep.mubr.f32.mxu1 %v16546_v48 }
 0x266   :  { %v1877_v15 = vmul.f32 0.1, %v1577_v8  ;;  %v5198_v55 = vpop.f32.mrf.mxu1 }
 0x267   :  { %7808 = vst [vmem:[%s16462_s2 + $0x1790] sm:$0xff] %v5198_v55  ;;  %v1194_v63 = vpop.permute.xlu1 %1193  ;;  %v11576_v19 = vpop.permute.xlu0 %2515  ;;  %v11589_v55 = vld [vmem:[%s16460_s0 + $0x290] sm:$0xff] }
 0x268   :  { %16663 = vst [vmem:[#allocation77_spill] sm:$0xff] %v11576_v19  ;;  %v1802_v54 = vsub.f32 %v11028_v7, %v1194_v63  ;;  %v3852_v47 = vpop.f32.mrf.mxu0  ;;  %2545 = vrot.lane.b32.xlu1 %v1877_v15, %s9335_s23  ;;  %8011 = vmatmul.mubr.msk.f32.gmra.mxu0 %vm3016_vm1, %v11576_v19 }
 0x269   :  { %7135 = vst [vmem:[%s16462_s2 + $0x288] sm:$0xff] %v3852_v47  ;;  %4000 = vmatprep.mubr.f32.mxu0 %v16546_v48 }
 0x26a   :  { %v2102_v24 = vmul.f32 0.1, %v1802_v54  ;;  %v3854_v8 = vpop.f32.mrf.mxu0 }
 0x26b   :  { %7136 = vst [vmem:[%s16462_s2 + $0x290] sm:$0xff] %v3854_v8  ;;  %v11594_v7 = vpop.permute.xlu1 %2965  ;;  %v746_v15 = vpop.permute.xlu0 %745 }
 0x26c   :  { %16664 = vst [vmem:[#allocation78_spill] sm:$0xff] %v11594_v7  ;;  %v1578_v63 = vsub.f32 %v11048_v33, %v746_v15  ;;  %v5202_v18 = vpop.f32.mrf.mxu1  ;;  %8236 = vmatmul.mubr.msk.f32.gmra.mxu1 %vm3016_vm1, %v11594_v7  ;;  %2995 = vrot.lane.b32.xlu0 %v2102_v24, %s9335_s23 }
 0x26d   :  { %7810 = vst [vmem:[%s16462_s2 + $0x17a0] sm:$0xff] %v5202_v18  ;;  %775 = vrot.lane.b32.xlu1 %v11589_v55, %s9333_s13  ;;  %5350 = vmatprep.mubr.f32.mxu1 %v16546_v48 }
 0x26e   :  { %v1878_v54 = vmul.f32 0.1, %v1578_v63  ;;  %v5204_v47 = vpop.f32.mrf.mxu1 }
 0x26f   :  { %7811 = vst [vmem:[%s16462_s2 + $0x17a8] sm:$0xff] %v5204_v47  ;;  %v1196_v33 = vpop.permute.xlu1 %1195  ;;  %v11609_v8 = vpop.permute.xlu0 %2517  ;;  %v11622_v47 = vld [vmem:[%s16460_s0 + $0x298] sm:$0xff] }
 0x270   :  { %16665 = vst [vmem:[#allocation79_spill] sm:$0xff] %v11609_v8  ;;  %v1803_v24 = vsub.f32 %v11068_v30, %v1196_v33  ;;  %v3858_v15 = vpop.f32.mrf.mxu0  ;;  %2547 = vrot.lane.b32.xlu0 %v1878_v54, %s9335_s23  ;;  %8012 = vmatmul.mubr.msk.f32.gmra.mxu0 %vm3016_vm1, %v11609_v8 }
 0x271   :  { %7138 = vst [vmem:[%s16462_s2 + $0x2a0] sm:$0xff] %v3858_v15  ;;  %4006 = vmatprep.mubr.f32.mxu0 %v16546_v48 }
 0x272   :  { %v2103_v18 = vmul.f32 0.1, %v1803_v24  ;;  %v3860_v63 = vpop.f32.mrf.mxu0  ;;  %v2112_v24 = vld [vmem:[%s16461_s1 + $0x8] sm:$0x7] }
 0x273   :  { %7139 = vst [vmem:[%s16462_s2 + $0x2a8] sm:$0xff] %v3860_v63  ;;  %v11627_v30 = vpop.permute.xlu1 %2967  ;;  %v748_v54 = vpop.permute.xlu0 %747  ;;  %8862 = vmatprep.subr.msk.mxu1 %vm3617_vm0, %v2112_v24 }
 0x274   :  { %16666 = vst [vmem:[#allocation80_spill] sm:$0xff] %v11627_v30  ;;  %v1579_v33 = vsub.f32 %v11088_v4, %v748_v54  ;;  %v5208_v7 = vpop.f32.mrf.mxu1  ;;  %8237 = vmatmul.mubr.msk.f32.gmra.mxu1 %vm3016_vm1, %v11627_v30  ;;  %2997 = vrot.lane.b32.xlu1 %v2103_v18, %s9335_s23 }
 0x275   :  { %7813 = vst [vmem:[%s16462_s2 + $0x17b8] sm:$0xff] %v5208_v7  ;;  %777 = vrot.lane.b32.xlu0 %v11622_v47, %s9333_s13  ;;  %5356 = vmatprep.mubr.f32.mxu1 %v16546_v48 }
 0x276   :  { %v1879_v4 = vmul.f32 0.1, %v1579_v33  ;;  %v5210_v15 = vpop.f32.mrf.mxu1  ;;  %8863 = vmatpush3.msk.msra.mxu1 %vm3617_vm0, %v2112_v24  ;;  %v11660_v24 = vld [vmem:[%s16460_s0 + $0x2a0] sm:$0xff] }
 0x277   :  { %7814 = vst [vmem:[%s16462_s2 + $0x17c0] sm:$0xff] %v5210_v15  ;;  %v1198_v18 = vpop.permute.xlu1 %1197  ;;  %v11646_v63 = vpop.permute.xlu0 %2519 }
 0x278   :  { %16667 = vst [vmem:[#allocation81_spill] sm:$0xff] %v11646_v63  ;;  %v1804_v7 = vsub.f32 %v11108_v11, %v1198_v18  ;;  %v3864_v54 = vpop.f32.mrf.mxu0  ;;  %2549 = vrot.lane.b32.xlu1 %v1879_v4, %s9335_s23  ;;  %8013 = vmatmul.mubr.msk.f32.gmra.mxu0 %vm3016_vm1, %v11646_v63 }
 0x279   :  { %7141 = vst [vmem:[%s16462_s2 + $0x2b8] sm:$0xff] %v3864_v54  ;;  %4012 = vmatprep.mubr.f32.mxu0 %v16546_v48 }
 0x27a   :  { %v2104_v33 = vmul.f32 0.1, %v1804_v7  ;;  %v3866_v15 = vpop.f32.mrf.mxu0 }
 0x27b   :  { %7142 = vst [vmem:[%s16462_s2 + $0x2c0] sm:$0xff] %v3866_v15  ;;  %v11665_v11 = vpop.permute.xlu1 %2969  ;;  %v750_v4 = vpop.permute.xlu0 %749 }
 0x27c   :  { %16668 = vst [vmem:[#allocation82_spill] sm:$0xff] %v11665_v11  ;;  %v1580_v18 = vsub.f32 %v11128_v38, %v750_v4  ;;  %v5214_v30 = vpop.f32.mrf.mxu1  ;;  %8238 = vmatmul.mubr.msk.f32.gmra.mxu1 %vm3016_vm1, %v11665_v11  ;;  %2999 = vrot.lane.b32.xlu0 %v2104_v33, %s9335_s23 }
 0x27d   :  { %7816 = vst [vmem:[%s16462_s2 + $0x17d0] sm:$0xff] %v5214_v30  ;;  %779 = vrot.lane.b32.xlu1 %v11660_v24, %s9333_s13  ;;  %5362 = vmatprep.mubr.f32.mxu1 %v16546_v48 }
 0x27e   :  { %v1880_v7 = vmul.f32 0.1, %v1580_v18  ;;  %v5216_v54 = vpop.f32.mrf.mxu1 }
 0x27f   :  { %7817 = vst [vmem:[%s16462_s2 + $0x17d8] sm:$0xff] %v5216_v54  ;;  %v1200_v38 = vpop.permute.xlu1 %1199  ;;  %v11680_v15 = vpop.permute.xlu0 %2521  ;;  %v11693_v54 = vld [vmem:[%s16460_s0 + $0x2a8] sm:$0xff] }
 0x280   :  { %16669 = vst [vmem:[#allocation83_spill] sm:$0xff] %v11680_v15  ;;  %v1805_v33 = vsub.f32 %v11148_v25, %v1200_v38  ;;  %v3870_v4 = vpop.f32.mrf.mxu0  ;;  %2551 = vrot.lane.b32.xlu0 %v1880_v7, %s9335_s23  ;;  %8014 = vmatmul.mubr.msk.f32.gmra.mxu0 %vm3016_vm1, %v11680_v15 }
 0x281   :  { %7144 = vst [vmem:[%s16462_s2 + $0x2d0] sm:$0xff] %v3870_v4  ;;  %4018 = vmatprep.mubr.f32.mxu0 %v16546_v48 }
 0x282   :  { %v2105_v30 = vmul.f32 0.1, %v1805_v33  ;;  %v3872_v18 = vpop.f32.mrf.mxu0 }
 0x283   :  { %7145 = vst [vmem:[%s16462_s2 + $0x2d8] sm:$0xff] %v3872_v18  ;;  %v11698_v25 = vpop.permute.xlu1 %2971  ;;  %v752_v7 = vpop.permute.xlu0 %751 }
 0x284   :  { %16670 = vst [vmem:[#allocation84_spill] sm:$0xff] %v11698_v25  ;;  %v1581_v38 = vsub.f32 %v11168_v40, %v752_v7  ;;  %v5220_v11 = vpop.f32.mrf.mxu1  ;;  %8239 = vmatmul.mubr.msk.f32.gmra.mxu1 %vm3016_vm1, %v11698_v25  ;;  %3001 = vrot.lane.b32.xlu1 %v2105_v30, %s9335_s23 }
 0x285   :  { %7819 = vst [vmem:[%s16462_s2 + $0x17e8] sm:$0xff] %v5220_v11  ;;  %781 = vrot.lane.b32.xlu0 %v11693_v54, %s9333_s13  ;;  %5368 = vmatprep.mubr.f32.mxu1 %v16546_v48 }
 0x286   :  { %v1881_v33 = vmul.f32 0.1, %v1581_v38  ;;  %v5222_v4 = vpop.f32.mrf.mxu1 }
 0x287   :  { %7820 = vst [vmem:[%s16462_s2 + $0x17f0] sm:$0xff] %v5222_v4  ;;  %v1202_v40 = vpop.permute.xlu1 %1201  ;;  %v11713_v18 = vpop.permute.xlu0 %2523  ;;  %v11726_v4 = vld [vmem:[%s16460_s0 + $0x2b0] sm:$0xff] }
 0x288   :  { %16671 = vst [vmem:[#allocation85_spill] sm:$0xff] %v11713_v18  ;;  %v1806_v30 = vsub.f32 %v11188_v36, %v1202_v40  ;;  %v3876_v7 = vpop.f32.mrf.mxu0  ;;  %2553 = vrot.lane.b32.xlu1 %v1881_v33, %s9335_s23  ;;  %8015 = vmatmul.mubr.msk.f32.gmra.mxu0 %vm3016_vm1, %v11713_v18 }
 0x289   :  { %7147 = vst [vmem:[%s16462_s2 + $0x2e8] sm:$0xff] %v3876_v7  ;;  %4024 = vmatprep.mubr.f32.mxu0 %v16546_v48 }
 0x28a   :  { %v2106_v11 = vmul.f32 0.1, %v1806_v30  ;;  %v3878_v38 = vpop.f32.mrf.mxu0 }
 0x28b   :  { %7148 = vst [vmem:[%s16462_s2 + $0x2f0] sm:$0xff] %v3878_v38  ;;  %v11731_v36 = vpop.permute.xlu1 %2973  ;;  %v754_v33 = vpop.permute.xlu0 %753 }
 0x28c   :  { %16672 = vst [vmem:[#allocation86_spill] sm:$0xff] %v11731_v36  ;;  %v1582_v40 = vsub.f32 %v11208_v42, %v754_v33  ;;  %v5226_v25 = vpop.f32.mrf.mxu1  ;;  %8240 = vmatmul.mubr.msk.f32.gmra.mxu1 %vm3016_vm1, %v11731_v36  ;;  %3003 = vrot.lane.b32.xlu0 %v2106_v11, %s9335_s23 }
 0x28d   :  { %7822 = vst [vmem:[%s16462_s2 + $0x1800] sm:$0xff] %v5226_v25  ;;  %783 = vrot.lane.b32.xlu1 %v11726_v4, %s9333_s13  ;;  %5374 = vmatprep.mubr.f32.mxu1 %v16546_v48 }
 0x28e   :  { %v1882_v30 = vmul.f32 0.1, %v1582_v40  ;;  %v5228_v7 = vpop.f32.mrf.mxu1 }
 0x28f   :  { %7823 = vst [vmem:[%s16462_s2 + $0x1808] sm:$0xff] %v5228_v7  ;;  %v1204_v42 = vpop.permute.xlu1 %1203  ;;  %v11746_v38 = vpop.permute.xlu0 %2525  ;;  %v11759_v7 = vld [vmem:[%s16460_s0 + $0x2b8] sm:$0xff] }
 0x290   :  { %16673 = vst [vmem:[#allocation87_spill] sm:$0xff] %v11746_v38  ;;  %v1807_v11 = vsub.f32 %v11228_v39, %v1204_v42  ;;  %v3882_v33 = vpop.f32.mrf.mxu0  ;;  %2555 = vrot.lane.b32.xlu0 %v1882_v30, %s9335_s23  ;;  %8016 = vmatmul.mubr.msk.f32.gmra.mxu0 %vm3016_vm1, %v11746_v38 }
 0x291   :  { %7150 = vst [vmem:[%s16462_s2 + $0x300] sm:$0xff] %v3882_v33  ;;  %4030 = vmatprep.mubr.f32.mxu0 %v16546_v48 }
 0x292   :  { %v2107_v25 = vmul.f32 0.1, %v1807_v11  ;;  %v3884_v40 = vpop.f32.mrf.mxu0 }
 0x293   :  { %7151 = vst [vmem:[%s16462_s2 + $0x308] sm:$0xff] %v3884_v40  ;;  %v11764_v39 = vpop.permute.xlu1 %2975  ;;  %v756_v30 = vpop.permute.xlu0 %755 }
 0x294   :  { %16674 = vst [vmem:[#allocation88_spill] sm:$0xff] %v11764_v39  ;;  %v1583_v42 = vsub.f32 %v11248_v44, %v756_v30  ;;  %v5232_v36 = vpop.f32.mrf.mxu1  ;;  %8241 = vmatmul.mubr.msk.f32.gmra.mxu1 %vm3016_vm1, %v11764_v39  ;;  %3005 = vrot.lane.b32.xlu1 %v2107_v25, %s9335_s23 }
 0x295   :  { %7825 = vst [vmem:[%s16462_s2 + $0x1818] sm:$0xff] %v5232_v36  ;;  %785 = vrot.lane.b32.xlu0 %v11759_v7, %s9333_s13  ;;  %5380 = vmatprep.mubr.f32.mxu1 %v16546_v48 }
 0x296   :  { %v1883_v11 = vmul.f32 0.1, %v1583_v42  ;;  %v5234_v33 = vpop.f32.mrf.mxu1 }
 0x297   :  { %7826 = vst [vmem:[%s16462_s2 + $0x1820] sm:$0xff] %v5234_v33  ;;  %v1206_v44 = vpop.permute.xlu1 %1205  ;;  %v11779_v40 = vpop.permute.xlu0 %2527  ;;  %v11792_v33 = vld [vmem:[%s16460_s0 + $0x2c0] sm:$0xff] }
 0x298   :  { %16675 = vst [vmem:[#allocation89_spill] sm:$0xff] %v11779_v40  ;;  %v1808_v25 = vsub.f32 %v11268_v41, %v1206_v44  ;;  %v3888_v30 = vpop.f32.mrf.mxu0  ;;  %2557 = vrot.lane.b32.xlu1 %v1883_v11, %s9335_s23  ;;  %8017 = vmatmul.mubr.msk.f32.gmra.mxu0 %vm3016_vm1, %v11779_v40 }
 0x299   :  { %7153 = vst [vmem:[%s16462_s2 + $0x318] sm:$0xff] %v3888_v30  ;;  %4036 = vmatprep.mubr.f32.mxu0 %v16546_v48 }
 0x29a   :  { %v2108_v36 = vmul.f32 0.1, %v1808_v25  ;;  %v3890_v42 = vpop.f32.mrf.mxu0 }
 0x29b   :  { %7154 = vst [vmem:[%s16462_s2 + $0x320] sm:$0xff] %v3890_v42  ;;  %v11797_v41 = vpop.permute.xlu1 %2977  ;;  %v758_v11 = vpop.permute.xlu0 %757 }
 0x29c   :  { %16676 = vst [vmem:[#allocation90_spill] sm:$0xff] %v11797_v41  ;;  %v1584_v44 = vsub.f32 %v11288_v59, %v758_v11  ;;  %v5238_v39 = vpop.f32.mrf.mxu1  ;;  %8242 = vmatmul.mubr.msk.f32.gmra.mxu1 %vm3016_vm1, %v11797_v41  ;;  %3007 = vrot.lane.b32.xlu0 %v2108_v36, %s9335_s23 }
 0x29d   :  { %7828 = vst [vmem:[%s16462_s2 + $0x1830] sm:$0xff] %v5238_v39  ;;  %787 = vrot.lane.b32.xlu1 %v11792_v33, %s9333_s13  ;;  %5386 = vmatprep.mubr.f32.mxu1 %v16546_v48 }
 0x29e   :  { %v1884_v25 = vmul.f32 0.1, %v1584_v44  ;;  %v5240_v30 = vpop.f32.mrf.mxu1 }
 0x29f   :  { %7829 = vst [vmem:[%s16462_s2 + $0x1838] sm:$0xff] %v5240_v30  ;;  %v1208_v59 = vpop.permute.xlu1 %1207  ;;  %v11812_v42 = vpop.permute.xlu0 %2529  ;;  %v11825_v30 = vld [vmem:[%s16460_s0 + $0x2c8] sm:$0xff] }
 0x2a0   :  { %16677 = vst [vmem:[#allocation91_spill] sm:$0xff] %v11812_v42  ;;  %v1809_v36 = vsub.f32 %v11308_v43, %v1208_v59  ;;  %v3894_v11 = vpop.f32.mrf.mxu0  ;;  %2559 = vrot.lane.b32.xlu0 %v1884_v25, %s9335_s23  ;;  %8018 = vmatmul.mubr.msk.f32.gmra.mxu0 %vm3016_vm1, %v11812_v42 }
 0x2a1   :  { %7156 = vst [vmem:[%s16462_s2 + $0x330] sm:$0xff] %v3894_v11  ;;  %4042 = vmatprep.mubr.f32.mxu0 %v16546_v48 }
 0x2a2   :  { %v2109_v39 = vmul.f32 0.1, %v1809_v36  ;;  %v3896_v44 = vpop.f32.mrf.mxu0 }
 0x2a3   :  { %7157 = vst [vmem:[%s16462_s2 + $0x338] sm:$0xff] %v3896_v44  ;;  %v11830_v43 = vpop.permute.xlu1 %2979  ;;  %v760_v25 = vpop.permute.xlu0 %759 }
 0x2a4   :  { %16678 = vst [vmem:[#allocation92_spill] sm:$0xff] %v11830_v43  ;;  %v1585_v59 = vsub.f32 %v11328_v16, %v760_v25  ;;  %v5244_v41 = vpop.f32.mrf.mxu1  ;;  %8243 = vmatmul.mubr.msk.f32.gmra.mxu1 %vm3016_vm1, %v11830_v43  ;;  %3009 = vrot.lane.b32.xlu1 %v2109_v39, %s9335_s23 }
 0x2a5   :  { %7831 = vst [vmem:[%s16462_s2 + $0x1848] sm:$0xff] %v5244_v41  ;;  %789 = vrot.lane.b32.xlu0 %v11825_v30, %s9333_s13  ;;  %5392 = vmatprep.mubr.f32.mxu1 %v16546_v48 }
 0x2a6   :  { %v1885_v36 = vmul.f32 0.1, %v1585_v59  ;;  %v5246_v11 = vpop.f32.mrf.mxu1 }
 0x2a7   :  { %7832 = vst [vmem:[%s16462_s2 + $0x1850] sm:$0xff] %v5246_v11  ;;  %v1210_v16 = vpop.permute.xlu1 %1209  ;;  %v11845_v44 = vpop.permute.xlu0 %2531  ;;  %v11858_v11 = vld [vmem:[%s16460_s0 + $0x2d0] sm:$0xff] }
 0x2a8   :  { %16679 = vst [vmem:[#allocation93_spill] sm:$0xff] %v11845_v44  ;;  %v1810_v39 = vsub.f32 %v11348_v28, %v1210_v16  ;;  %v3900_v25 = vpop.f32.mrf.mxu0  ;;  %2561 = vrot.lane.b32.xlu1 %v1885_v36, %s9335_s23  ;;  %8019 = vmatmul.mubr.msk.f32.gmra.mxu0 %vm3016_vm1, %v11845_v44 }
 0x2a9   :  { %7159 = vst [vmem:[%s16462_s2 + $0x348] sm:$0xff] %v3900_v25  ;;  %4048 = vmatprep.mubr.f32.mxu0 %v16546_v48 }
 0x2aa   :  { %v2110_v41 = vmul.f32 0.1, %v1810_v39  ;;  %v3902_v59 = vpop.f32.mrf.mxu0 }
 0x2ab   :  { %7160 = vst [vmem:[%s16462_s2 + $0x350] sm:$0xff] %v3902_v59  ;;  %v11863_v28 = vpop.permute.xlu1 %2981  ;;  %v762_v36 = vpop.permute.xlu0 %761 }
 0x2ac   :  { %16680 = vst [vmem:[#allocation94_spill] sm:$0xff] %v11863_v28  ;;  %v1586_v16 = vsub.f32 %v11368_v51, %v762_v36  ;;  %v5250_v43 = vpop.f32.mrf.mxu1  ;;  %8244 = vmatmul.mubr.msk.f32.gmra.mxu1 %vm3016_vm1, %v11863_v28  ;;  %3011 = vrot.lane.b32.xlu0 %v2110_v41, %s9335_s23  ;;  %v11878_v51 = vld [vmem:[%s16460_s0 + $0x2d8] sm:$0xff] }
 0x2ad   :  { %7834 = vst [vmem:[%s16462_s2 + $0x1860] sm:$0xff] %v5250_v43  ;;  %791 = vrot.lane.b32.xlu1 %v11858_v11, %s9333_s13  ;;  %5398 = vmatprep.mubr.f32.mxu1 %v16546_v48 }
 0x2ae   :  { %v1886_v39 = vmul.f32 0.1, %v1586_v16  ;;  %v5252_v25 = vpop.f32.mrf.mxu1  ;;  %v11900_v16 = vld [vmem:[%s16460_s0 + $0x2e0] sm:$0xff] }
 0x2af   :  { %7835 = vst [vmem:[%s16462_s2 + $0x1868] sm:$0xff] %v5252_v25  ;;  %v11883_v41 = vpop.permute.xlu1 %2533  ;;  %v11885_v59 = vpop.permute.xlu0 %2983 }
 0x2b0   :  { %16681 = vst [vmem:[#allocation95_spill] sm:$0xff] %v11883_v41  ;;  %16682 = vst [vmem:[#allocation96_spill] sm:$0xff] %v11885_v59  ;;  %v3906_v43 = vpop.f32.mrf.mxu0  ;;  %8020 = vmatmul.mubr.msk.f32.gmra.mxu0 %vm3016_vm1, %v11883_v41  ;;  %8245 = vmatmul.mubr.msk.f32.gmra.mxu1 %vm3016_vm1, %v11885_v59  ;;  %v11941_v41 = vld [vmem:[%s16460_s0 + $0x2f0] sm:$0xff] }
 0x2b1   :  { %7162 = vst [vmem:[%s16462_s2 + $0x360] sm:$0xff] %v3906_v43  ;;  %793 = vrot.lane.b32.xlu1 %v11878_v51, %s9333_s13  ;;  %4054 = vmatprep.mubr.f32.mxu0 %v16546_v48 }
 0x2b2   :  { %v3908_v36 = vpop.f32.mrf.mxu0  ;;  %5404 = vmatprep.mubr.f32.mxu1 %v16546_v48  ;;  %2563 = vrot.lane.b32.xlu0 %v1886_v39, %s9335_s23 }
 0x2b3   :  { %7163 = vst [vmem:[%s16462_s2 + $0x368] sm:$0xff] %v3908_v36  ;;  %v764_v25 = vpop.permute.xlu1 %763  ;;  %v11907_v43 = vpop.permute.xlu0 %2535 }
 0x2b4   :  { %16683 = vst [vmem:[#allocation97_spill] sm:$0xff] %v11907_v43  ;;  %v1587_v59 = vsub.f32 %v11403_v1, %v764_v25  ;;  %v5256_v28 = vpop.f32.mrf.mxu1  ;;  %8021 = vmatmul.mubr.msk.f32.gmra.mxu0 %vm3016_vm1, %v11907_v43 }
 0x2b5   :  { %7837 = vst [vmem:[%s16462_s2 + $0x1878] sm:$0xff] %v5256_v28  ;;  %795 = vrot.lane.b32.xlu1 %v11900_v16, %s9333_s13  ;;  %4060 = vmatprep.mubr.f32.mxu0 %v16546_v48 }
 0x2b6   :  { %v1887_v39 = vmul.f32 0.1, %v1587_v59  ;;  %v5258_v36 = vpop.f32.mrf.mxu1  ;;  %v16685_v59 = vmov 0.0  }
 0x2b7   :  { %7838 = vst [vmem:[%s16462_s2 + $0x1880] sm:$0xff] %v5258_v36  ;;  %v11926_v1 = vpop.permute.xlu1 %2985  ;;  %v766_v25 = vpop.permute.xlu0 %765 }
 0x2b8   :  { %16684 = vst [vmem:[#allocation98_spill] sm:$0xff] %v11926_v1  ;;  %v3912_v28 = vpop.f32.mrf.mxu0  ;;  %8246 = vmatmul.mubr.msk.f32.gmra.mxu1 %vm3016_vm1, %v11926_v1  ;;  %v1588_v48 = vsub.f32 %v11424_v22, %v766_v25  ;;  %2565 = vrot.lane.b32.xlu0 %v1887_v39, %s9335_s23 }
 0x2b9   :  { %7165 = vst [vmem:[%s16462_s2 + $0x378] sm:$0xff] %v3912_v28  ;;  %797 = vrot.lane.b32.xlu1 %v11921_v3, %s9333_s13  ;;  %5410 = vmatprep.mubr.f32.mxu1 %v16685_v59  ;;  %v11962_v28 = vld [vmem:[%s16460_s0 + $0x2f8] sm:$0xff] }
 0x2ba   :  { %v3914_v36 = vpop.f32.mrf.mxu0  ;;  %v1888_v43 = vmul.f32 0.1, %v1588_v48 }
 0x2bb   :  { %7166 = vst [vmem:[%s16462_s2 + $0x380] sm:$0xff] %v3914_v36  ;;  %v11946_v22 = vpop.permute.xlu1 %2537 }
 0x2bc   :  { %16686 = vst [vmem:[#allocation99_spill] sm:$0xff] %v11946_v22  ;;  %v5262_v39 = vpop.f32.mrf.mxu1  ;;  %8022 = vmatmul.mubr.msk.f32.gmra.mxu0 %vm3016_vm1, %v11946_v22  ;;  %2567 = vrot.lane.b32.xlu0 %v1888_v43, %s9335_s23 }
 0x2bd   :  { %7840 = vst [vmem:[%s16462_s2 + $0x1890] sm:$0xff] %v5262_v39  ;;  %799 = vrot.lane.b32.xlu1 %v11941_v41, %s9333_s13  ;;  %4066 = vmatprep.mubr.f32.mxu0 %v16685_v59 }
 0x2be   :  { %v5264_v48 = vpop.f32.mrf.mxu1  ;;  %v11957_v25 = vpop.permute.xlu0 %2987 }
 0x2bf   :  { %16687 = vst [vmem:[#allocation100_spill] sm:$0xff] %v11957_v25  ;;  %7841 = vst [vmem:[%s16462_s2 + $0x1898] sm:$0xff] %v5264_v48  ;;  %8247 = vmatmul.mubr.msk.f32.gmra.mxu1 %vm3016_vm1, %v11957_v25  ;;  %v768_v43 = vpop.permute.xlu1 %767  ;;  %v11981_v48 = vld [vmem:[%s16460_s0 + $0x300] sm:$0xff] }
 0x2c0   :  { %v3918_v36 = vpop.f32.mrf.mxu0  ;;  %v1589_v39 = vsub.f32 %v11457_v2, %v768_v43  ;;  %5416 = vmatprep.mubr.f32.mxu1 %v16685_v59 }
 0x2c1   :  { %7168 = vst [vmem:[%s16462_s2 + $0x390] sm:$0xff] %v3918_v36  ;;  %801 = vrot.lane.b32.xlu1 %v11962_v28, %s9333_s13 }
 0x2c2   :  { %v3920_v1 = vpop.f32.mrf.mxu0  ;;  %v1889_v22 = vmul.f32 0.1, %v1589_v39  ;;  %v11976_v44 = vpop.permute.xlu0 %2539 }
 0x2c3   :  { %16688 = vst [vmem:[#allocation101_spill] sm:$0xff] %v11976_v44  ;;  %7169 = vst [vmem:[%s16462_s2 + $0x398] sm:$0xff] %v3920_v1  ;;  %8023 = vmatmul.mubr.msk.f32.gmra.mxu0 %vm3016_vm1, %v11976_v44  ;;  %v12000_v1 = vld [vmem:[%s16460_s0 + $0x308] sm:$0xff] }
 0x2c4   :  { %v5268_v2 = vpop.f32.mrf.mxu1  ;;  %4072 = vmatprep.mubr.f32.mxu0 %v16685_v59  ;;  %2569 = vrot.lane.b32.xlu0 %v1889_v22, %s9335_s23 }
 0x2c5   :  { %7843 = vst [vmem:[%s16462_s2 + $0x18a8] sm:$0xff] %v5268_v2  ;;  %803 = vrot.lane.b32.xlu1 %v11981_v48, %s9333_s13 }
 0x2c6   :  { %v5270_v43 = vpop.f32.mrf.mxu1  ;;  %v11995_v36 = vpop.permute.xlu1 %2989 }
 0x2c7   :  { %16689 = vst [vmem:[#allocation102_spill] sm:$0xff] %v11995_v36  ;;  %7844 = vst [vmem:[%s16462_s2 + $0x18b0] sm:$0xff] %v5270_v43  ;;  %8248 = vmatmul.mubr.msk.f32.gmra.mxu1 %vm3016_vm1, %v11995_v36  ;;  %v770_v22 = vpop.permute.xlu0 %769  ;;  %v12019_v36 = vld [vmem:[%s16460_s0 + $0x310] sm:$0xff] }
 0x2c8   :  { %v3924_v39 = vpop.f32.mrf.mxu0  ;;  %v1590_v2 = vsub.f32 %v11490_v57, %v770_v22  ;;  %5422 = vmatprep.mubr.f32.mxu1 %v16685_v59 }
 0x2c9   :  { %7171 = vst [vmem:[%s16462_s2 + $0x3a8] sm:$0xff] %v3924_v39  ;;  %805 = vrot.lane.b32.xlu1 %v12000_v1, %s9333_s13 }
 0x2ca   :  { %v3926_v25 = vpop.f32.mrf.mxu0  ;;  %v12014_v44 = vpop.permute.xlu1 %2541  ;;  %v1890_v43 = vmul.f32 0.1, %v1590_v2 }
 0x2cb   :  { %16690 = vst [vmem:[#allocation103_spill] sm:$0xff] %v12014_v44  ;;  %7172 = vst [vmem:[%s16462_s2 + $0x3b0] sm:$0xff] %v3926_v25  ;;  %8024 = vmatmul.mubr.msk.f32.gmra.mxu0 %vm3016_vm1, %v12014_v44  ;;  %v12038_v25 = vld [vmem:[%s16460_s0 + $0x318] sm:$0xff] }
 0x2cc   :  { %v5274_v57 = vpop.f32.mrf.mxu1  ;;  %4078 = vmatprep.mubr.f32.mxu0 %v16685_v59  ;;  %2571 = vrot.lane.b32.xlu0 %v1890_v43, %s9335_s23 }
 0x2cd   :  { %7846 = vst [vmem:[%s16462_s2 + $0x18c0] sm:$0xff] %v5274_v57  ;;  %807 = vrot.lane.b32.xlu1 %v12019_v36, %s9333_s13 }
 0x2ce   :  { %v5276_v22 = vpop.f32.mrf.mxu1  ;;  %v12033_v39 = vpop.permute.xlu0 %2991 }
 0x2cf   :  { %16691 = vst [vmem:[#allocation104_spill] sm:$0xff] %v12033_v39  ;;  %7847 = vst [vmem:[%s16462_s2 + $0x18c8] sm:$0xff] %v5276_v22  ;;  %8249 = vmatmul.mubr.msk.f32.gmra.mxu1 %vm3016_vm1, %v12033_v39  ;;  %v772_v2 = vpop.permute.xlu1 %771  ;;  %v12057_v22 = vld [vmem:[%s16460_s0 + $0x320] sm:$0xff] }
 0x2d0   :  { %v3930_v43 = vpop.f32.mrf.mxu0  ;;  %v1591_v57 = vsub.f32 %v11523_v60, %v772_v2  ;;  %5428 = vmatprep.mubr.f32.mxu1 %v16685_v59 }
 0x2d1   :  { %7174 = vst [vmem:[%s16462_s2 + $0x3c0] sm:$0xff] %v3930_v43  ;;  %809 = vrot.lane.b32.xlu1 %v12038_v25, %s9333_s13 }
 0x2d2   :  { %v3932_v44 = vpop.f32.mrf.mxu0  ;;  %v1891_v42 = vmul.f32 0.1, %v1591_v57  ;;  %v12052_v40 = vpop.permute.xlu0 %2543 }
 0x2d3   :  { %16692 = vst [vmem:[#allocation105_spill] sm:$0xff] %v12052_v40  ;;  %7175 = vst [vmem:[%s16462_s2 + $0x3c8] sm:$0xff] %v3932_v44  ;;  %8025 = vmatmul.mubr.msk.f32.gmra.mxu0 %vm3016_vm1, %v12052_v40  ;;  %v12076_v44 = vld [vmem:[%s16460_s0 + $0x328] sm:$0xff] }
 0x2d4   :  { %v5280_v60 = vpop.f32.mrf.mxu1  ;;  %4084 = vmatprep.mubr.f32.mxu0 %v16685_v59  ;;  %2573 = vrot.lane.b32.xlu0 %v1891_v42, %s9335_s23 }
 0x2d5   :  { %7849 = vst [vmem:[%s16462_s2 + $0x18d8] sm:$0xff] %v5280_v60  ;;  %811 = vrot.lane.b32.xlu1 %v12057_v22, %s9333_s13 }
 0x2d6   :  { %v5282_v2 = vpop.f32.mrf.mxu1  ;;  %v12071_v43 = vpop.permute.xlu1 %2993 }
 0x2d7   :  { %16693 = vst [vmem:[#allocation106_spill] sm:$0xff] %v12071_v43  ;;  %7850 = vst [vmem:[%s16462_s2 + $0x18e0] sm:$0xff] %v5282_v2  ;;  %8250 = vmatmul.mubr.msk.f32.gmra.mxu1 %vm3016_vm1, %v12071_v43  ;;  %v774_v42 = vpop.permute.xlu0 %773  ;;  %v12095_v43 = vld [vmem:[%s16460_s0 + $0x330] sm:$0xff] }
 0x2d8   :  { %v3936_v57 = vpop.f32.mrf.mxu0  ;;  %v1592_v60 = vsub.f32 %v11556_v0, %v774_v42  ;;  %5434 = vmatprep.mubr.f32.mxu1 %v16685_v59 }
 0x2d9   :  { %7177 = vst [vmem:[%s16462_s2 + $0x3d8] sm:$0xff] %v3936_v57  ;;  %813 = vrot.lane.b32.xlu1 %v12076_v44, %s9333_s13 }
 0x2da   :  { %v3938_v39 = vpop.f32.mrf.mxu0  ;;  %v12090_v40 = vpop.permute.xlu1 %2545  ;;  %v1892_v2 = vmul.f32 0.1, %v1592_v60 }
 0x2db   :  { %16694 = vst [vmem:[#allocation107_spill] sm:$0xff] %v12090_v40  ;;  %7178 = vst [vmem:[%s16462_s2 + $0x3e0] sm:$0xff] %v3938_v39  ;;  %8026 = vmatmul.mubr.msk.f32.gmra.mxu0 %vm3016_vm1, %v12090_v40  ;;  %v12114_v39 = vld [vmem:[%s16460_s0 + $0x338] sm:$0xff] }
 0x2dc   :  { %v5286_v0 = vpop.f32.mrf.mxu1  ;;  %4090 = vmatprep.mubr.f32.mxu0 %v16685_v59  ;;  %2575 = vrot.lane.b32.xlu0 %v1892_v2, %s9335_s23 }
 0x2dd   :  { %7852 = vst [vmem:[%s16462_s2 + $0x18f0] sm:$0xff] %v5286_v0  ;;  %815 = vrot.lane.b32.xlu1 %v12095_v43, %s9333_s13 }
 0x2de   :  { %v5288_v42 = vpop.f32.mrf.mxu1  ;;  %v12109_v57 = vpop.permute.xlu0 %2995 }
 0x2df   :  { %16695 = vst [vmem:[#allocation108_spill] sm:$0xff] %v12109_v57  ;;  %7853 = vst [vmem:[%s16462_s2 + $0x18f8] sm:$0xff] %v5288_v42  ;;  %8251 = vmatmul.mubr.msk.f32.gmra.mxu1 %vm3016_vm1, %v12109_v57  ;;  %v776_v60 = vpop.permute.xlu1 %775  ;;  %v12133_v42 = vld [vmem:[%s16460_s0 + $0x340] sm:$0xff] }
 0x2e0   :  { %v3942_v2 = vpop.f32.mrf.mxu0  ;;  %v1593_v0 = vsub.f32 %v11589_v55, %v776_v60  ;;  %5440 = vmatprep.mubr.f32.mxu1 %v16685_v59 }
 0x2e1   :  { %7180 = vst [vmem:[%s16462_s2 + $0x3f0] sm:$0xff] %v3942_v2  ;;  %817 = vrot.lane.b32.xlu1 %v12114_v39, %s9333_s13 }
 0x2e2   :  { %v3944_v40 = vpop.f32.mrf.mxu0  ;;  %v1893_v38 = vmul.f32 0.1, %v1593_v0  ;;  %v12128_v18 = vpop.permute.xlu0 %2547 }
 0x2e3   :  { %16696 = vst [vmem:[#allocation109_spill] sm:$0xff] %v12128_v18  ;;  %7181 = vst [vmem:[%s16462_s2 + $0x3f8] sm:$0xff] %v3944_v40  ;;  %8027 = vmatmul.mubr.msk.f32.gmra.mxu0 %vm3016_vm1, %v12128_v18  ;;  %v12152_v40 = vld [vmem:[%s16460_s0 + $0x348] sm:$0xff] }
 0x2e4   :  { %v5292_v55 = vpop.f32.mrf.mxu1  ;;  %4096 = vmatprep.mubr.f32.mxu0 %v16685_v59  ;;  %2577 = vrot.lane.b32.xlu0 %v1893_v38, %s9335_s23 }
 0x2e5   :  { %7855 = vst [vmem:[%s16462_s2 + $0x1908] sm:$0xff] %v5292_v55  ;;  %819 = vrot.lane.b32.xlu1 %v12133_v42, %s9333_s13 }
 0x2e6   :  { %v5294_v60 = vpop.f32.mrf.mxu1  ;;  %v12147_v2 = vpop.permute.xlu1 %2997 }
 0x2e7   :  { %16697 = vst [vmem:[#allocation110_spill] sm:$0xff] %v12147_v2  ;;  %7856 = vst [vmem:[%s16462_s2 + $0x1910] sm:$0xff] %v5294_v60  ;;  %8252 = vmatmul.mubr.msk.f32.gmra.mxu1 %vm3016_vm1, %v12147_v2  ;;  %v778_v38 = vpop.permute.xlu0 %777  ;;  %v12171_v2 = vld [vmem:[%s16460_s0 + $0x350] sm:$0xff] }
 0x2e8   :  { %v3948_v0 = vpop.f32.mrf.mxu0  ;;  %v1594_v55 = vsub.f32 %v11622_v47, %v778_v38  ;;  %5446 = vmatprep.mubr.f32.mxu1 %v16685_v59 }
 0x2e9   :  { %7183 = vst [vmem:[%s16462_s2 + $0x408] sm:$0xff] %v3948_v0  ;;  %821 = vrot.lane.b32.xlu1 %v12152_v40, %s9333_s13 }
 0x2ea   :  { %v3950_v57 = vpop.f32.mrf.mxu0  ;;  %v12166_v18 = vpop.permute.xlu1 %2549  ;;  %v1894_v60 = vmul.f32 0.1, %v1594_v55 }
 0x2eb   :  { %16698 = vst [vmem:[#allocation111_spill] sm:$0xff] %v12166_v18  ;;  %7184 = vst [vmem:[%s16462_s2 + $0x410] sm:$0xff] %v3950_v57  ;;  %8028 = vmatmul.mubr.msk.f32.gmra.mxu0 %vm3016_vm1, %v12166_v18  ;;  %v12190_v57 = vld [vmem:[%s16460_s0 + $0x358] sm:$0xff] }
 0x2ec   :  { %v5298_v47 = vpop.f32.mrf.mxu1  ;;  %4102 = vmatprep.mubr.f32.mxu0 %v16685_v59  ;;  %2579 = vrot.lane.b32.xlu0 %v1894_v60, %s9335_s23 }
 0x2ed   :  { %7858 = vst [vmem:[%s16462_s2 + $0x1920] sm:$0xff] %v5298_v47  ;;  %823 = vrot.lane.b32.xlu1 %v12171_v2, %s9333_s13 }
 0x2ee   :  { %v5300_v38 = vpop.f32.mrf.mxu1  ;;  %v12185_v0 = vpop.permute.xlu0 %2999 }
 0x2ef   :  { %16699 = vst [vmem:[#allocation112_spill] sm:$0xff] %v12185_v0  ;;  %7859 = vst [vmem:[%s16462_s2 + $0x1928] sm:$0xff] %v5300_v38  ;;  %8253 = vmatmul.mubr.msk.f32.gmra.mxu1 %vm3016_vm1, %v12185_v0  ;;  %v780_v55 = vpop.permute.xlu1 %779  ;;  %v12209_v38 = vld [vmem:[%s16460_s0 + $0x360] sm:$0xff] }
 0x2f0   :  { %v3954_v60 = vpop.f32.mrf.mxu0  ;;  %v1595_v47 = vsub.f32 %v11660_v24, %v780_v55  ;;  %5452 = vmatprep.mubr.f32.mxu1 %v16685_v59 }
 0x2f1   :  { %7186 = vst [vmem:[%s16462_s2 + $0x420] sm:$0xff] %v3954_v60  ;;  %825 = vrot.lane.b32.xlu1 %v12190_v57, %s9333_s13 }
 0x2f2   :  { %v3956_v18 = vpop.f32.mrf.mxu0  ;;  %v1895_v15 = vmul.f32 0.1, %v1595_v47  ;;  %v12204_v63 = vpop.permute.xlu0 %2551 }
 0x2f3   :  { %16700 = vst [vmem:[#allocation113_spill] sm:$0xff] %v12204_v63  ;;  %7187 = vst [vmem:[%s16462_s2 + $0x428] sm:$0xff] %v3956_v18  ;;  %8029 = vmatmul.mubr.msk.f32.gmra.mxu0 %vm3016_vm1, %v12204_v63  ;;  %v12228_v18 = vld [vmem:[%s16460_s0 + $0x368] sm:$0xff] }
 0x2f4   :  { %v5304_v24 = vpop.f32.mrf.mxu1  ;;  %4108 = vmatprep.mubr.f32.mxu0 %v16685_v59  ;;  %2581 = vrot.lane.b32.xlu0 %v1895_v15, %s9335_s23 }
 0x2f5   :  { %7861 = vst [vmem:[%s16462_s2 + $0x1938] sm:$0xff] %v5304_v24  ;;  %827 = vrot.lane.b32.xlu1 %v12209_v38, %s9333_s13 }
 0x2f6   :  { %v5306_v55 = vpop.f32.mrf.mxu1  ;;  %v12223_v60 = vpop.permute.xlu1 %3001 }
 0x2f7   :  { %16701 = vst [vmem:[#allocation114_spill] sm:$0xff] %v12223_v60  ;;  %7862 = vst [vmem:[%s16462_s2 + $0x1940] sm:$0xff] %v5306_v55  ;;  %8254 = vmatmul.mubr.msk.f32.gmra.mxu1 %vm3016_vm1, %v12223_v60  ;;  %v782_v15 = vpop.permute.xlu0 %781  ;;  %v12247_v60 = vld [vmem:[%s16460_s0 + $0x370] sm:$0xff] }
 0x2f8   :  { %v3960_v47 = vpop.f32.mrf.mxu0  ;;  %v1596_v24 = vsub.f32 %v11693_v54, %v782_v15  ;;  %5458 = vmatprep.mubr.f32.mxu1 %v16685_v59 }
 0x2f9   :  { %7189 = vst [vmem:[%s16462_s2 + $0x438] sm:$0xff] %v3960_v47  ;;  %829 = vrot.lane.b32.xlu1 %v12228_v18, %s9333_s13 }
 0x2fa   :  { %v3962_v0 = vpop.f32.mrf.mxu0  ;;  %v12242_v63 = vpop.permute.xlu1 %2553  ;;  %v1896_v55 = vmul.f32 0.1, %v1596_v24 }
 0x2fb   :  { %16702 = vst [vmem:[#allocation115_spill] sm:$0xff] %v12242_v63  ;;  %7190 = vst [vmem:[%s16462_s2 + $0x440] sm:$0xff] %v3962_v0  ;;  %8030 = vmatmul.mubr.msk.f32.gmra.mxu0 %vm3016_vm1, %v12242_v63  ;;  %v12266_v0 = vld [vmem:[%s16460_s0 + $0x378] sm:$0xff] }
 0x2fc   :  { %v5310_v54 = vpop.f32.mrf.mxu1  ;;  %4114 = vmatprep.mubr.f32.mxu0 %v16685_v59  ;;  %2583 = vrot.lane.b32.xlu0 %v1896_v55, %s9335_s23 }
 0x2fd   :  { %7864 = vst [vmem:[%s16462_s2 + $0x1950] sm:$0xff] %v5310_v54  ;;  %831 = vrot.lane.b32.xlu1 %v12247_v60, %s9333_s13 }
 0x2fe   :  { %v5312_v15 = vpop.f32.mrf.mxu1  ;;  %v12261_v47 = vpop.permute.xlu0 %3003 }
 0x2ff   :  { %16703 = vst [vmem:[#allocation116_spill] sm:$0xff] %v12261_v47  ;;  %7865 = vst [vmem:[%s16462_s2 + $0x1958] sm:$0xff] %v5312_v15  ;;  %8255 = vmatmul.mubr.msk.f32.gmra.mxu1 %vm3016_vm1, %v12261_v47  ;;  %v784_v24 = vpop.permute.xlu1 %783  ;;  %v12285_v15 = vld [vmem:[%s16460_s0 + $0x380] sm:$0xff] }
 0x300   :  { %v3966_v55 = vpop.f32.mrf.mxu0  ;;  %v1597_v54 = vsub.f32 %v11726_v4, %v784_v24  ;;  %5464 = vmatprep.mubr.f32.mxu1 %v16685_v59 }
 0x301   :  { %7192 = vst [vmem:[%s16462_s2 + $0x450] sm:$0xff] %v3966_v55  ;;  %833 = vrot.lane.b32.xlu1 %v12266_v0, %s9333_s13 }
 0x302   :  { %v3968_v63 = vpop.f32.mrf.mxu0  ;;  %v1897_v8 = vmul.f32 0.1, %v1597_v54  ;;  %v12280_v19 = vpop.permute.xlu0 %2555 }
 0x303   :  { %16704 = vst [vmem:[#allocation117_spill] sm:$0xff] %v12280_v19  ;;  %7193 = vst [vmem:[%s16462_s2 + $0x458] sm:$0xff] %v3968_v63  ;;  %8031 = vmatmul.mubr.msk.f32.gmra.mxu0 %vm3016_vm1, %v12280_v19  ;;  %v12304_v63 = vld [vmem:[%s16460_s0 + $0x388] sm:$0xff] }
 0x304   :  { %v5316_v4 = vpop.f32.mrf.mxu1  ;;  %2585 = vrot.lane.b32.xlu0 %v1897_v8, %s9335_s23  ;;  %4120 = vmatprep.mubr.f32.mxu0 %v16685_v59 }
 0x305   :  { %7867 = vst [vmem:[%s16462_s2 + $0x1968] sm:$0xff] %v5316_v4  ;;  %835 = vrot.lane.b32.xlu1 %v12285_v15, %s9333_s13 }
 0x306   :  { %v5318_v24 = vpop.f32.mrf.mxu1  ;;  %v12299_v55 = vpop.permute.xlu1 %3005 }
 0x307   :  { %16705 = vst [vmem:[#allocation118_spill] sm:$0xff] %v12299_v55  ;;  %7868 = vst [vmem:[%s16462_s2 + $0x1970] sm:$0xff] %v5318_v24  ;;  %8256 = vmatmul.mubr.msk.f32.gmra.mxu1 %vm3016_vm1, %v12299_v55  ;;  %v786_v8 = vpop.permute.xlu0 %785  ;;  %v12323_v55 = vld [vmem:[%s16460_s0 + $0x390] sm:$0xff] }
 0x308   :  { %v3972_v54 = vpop.f32.mrf.mxu0  ;;  %v1598_v4 = vsub.f32 %v11759_v7, %v786_v8  ;;  %5470 = vmatprep.mubr.f32.mxu1 %v16685_v59 }
 0x309   :  { %7195 = vst [vmem:[%s16462_s2 + $0x468] sm:$0xff] %v3972_v54  ;;  %837 = vrot.lane.b32.xlu1 %v12304_v63, %s9333_s13 }
 0x30a   :  { %v3974_v47 = vpop.f32.mrf.mxu0  ;;  %v12318_v19 = vpop.permute.xlu1 %2557  ;;  %v1898_v24 = vmul.f32 0.1, %v1598_v4 }
 0x30b   :  { %16706 = vst [vmem:[#allocation119_spill] sm:$0xff] %v12318_v19  ;;  %7196 = vst [vmem:[%s16462_s2 + $0x470] sm:$0xff] %v3974_v47  ;;  %8032 = vmatmul.mubr.msk.f32.gmra.mxu0 %vm3016_vm1, %v12318_v19  ;;  %v12342_v47 = vld [vmem:[%s16460_s0 + $0x398] sm:$0xff] }
 0x30c   :  { %v5322_v7 = vpop.f32.mrf.mxu1  ;;  %2587 = vrot.lane.b32.xlu0 %v1898_v24, %s9335_s23  ;;  %4126 = vmatprep.mubr.f32.mxu0 %v16685_v59 }
 0x30d   :  { %7870 = vst [vmem:[%s16462_s2 + $0x1980] sm:$0xff] %v5322_v7  ;;  %839 = vrot.lane.b32.xlu1 %v12323_v55, %s9333_s13 }
 0x30e   :  { %v5324_v8 = vpop.f32.mrf.mxu1  ;;  %v12337_v54 = vpop.permute.xlu0 %3007 }
 0x30f   :  { %16707 = vst [vmem:[#allocation120_spill] sm:$0xff] %v12337_v54  ;;  %7871 = vst [vmem:[%s16462_s2 + $0x1988] sm:$0xff] %v5324_v8  ;;  %8257 = vmatmul.mubr.msk.f32.gmra.mxu1 %vm3016_vm1, %v12337_v54  ;;  %v788_v4 = vpop.permute.xlu1 %787  ;;  %v12361_v8 = vld [vmem:[%s16460_s0 + $0x3a0] sm:$0xff] }
 0x310   :  { %v3978_v24 = vpop.f32.mrf.mxu0  ;;  %v1599_v7 = vsub.f32 %v11792_v33, %v788_v4  ;;  %5476 = vmatprep.mubr.f32.mxu1 %v16685_v59  ;;  %16709 = vst [vmem:[#allocation122_spill] sm:$0xff] %v12361_v8 }
 0x311   :  { %7198 = vst [vmem:[%s16462_s2 + $0x480] sm:$0xff] %v3978_v24  ;;  %841 = vrot.lane.b32.xlu1 %v12342_v47, %s9333_s13 }
 0x312   :  { %v1899_v19 = vmul.f32 0.1, %v1599_v7  ;;  %v3980_v17 = vpop.f32.mrf.mxu0  ;;  %v12356_v34 = vpop.permute.xlu0 %2559 }
 0x313   :  { %16708 = vst [vmem:[#allocation121_spill] sm:$0xff] %v12356_v34  ;;  %7199 = vst [vmem:[%s16462_s2 + $0x488] sm:$0xff] %v3980_v17  ;;  %8033 = vmatmul.mubr.msk.f32.gmra.mxu0 %vm3016_vm1, %v12356_v34  ;;  %v12380_v17 = vld [vmem:[%s16460_s0 + $0x3a8] sm:$0xff] }
 0x314   :  { %v5328_v33 = vpop.f32.mrf.mxu1  ;;  %2589 = vrot.lane.b32.xlu0 %v1899_v19, %s9335_s23  ;;  %4132 = vmatprep.mubr.f32.mxu0 %v16685_v59 }
 0x315   :  { %7873 = vst [vmem:[%s16462_s2 + $0x1998] sm:$0xff] %v5328_v33  ;;  %843 = vrot.lane.b32.xlu1 %v12361_v8, %s9333_s13 }
 0x316   :  { %v5330_v4 = vpop.f32.mrf.mxu1  ;;  %v12375_v24 = vpop.permute.xlu1 %3009 }
 0x317   :  { %16710 = vst [vmem:[#allocation123_spill] sm:$0xff] %v12375_v24  ;;  %7874 = vst [vmem:[%s16462_s2 + $0x19a0] sm:$0xff] %v5330_v4  ;;  %8258 = vmatmul.mubr.msk.f32.gmra.mxu1 %vm3016_vm1, %v12375_v24  ;;  %v790_v19 = vpop.permute.xlu0 %789  ;;  %v12399_v4 = vld [vmem:[%s16460_s0 + $0x3b0] sm:$0xff] }
 0x318   :  { %v3984_v7 = vpop.f32.mrf.mxu0  ;;  %v1600_v33 = vsub.f32 %v11825_v30, %v790_v19  ;;  %5482 = vmatprep.mubr.f32.mxu1 %v16685_v59 }
 0x319   :  { %7201 = vst [vmem:[%s16462_s2 + $0x498] sm:$0xff] %v3984_v7  ;;  %845 = vrot.lane.b32.xlu1 %v12380_v17, %s9333_s13 }
 0x31a   :  { %v1900_v54 = vmul.f32 0.1, %v1600_v33  ;;  %v3986_v34 = vpop.f32.mrf.mxu0  ;;  %v12394_v8 = vpop.permute.xlu1 %2561 }
 0x31b   :  { %16711 = vst [vmem:[#allocation124_spill] sm:$0xff] %v12394_v8  ;;  %7202 = vst [vmem:[%s16462_s2 + $0x4a0] sm:$0xff] %v3986_v34  ;;  %8034 = vmatmul.mubr.msk.f32.gmra.mxu0 %vm3016_vm1, %v12394_v8  ;;  %v12418_v34 = vld [vmem:[%s16460_s0 + $0x3b8] sm:$0xff] }
 0x31c   :  { %v5334_v30 = vpop.f32.mrf.mxu1  ;;  %2591 = vrot.lane.b32.xlu0 %v1900_v54, %s9335_s23  ;;  %4138 = vmatprep.mubr.f32.mxu0 %v16685_v59 }
 0x31d   :  { %7876 = vst [vmem:[%s16462_s2 + $0x19b0] sm:$0xff] %v5334_v30  ;;  %847 = vrot.lane.b32.xlu1 %v12399_v4, %s9333_s13 }
 0x31e   :  { %v5336_v19 = vpop.f32.mrf.mxu1  ;;  %v12413_v7 = vpop.permute.xlu0 %3011 }
 0x31f   :  { %7877 = vst [vmem:[%s16462_s2 + $0x19b8] sm:$0xff] %v5336_v19  ;;  %v792_v54 = vpop.permute.xlu1 %791  ;;  %8259 = vmatmul.mubr.msk.f32.gmra.mxu1 %vm3016_vm1, %v12413_v7  ;;  %v12436_v19 = vld [vmem:[%s16460_s0 + $0x3c0] sm:$0xff] }
 0x320   :  { %v1601_v33 = vsub.f32 %v11858_v11, %v792_v54  ;;  %v3990_v30 = vpop.f32.mrf.mxu0  ;;  %8864 = vmatprep.mubr.msk.f32.mxu1 %vm3016_vm1, %v9920_v53 }
 0x321   :  { %7204 = vst [vmem:[%s16462_s2 + $0x4b0] sm:$0xff] %v3990_v30  ;;  %849 = vrot.lane.b32.xlu1 %v12418_v34, %s9333_s13 }
 0x322   :  { %v1901_v24 = vmul.f32 0.1, %v1601_v33  ;;  %v3992_v8 = vpop.f32.mrf.mxu0 }
 0x323   :  { %7205 = vst [vmem:[%s16462_s2 + $0x4b8] sm:$0xff] %v3992_v8  ;;  %v794_v11 = vpop.permute.xlu1 %793  ;;  %8865 = vmatmul.mubr.msk.f32.vlgmr.msra.gmra.mxu1 %vm3016_vm1, %v9936_v6  ;;  %v12459_v8 = vld [vmem:[%s16460_s0 + $0x3c8] sm:$0xff] }
 0x324   :  { %v1602_v53 = vsub.f32 %v11878_v51, %v794_v11  ;;  %2593 = vrot.lane.b32.xlu0 %v1901_v24, %s9335_s23  ;;  %v5340_v54 = vpop.f32.mrf.mxu1  ;;  %8867 = vmatprep.mubr.msk.f32.mxu1 %vm3016_vm1, %v9955_v29  ;;  %v12447_v33 = vpop.permute.xlu0 %2563 }
 0x325   :  { %7879 = vst [vmem:[%s16462_s2 + $0x19c8] sm:$0xff] %v5340_v54  ;;  %851 = vrot.lane.b32.xlu1 %v12436_v19, %s9333_s13  ;;  %8035 = vmatmul.mubr.msk.f32.gmra.mxu0 %vm3016_vm1, %v12447_v33 }
 0x326   :  { %v1902_v6 = vmul.f32 0.1, %v1602_v53  ;;  %v5342_v51 = vpop.f32.mrf.mxu1  ;;  %4144 = vmatprep.mubr.f32.mxu0 %v16685_v59 }
 0x327   :  { %7880 = vst [vmem:[%s16462_s2 + $0x19d0] sm:$0xff] %v5342_v51  ;;  %v796_v29 = vpop.permute.xlu1 %795  ;;  %8868 = vmatmul.mubr.msk.f32.gmra.mxu1 %vm3016_vm1, %v9975_v61  ;;  %v12479_v61 = vld [vmem:[%s16460_s0 + $0x3d0] sm:$0xff] }
 0x328   :  { %v1603_v24 = vsub.f32 %v11900_v16, %v796_v29  ;;  %2595 = vrot.lane.b32.xlu0 %v1902_v6, %s9335_s23  ;;  %v3996_v30 = vpop.f32.mrf.mxu0  ;;  %8870 = vmatprep.mubr.msk.f32.mxu1 %vm3016_vm1, %v9995_v31 }
 0x329   :  { %7207 = vst [vmem:[%s16462_s2 + $0x4c8] sm:$0xff] %v3996_v30  ;;  %853 = vrot.lane.b32.xlu1 %v12459_v8, %s9333_s13 }
 0x32a   :  { %v1903_v11 = vmul.f32 0.1, %v1603_v24  ;;  %v3998_v53 = vpop.f32.mrf.mxu0  ;;  %v12481_v16 = vpop.permute.xlu0 %2565 }
 0x32b   :  { %7208 = vst [vmem:[%s16462_s2 + $0x4d0] sm:$0xff] %v3998_v53  ;;  %v798_v31 = vpop.permute.xlu1 %797  ;;  %8871 = vmatmul.mubr.msk.f32.gmra.mxu1 %vm3016_vm1, %v10015_v46  ;;  %8036 = vmatmul.mubr.msk.f32.gmra.mxu0 %vm3016_vm1, %v12481_v16 }
 0x32c   :  { %v1604_v54 = vsub.f32 %v11921_v3, %v798_v31  ;;  %2597 = vrot.lane.b32.xlu0 %v1903_v11, %s9335_s23  ;;  %v5346_v6 = vpop.f32.mrf.mxu1  ;;  %8873 = vmatprep.mubr.msk.f32.mxu1 %vm3016_vm1, %v10035_v14  ;;  %v12503_v3 = vld [vmem:[%s16460_s0 + $0x3d8] sm:$0xff] }
 0x32d   :  { %7882 = vst [vmem:[%s16462_s2 + $0x19e0] sm:$0xff] %v5346_v6  ;;  %855 = vrot.lane.b32.xlu1 %v12479_v61, %s9333_s13  ;;  %4150 = vmatprep.mubr.f32.mxu0 %v16685_v59 }
 0x32e   :  { %v1904_v46 = vmul.f32 0.1, %v1604_v54  ;;  %v5348_v51 = vpop.f32.mrf.mxu1  ;;  %v12505_v29 = vpop.permute.xlu0 %2567 }
 0x32f   :  { %7883 = vst [vmem:[%s16462_s2 + $0x19e8] sm:$0xff] %v5348_v51  ;;  %v800_v14 = vpop.permute.xlu1 %799  ;;  %8874 = vmatmul.mubr.msk.f32.gmra.mxu1 %vm3016_vm1, %v10055_v26  ;;  %8037 = vmatmul.mubr.msk.f32.gmra.mxu0 %vm3016_vm1, %v12505_v29 }
 0x330   :  { %v1605_v24 = vsub.f32 %v11941_v41, %v800_v14  ;;  %2599 = vrot.lane.b32.xlu0 %v1904_v46, %s9335_s23  ;;  %v4002_v30 = vpop.f32.mrf.mxu0  ;;  %8876 = vmatprep.mubr.msk.f32.mxu1 %vm3016_vm1, %v10087_v20  ;;  %v12527_v41 = vld [vmem:[%s16460_s0 + $0x3e0] sm:$0xff] }
 0x331   :  { %7210 = vst [vmem:[%s16462_s2 + $0x4e0] sm:$0xff] %v4002_v30  ;;  %857 = vrot.lane.b32.xlu1 %v12503_v3, %s9333_s13  ;;  %4156 = vmatprep.mubr.f32.mxu0 %v16685_v59 }
 0x332   :  { %v1905_v26 = vmul.f32 0.1, %v1605_v24  ;;  %v4004_v11 = vpop.f32.mrf.mxu0 }
 0x333   :  { %7211 = vst [vmem:[%s16462_s2 + $0x4e8] sm:$0xff] %v4004_v11  ;;  %v802_v20 = vpop.permute.xlu1 %801  ;;  %8877 = vmatmul.mubr.msk.f32.gmra.mxu1 %vm3016_vm1, %v10115_v49  ;;  %v12546_v49 = vld [vmem:[%s16460_s0 + $0x3e8] sm:$0xff] }
 0x334   :  { %v1606_v53 = vsub.f32 %v11962_v28, %v802_v20  ;;  %2601 = vrot.lane.b32.xlu0 %v1905_v26, %s9335_s23  ;;  %v5352_v31 = vpop.f32.mrf.mxu1  ;;  %8879 = vmatprep.mubr.msk.f32.mxu1 %vm3016_vm1, %v10143_v9 }
 0x335   :  { %7885 = vst [vmem:[%s16462_s2 + $0x19f8] sm:$0xff] %v5352_v31  ;;  %859 = vrot.lane.b32.xlu1 %v12527_v41, %s9333_s13 }
 0x336   :  { %v1906_v54 = vmul.f32 0.1, %v1606_v53  ;;  %v5354_v6 = vpop.f32.mrf.mxu1  ;;  %v12548_v28 = vpop.permute.xlu0 %2569 }
 0x337   :  { %7886 = vst [vmem:[%s16462_s2 + $0x1a00] sm:$0xff] %v5354_v6  ;;  %v804_v9 = vpop.permute.xlu1 %803  ;;  %8880 = vmatmul.mubr.msk.f32.gmra.mxu1 %vm3016_vm1, %v10171_v37  ;;  %8038 = vmatmul.mubr.msk.f32.gmra.mxu0 %vm3016_vm1, %v12548_v28 }
 0x338   :  { %v1607_v46 = vsub.f32 %v11981_v48, %v804_v9  ;;  %2603 = vrot.lane.b32.xlu0 %v1906_v54, %s9335_s23  ;;  %v4008_v51 = vpop.f32.mrf.mxu0  ;;  %8882 = vmatprep.mubr.msk.f32.mxu1 %vm3016_vm1, %v10199_v58  ;;  %v12570_v48 = vld [vmem:[%s16460_s0 + $0x3f0] sm:$0xff] }
 0x339   :  { %7213 = vst [vmem:[%s16462_s2 + $0x4f8] sm:$0xff] %v4008_v51  ;;  %861 = vrot.lane.b32.xlu1 %v12546_v49, %s9333_s13  ;;  %4162 = vmatprep.mubr.f32.mxu0 %v16685_v59 }
 0x33a   :  { %v1907_v37 = vmul.f32 0.1, %v1607_v46  ;;  %v4010_v14 = vpop.f32.mrf.mxu0 }
 0x33b   :  { %7214 = vst [vmem:[%s16462_s2 + $0x500] sm:$0xff] %v4010_v14  ;;  %v806_v58 = vpop.permute.xlu1 %805  ;;  %8883 = vmatmul.mubr.msk.f32.gmra.mxu1 %vm3016_vm1, %v10227_v35  ;;  %v12589_v35 = vld [vmem:[%s16460_s0 + $0x3f8] sm:$0xff] }
 0x33c   :  { %v1608_v24 = vsub.f32 %v12000_v1, %v806_v58  ;;  %2605 = vrot.lane.b32.xlu0 %v1907_v37, %s9335_s23  ;;  %v5358_v30 = vpop.f32.mrf.mxu1  ;;  %8885 = vmatprep.mubr.msk.f32.mxu1 %vm3016_vm1, %v10255_v12 }
 0x33d   :  { %7888 = vst [vmem:[%s16462_s2 + $0x1a10] sm:$0xff] %v5358_v30  ;;  %863 = vrot.lane.b32.xlu1 %v12570_v48, %s9333_s13  ;;  %v16712_v30 = vld [vmem:[#allocation24_spill] sm:$0xff] }
 0x33e   :  { %v1908_v26 = vmul.f32 0.1, %v1608_v24  ;;  %v5360_v11 = vpop.f32.mrf.mxu1  ;;  %v12591_v1 = vpop.permute.xlu0 %2571 }
 0x33f   :  { %7889 = vst [vmem:[%s16462_s2 + $0x1a18] sm:$0xff] %v5360_v11  ;;  %v808_v12 = vpop.permute.xlu1 %807  ;;  %8886 = vmatmul.mubr.msk.f32.gmra.mxu1 %vm3016_vm1, %v10283_v52  ;;  %8039 = vmatmul.mubr.msk.f32.gmra.mxu0 %vm3016_vm1, %v12591_v1 }
 0x340   :  { %v1609_v20 = vsub.f32 %v12019_v36, %v808_v12  ;;  %2607 = vrot.lane.b32.xlu0 %v1908_v26, %s9335_s23  ;;  %v4014_v53 = vpop.f32.mrf.mxu0  ;;  %8888 = vmatprep.mubr.msk.f32.mxu1 %vm3016_vm1, %v10311_v62  ;;  %v12613_v36 = vld [vmem:[%s16460_s0 + $0x400] sm:$0xff] }
 0x341   :  { %7216 = vst [vmem:[%s16462_s2 + $0x510] sm:$0xff] %v4014_v53  ;;  %865 = vrot.lane.b32.xlu1 %v12589_v35, %s9333_s13  ;;  %4168 = vmatprep.mubr.f32.mxu0 %v16685_v59 }
 0x342   :  { %v1909_v52 = vmul.f32 0.1, %v1609_v20  ;;  %v4016_v31 = vpop.f32.mrf.mxu0  ;;  %v16713_v20 = vld [vmem:[#allocation26_spill] sm:$0xff] }
 0x343   :  { %7217 = vst [vmem:[%s16462_s2 + $0x518] sm:$0xff] %v4016_v31  ;;  %v810_v62 = vpop.permute.xlu1 %809  ;;  %8889 = vmatmul.mubr.msk.f32.gmra.mxu1 %vm3016_vm1, %v10339_v27  ;;  %v12632_v27 = vld [vmem:[%s16460_s0 + $0x408] sm:$0xff]  ;;  %v16714_v31 = vld [vmem:[#allocation28_spill] sm:$0xff] }
 0x344   :  { %v1610_v54 = vsub.f32 %v12038_v25, %v810_v62  ;;  %2609 = vrot.lane.b32.xlu0 %v1909_v52, %s9335_s23  ;;  %v5364_v6 = vpop.f32.mrf.mxu1  ;;  %8891 = vmatprep.mubr.msk.f32.mxu1 %vm3016_vm1, %v10367_v50 }
 0x345   :  { %7891 = vst [vmem:[%s16462_s2 + $0x1a28] sm:$0xff] %v5364_v6  ;;  %867 = vrot.lane.b32.xlu1 %v12613_v36, %s9333_s13 }
 0x346   :  { %v1910_v9 = vmul.f32 0.1, %v1610_v54  ;;  %v5366_v46 = vpop.f32.mrf.mxu1  ;;  %v12634_v25 = vpop.permute.xlu0 %2573 }
 0x347   :  { %7892 = vst [vmem:[%s16462_s2 + $0x1a30] sm:$0xff] %v5366_v46  ;;  %v812_v50 = vpop.permute.xlu1 %811  ;;  %8892 = vmatmul.mubr.msk.f32.gmra.mxu1 %vm3016_vm1, %v10395_v13  ;;  %8040 = vmatmul.mubr.msk.f32.gmra.mxu0 %vm3016_vm1, %v12634_v25 }
 0x348   :  { %v1611_v51 = vsub.f32 %v12057_v22, %v812_v50  ;;  %2611 = vrot.lane.b32.xlu0 %v1910_v9, %s9335_s23  ;;  %v4020_v37 = vpop.f32.mrf.mxu0  ;;  %8894 = vmatprep.mubr.msk.f32.mxu1 %vm3016_vm1, %v10423_v32  ;;  %v12656_v22 = vld [vmem:[%s16460_s0 + $0x410] sm:$0xff]  ;;  %v16715_v9 = vld [vmem:[#allocation30_spill] sm:$0xff] }
 0x349   :  { %7219 = vst [vmem:[%s16462_s2 + $0x528] sm:$0xff] %v4020_v37  ;;  %869 = vrot.lane.b32.xlu1 %v12632_v27, %s9333_s13  ;;  %4174 = vmatprep.mubr.f32.mxu0 %v16685_v59 }
 0x34a   :  { %v1911_v13 = vmul.f32 0.1, %v1611_v51  ;;  %v4022_v14 = vpop.f32.mrf.mxu0  ;;  %v16716_v51 = vld [vmem:[#allocation32_spill] sm:$0xff] }
 0x34b   :  { %7220 = vst [vmem:[%s16462_s2 + $0x530] sm:$0xff] %v4022_v14  ;;  %v814_v32 = vpop.permute.xlu1 %813  ;;  %8895 = vmatmul.mubr.msk.f32.gmra.mxu1 %vm3016_vm1, %v10451_v10  ;;  %v12675_v10 = vld [vmem:[%s16460_s0 + $0x418] sm:$0xff]  ;;  %v12718_v14 = vld [vmem:[%s16460_s0 + $0x428] sm:$0xff] }
 0x34c   :  { %v1612_v58 = vsub.f32 %v12076_v44, %v814_v32  ;;  %2613 = vrot.lane.b32.xlu0 %v1911_v13, %s9335_s23  ;;  %v5370_v24 = vpop.f32.mrf.mxu1  ;;  %8897 = vmatprep.mubr.msk.f32.mxu1 %vm3016_vm1, %v16712_v30 }
 0x34d   :  { %7894 = vst [vmem:[%s16462_s2 + $0x1a40] sm:$0xff] %v5370_v24  ;;  %871 = vrot.lane.b32.xlu1 %v12656_v22, %s9333_s13 }
 0x34e   :  { %v1912_v26 = vmul.f32 0.1, %v1612_v58  ;;  %v5372_v11 = vpop.f32.mrf.mxu1  ;;  %v12677_v44 = vpop.permute.xlu0 %2575  ;;  %v16717_v58 = vld [vmem:[#allocation34_spill] sm:$0xff] }
 0x34f   :  { %7895 = vst [vmem:[%s16462_s2 + $0x1a48] sm:$0xff] %v5372_v11  ;;  %v816_v12 = vpop.permute.xlu1 %815  ;;  %8898 = vmatmul.mubr.msk.f32.gmra.mxu1 %vm3016_vm1, %v16713_v20  ;;  %8041 = vmatmul.mubr.msk.f32.gmra.mxu0 %vm3016_vm1, %v12677_v44 }
 0x350   :  { %v1613_v53 = vsub.f32 %v12095_v43, %v816_v12  ;;  %2615 = vrot.lane.b32.xlu0 %v1912_v26, %s9335_s23  ;;  %v4026_v52 = vpop.f32.mrf.mxu0  ;;  %8900 = vmatprep.mubr.msk.f32.mxu1 %vm3016_vm1, %v16714_v31  ;;  %v12699_v43 = vld [vmem:[%s16460_s0 + $0x420] sm:$0xff]  ;;  %v16718_v26 = vld [vmem:[#allocation36_spill] sm:$0xff] }
 0x351   :  { %7222 = vst [vmem:[%s16462_s2 + $0x540] sm:$0xff] %v4026_v52  ;;  %873 = vrot.lane.b32.xlu1 %v12675_v10, %s9333_s13  ;;  %4180 = vmatprep.mubr.f32.mxu0 %v16685_v59 }
 0x352   :  { %v1913_v62 = vmul.f32 0.1, %v1613_v53  ;;  %v4028_v54 = vpop.f32.mrf.mxu0  ;;  %v16719_v53 = vld [vmem:[#allocation38_spill] sm:$0xff] }
 0x353   :  { %7223 = vst [vmem:[%s16462_s2 + $0x548] sm:$0xff] %v4028_v54  ;;  %v818_v6 = vpop.permute.xlu1 %817  ;;  %8901 = vmatmul.mubr.msk.f32.gmra.mxu1 %vm3016_vm1, %v16715_v9  ;;  %v12761_v9 = vld [vmem:[%s16460_s0 + $0x438] sm:$0xff] }
 0x354   :  { %v1614_v46 = vsub.f32 %v12114_v39, %v818_v6  ;;  %2617 = vrot.lane.b32.xlu0 %v1913_v62, %s9335_s23  ;;  %v5376_v50 = vpop.f32.mrf.mxu1  ;;  %8903 = vmatprep.mubr.msk.f32.mxu1 %vm3016_vm1, %v16716_v51  ;;  %v16720_v62 = vld [vmem:[#allocation40_spill] sm:$0xff] }
 0x355   :  { %7897 = vst [vmem:[%s16462_s2 + $0x1a58] sm:$0xff] %v5376_v50  ;;  %875 = vrot.lane.b32.xlu1 %v12699_v43, %s9333_s13 }
 0x356   :  { %v1914_v37 = vmul.f32 0.1, %v1614_v46  ;;  %v5378_v13 = vpop.f32.mrf.mxu1  ;;  %v12720_v39 = vpop.permute.xlu0 %2577 }
 0x357   :  { %7898 = vst [vmem:[%s16462_s2 + $0x1a60] sm:$0xff] %v5378_v13  ;;  %v820_v32 = vpop.permute.xlu1 %819  ;;  %8904 = vmatmul.mubr.msk.f32.gmra.mxu1 %vm3016_vm1, %v16717_v58  ;;  %8042 = vmatmul.mubr.msk.f32.gmra.mxu0 %vm3016_vm1, %v12720_v39  ;;  %v16722_v58 = vld [vmem:[#allocation45_spill] sm:$0xff] }
 0x358   :  { %v1615_v24 = vsub.f32 %v12133_v42, %v820_v32  ;;  %2619 = vrot.lane.b32.xlu0 %v1914_v37, %s9335_s23  ;;  %v4032_v30 = vpop.f32.mrf.mxu0  ;;  %8906 = vmatprep.mubr.msk.f32.mxu1 %vm3016_vm1, %v16718_v26  ;;  %v12742_v42 = vld [vmem:[%s16460_s0 + $0x430] sm:$0xff]  ;;  %v16721_v37 = vld [vmem:[#allocation43_spill] sm:$0xff] }
 0x359   :  { %7225 = vst [vmem:[%s16462_s2 + $0x558] sm:$0xff] %v4032_v30  ;;  %877 = vrot.lane.b32.xlu1 %v12718_v14, %s9333_s13  ;;  %4186 = vmatprep.mubr.f32.mxu0 %v16685_v59  ;;  %v16723_v26 = vld [vmem:[#allocation47_spill] sm:$0xff] }
 0x35a   :  { %v1915_v11 = vmul.f32 0.1, %v1615_v24  ;;  %v4034_v12 = vpop.f32.mrf.mxu0 }
 0x35b   :  { %7226 = vst [vmem:[%s16462_s2 + $0x560] sm:$0xff] %v4034_v12  ;;  %v822_v20 = vpop.permute.xlu1 %821  ;;  %8907 = vmatmul.mubr.msk.f32.gmra.mxu1 %vm3016_vm1, %v16719_v53 }
 0x35c   :  { %v1616_v52 = vsub.f32 %v12152_v40, %v822_v20  ;;  %2621 = vrot.lane.b32.xlu0 %v1915_v11, %s9335_s23  ;;  %v5382_v31 = vpop.f32.mrf.mxu1  ;;  %8909 = vmatprep.mubr.msk.f32.mxu1 %vm3016_vm1, %v16720_v62 }
 0x35d   :  { %7900 = vst [vmem:[%s16462_s2 + $0x1a70] sm:$0xff] %v5382_v31  ;;  %879 = vrot.lane.b32.xlu1 %v12742_v42, %s9333_s13 }
 0x35e   :  { %v1916_v54 = vmul.f32 0.1, %v1616_v52  ;;  %v5384_v6 = vpop.f32.mrf.mxu1  ;;  %v12763_v40 = vpop.permute.xlu0 %2579  ;;  %v16724_v52 = vld [vmem:[#allocation49_spill] sm:$0xff] }
 0x35f   :  { %7901 = vst [vmem:[%s16462_s2 + $0x1a78] sm:$0xff] %v5384_v6  ;;  %v824_v46 = vpop.permute.xlu1 %823  ;;  %8910 = vmatmul.mubr.msk.f32.gmra.mxu1 %vm3016_vm1, %v10809_v23  ;;  %8043 = vmatmul.mubr.msk.f32.gmra.mxu0 %vm3016_vm1, %v12763_v40 }
 0x360   :  { %v1617_v50 = vsub.f32 %v12171_v2, %v824_v46  ;;  %2623 = vrot.lane.b32.xlu0 %v1916_v54, %s9335_s23  ;;  %v4038_v51 = vpop.f32.mrf.mxu0  ;;  %8912 = vmatprep.mubr.msk.f32.mxu1 %vm3016_vm1, %v16721_v37  ;;  %v12785_v2 = vld [vmem:[%s16460_s0 + $0x440] sm:$0xff]  ;;  %v16725_v54 = vld [vmem:[#allocation51_spill] sm:$0xff] }
 0x361   :  { %7228 = vst [vmem:[%s16462_s2 + $0x570] sm:$0xff] %v4038_v51  ;;  %881 = vrot.lane.b32.xlu1 %v12761_v9, %s9333_s13  ;;  %4192 = vmatprep.mubr.f32.mxu0 %v16685_v59  ;;  %v16726_v51 = vld [vmem:[#allocation53_spill] sm:$0xff] }
 0x362   :  { %v1917_v23 = vmul.f32 0.1, %v1617_v50  ;;  %v4040_v13 = vpop.f32.mrf.mxu0 }
 0x363   :  { %7229 = vst [vmem:[%s16462_s2 + $0x578] sm:$0xff] %v4040_v13  ;;  %v826_v32 = vpop.permute.xlu1 %825  ;;  %8913 = vmatmul.mubr.msk.f32.gmra.mxu1 %vm3016_vm1, %v16722_v58  ;;  %v16727_v13 = vld [vmem:[#allocation55_spill] sm:$0xff] }
 0x364   :  { %v1618_v24 = vsub.f32 %v12190_v57, %v826_v32  ;;  %2625 = vrot.lane.b32.xlu0 %v1917_v23, %s9335_s23  ;;  %v5388_v30 = vpop.f32.mrf.mxu1  ;;  %8915 = vmatprep.mubr.msk.f32.mxu1 %vm3016_vm1, %v16723_v26  ;;  %v12806_v57 = vld [vmem:[%s16460_s0 + $0x448] sm:$0xff]  ;;  %v16728_v26 = vld [vmem:[#allocation57_spill] sm:$0xff] }
 0x365   :  { %7903 = vst [vmem:[%s16462_s2 + $0x1a88] sm:$0xff] %v5388_v30  ;;  %883 = vrot.lane.b32.xlu1 %v12785_v2, %s9333_s13 }
 0x366   :  { %v1918_v11 = vmul.f32 0.1, %v1618_v24  ;;  %v5390_v12 = vpop.f32.mrf.mxu1  ;;  %v12801_v20 = vpop.permute.xlu0 %2581 }
 0x367   :  { %7904 = vst [vmem:[%s16462_s2 + $0x1a90] sm:$0xff] %v5390_v12  ;;  %v828_v53 = vpop.permute.xlu1 %827  ;;  %8916 = vmatmul.mubr.msk.f32.gmra.mxu1 %vm3016_vm1, %v16724_v52  ;;  %8044 = vmatmul.mubr.msk.f32.gmra.mxu0 %vm3016_vm1, %v12801_v20  ;;  %v16729_v52 = vld [vmem:[#allocation59_spill] sm:$0xff] }
 0x368   :  { %v1619_v31 = vsub.f32 %v12209_v38, %v828_v53  ;;  %2627 = vrot.lane.b32.xlu0 %v1918_v11, %s9335_s23  ;;  %v4044_v62 = vpop.f32.mrf.mxu0  ;;  %8918 = vmatprep.mubr.msk.f32.mxu1 %vm3016_vm1, %v16725_v54  ;;  %v12828_v38 = vld [vmem:[%s16460_s0 + $0x450] sm:$0xff]  ;;  %v12874_v54 = vld [vmem:[%s16460_s0 + $0x460] sm:$0xff] }
 0x369   :  { %7231 = vst [vmem:[%s16462_s2 + $0x588] sm:$0xff] %v4044_v62  ;;  %885 = vrot.lane.b32.xlu1 %v12806_v57, %s9333_s13  ;;  %4198 = vmatprep.mubr.f32.mxu0 %v16685_v59 }
 0x36a   :  { %v1919_v6 = vmul.f32 0.1, %v1619_v31  ;;  %v4046_v46 = vpop.f32.mrf.mxu0 }
 0x36b   :  { %v830_v50 = vpop.permute.xlu1 %829  ;;  %7232 = vst [vmem:[%s16462_s2 + $0x590] sm:$0xff] %v4046_v46  ;;  %8919 = vmatmul.mubr.msk.f32.gmra.mxu1 %vm3016_vm1, %v16726_v51  ;;  %v16730_v46 = vld [vmem:[#allocation61_spill] sm:$0xff] }
 0x36c   :  { %v1620_v37 = vsub.f32 %v12228_v18, %v830_v50  ;;  %2629 = vrot.lane.b32.xlu0 %v1919_v6, %s9335_s23  ;;  %v5394_v23 = vpop.f32.mrf.mxu1  ;;  %8921 = vmatprep.mubr.msk.f32.mxu1 %vm3016_vm1, %v16727_v13  ;;  %v12849_v18 = vld [vmem:[%s16460_s0 + $0x458] sm:$0xff] }
 0x36d   :  { %7906 = vst [vmem:[%s16462_s2 + $0x1aa0] sm:$0xff] %v5394_v23  ;;  %887 = vrot.lane.b32.xlu1 %v12828_v38, %s9333_s13 }
 0x36e   :  { %v1920_v32 = vmul.f32 0.1, %v1620_v37  ;;  %v5396_v58 = vpop.f32.mrf.mxu1  ;;  %v12844_v24 = vpop.permute.xlu0 %2583  ;;  %v16731_v37 = vld [vmem:[#allocation63_spill] sm:$0xff] }
 0x36f   :  { %7907 = vst [vmem:[%s16462_s2 + $0x1aa8] sm:$0xff] %v5396_v58  ;;  %v832_v30 = vpop.permute.xlu1 %831  ;;  %8922 = vmatmul.mubr.msk.f32.gmra.mxu1 %vm3016_vm1, %v16728_v26  ;;  %8045 = vmatmul.mubr.msk.f32.gmra.mxu0 %vm3016_vm1, %v12844_v24 }
 0x370   :  { %v1621_v11 = vsub.f32 %v12247_v60, %v832_v30  ;;  %2631 = vrot.lane.b32.xlu0 %v1920_v32, %s9335_s23  ;;  %v4050_v12 = vpop.f32.mrf.mxu0  ;;  %v5400_v53 = vpop.f32.mrf.mxu1  ;;  %8924 = vmatprep.mubr.msk.f32.mxu1 %vm3016_vm1, %v16729_v52  ;;  %v16732_v30 = vld [vmem:[#allocation65_spill] sm:$0xff] }
 0x371   :  { %7234 = vst [vmem:[%s16462_s2 + $0x5a0] sm:$0xff] %v4050_v12  ;;  %7909 = vst [vmem:[%s16462_s2 + $0x1ab8] sm:$0xff] %v5400_v53  ;;  %4204 = vmatprep.mubr.f32.mxu0 %v16685_v59  ;;  %889 = vrot.lane.b32.xlu1 %v12849_v18, %s9333_s13  ;;  %v16733_v12 = vld [vmem:[#allocation67_spill] sm:$0xff] }
 0x372   :  { %v1921_v60 = vmul.f32 0.1, %v1621_v11  ;;  %v4052_v31 = vpop.f32.mrf.mxu0  ;;  %v5402_v62 = vpop.f32.mrf.mxu1 }
 0x373   :  { %v834_v6 = vpop.permute.xlu1 %833  ;;  %7235 = vst [vmem:[%s16462_s2 + $0x5a8] sm:$0xff] %v4052_v31  ;;  %7910 = vst [vmem:[%s16462_s2 + $0x1ac0] sm:$0xff] %v5402_v62  ;;  %8925 = vmatmul.mubr.msk.f32.gmra.mxu1 %vm3016_vm1, %v16730_v46 }
 0x374   :  { %v1622_v50 = vsub.f32 %v12266_v0, %v834_v6  ;;  %2633 = vrot.lane.b32.xlu0 %v1921_v60, %s9335_s23  ;;  %v4056_v51 = vpop.f32.mrf.mxu0  ;;  %8927 = vmatprep.mubr.msk.f32.mxu1 %vm3016_vm1, %v16731_v37  ;;  %v12898_v0 = vld [vmem:[%s16460_s0 + $0x468] sm:$0xff] }
 0x375   :  { %7237 = vst [vmem:[%s16462_s2 + $0x5b8] sm:$0xff] %v4056_v51  ;;  %891 = vrot.lane.b32.xlu1 %v12874_v54, %s9333_s13 }
 0x376   :  { %v1922_v23 = vmul.f32 0.1, %v1622_v50  ;;  %v4058_v13 = vpop.f32.mrf.mxu0  ;;  %v12893_v32 = vpop.permute.xlu0 %2585 }
 0x377   :  { %v836_v58 = vpop.permute.xlu1 %835  ;;  %7238 = vst [vmem:[%s16462_s2 + $0x5c0] sm:$0xff] %v4058_v13  ;;  %8928 = vmatmul.mubr.msk.f32.gmra.mxu1 %vm3016_vm1, %v16732_v30  ;;  %8046 = vmatmul.mubr.msk.f32.gmra.mxu0 %vm3016_vm1, %v12893_v32  ;;  %v16735_v30 = vld [vmem:[#allocation75_spill] sm:$0xff] }
 0x378   :  { %v1623_v26 = vsub.f32 %v12285_v15, %v836_v58  ;;  %2635 = vrot.lane.b32.xlu0 %v1922_v23, %s9335_s23  ;;  %v5406_v11 = vpop.f32.mrf.mxu1  ;;  %8930 = vmatprep.mubr.msk.f32.mxu1 %vm3016_vm1, %v16733_v12  ;;  %v12920_v15 = vld [vmem:[%s16460_s0 + $0x470] sm:$0xff]  ;;  %v16734_v58 = vld [vmem:[#allocation73_spill] sm:$0xff] }
 0x379   :  { %7912 = vst [vmem:[%s16462_s2 + $0x1ad0] sm:$0xff] %v5406_v11  ;;  %4210 = vmatprep.mubr.f32.mxu0 %v16685_v59  ;;  %893 = vrot.lane.b32.xlu1 %v12898_v0, %s9333_s13 }
 0x37a   :  { %v1923_v53 = vmul.f32 0.1, %v1623_v26  ;;  %v5408_v52 = vpop.f32.mrf.mxu1 }
 0x37b   :  { %v838_v60 = vpop.permute.xlu1 %837  ;;  %7913 = vst [vmem:[%s16462_s2 + $0x1ad8] sm:$0xff] %v5408_v52  ;;  %8931 = vmatmul.mubr.msk.f32.gmra.mxu1 %vm3016_vm1, %v11375_v45  ;;  %v12941_v45 = vld [vmem:[%s16460_s0 + $0x478] sm:$0xff] }
 0x37c   :  { %v1624_v31 = vsub.f32 %v12304_v63, %v838_v60  ;;  %2637 = vrot.lane.b32.xlu0 %v1923_v53, %s9335_s23  ;;  %v4062_v62 = vpop.f32.mrf.mxu0  ;;  %8933 = vmatprep.mubr.msk.f32.mxu1 %vm3016_vm1, %v11409_v56  ;;  %v16736_v60 = vld [vmem:[#allocation77_spill] sm:$0xff] }
 0x37d   :  { %7240 = vst [vmem:[%s16462_s2 + $0x5d0] sm:$0xff] %v4062_v62  ;;  %895 = vrot.lane.b32.xlu1 %v12920_v15, %s9333_s13 }
 0x37e   :  { %v1924_v6 = vmul.f32 0.1, %v1624_v31  ;;  %v4064_v46 = vpop.f32.mrf.mxu0  ;;  %v12936_v50 = vpop.permute.xlu0 %2587  ;;  %v16737_v31 = vld [vmem:[#allocation122_spill] sm:$0xff] }
 0x37f   :  { %v840_v63 = vpop.permute.xlu1 %839  ;;  %7241 = vst [vmem:[%s16462_s2 + $0x5d8] sm:$0xff] %v4064_v46  ;;  %v5412_v56 = vpop.f32.mrf.mxu1  ;;  %8934 = vmatmul.mubr.msk.f32.gmra.mxu1 %vm3016_vm1, %v11444_v5  ;;  %8047 = vmatmul.mubr.msk.f32.gmra.mxu0 %vm3016_vm1, %v12936_v50 }
 0x380   :  { %v1625_v51 = vsub.f32 %v12323_v55, %v840_v63  ;;  %7915 = vst [vmem:[%s16462_s2 + $0x1ae8] sm:$0xff] %v5412_v56  ;;  %2639 = vrot.lane.b32.xlu0 %v1924_v6, %s9335_s23  ;;  %8936 = vmatprep.mubr.msk.f32.mxu1 %vm3016_vm1, %v11477_v21  ;;  %v12966_v55 = vld [vmem:[%s16460_s0 + $0x480] sm:$0xff]  ;;  %v16738_v6 = vld [vmem:[#allocation79_spill] sm:$0xff]  ;;  %v13009_v56 = vld [vmem:[%s16460_s0 + $0x490] sm:$0xff] }
 0x381   :  { %v5414_v37 = vpop.f32.mrf.mxu1  ;;  %4216 = vmatprep.mubr.f32.mxu0 %v16685_v59  ;;  %897 = vrot.lane.b32.xlu1 %v12941_v45, %s9333_s13 }
 0x382   :  { %v1925_v5 = vmul.f32 0.1, %v1625_v51  ;;  %7916 = vst [vmem:[%s16462_s2 + $0x1af0] sm:$0xff] %v5414_v37 }
 0x383   :  { %v842_v23 = vpop.permute.xlu1 %841  ;;  %v4068_v13 = vpop.f32.mrf.mxu0  ;;  %8937 = vmatmul.mubr.msk.f32.gmra.mxu1 %vm3016_vm1, %v16734_v58 }
 0x384   :  { %v1626_v21 = vsub.f32 %v12342_v47, %v842_v23  ;;  %7243 = vst [vmem:[%s16462_s2 + $0x5e8] sm:$0xff] %v4068_v13  ;;  %2641 = vrot.lane.b32.xlu0 %v1925_v5, %s9335_s23  ;;  %8939 = vmatprep.mubr.msk.f32.mxu1 %vm3016_vm1, %v16735_v30  ;;  %v12987_v47 = vld [vmem:[%s16460_s0 + $0x488] sm:$0xff]  ;;  %v16739_v5 = vld [vmem:[#allocation81_spill] sm:$0xff] }
 0x385   :  { %v4070_v26 = vpop.f32.mrf.mxu0  ;;  %899 = vrot.lane.b32.xlu1 %v12966_v55, %s9333_s13  ;;  %v16740_v13 = vld [vmem:[#allocation83_spill] sm:$0xff] }
 0x386   :  { %v1926_v11 = vmul.f32 0.1, %v1626_v21  ;;  %7244 = vst [vmem:[%s16462_s2 + $0x5f0] sm:$0xff] %v4070_v26  ;;  %v12982_v12 = vpop.permute.xlu0 %2589 }
 0x387   :  { %v844_v53 = vpop.permute.xlu1 %843  ;;  %v5418_v52 = vpop.f32.mrf.mxu1  ;;  %8940 = vmatmul.mubr.msk.f32.gmra.mxu1 %vm3016_vm1, %v16736_v60  ;;  %8048 = vmatmul.mubr.msk.f32.gmra.mxu0 %vm3016_vm1, %v12982_v12  ;;  %v16742_v60 = vld [vmem:[#allocation87_spill] sm:$0xff] }
 0x388   :  { %v1627_v62 = vsub.f32 %v16737_v31, %v844_v53  ;;  %7918 = vst [vmem:[%s16462_s2 + $0x1b00] sm:$0xff] %v5418_v52  ;;  %2643 = vrot.lane.b32.xlu0 %v1926_v11, %s9335_s23  ;;  %8942 = vmatprep.mubr.msk.f32.mxu1 %vm3016_vm1, %v16738_v6  ;;  %v16741_v53 = vld [vmem:[#allocation85_spill] sm:$0xff] }
 0x389   :  { %v5420_v46 = vpop.f32.mrf.mxu1  ;;  %4222 = vmatprep.mubr.f32.mxu0 %v16685_v59  ;;  %901 = vrot.lane.b32.xlu1 %v12987_v47, %s9333_s13 }
 0x38a   :  { %v1927_v63 = vmul.f32 0.1, %v1627_v62  ;;  %7919 = vst [vmem:[%s16462_s2 + $0x1b08] sm:$0xff] %v5420_v46 }
 0x38b   :  { %v846_v51 = vpop.permute.xlu1 %845  ;;  %v4074_v37 = vpop.f32.mrf.mxu0  ;;  %8943 = vmatmul.mubr.msk.f32.gmra.mxu1 %vm3016_vm1, %v16739_v5 }
 0x38c   :  { %v1628_v23 = vsub.f32 %v12380_v17, %v846_v51  ;;  %7246 = vst [vmem:[%s16462_s2 + $0x600] sm:$0xff] %v4074_v37  ;;  %2645 = vrot.lane.b32.xlu0 %v1927_v63, %s9335_s23  ;;  %8945 = vmatprep.mubr.msk.f32.mxu1 %vm3016_vm1, %v16740_v13  ;;  %v13030_v17 = vld [vmem:[%s16460_s0 + $0x498] sm:$0xff]  ;;  %v16744_v37 = vld [vmem:[#allocation91_spill] sm:$0xff] }
 0x38d   :  { %v4076_v58 = vpop.f32.mrf.mxu0  ;;  %903 = vrot.lane.b32.xlu1 %v13009_v56, %s9333_s13  ;;  %v16743_v63 = vld [vmem:[#allocation89_spill] sm:$0xff] }
 0x38e   :  { %v1928_v21 = vmul.f32 0.1, %v1628_v23  ;;  %7247 = vst [vmem:[%s16462_s2 + $0x608] sm:$0xff] %v4076_v58  ;;  %v13025_v30 = vpop.permute.xlu0 %2591 }
 0x38f   :  { %v848_v26 = vpop.permute.xlu1 %847  ;;  %v5424_v11 = vpop.f32.mrf.mxu1  ;;  %8946 = vmatmul.mubr.msk.f32.gmra.mxu1 %vm3016_vm1, %v16741_v53  ;;  %8049 = vmatmul.mubr.msk.f32.gmra.mxu0 %vm3016_vm1, %v13025_v30  ;;  %v16746_v53 = vld [vmem:[#allocation95_spill] sm:$0xff] }
 0x390   :  { %v1629_v52 = vsub.f32 %v12399_v4, %v848_v26  ;;  %7921 = vst [vmem:[%s16462_s2 + $0x1b18] sm:$0xff] %v5424_v11  ;;  %2647 = vrot.lane.b32.xlu0 %v1928_v21, %s9335_s23  ;;  %8948 = vmatprep.mubr.msk.f32.mxu1 %vm3016_vm1, %v16742_v60  ;;  %v159_v4 = vld [vmem:[%s16460_s0 + $0x4a0] sm:$0xff]  ;;  %v16745_v26 = vld [vmem:[#allocation93_spill] sm:$0xff] }
 0x391   :  { %v5426_v31 = vpop.f32.mrf.mxu1  ;;  %4228 = vmatprep.mubr.f32.mxu0 %v16685_v59  ;;  %905 = vrot.lane.b32.xlu1 %v13030_v17, %s9333_s13 }
 0x392   :  { %v1929_v62 = vmul.f32 0.1, %v1629_v52  ;;  %7922 = vst [vmem:[%s16462_s2 + $0x1b20] sm:$0xff] %v5426_v31  ;;  %v161_v31 = vld [vmem:[%s16460_s0 + $0x4b0] sm:$0xff] }
 0x393   :  { %v850_v6 = vpop.permute.xlu1 %849  ;;  %v4080_v46 = vpop.f32.mrf.mxu0  ;;  %8949 = vmatmul.mubr.msk.f32.gmra.mxu1 %vm3016_vm1, %v16743_v63  ;;  %v16748_v63 = vld [vmem:[#allocation99_spill] sm:$0xff] }
 0x394   :  { %v1630_v51 = vsub.f32 %v12418_v34, %v850_v6  ;;  %7249 = vst [vmem:[%s16462_s2 + $0x618] sm:$0xff] %v4080_v46  ;;  %2649 = vrot.lane.b32.xlu0 %v1929_v62, %s9335_s23  ;;  %8951 = vmatprep.mubr.msk.f32.mxu1 %vm3016_vm1, %v16744_v37  ;;  %v160_v34 = vld [vmem:[%s16460_s0 + $0x4a8] sm:$0xff]  ;;  %v16747_v6 = vld [vmem:[#allocation97_spill] sm:$0xff] }
 0x395   :  { %v4082_v5 = vpop.f32.mrf.mxu0  ;;  %907 = vrot.lane.b32.xlu1 %v159_v4, %s9333_s13 }
 0x396   :  { %v1930_v23 = vmul.f32 0.1, %v1630_v51  ;;  %7250 = vst [vmem:[%s16462_s2 + $0x620] sm:$0xff] %v4082_v5  ;;  %v13065_v13 = vpop.permute.xlu0 %2593 }
 0x397   :  { %v852_v58 = vpop.permute.xlu1 %851  ;;  %8050 = vmatmul.mubr.msk.f32.gmra.mxu0 %vm3016_vm1, %v13065_v13  ;;  %v5430_v21 = vpop.f32.mrf.mxu1  ;;  %8952 = vmatmul.mubr.msk.f32.gmra.mxu1 %vm3016_vm1, %v16745_v26 }
 0x398   :  { %v1631_v11 = vsub.f32 %v12436_v19, %v852_v58  ;;  %7924 = vst [vmem:[%s16462_s2 + $0x1b30] sm:$0xff] %v5430_v21  ;;  %2651 = vrot.lane.b32.xlu0 %v1930_v23, %s9335_s23  ;;  %8954 = vmatprep.mubr.msk.f32.mxu1 %vm3016_vm1, %v16746_v53  ;;  %v16750_v21 = vld [vmem:[#allocation103_spill] sm:$0xff] }
 0x399   :  { %4234 = vmatprep.mubr.f32.mxu0 %v16685_v59  ;;  %v5432_v52 = vpop.f32.mrf.mxu1  ;;  %909 = vrot.lane.b32.xlu1 %v160_v34, %s9333_s13  ;;  %v16749_v34 = vld [vmem:[#allocation101_spill] sm:$0xff] }
 0x39a   :  { %v1931_v60 = vmul.f32 0.1, %v1631_v11  ;;  %7925 = vst [vmem:[%s16462_s2 + $0x1b38] sm:$0xff] %v5432_v52  ;;  %v13086_v19 = vpop.permute.xlu0 %2595 }
 0x39b   :  { %v854_v62 = vpop.permute.xlu1 %853  ;;  %8051 = vmatmul.mubr.msk.f32.gmra.mxu0 %vm3016_vm1, %v13086_v19  ;;  %v4086_v4 = vpop.f32.mrf.mxu0  ;;  %8955 = vmatmul.mubr.msk.f32.gmra.mxu1 %vm3016_vm1, %v16747_v6 }
 0x39c   :  { %v1632_v46 = vsub.f32 %v12459_v8, %v854_v62  ;;  %7252 = vst [vmem:[%s16462_s2 + $0x630] sm:$0xff] %v4086_v4  ;;  %2653 = vrot.lane.b32.xlu0 %v1931_v60, %s9335_s23  ;;  %8957 = vmatprep.mubr.msk.f32.mxu1 %vm3016_vm1, %v16748_v63  ;;  %v16751_v60 = vld [vmem:[#allocation105_spill] sm:$0xff]  ;;  %v16752_v62 = vld [vmem:[#allocation107_spill] sm:$0xff] }
 0x39d   :  { %v4088_v51 = vpop.f32.mrf.mxu0  ;;  %4240 = vmatprep.mubr.f32.mxu0 %v16685_v59  ;;  %911 = vrot.lane.b32.xlu1 %v161_v31, %s9333_s13 }
 0x39e   :  { %v1932_v37 = vmul.f32 0.1, %v1632_v46  ;;  %7253 = vst [vmem:[%s16462_s2 + $0x638] sm:$0xff] %v4088_v51  ;;  %v13107_v8 = vpop.permute.xlu0 %2597  ;;  %v16753_v51 = vld [vmem:[#allocation109_spill] sm:$0xff] }
 0x39f   :  { %v856_v5 = vpop.permute.xlu1 %855  ;;  %8052 = vmatmul.mubr.msk.f32.gmra.mxu0 %vm3016_vm1, %v13107_v8  ;;  %v5436_v23 = vpop.f32.mrf.mxu1  ;;  %8958 = vmatmul.mubr.msk.f32.gmra.mxu1 %vm3016_vm1, %v16749_v34 }
 0x3a0   :  { %v1633_v58 = vsub.f32 %v12479_v61, %v856_v5  ;;  %7927 = vst [vmem:[%s16462_s2 + $0x1b48] sm:$0xff] %v5436_v23  ;;  %2655 = vrot.lane.b32.xlu0 %v1932_v37, %s9335_s23  ;;  %8960 = vmatprep.mubr.msk.f32.mxu1 %vm3016_vm1, %v16750_v21  ;;  %v16754_v5 = vld [vmem:[#allocation111_spill] sm:$0xff] }
 0x3a1   :  { %4246 = vmatprep.mubr.f32.mxu0 %v16685_v59  ;;  %v5438_v26 = vpop.f32.mrf.mxu1 }
 0x3a2   :  { %v1933_v11 = vmul.f32 0.1, %v1633_v58  ;;  %7928 = vst [vmem:[%s16462_s2 + $0x1b50] sm:$0xff] %v5438_v26  ;;  %v13124_v53 = vpop.permute.xlu0 %2599  ;;  %v16755_v26 = vld [vmem:[#allocation113_spill] sm:$0xff] }
 0x3a3   :  { %v858_v61 = vpop.permute.xlu1 %857  ;;  %8053 = vmatmul.mubr.msk.f32.gmra.mxu0 %vm3016_vm1, %v13124_v53  ;;  %v4092_v52 = vpop.f32.mrf.mxu0  ;;  %8961 = vmatmul.mubr.msk.f32.gmra.mxu1 %vm3016_vm1, %v16751_v60 }
 0x3a4   :  { %v1634_v31 = vsub.f32 %v12503_v3, %v858_v61  ;;  %7255 = vst [vmem:[%s16462_s2 + $0x648] sm:$0xff] %v4092_v52  ;;  %2657 = vrot.lane.b32.xlu0 %v1933_v11, %s9335_s23  ;;  %8963 = vmatprep.mubr.msk.f32.mxu1 %vm3016_vm1, %v16752_v62  ;;  %v16756_v61 = vld [vmem:[#allocation115_spill] sm:$0xff] }
 0x3a5   :  { %v4094_v4 = vpop.f32.mrf.mxu0  ;;  %4252 = vmatprep.mubr.f32.mxu0 %v16685_v59 }
 0x3a6   :  { %v1934_v6 = vmul.f32 0.1, %v1634_v31  ;;  %7256 = vst [vmem:[%s16462_s2 + $0x650] sm:$0xff] %v4094_v4  ;;  %v13141_v46 = vpop.permute.xlu0 %2601  ;;  %v16757_v4 = vld [vmem:[#allocation117_spill] sm:$0xff] }
 0x3a7   :  { %v860_v3 = vpop.permute.xlu1 %859  ;;  %8054 = vmatmul.mubr.msk.f32.gmra.mxu0 %vm3016_vm1, %v13141_v46  ;;  %v5442_v63 = vpop.f32.mrf.mxu1  ;;  %8964 = vmatmul.mubr.msk.f32.gmra.mxu1 %vm3016_vm1, %v16753_v51 }
 0x3a8   :  { %v1635_v37 = vsub.f32 %v12527_v41, %v860_v3  ;;  %7930 = vst [vmem:[%s16462_s2 + $0x1b60] sm:$0xff] %v5442_v63  ;;  %2659 = vrot.lane.b32.xlu0 %v1934_v6, %s9335_s23  ;;  %8966 = vmatprep.mubr.msk.f32.mxu1 %vm3016_vm1, %v16754_v5  ;;  %v16758_v3 = vld [vmem:[#allocation119_spill] sm:$0xff] }
 0x3a9   :  { %4258 = vmatprep.mubr.f32.mxu0 %v16685_v59  ;;  %v5444_v23 = vpop.f32.mrf.mxu1 }
 0x3aa   :  { %v1935_v34 = vmul.f32 0.1, %v1635_v37  ;;  %7931 = vst [vmem:[%s16462_s2 + $0x1b68] sm:$0xff] %v5444_v23  ;;  %v13158_v58 = vpop.permute.xlu0 %2603  ;;  %v16759_v23 = vld [vmem:[#allocation121_spill] sm:$0xff] }
 0x3ab   :  { %v862_v41 = vpop.permute.xlu1 %861  ;;  %8055 = vmatmul.mubr.msk.f32.gmra.mxu0 %vm3016_vm1, %v13158_v58  ;;  %v4098_v21 = vpop.f32.mrf.mxu0  ;;  %8967 = vmatmul.mubr.msk.f32.gmra.mxu1 %vm3016_vm1, %v16755_v26 }
 0x3ac   :  { %v1636_v11 = vsub.f32 %v12546_v49, %v862_v41  ;;  %7258 = vst [vmem:[%s16462_s2 + $0x660] sm:$0xff] %v4098_v21  ;;  %2661 = vrot.lane.b32.xlu0 %v1935_v34, %s9335_s23  ;;  %8969 = vmatprep.mubr.msk.f32.mxu1 %vm3016_vm1, %v16756_v61  ;;  %v16760_v41 = vld [vmem:[#allocation124_spill] sm:$0xff] }
 0x3ad   :  { %v4100_v52 = vpop.f32.mrf.mxu0  ;;  %4264 = vmatprep.mubr.f32.mxu0 %v16685_v59 }
 0x3ae   :  { %v1936_v60 = vmul.f32 0.1, %v1636_v11  ;;  %7259 = vst [vmem:[%s16462_s2 + $0x668] sm:$0xff] %v4100_v52  ;;  %v13175_v31 = vpop.permute.xlu0 %2605 }
 0x3af   :  { %v864_v49 = vpop.permute.xlu1 %863  ;;  %8056 = vmatmul.mubr.msk.f32.gmra.mxu0 %vm3016_vm1, %v13175_v31  ;;  %v5448_v62 = vpop.f32.mrf.mxu1  ;;  %8970 = vmatmul.mubr.msk.f32.gmra.mxu1 %vm3016_vm1, %v16757_v4 }
 0x3b0   :  { %v1637_v6 = vsub.f32 %v12570_v48, %v864_v49  ;;  %7933 = vst [vmem:[%s16462_s2 + $0x1b78] sm:$0xff] %v5448_v62  ;;  %2663 = vrot.lane.b32.xlu0 %v1936_v60, %s9335_s23  ;;  %8972 = vmatprep.mubr.msk.f32.mxu1 %vm3016_vm1, %v16758_v3 }
 0x3b1   :  { %4270 = vmatprep.mubr.f32.mxu0 %v16685_v59  ;;  %v5450_v63 = vpop.f32.mrf.mxu1 }
 0x3b2   :  { %v1937_v51 = vmul.f32 0.1, %v1637_v6  ;;  %7934 = vst [vmem:[%s16462_s2 + $0x1b80] sm:$0xff] %v5450_v63  ;;  %v13192_v37 = vpop.permute.xlu0 %2607 }
 0x3b3   :  { %v866_v48 = vpop.permute.xlu1 %865  ;;  %8057 = vmatmul.mubr.msk.f32.gmra.mxu0 %vm3016_vm1, %v13192_v37  ;;  %v4104_v5 = vpop.f32.mrf.mxu0  ;;  %8973 = vmatmul.mubr.msk.f32.gmra.mxu1 %vm3016_vm1, %v16759_v23 }
 0x3b4   :  { %v1638_v34 = vsub.f32 %v12589_v35, %v866_v48  ;;  %7261 = vst [vmem:[%s16462_s2 + $0x678] sm:$0xff] %v4104_v5  ;;  %2665 = vrot.lane.b32.xlu0 %v1937_v51, %s9335_s23  ;;  %8975 = vmatprep.mubr.msk.f32.mxu1 %vm3016_vm1, %v16760_v41 }
 0x3b5   :  { %v4106_v21 = vpop.f32.mrf.mxu0  ;;  %4276 = vmatprep.mubr.f32.mxu0 %v16685_v59 }
 0x3b6   :  { %v1938_v26 = vmul.f32 0.1, %v1638_v34  ;;  %7262 = vst [vmem:[%s16462_s2 + $0x680] sm:$0xff] %v4106_v21  ;;  %v13209_v11 = vpop.permute.xlu0 %2609 }
 0x3b7   :  { %v868_v35 = vpop.permute.xlu1 %867  ;;  %8058 = vmatmul.mubr.msk.f32.gmra.mxu0 %vm3016_vm1, %v13209_v11  ;;  %v5454_v61 = vpop.f32.mrf.mxu1  ;;  %8976 = vmatmul.mubr.msk.f32.gmra.mxu1 %vm3016_vm1, %v12447_v33 }
 0x3b8   :  { %v1639_v52 = vsub.f32 %v12613_v36, %v868_v35  ;;  %7936 = vst [vmem:[%s16462_s2 + $0x1b90] sm:$0xff] %v5454_v61  ;;  %2667 = vrot.lane.b32.xlu0 %v1938_v26, %s9335_s23  ;;  %8978 = vmatprep.mubr.msk.f32.mxu1 %vm3016_vm1, %v12481_v16 }
 0x3b9   :  { %4282 = vmatprep.mubr.f32.mxu0 %v16685_v59  ;;  %v5456_v60 = vpop.f32.mrf.mxu1 }
 0x3ba   :  { %v1939_v49 = vmul.f32 0.1, %v1639_v52  ;;  %7937 = vst [vmem:[%s16462_s2 + $0x1b98] sm:$0xff] %v5456_v60  ;;  %v13226_v33 = vpop.permute.xlu0 %2611 }
 0x3bb   :  { %v870_v36 = vpop.permute.xlu1 %869  ;;  %8059 = vmatmul.mubr.msk.f32.gmra.mxu0 %vm3016_vm1, %v13226_v33  ;;  %v4110_v62 = vpop.f32.mrf.mxu0  ;;  %8979 = vmatmul.mubr.msk.f32.gmra.mxu1 %vm3016_vm1, %v12505_v29 }
 0x3bc   :  { %v1640_v16 = vsub.f32 %v12632_v27, %v870_v36  ;;  %7264 = vst [vmem:[%s16462_s2 + $0x690] sm:$0xff] %v4110_v62  ;;  %2669 = vrot.lane.b32.xlu0 %v1939_v49, %s9335_s23  ;;  %8981 = vmatprep.mubr.msk.f32.mxu1 %vm3016_vm1, %v12548_v28 }
 0x3bd   :  { %v4112_v4 = vpop.f32.mrf.mxu0  ;;  %4288 = vmatprep.mubr.f32.mxu0 %v16685_v59 }
 0x3be   :  { %v1940_v6 = vmul.f32 0.1, %v1640_v16  ;;  %7265 = vst [vmem:[%s16462_s2 + $0x698] sm:$0xff] %v4112_v4  ;;  %v13243_v29 = vpop.permute.xlu0 %2613  ;;  %v13345_v16 = vld [vmem:[%s16460_s0 + $0x4b8] sm:$0xff] }
 0x3bf   :  { %v872_v27 = vpop.permute.xlu1 %871  ;;  %8060 = vmatmul.mubr.msk.f32.gmra.mxu0 %vm3016_vm1, %v13243_v29  ;;  %v5460_v3 = vpop.f32.mrf.mxu1  ;;  %8982 = vmatmul.mubr.msk.f32.gmra.mxu1 %vm3016_vm1, %v12591_v1 }
 0x3c0   :  { %v1641_v28 = vsub.f32 %v12656_v22, %v872_v27  ;;  %7939 = vst [vmem:[%s16462_s2 + $0x1ba8] sm:$0xff] %v5460_v3  ;;  %2671 = vrot.lane.b32.xlu0 %v1940_v6, %s9335_s23  ;;  %8984 = vmatprep.mubr.msk.f32.mxu1 %vm3016_vm1, %v12634_v25 }
 0x3c1   :  { %4294 = vmatprep.mubr.f32.mxu0 %v16685_v59  ;;  %v5462_v63 = vpop.f32.mrf.mxu1 }
 0x3c2   :  { %v1941_v51 = vmul.f32 0.1, %v1641_v28  ;;  %7940 = vst [vmem:[%s16462_s2 + $0x1bb0] sm:$0xff] %v5462_v63  ;;  %v13260_v1 = vpop.permute.xlu0 %2615 }
 0x3c3   :  { %v874_v22 = vpop.permute.xlu1 %873  ;;  %8061 = vmatmul.mubr.msk.f32.gmra.mxu0 %vm3016_vm1, %v13260_v1  ;;  %v4116_v48 = vpop.f32.mrf.mxu0  ;;  %8985 = vmatmul.mubr.msk.f32.gmra.mxu1 %vm3016_vm1, %v12677_v44 }
 0x3c4   :  { %v1642_v25 = vsub.f32 %v12675_v10, %v874_v22  ;;  %7267 = vst [vmem:[%s16462_s2 + $0x6a8] sm:$0xff] %v4116_v48  ;;  %2673 = vrot.lane.b32.xlu0 %v1941_v51, %s9335_s23  ;;  %8987 = vmatprep.mubr.msk.f32.mxu1 %vm3016_vm1, %v12720_v39  ;;  %v13404_v48 = vld [vmem:[%s16460_s0 + $0x4d0] sm:$0xff] }
 0x3c5   :  { %v4118_v5 = vpop.f32.mrf.mxu0  ;;  %4300 = vmatprep.mubr.f32.mxu0 %v16685_v59 }
 0x3c6   :  { %v1942_v23 = vmul.f32 0.1, %v1642_v25  ;;  %7268 = vst [vmem:[%s16462_s2 + $0x6b0] sm:$0xff] %v4118_v5  ;;  %v13277_v44 = vpop.permute.xlu0 %2617  ;;  %v13427_v5 = vld [vmem:[%s16460_s0 + $0x4d8] sm:$0xff] }
 0x3c7   :  { %v876_v10 = vpop.permute.xlu1 %875  ;;  %8062 = vmatmul.mubr.msk.f32.gmra.mxu0 %vm3016_vm1, %v13277_v44  ;;  %v5466_v34 = vpop.f32.mrf.mxu1  ;;  %8988 = vmatmul.mubr.msk.f32.gmra.mxu1 %vm3016_vm1, %v12763_v40 }
 0x3c8   :  { %v1643_v39 = vsub.f32 %v12699_v43, %v876_v10  ;;  %7942 = vst [vmem:[%s16462_s2 + $0x1bc0] sm:$0xff] %v5466_v34  ;;  %2675 = vrot.lane.b32.xlu0 %v1942_v23, %s9335_s23  ;;  %8990 = vmatprep.mubr.msk.f32.mxu1 %vm3016_vm1, %v12801_v20 }
 0x3c9   :  { %4306 = vmatprep.mubr.f32.mxu0 %v16685_v59  ;;  %v5468_v41 = vpop.f32.mrf.mxu1 }
 0x3ca   :  { %v1943_v21 = vmul.f32 0.1, %v1643_v39  ;;  %7943 = vst [vmem:[%s16462_s2 + $0x1bc8] sm:$0xff] %v5468_v41  ;;  %v13294_v40 = vpop.permute.xlu0 %2619  ;;  %v13456_v41 = vld [vmem:[%s16460_s0 + $0x4e8] sm:$0xff] }
 0x3cb   :  { %v878_v43 = vpop.permute.xlu1 %877  ;;  %8063 = vmatmul.mubr.msk.f32.gmra.mxu0 %vm3016_vm1, %v13294_v40  ;;  %v4122_v26 = vpop.f32.mrf.mxu0  ;;  %8991 = vmatmul.mubr.msk.f32.gmra.mxu1 %vm3016_vm1, %v12844_v24 }
 0x3cc   :  { %v1644_v20 = vsub.f32 %v12718_v14, %v878_v43  ;;  %7270 = vst [vmem:[%s16462_s2 + $0x6c0] sm:$0xff] %v4122_v26  ;;  %2677 = vrot.lane.b32.xlu0 %v1943_v21, %s9335_s23  ;;  %8993 = vmatprep.mubr.msk.f32.mxu1 %vm3016_vm1, %v12893_v32 }
 0x3cd   :  { %v4124_v35 = vpop.f32.mrf.mxu0  ;;  %4312 = vmatprep.mubr.f32.mxu0 %v16685_v59 }
 0x3ce   :  { %v1944_v61 = vmul.f32 0.1, %v1644_v20  ;;  %7271 = vst [vmem:[%s16462_s2 + $0x6c8] sm:$0xff] %v4124_v35  ;;  %v13311_v24 = vpop.permute.xlu0 %2621  ;;  %v13487_v35 = vld [vmem:[%s16460_s0 + $0x4f0] sm:$0xff] }
 0x3cf   :  { %v880_v14 = vpop.permute.xlu1 %879  ;;  %8064 = vmatmul.mubr.msk.f32.gmra.mxu0 %vm3016_vm1, %v13311_v24  ;;  %v5472_v52 = vpop.f32.mrf.mxu1  ;;  %8994 = vmatmul.mubr.msk.f32.gmra.mxu1 %vm3016_vm1, %v12936_v50 }
 0x3d0   :  { %v1645_v32 = vsub.f32 %v12742_v42, %v880_v14  ;;  %7945 = vst [vmem:[%s16462_s2 + $0x1bd8] sm:$0xff] %v5472_v52  ;;  %2679 = vrot.lane.b32.xlu0 %v1944_v61, %s9335_s23  ;;  %8996 = vmatprep.mubr.msk.f32.mxu1 %vm3016_vm1, %v12982_v12 }
 0x3d1   :  { %4318 = vmatprep.mubr.f32.mxu0 %v16685_v59  ;;  %v5474_v60 = vpop.f32.mrf.mxu1 }
 0x3d2   :  { %v1945_v49 = vmul.f32 0.1, %v1645_v32  ;;  %7946 = vst [vmem:[%s16462_s2 + $0x1be0] sm:$0xff] %v5474_v60  ;;  %v13328_v50 = vpop.permute.xlu0 %2623 }
 0x3d3   :  { %8065 = vmatmul.mubr.msk.f32.gmra.mxu0 %vm3016_vm1, %v13328_v50  ;;  %v4128_v42 = vpop.f32.mrf.mxu0  ;;  %8997 = vmatmul.mubr.msk.f32.gmra.mxu1 %vm3016_vm1, %v13025_v30  ;;  %v882_v36 = vpop.permute.xlu1 %881 }
 0x3d4   :  { %7273 = vst [vmem:[%s16462_s2 + $0x6d8] sm:$0xff] %v4128_v42  ;;  %2681 = vrot.lane.b32.xlu0 %v1945_v49, %s9335_s23  ;;  %v1646_v12 = vsub.f32 %v12761_v9, %v882_v36  ;;  %8999 = vmatprep.mubr.msk.f32.mxu1 %vm3016_vm1, %v13065_v13 }
 0x3d5   :  { %v4130_v62 = vpop.f32.mrf.mxu0  ;;  %4324 = vmatprep.mubr.f32.mxu0 %v16685_v59 }
 0x3d6   :  { %v1946_v30 = vmul.f32 0.1, %v1646_v12  ;;  %7274 = vst [vmem:[%s16462_s2 + $0x6e0] sm:$0xff] %v4130_v62  ;;  %v13350_v4 = vpop.permute.xlu0 %2625  ;;  %v13543_v62 = vld [vmem:[%s16460_s0 + $0x500] sm:$0xff] }
 0x3d7   :  { %8066 = vmatmul.mubr.msk.f32.gmra.mxu0 %vm3016_vm1, %v13350_v4  ;;  %v5478_v9 = vpop.f32.mrf.mxu1  ;;  %9000 = vmatmul.mubr.msk.f32.gmra.mxu1 %vm3016_vm1, %v13086_v19  ;;  %v884_v13 = vpop.permute.xlu1 %883  ;;  %v13369_v19 = vld [vmem:[%s16460_s0 + $0x4c0] sm:$0xff] }
 0x3d8   :  { %7948 = vst [vmem:[%s16462_s2 + $0x1bf0] sm:$0xff] %v5478_v9  ;;  %913 = vrot.lane.b32.xlu0 %v13345_v16, %s9333_s13  ;;  %9002 = vmatprep.mubr.msk.f32.mxu1 %vm3016_vm1, %v13107_v8  ;;  %v1647_v6 = vsub.f32 %v12785_v2, %v884_v13  ;;  %v13379_v2 = vld [vmem:[%s16460_s0 + $0x4c8] sm:$0xff] }
 0x3d9   :  { %2683 = vrot.lane.b32.xlu1 %v1946_v30, %s9335_s23  ;;  %4330 = vmatprep.mubr.f32.mxu0 %v16685_v59  ;;  %v5480_v27 = vpop.f32.mrf.mxu1  ;;  %v13548_v30 = vld [vmem:[%s16460_s0 + $0x508] sm:$0xff] }
 0x3da   :  { %7949 = vst [vmem:[%s16462_s2 + $0x1bf8] sm:$0xff] %v5480_v27  ;;  %v13374_v3 = vpop.permute.xlu0 %2627  ;;  %v1947_v63 = vmul.f32 0.1, %v1647_v6 }
 0x3db   :  { %8067 = vmatmul.mubr.msk.f32.gmra.mxu0 %vm3016_vm1, %v13374_v3  ;;  %v4134_v8 = vpop.f32.mrf.mxu0  ;;  %9003 = vmatmul.mubr.msk.f32.gmra.mxu1 %vm3016_vm1, %v13124_v53  ;;  %v886_v28 = vpop.permute.xlu1 %885 }
 0x3dc   :  { %7276 = vst [vmem:[%s16462_s2 + $0x6f0] sm:$0xff] %v4134_v8  ;;  %915 = vrot.lane.b32.xlu0 %v13369_v19, %s9333_s13  ;;  %9005 = vmatprep.mubr.msk.f32.mxu1 %vm3016_vm1, %v13141_v46  ;;  %v1648_v53 = vsub.f32 %v12806_v57, %v886_v28 }
 0x3dd   :  { %v4136_v51 = vpop.f32.mrf.mxu0  ;;  %4336 = vmatprep.mubr.f32.mxu0 %v16685_v59  ;;  %917 = vrot.lane.b32.xlu1 %v13379_v2, %s9333_s13 }
 0x3de   :  { %7277 = vst [vmem:[%s16462_s2 + $0x6f8] sm:$0xff] %v4136_v51  ;;  %v13399_v22 = vpop.permute.xlu0 %2629  ;;  %v1948_v25 = vmul.f32 0.1, %v1648_v53  ;;  %v13597_v53 = vld [vmem:[%s16460_s0 + $0x518] sm:$0xff] }
 0x3df   :  { %8068 = vmatmul.mubr.msk.f32.gmra.mxu0 %vm3016_vm1, %v13399_v22  ;;  %v5484_v46 = vpop.f32.mrf.mxu1  ;;  %9006 = vmatmul.mubr.msk.f32.gmra.mxu1 %vm3016_vm1, %v13158_v58 }
 0x3e0   :  { %7951 = vst [vmem:[%s16462_s2 + $0x1c08] sm:$0xff] %v5484_v46  ;;  %9008 = vmatprep.mubr.msk.f32.mxu1 %vm3016_vm1, %v13175_v31  ;;  %2685 = vrot.lane.b32.xlu0 %v1947_v63, %s9335_s23  ;;  %v888_v31 = vpop.permute.xlu1 %887 }
 0x3e1   :  { %v5486_v57 = vpop.f32.mrf.mxu1  ;;  %4342 = vmatprep.mubr.f32.mxu0 %v16685_v59  ;;  %919 = vrot.lane.b32.xlu1 %v13404_v48, %s9333_s13  ;;  %v1649_v34 = vsub.f32 %v12828_v38, %v888_v31  ;;  %v13621_v31 = vld [vmem:[%s16460_s0 + $0x520] sm:$0xff] }
 0x3e2   :  { %7952 = vst [vmem:[%s16462_s2 + $0x1c10] sm:$0xff] %v5486_v57  ;;  %v13422_v58 = vpop.permute.xlu0 %2631 }
 0x3e3   :  { %8069 = vmatmul.mubr.msk.f32.gmra.mxu0 %vm3016_vm1, %v13422_v58  ;;  %v8866_v23 = vpop.f32.mrf.mxu1  ;;  %9009 = vmatmul.mubr.msk.f32.gmra.mxu1 %vm3016_vm1, %v13192_v37  ;;  %v1949_v20 = vmul.f32 0.1, %v1649_v34 }
 0x3e4   :  { %7059 = vst [vmem:[%s16462_s2 + $0x28] sm:$0xff] %v8866_v23  ;;  %9011 = vmatprep.mubr.msk.f32.mxu1 %vm3016_vm1, %v13209_v11  ;;  %4348 = vmatprep.mubr.f32.mxu0 %v16685_v59  ;;  %v13451_v11 = vld [vmem:[%s16460_s0 + $0x4e0] sm:$0xff]  ;;  %v890_v21 = vpop.permute.xlu1 %889  ;;  %v13626_v23 = vld [vmem:[%s16460_s0 + $0x528] sm:$0xff] }
 0x3e5   :  { %v5555_v10 = vpop.f32.mrf.mxu1  ;;  %921 = vrot.lane.b32.xlu0 %v13427_v5, %s9333_s13  ;;  %2687 = vrot.lane.b32.xlu1 %v1948_v25, %s9335_s23  ;;  %v4140_v39 = vpop.f32.mrf.mxu0 }
 0x3e6   :  { %7056 = vst [vmem:[%s16462_s2 + $0x10] sm:$0xff] %v5555_v10  ;;  %v13446_v37 = vpop.permute.xlu0 %2633  ;;  %7279 = vst [vmem:[%s16462_s2 + $0x708] sm:$0xff] %v4140_v39 }
 0x3e7   :  { %8070 = vmatmul.mubr.msk.f32.gmra.mxu0 %vm3016_vm1, %v13446_v37  ;;  %v8869_v38 = vpop.f32.mrf.mxu1  ;;  %9012 = vmatmul.mubr.msk.f32.gmra.mxu1 %vm3016_vm1, %v13226_v33  ;;  %v4142_v43 = vpop.f32.mrf.mxu0  ;;  %v1650_v33 = vsub.f32 %v12849_v18, %v890_v21 }
 0x3e8   :  { %7065 = vst [vmem:[%s16462_s2 + $0x58] sm:$0xff] %v8869_v38  ;;  %9014 = vmatprep.mubr.msk.f32.mxu1 %vm3016_vm1, %v13243_v29  ;;  %4354 = vmatprep.mubr.f32.mxu0 %v16685_v59  ;;  %7280 = vst [vmem:[%s16462_s2 + $0x710] sm:$0xff] %v4142_v43  ;;  %v892_v60 = vpop.permute.xlu1 %891 }
 0x3e9   :  { %v5565_v26 = vpop.f32.mrf.mxu1  ;;  %923 = vrot.lane.b32.xlu0 %v13451_v11, %s9333_s13  ;;  %925 = vrot.lane.b32.xlu1 %v13456_v41, %s9333_s13 }
 0x3ea   :  { %7062 = vst [vmem:[%s16462_s2 + $0x40] sm:$0xff] %v5565_v26  ;;  %v13482_v29 = vpop.permute.xlu0 %2635  ;;  %v13651_v26 = vld [vmem:[%s16460_s0 + $0x530] sm:$0xff] }
 0x3eb   :  { %8071 = vmatmul.mubr.msk.f32.gmra.mxu0 %vm3016_vm1, %v13482_v29  ;;  %v8872_v61 = vpop.f32.mrf.mxu1  ;;  %9015 = vmatmul.mubr.msk.f32.gmra.mxu1 %vm3016_vm1, %v13260_v1  ;;  %v4146_v18 = vpop.f32.mrf.mxu0  ;;  %v1950_v1 = vmul.f32 0.1, %v1650_v33 }
 0x3ec   :  { %7071 = vst [vmem:[%s16462_s2 + $0x88] sm:$0xff] %v8872_v61  ;;  %9017 = vmatprep.mubr.msk.f32.mxu1 %vm3016_vm1, %v13277_v44  ;;  %4360 = vmatprep.mubr.f32.mxu0 %v16685_v59  ;;  %7282 = vst [vmem:[%s16462_s2 + $0x720] sm:$0xff] %v4146_v18  ;;  %v13513_v44 = vld [vmem:[%s16460_s0 + $0x4f8] sm:$0xff]  ;;  %v894_v9 = vpop.permute.xlu1 %893 }
 0x3ed   :  { %v5575_v14 = vpop.f32.mrf.mxu1  ;;  %2689 = vrot.lane.b32.xlu0 %v1949_v20, %s9335_s23  ;;  %927 = vrot.lane.b32.xlu1 %v13487_v35, %s9333_s13  ;;  %v4148_v52 = vpop.f32.mrf.mxu0  ;;  %v1652_v27 = vsub.f32 %v12898_v0, %v894_v9  ;;  %v13673_v61 = vld [vmem:[%s16460_s0 + $0x538] sm:$0xff] }
 0x3ee   :  { %7068 = vst [vmem:[%s16462_s2 + $0x70] sm:$0xff] %v5575_v14  ;;  %v13508_v32 = vpop.permute.xlu0 %2637  ;;  %7283 = vst [vmem:[%s16462_s2 + $0x728] sm:$0xff] %v4148_v52 }
 0x3ef   :  { %8072 = vmatmul.mubr.msk.f32.gmra.mxu0 %vm3016_vm1, %v13508_v32  ;;  %v8875_v49 = vpop.f32.mrf.mxu1  ;;  %9018 = vmatmul.mubr.msk.f32.gmra.mxu1 %vm3016_vm1, %v13294_v40  ;;  %v4152_v42 = vpop.f32.mrf.mxu0  ;;  %v1651_v40 = vsub.f32 %v12874_v54, %v892_v60 }
 0x3f0   :  { %7077 = vst [vmem:[%s16462_s2 + $0xb8] sm:$0xff] %v8875_v49  ;;  %9020 = vmatprep.mubr.msk.f32.mxu1 %vm3016_vm1, %v13311_v24  ;;  %4366 = vmatprep.mubr.f32.mxu0 %v16685_v59  ;;  %7285 = vst [vmem:[%s16462_s2 + $0x738] sm:$0xff] %v4152_v42  ;;  %v13698_v42 = vld [vmem:[%s16460_s0 + $0x540] sm:$0xff] }
 0x3f1   :  { %v5585_v36 = vpop.f32.mrf.mxu1  ;;  %929 = vrot.lane.b32.xlu0 %v13513_v44, %s9333_s13  ;;  %2691 = vrot.lane.b32.xlu1 %v1950_v1, %s9335_s23  ;;  %v4154_v12 = vpop.f32.mrf.mxu0  ;;  %v1951_v6 = vmul.f32 0.1, %v1651_v40 }
 0x3f2   :  { %7074 = vst [vmem:[%s16462_s2 + $0xa0] sm:$0xff] %v5585_v36  ;;  %v13538_v24 = vpop.permute.xlu0 %2639  ;;  %7286 = vst [vmem:[%s16462_s2 + $0x740] sm:$0xff] %v4154_v12  ;;  %v13703_v36 = vld [vmem:[%s16460_s0 + $0x548] sm:$0xff] }
 0x3f3   :  { %8073 = vmatmul.mubr.msk.f32.gmra.mxu0 %vm3016_vm1, %v13538_v24  ;;  %v8878_v54 = vpop.f32.mrf.mxu1  ;;  %9021 = vmatmul.mubr.msk.f32.gmra.mxu1 %vm3016_vm1, %v13328_v50 }
 0x3f4   :  { %7083 = vst [vmem:[%s16462_s2 + $0xe8] sm:$0xff] %v8878_v54  ;;  %9023 = vmatprep.mubr.msk.f32.mxu1 %vm3016_vm1, %v13350_v4  ;;  %4372 = vmatprep.mubr.f32.mxu0 %v16685_v59  ;;  %v13574_v4 = vld [vmem:[%s16460_s0 + $0x510] sm:$0xff] }
 0x3f5   :  { %v5595_v13 = vpop.f32.mrf.mxu1  ;;  %931 = vrot.lane.b32.xlu0 %v13543_v62, %s9333_s13  ;;  %933 = vrot.lane.b32.xlu1 %v13548_v30, %s9333_s13 }
 0x3f6   :  { %7080 = vst [vmem:[%s16462_s2 + $0xd0] sm:$0xff] %v5595_v13  ;;  %v2642_v50 = vpop.permute.xlu0 %2641  ;;  %v13723_v13 = vld [vmem:[%s16460_s0 + $0x550] sm:$0xff] }
 0x3f7   :  { %8074 = vmatmul.mubr.msk.f32.gmra.mxu0 %vm3016_vm1, %v2642_v50  ;;  %v8881_v8 = vpop.f32.mrf.mxu1  ;;  %9024 = vmatmul.mubr.msk.f32.gmra.mxu1 %vm3016_vm1, %v13374_v3  ;;  %v4158_v28 = vpop.f32.mrf.mxu0  ;;  %v1952_v3 = vmul.f32 0.1, %v1652_v27 }
 0x3f8   :  { %7089 = vst [vmem:[%s16462_s2 + $0x118] sm:$0xff] %v8881_v8  ;;  %9026 = vmatprep.mubr.msk.f32.mxu1 %vm3016_vm1, %v13399_v22  ;;  %4378 = vmatprep.mubr.f32.mxu0 %v16685_v59  ;;  %7288 = vst [vmem:[%s16462_s2 + $0x750] sm:$0xff] %v4158_v28  ;;  %v896_v22 = vpop.permute.xlu1 %895 }
 0x3f9   :  { %v5605_v0 = vpop.f32.mrf.mxu1  ;;  %2693 = vrot.lane.b32.xlu0 %v1951_v6, %s9335_s23  ;;  %935 = vrot.lane.b32.xlu1 %v13574_v4, %s9333_s13  ;;  %v4160_v63 = vpop.f32.mrf.mxu0  ;;  %v1653_v25 = vsub.f32 %v12920_v15, %v896_v22 }
 0x3fa   :  { %7086 = vst [vmem:[%s16462_s2 + $0x100] sm:$0xff] %v5605_v0  ;;  %v2644_v51 = vpop.permute.xlu0 %2643  ;;  %7289 = vst [vmem:[%s16462_s2 + $0x758] sm:$0xff] %v4160_v63  ;;  %v13747_v0 = vld [vmem:[%s16460_s0 + $0x558] sm:$0xff] }
 0x3fb   :  { %8075 = vmatmul.mubr.msk.f32.gmra.mxu0 %vm3016_vm1, %v2644_v51  ;;  %v8884_v46 = vpop.f32.mrf.mxu1  ;;  %9027 = vmatmul.mubr.msk.f32.gmra.mxu1 %vm3016_vm1, %v13422_v58 }
 0x3fc   :  { %7095 = vst [vmem:[%s16462_s2 + $0x148] sm:$0xff] %v8884_v46  ;;  %9029 = vmatprep.mubr.msk.f32.mxu1 %vm3016_vm1, %v13446_v37  ;;  %4384 = vmatprep.mubr.f32.mxu0 %v16685_v59  ;;  %v898_v10 = vpop.permute.xlu1 %897  ;;  %v1953_v37 = vmul.f32 0.1, %v1653_v25  ;;  %v184_v25 = vld [vmem:[%s16460_s0 + $0x568] sm:$0xff] }
 0x3fd   :  { %v5615_v57 = vpop.f32.mrf.mxu1  ;;  %937 = vrot.lane.b32.xlu0 %v13597_v53, %s9333_s13  ;;  %2695 = vrot.lane.b32.xlu1 %v1952_v3, %s9335_s23  ;;  %v1654_v21 = vsub.f32 %v12941_v45, %v898_v10 }
 0x3fe   :  { %7092 = vst [vmem:[%s16462_s2 + $0x130] sm:$0xff] %v5615_v57  ;;  %v2646_v58 = vpop.permute.xlu0 %2645  ;;  %v13765_v57 = vld [vmem:[%s16460_s0 + $0x560] sm:$0xff] }
 0x3ff   :  { %8076 = vmatmul.mubr.msk.f32.gmra.mxu0 %vm3016_vm1, %v2646_v58  ;;  %v8887_v34 = vpop.f32.mrf.mxu1  ;;  %9030 = vmatmul.mubr.msk.f32.gmra.mxu1 %vm3016_vm1, %v13482_v29  ;;  %v4164_v15 = vpop.f32.mrf.mxu0  ;;  %v1954_v33 = vmul.f32 0.1, %v1654_v21 }
 0x400   :  { %7101 = vst [vmem:[%s16462_s2 + $0x178] sm:$0xff] %v8887_v34  ;;  %9032 = vmatprep.mubr.msk.f32.mxu1 %vm3016_vm1, %v13508_v32  ;;  %4390 = vmatprep.mubr.f32.mxu0 %v16685_v59  ;;  %7291 = vst [vmem:[%s16462_s2 + $0x768] sm:$0xff] %v4164_v15  ;;  %v900_v18 = vpop.permute.xlu1 %899 }
 0x401   :  { %v5625_v39 = vpop.f32.mrf.mxu1  ;;  %939 = vrot.lane.b32.xlu0 %v13621_v31, %s9333_s13  ;;  %941 = vrot.lane.b32.xlu1 %v13626_v23, %s9333_s13  ;;  %v4166_v38 = vpop.f32.mrf.mxu0  ;;  %v1655_v60 = vsub.f32 %v12966_v55, %v900_v18 }
 0x402   :  { %7098 = vst [vmem:[%s16462_s2 + $0x160] sm:$0xff] %v5625_v39  ;;  %v2648_v43 = vpop.permute.xlu0 %2647  ;;  %7292 = vst [vmem:[%s16462_s2 + $0x770] sm:$0xff] %v4166_v38  ;;  %v185_v38 = vld [vmem:[%s16460_s0 + $0x570] sm:$0xff] }
 0x403   :  { %8077 = vmatmul.mubr.msk.f32.gmra.mxu0 %vm3016_vm1, %v2648_v43  ;;  %v8890_v20 = vpop.f32.mrf.mxu1  ;;  %9033 = vmatmul.mubr.msk.f32.gmra.mxu1 %vm3016_vm1, %v13538_v24  ;;  %v1955_v24 = vmul.f32 0.1, %v1655_v60 }
 0x404   :  { %7107 = vst [vmem:[%s16462_s2 + $0x1a8] sm:$0xff] %v8890_v20  ;;  %9035 = vmatprep.mubr.msk.f32.mxu1 %vm3016_vm1, %v2642_v50  ;;  %4396 = vmatprep.mubr.f32.mxu0 %v16685_v59  ;;  %v902_v55 = vpop.permute.xlu1 %901 }
 0x405   :  { %v5635_v45 = vpop.f32.mrf.mxu1  ;;  %2697 = vrot.lane.b32.xlu0 %v1953_v37, %s9335_s23  ;;  %943 = vrot.lane.b32.xlu1 %v13651_v26, %s9333_s13  ;;  %v1656_v9 = vsub.f32 %v12987_v47, %v902_v55  ;;  %v187_v55 = vld [vmem:[%s16460_s0 + $0x580] sm:$0xff] }
 0x406   :  { %7104 = vst [vmem:[%s16462_s2 + $0x190] sm:$0xff] %v5635_v45  ;;  %v2650_v29 = vpop.permute.xlu0 %2649 }
 0x407   :  { %8078 = vmatmul.mubr.msk.f32.gmra.mxu0 %vm3016_vm1, %v2650_v29  ;;  %v8893_v14 = vpop.f32.mrf.mxu1  ;;  %9036 = vmatmul.mubr.msk.f32.gmra.mxu1 %vm3016_vm1, %v2644_v51  ;;  %v4170_v1 = vpop.f32.mrf.mxu0  ;;  %v1956_v8 = vmul.f32 0.1, %v1656_v9 }
 0x408   :  { %7113 = vst [vmem:[%s16462_s2 + $0x1d8] sm:$0xff] %v8893_v14  ;;  %9038 = vmatprep.mubr.msk.f32.mxu1 %vm3016_vm1, %v2646_v58  ;;  %4402 = vmatprep.mubr.f32.mxu0 %v16685_v59  ;;  %7294 = vst [vmem:[%s16462_s2 + $0x780] sm:$0xff] %v4170_v1  ;;  %v904_v3 = vpop.permute.xlu1 %903 }
 0x409   :  { %v5645_v52 = vpop.f32.mrf.mxu1  ;;  %945 = vrot.lane.b32.xlu0 %v13673_v61, %s9333_s13  ;;  %2699 = vrot.lane.b32.xlu1 %v1954_v33, %s9335_s23  ;;  %v4172_v32 = vpop.f32.mrf.mxu0  ;;  %v1657_v22 = vsub.f32 %v13009_v56, %v904_v3  ;;  %v186_v33 = vld [vmem:[%s16460_s0 + $0x578] sm:$0xff] }
 0x40a   :  { %7110 = vst [vmem:[%s16462_s2 + $0x1c0] sm:$0xff] %v5645_v52  ;;  %v2652_v49 = vpop.permute.xlu0 %2651  ;;  %7295 = vst [vmem:[%s16462_s2 + $0x788] sm:$0xff] %v4172_v32  ;;  %v9320_v32 = vld [vmem:[%s16460_s0 + $0x4a0] sm:$0xff] }
 0x40b   :  { %8079 = vmatmul.mubr.msk.f32.gmra.mxu0 %vm3016_vm1, %v2652_v49  ;;  %v8896_v40 = vpop.f32.mrf.mxu1  ;;  %9039 = vmatmul.mubr.msk.f32.gmra.mxu1 %vm3016_vm1, %v2648_v43  ;;  %v1957_v39 = vmul.f32 0.1, %v1657_v22 }
 0x40c   :  { %7119 = vst [vmem:[%s16462_s2 + $0x208] sm:$0xff] %v8896_v40  ;;  %9041 = vmatprep.mubr.msk.f32.mxu1 %vm3016_vm1, %v2650_v29  ;;  %4408 = vmatprep.mubr.f32.mxu0 %v16685_v59  ;;  %v906_v58 = vpop.permute.xlu1 %905  ;;  %v188_v40 = vld [vmem:[%s16460_s0 + $0x588] sm:$0xff] }
 0x40d   :  { %v5655_v12 = vpop.f32.mrf.mxu1  ;;  %947 = vrot.lane.b32.xlu0 %v13698_v42, %s9333_s13  ;;  %949 = vrot.lane.b32.xlu1 %v13703_v36, %s9333_s13  ;;  %v1658_v37 = vsub.f32 %v13030_v17, %v906_v58 }
 0x40e   :  { %7116 = vst [vmem:[%s16462_s2 + $0x1f0] sm:$0xff] %v5655_v12  ;;  %v2654_v54 = vpop.permute.xlu0 %2653 }
 0x40f   :  { %8080 = vmatmul.mubr.msk.f32.gmra.mxu0 %vm3016_vm1, %v2654_v54  ;;  %v8899_v6 = vpop.f32.mrf.mxu1  ;;  %9042 = vmatmul.mubr.msk.f32.gmra.mxu1 %vm3016_vm1, %v2652_v49  ;;  %v4176_v27 = vpop.f32.mrf.mxu0  ;;  %v1958_v20 = vmul.f32 0.1, %v1658_v37  ;;  %v192_v37 = vld [vmem:[%s16460_s0 + $0x5a8] sm:$0xff] }
 0x410   :  { %7125 = vst [vmem:[%s16462_s2 + $0x238] sm:$0xff] %v8899_v6  ;;  %9044 = vmatprep.mubr.msk.f32.mxu1 %vm3016_vm1, %v2654_v54  ;;  %4414 = vmatprep.mubr.f32.mxu0 %v16685_v59  ;;  %7297 = vst [vmem:[%s16462_s2 + $0x798] sm:$0xff] %v4176_v27  ;;  %v908_v29 = vpop.permute.xlu1 %907  ;;  %v9321_v6 = vld [vmem:[%s16460_s0 + $0x4a8] sm:$0xff] }
 0x411   :  { %v5665_v47 = vpop.f32.mrf.mxu1  ;;  %2701 = vrot.lane.b32.xlu0 %v1955_v24, %s9335_s23  ;;  %v4178_v50 = vpop.f32.mrf.mxu0  ;;  %951 = vrot.lane.b32.xlu1 %v13723_v13, %s9333_s13  ;;  %v1659_v60 = vsub.f32 %v9320_v32, %v908_v29 }
 0x412   :  { %7122 = vst [vmem:[%s16462_s2 + $0x220] sm:$0xff] %v5665_v47  ;;  %v2656_v28 = vpop.permute.xlu0 %2655  ;;  %7298 = vst [vmem:[%s16462_s2 + $0x7a0] sm:$0xff] %v4178_v50  ;;  %v189_v50 = vld [vmem:[%s16460_s0 + $0x590] sm:$0xff] }
 0x413   :  { %8081 = vmatmul.mubr.msk.f32.gmra.mxu0 %vm3016_vm1, %v2656_v28  ;;  %v8902_v63 = vpop.f32.mrf.mxu1  ;;  %9045 = vmatmul.mubr.msk.f32.gmra.mxu1 %vm3016_vm1, %v2656_v28  ;;  %v1959_v54 = vmul.f32 0.1, %v1659_v60 }
 0x414   :  { %7131 = vst [vmem:[%s16462_s2 + $0x268] sm:$0xff] %v8902_v63  ;;  %4420 = vmatprep.mubr.f32.mxu0 %v16685_v59  ;;  %v910_v12 = vpop.permute.xlu1 %909 }
 0x415   :  { %v5675_v51 = vpop.f32.mrf.mxu1  ;;  %953 = vrot.lane.b32.xlu0 %v13747_v0, %s9333_s13  ;;  %2703 = vrot.lane.b32.xlu1 %v1956_v8, %s9335_s23  ;;  %v1660_v27 = vsub.f32 %v9321_v6, %v910_v12 }
 0x416   :  { %7128 = vst [vmem:[%s16462_s2 + $0x250] sm:$0xff] %v5675_v51  ;;  %v2658_v46 = vpop.permute.xlu0 %2657 }
 0x417   :  { %8082 = vmatmul.mubr.msk.f32.gmra.mxu0 %vm3016_vm1, %v2658_v46  ;;  %9047 = vmatprep.mubr.msk.f32.mxu1 %vm3016_vm1, %v2658_v46  ;;  %v8905_v56 = vpop.f32.mrf.mxu1  ;;  %v4182_v10 = vpop.f32.mrf.mxu0  ;;  %v1960_v51 = vmul.f32 0.1, %v1660_v27  ;;  %v190_v46 = vld [vmem:[%s16460_s0 + $0x598] sm:$0xff] }
 0x418   :  { %7137 = vst [vmem:[%s16462_s2 + $0x298] sm:$0xff] %v8905_v56  ;;  %4426 = vmatprep.mubr.f32.mxu0 %v16685_v59  ;;  %7300 = vst [vmem:[%s16462_s2 + $0x7b0] sm:$0xff] %v4182_v10  ;;  %v9322_v10 = vld [vmem:[%s16460_s0 + $0x4b0] sm:$0xff] }
 0x419   :  { %v5685_v34 = vpop.f32.mrf.mxu1  ;;  %v4184_v15 = vpop.f32.mrf.mxu0  ;;  %955 = vrot.lane.b32.xlu0 %v13765_v57, %s9333_s13  ;;  %957 = vrot.lane.b32.xlu1 %v184_v25, %s9333_s13 }
 0x41a   :  { %7134 = vst [vmem:[%s16462_s2 + $0x280] sm:$0xff] %v5685_v34  ;;  %v2660_v21 = vpop.permute.xlu0 %2659  ;;  %7301 = vst [vmem:[%s16462_s2 + $0x7b8] sm:$0xff] %v4184_v15  ;;  %v912_v25 = vpop.permute.xlu1 %911 }
 0x41b   :  { %8083 = vmatmul.mubr.msk.f32.gmra.mxu0 %vm3016_vm1, %v2660_v21  ;;  %9048 = vmatmul.mubr.msk.f32.gmra.mxu1 %vm3016_vm1, %v2660_v21  ;;  %v8908_v43 = vpop.f32.mrf.mxu1  ;;  %v1661_v34 = vsub.f32 %v9322_v10, %v912_v25 }
 0x41c   :  { %7143 = vst [vmem:[%s16462_s2 + $0x2c8] sm:$0xff] %v8908_v43  ;;  %4432 = vmatprep.mubr.f32.mxu0 %v16685_v59 }
 0x41d   :  { %v5695_v17 = vpop.f32.mrf.mxu1  ;;  %2705 = vrot.lane.b32.xlu0 %v1957_v39, %s9335_s23  ;;  %959 = vrot.lane.b32.xlu1 %v185_v38, %s9333_s13  ;;  %v191_v39 = vld [vmem:[%s16460_s0 + $0x5a0] sm:$0xff] }
 0x41e   :  { %7140 = vst [vmem:[%s16462_s2 + $0x2b0] sm:$0xff] %v5695_v17  ;;  %v2662_v45 = vpop.permute.xlu0 %2661 }
 0x41f   :  { %8084 = vmatmul.mubr.msk.f32.gmra.mxu0 %vm3016_vm1, %v2662_v45  ;;  %9050 = vmatprep.mubr.msk.f32.mxu1 %vm3016_vm1, %v2662_v45  ;;  %v8911_v18 = vpop.f32.mrf.mxu1  ;;  %v4188_v14 = vpop.f32.mrf.mxu0 }
 0x420   :  { %7149 = vst [vmem:[%s16462_s2 + $0x2f8] sm:$0xff] %v8911_v18  ;;  %4438 = vmatprep.mubr.f32.mxu0 %v16685_v59  ;;  %7303 = vst [vmem:[%s16462_s2 + $0x7c8] sm:$0xff] %v4188_v14  ;;  %v193_v14 = vld [vmem:[%s16460_s0 + $0x5b0] sm:$0xff] }
 0x421   :  { %v5705_v1 = vpop.f32.mrf.mxu1  ;;  %v4190_v52 = vpop.f32.mrf.mxu0  ;;  %961 = vrot.lane.b32.xlu0 %v186_v33, %s9333_s13  ;;  %2707 = vrot.lane.b32.xlu1 %v1958_v20, %s9335_s23  ;;  %v1961_v20 = vmul.f32 0.1, %v1661_v34 }
 0x422   :  { %7146 = vst [vmem:[%s16462_s2 + $0x2e0] sm:$0xff] %v5705_v1  ;;  %v2664_v49 = vpop.permute.xlu0 %2663  ;;  %7304 = vst [vmem:[%s16462_s2 + $0x7d0] sm:$0xff] %v4190_v52 }
 0x423   :  { %8085 = vmatmul.mubr.msk.f32.gmra.mxu0 %vm3016_vm1, %v2664_v49  ;;  %9051 = vmatmul.mubr.msk.f32.gmra.mxu1 %vm3016_vm1, %v2664_v49  ;;  %v8914_v24 = vpop.f32.mrf.mxu1 }
 0x424   :  { %7155 = vst [vmem:[%s16462_s2 + $0x328] sm:$0xff] %v8914_v24  ;;  %4444 = vmatprep.mubr.f32.mxu0 %v16685_v59 }
 0x425   :  { %v5715_v9 = vpop.f32.mrf.mxu1  ;;  %963 = vrot.lane.b32.xlu0 %v187_v55, %s9333_s13  ;;  %965 = vrot.lane.b32.xlu1 %v188_v40, %s9333_s13 }
 0x426   :  { %7152 = vst [vmem:[%s16462_s2 + $0x310] sm:$0xff] %v5715_v9  ;;  %v2666_v47 = vpop.permute.xlu0 %2665 }
 0x427   :  { %8086 = vmatmul.mubr.msk.f32.gmra.mxu0 %vm3016_vm1, %v2666_v47  ;;  %9053 = vmatprep.mubr.msk.f32.mxu1 %vm3016_vm1, %v2666_v47  ;;  %v8917_v8 = vpop.f32.mrf.mxu1  ;;  %v4194_v28 = vpop.f32.mrf.mxu0 }
 0x428   :  { %7161 = vst [vmem:[%s16462_s2 + $0x358] sm:$0xff] %v8917_v8  ;;  %4450 = vmatprep.mubr.f32.mxu0 %v16685_v59  ;;  %7306 = vst [vmem:[%s16462_s2 + $0x7e0] sm:$0xff] %v4194_v28 }
 0x429   :  { %v5725_v3 = vpop.f32.mrf.mxu1  ;;  %v4196_v63 = vpop.f32.mrf.mxu0  ;;  %2709 = vrot.lane.b32.xlu0 %v1959_v54, %s9335_s23  ;;  %967 = vrot.lane.b32.xlu1 %v189_v50, %s9333_s13 }
 0x42a   :  { %7158 = vst [vmem:[%s16462_s2 + $0x340] sm:$0xff] %v5725_v3  ;;  %v2668_v22 = vpop.permute.xlu0 %2667  ;;  %7307 = vst [vmem:[%s16462_s2 + $0x7e8] sm:$0xff] %v4196_v63 }
 0x42b   :  { %8087 = vmatmul.mubr.msk.f32.gmra.mxu0 %vm3016_vm1, %v2668_v22  ;;  %9054 = vmatmul.mubr.msk.f32.gmra.mxu1 %vm3016_vm1, %v2668_v22  ;;  %v8920_v58 = vpop.f32.mrf.mxu1 }
 0x42c   :  { %7167 = vst [vmem:[%s16462_s2 + $0x388] sm:$0xff] %v8920_v58  ;;  %4456 = vmatprep.mubr.f32.mxu0 %v16685_v59 }
 0x42d   :  { %v5735_v56 = vpop.f32.mrf.mxu1  ;;  %969 = vrot.lane.b32.xlu0 %v190_v46, %s9333_s13  ;;  %2711 = vrot.lane.b32.xlu1 %v1960_v51, %s9335_s23 }
 0x42e   :  { %7164 = vst [vmem:[%s16462_s2 + $0x370] sm:$0xff] %v5735_v56  ;;  %v2670_v15 = vpop.permute.xlu0 %2669 }
 0x42f   :  { %8088 = vmatmul.mubr.msk.f32.gmra.mxu0 %vm3016_vm1, %v2670_v15  ;;  %9056 = vmatprep.mubr.msk.f32.mxu1 %vm3016_vm1, %v2670_v15  ;;  %v8923_v21 = vpop.f32.mrf.mxu1  ;;  %v4200_v38 = vpop.f32.mrf.mxu0 }
 0x430   :  { %7173 = vst [vmem:[%s16462_s2 + $0x3b8] sm:$0xff] %v8923_v21  ;;  %4462 = vmatprep.mubr.f32.mxu0 %v16685_v59  ;;  %7309 = vst [vmem:[%s16462_s2 + $0x7f8] sm:$0xff] %v4200_v38  ;;  %v14004_v21 = vld [vmem:[%s16460_s0 + $0x5b8] sm:$0xff] }
 0x431   :  { %v5745_v43 = vpop.f32.mrf.mxu1  ;;  %v4202_v17 = vpop.f32.mrf.mxu0  ;;  %971 = vrot.lane.b32.xlu0 %v191_v39, %s9333_s13  ;;  %973 = vrot.lane.b32.xlu1 %v192_v37, %s9333_s13 }
 0x432   :  { %7170 = vst [vmem:[%s16462_s2 + $0x3a0] sm:$0xff] %v5745_v43  ;;  %v2672_v45 = vpop.permute.xlu0 %2671  ;;  %7310 = vst [vmem:[%s16462_s2 + $0x800] sm:$0xff] %v4202_v17 }
 0x433   :  { %8089 = vmatmul.mubr.msk.f32.gmra.mxu0 %vm3016_vm1, %v2672_v45  ;;  %9057 = vmatmul.mubr.msk.f32.gmra.mxu1 %vm3016_vm1, %v2672_v45  ;;  %v8926_v33 = vpop.f32.mrf.mxu1 }
 0x434   :  { %7179 = vst [vmem:[%s16462_s2 + $0x3e8] sm:$0xff] %v8926_v33  ;;  %4468 = vmatprep.mubr.f32.mxu0 %v16685_v59 }
 0x435   :  { %v5755_v29 = vpop.f32.mrf.mxu1  ;;  %2713 = vrot.lane.b32.xlu0 %v1961_v20, %s9335_s23 }
 0x436   :  { %7176 = vst [vmem:[%s16462_s2 + $0x3d0] sm:$0xff] %v5755_v29  ;;  %v2674_v18 = vpop.permute.xlu0 %2673  ;;  %v14023_v29 = vld [vmem:[%s16460_s0 + $0x5c0] sm:$0xff] }
 0x437   :  { %8090 = vmatmul.mubr.msk.f32.gmra.mxu0 %vm3016_vm1, %v2674_v18  ;;  %9059 = vmatprep.mubr.msk.f32.mxu1 %vm3016_vm1, %v2674_v18  ;;  %v8929_v1 = vpop.f32.mrf.mxu1  ;;  %v4206_v52 = vpop.f32.mrf.mxu0 }
 0x438   :  { %7185 = vst [vmem:[%s16462_s2 + $0x418] sm:$0xff] %v8929_v1  ;;  %4474 = vmatprep.mubr.f32.mxu0 %v16685_v59  ;;  %7312 = vst [vmem:[%s16462_s2 + $0x810] sm:$0xff] %v4206_v52 }
 0x439   :  { %v5765_v32 = vpop.f32.mrf.mxu1  ;;  %v4208_v60 = vpop.f32.mrf.mxu0  ;;  %975 = vrot.lane.b32.xlu0 %v193_v14, %s9333_s13 }
 0x43a   :  { %7182 = vst [vmem:[%s16462_s2 + $0x400] sm:$0xff] %v5765_v32  ;;  %v2676_v49 = vpop.permute.xlu0 %2675  ;;  %7313 = vst [vmem:[%s16462_s2 + $0x818] sm:$0xff] %v4208_v60  ;;  %v14043_v60 = vld [vmem:[%s16460_s0 + $0x5c8] sm:$0xff] }
 0x43b   :  { %8091 = vmatmul.mubr.msk.f32.gmra.mxu0 %vm3016_vm1, %v2676_v49  ;;  %9060 = vmatmul.mubr.msk.f32.gmra.mxu1 %vm3016_vm1, %v2676_v49  ;;  %v8932_v55 = vpop.f32.mrf.mxu1 }
 0x43c   :  { %7191 = vst [vmem:[%s16462_s2 + $0x448] sm:$0xff] %v8932_v55  ;;  %4480 = vmatprep.mubr.f32.mxu0 %v16685_v59 }
 0x43d   :  { %v5775_v40 = vpop.f32.mrf.mxu1 }
 0x43e   :  { %7188 = vst [vmem:[%s16462_s2 + $0x430] sm:$0xff] %v5775_v40  ;;  %v2678_v12 = vpop.permute.xlu0 %2677 }
 0x43f   :  { %8092 = vmatmul.mubr.msk.f32.gmra.mxu0 %vm3016_vm1, %v2678_v12  ;;  %9062 = vmatprep.mubr.msk.f32.mxu1 %vm3016_vm1, %v2678_v12  ;;  %v8935_v24 = vpop.f32.mrf.mxu1  ;;  %v4212_v9 = vpop.f32.mrf.mxu0 }
 0x440   :  { %7197 = vst [vmem:[%s16462_s2 + $0x478] sm:$0xff] %v8935_v24  ;;  %4486 = vmatprep.mubr.f32.mxu0 %v16685_v59  ;;  %7315 = vst [vmem:[%s16462_s2 + $0x828] sm:$0xff] %v4212_v9 }
 0x441   :  { %v5785_v54 = vpop.f32.mrf.mxu1  ;;  %v4214_v6 = vpop.f32.mrf.mxu0 }
 0x442   :  { %7194 = vst [vmem:[%s16462_s2 + $0x460] sm:$0xff] %v5785_v54  ;;  %v2680_v27 = vpop.permute.xlu0 %2679  ;;  %7316 = vst [vmem:[%s16462_s2 + $0x830] sm:$0xff] %v4214_v6  ;;  %v14067_v6 = vld [vmem:[%s16460_s0 + $0x5d0] sm:$0xff] }
 0x443   :  { %8093 = vmatmul.mubr.msk.f32.gmra.mxu0 %vm3016_vm1, %v2680_v27  ;;  %9063 = vmatmul.mubr.msk.f32.gmra.mxu1 %vm3016_vm1, %v2680_v27  ;;  %v8938_v47 = vpop.f32.mrf.mxu1 }
 0x444   :  { %7203 = vst [vmem:[%s16462_s2 + $0x4a8] sm:$0xff] %v8938_v47  ;;  %4492 = vmatprep.mubr.f32.mxu0 %v16685_v59 }
 0x445   :  { %v5795_v50 = vpop.f32.mrf.mxu1 }
 0x446   :  { %7200 = vst [vmem:[%s16462_s2 + $0x490] sm:$0xff] %v5795_v50  ;;  %v2682_v8 = vpop.permute.xlu0 %2681 }
 0x447   :  { %8094 = vmatmul.mubr.msk.f32.gmra.mxu0 %vm3016_vm1, %v2682_v8  ;;  %9065 = vmatprep.mubr.msk.f32.mxu1 %vm3016_vm1, %v2682_v8  ;;  %v8941_v28 = vpop.f32.mrf.mxu1  ;;  %v4218_v3 = vpop.f32.mrf.mxu0 }
 0x448   :  { %7209 = vst [vmem:[%s16462_s2 + $0x4d8] sm:$0xff] %v8941_v28  ;;  %7318 = vst [vmem:[%s16462_s2 + $0x840] sm:$0xff] %v4218_v3  ;;  %4498 = vmatprep.mubr.f32.mxu0 %v16685_v59 }
 0x449   :  { %v5805_v63 = vpop.f32.mrf.mxu1  ;;  %v4220_v51 = vpop.f32.mrf.mxu0 }
 0x44a   :  { %7206 = vst [vmem:[%s16462_s2 + $0x4c0] sm:$0xff] %v5805_v63  ;;  %v914_v22 = vpop.permute.xlu0 %913  ;;  %7319 = vst [vmem:[%s16462_s2 + $0x848] sm:$0xff] %v4220_v51 }
 0x44b   :  { %v1662_v46 = vsub.f32 %v13345_v16, %v914_v22  ;;  %v2684_v25 = vpop.permute.xlu1 %2683  ;;  %v8944_v58 = vpop.f32.mrf.mxu1 }
 0x44c   :  { %7215 = vst [vmem:[%s16462_s2 + $0x508] sm:$0xff] %v8944_v58  ;;  %8095 = vmatmul.mubr.msk.f32.gmra.mxu0 %vm3016_vm1, %v2684_v25  ;;  %9066 = vmatmul.mubr.msk.f32.gmra.mxu1 %vm3016_vm1, %v2684_v25 }
 0x44d   :  { %v1962_v56 = vmul.f32 0.1, %v1662_v46  ;;  %v5815_v10 = vpop.f32.mrf.mxu1  ;;  %4504 = vmatprep.mubr.f32.mxu0 %v16685_v59 }
 0x44e   :  { %7212 = vst [vmem:[%s16462_s2 + $0x4f0] sm:$0xff] %v5815_v10  ;;  %v916_v34 = vpop.permute.xlu0 %915 }
 0x44f   :  { %v1663_v16 = vsub.f32 %v13369_v19, %v916_v34  ;;  %2715 = vrot.lane.b32.xlu1 %v1962_v56, %s9335_s23  ;;  %v8947_v15 = vpop.f32.mrf.mxu1  ;;  %v4224_v39 = vpop.f32.mrf.mxu0 }
 0x450   :  { %7221 = vst [vmem:[%s16462_s2 + $0x538] sm:$0xff] %v8947_v15  ;;  %7321 = vst [vmem:[%s16462_s2 + $0x858] sm:$0xff] %v4224_v39  ;;  %v918_v37 = vpop.permute.xlu1 %917 }
 0x451   :  { %v1963_v38 = vmul.f32 0.1, %v1663_v16  ;;  %v1664_v19 = vsub.f32 %v13379_v2, %v918_v37  ;;  %v5825_v43 = vpop.f32.mrf.mxu1  ;;  %v4226_v17 = vpop.f32.mrf.mxu0  ;;  %v14113_v16 = vld [vmem:[%s16460_s0 + $0x5e0] sm:$0xff] }
 0x452   :  { %7218 = vst [vmem:[%s16462_s2 + $0x520] sm:$0xff] %v5825_v43  ;;  %7322 = vst [vmem:[%s16462_s2 + $0x860] sm:$0xff] %v4226_v17  ;;  %v2686_v20 = vpop.permute.xlu0 %2685 }
 0x453   :  { %v1964_v45 = vmul.f32 0.1, %v1664_v19  ;;  %977 = vrot.lane.b32.xlu1 %v14004_v21, %s9333_s13  ;;  %2717 = vrot.lane.b32.xlu0 %v1963_v38, %s9335_s23  ;;  %v8950_v33 = vpop.f32.mrf.mxu1 }
 0x454   :  { %7227 = vst [vmem:[%s16462_s2 + $0x568] sm:$0xff] %v8950_v33  ;;  %8096 = vmatmul.mubr.msk.f32.gmra.mxu0 %vm3016_vm1, %v2686_v20  ;;  %v920_v2 = vpop.permute.xlu1 %919  ;;  %9068 = vmatprep.mubr.msk.f32.mxu1 %vm3016_vm1, %v2686_v20  ;;  %v14137_v20 = vld [vmem:[%s16460_s0 + $0x5e8] sm:$0xff] }
 0x455   :  { %v1665_v18 = vsub.f32 %v13404_v48, %v920_v2  ;;  %v5835_v14 = vpop.f32.mrf.mxu1  ;;  %4510 = vmatprep.mubr.f32.mxu0 %v16685_v59 }
 0x456   :  { %7224 = vst [vmem:[%s16462_s2 + $0x550] sm:$0xff] %v5835_v14 }
 0x457   :  { %v1965_v1 = vmul.f32 0.1, %v1665_v18  ;;  %v4230_v52 = vpop.f32.mrf.mxu0  ;;  %2719 = vrot.lane.b32.xlu1 %v1964_v45, %s9335_s23  ;;  %979 = vrot.lane.b32.xlu0 %v14023_v29, %s9333_s13  ;;  %v8953_v32 = vpop.f32.mrf.mxu1 }
 0x458   :  { %7324 = vst [vmem:[%s16462_s2 + $0x870] sm:$0xff] %v4230_v52  ;;  %7233 = vst [vmem:[%s16462_s2 + $0x598] sm:$0xff] %v8953_v32  ;;  %v922_v48 = vpop.permute.xlu0 %921  ;;  %v2688_v49 = vpop.permute.xlu1 %2687  ;;  %v14158_v32 = vld [vmem:[%s16460_s0 + $0x5f0] sm:$0xff] }
 0x459   :  { %v4232_v55 = vpop.f32.mrf.mxu0  ;;  %v5845_v40 = vpop.f32.mrf.mxu1  ;;  %v1666_v12 = vsub.f32 %v13427_v5, %v922_v48  ;;  %8097 = vmatmul.mubr.msk.f32.gmra.mxu0 %vm3016_vm1, %v2688_v49  ;;  %9069 = vmatmul.mubr.msk.f32.gmra.mxu1 %vm3016_vm1, %v2688_v49 }
 0x45a   :  { %7325 = vst [vmem:[%s16462_s2 + $0x878] sm:$0xff] %v4232_v55  ;;  %7230 = vst [vmem:[%s16462_s2 + $0x580] sm:$0xff] %v5845_v40  ;;  %4516 = vmatprep.mubr.f32.mxu0 %v16685_v59 }
 0x45b   :  { %v1966_v24 = vmul.f32 0.1, %v1666_v12  ;;  %v4236_v9 = vpop.f32.mrf.mxu0  ;;  %981 = vrot.lane.b32.xlu1 %v14043_v60, %s9333_s13  ;;  %2721 = vrot.lane.b32.xlu0 %v1965_v1, %s9335_s23  ;;  %v8956_v5 = vpop.f32.mrf.mxu1 }
 0x45c   :  { %7327 = vst [vmem:[%s16462_s2 + $0x888] sm:$0xff] %v4236_v9  ;;  %7239 = vst [vmem:[%s16462_s2 + $0x5c8] sm:$0xff] %v8956_v5  ;;  %v924_v54 = vpop.permute.xlu0 %923  ;;  %v926_v27 = vpop.permute.xlu1 %925  ;;  %v14182_v5 = vld [vmem:[%s16460_s0 + $0x5f8] sm:$0xff] }
 0x45d   :  { %v4238_v47 = vpop.f32.mrf.mxu0  ;;  %v5855_v50 = vpop.f32.mrf.mxu1  ;;  %v1667_v8 = vsub.f32 %v13451_v11, %v924_v54  ;;  %v1668_v51 = vsub.f32 %v13456_v41, %v926_v27  ;;  %v14089_v11 = vld [vmem:[%s16460_s0 + $0x5d8] sm:$0xff] }
 0x45e   :  { %7328 = vst [vmem:[%s16462_s2 + $0x890] sm:$0xff] %v4238_v47  ;;  %7236 = vst [vmem:[%s16462_s2 + $0x5b0] sm:$0xff] %v5855_v50 }
 0x45f   :  { %v1967_v28 = vmul.f32 0.1, %v1667_v8  ;;  %v4242_v3 = vpop.f32.mrf.mxu0  ;;  %983 = vrot.lane.b32.xlu0 %v14067_v6, %s9333_s13  ;;  %2723 = vrot.lane.b32.xlu1 %v1966_v24, %s9335_s23  ;;  %v8959_v63 = vpop.f32.mrf.mxu1  ;;  %v1968_v41 = vmul.f32 0.1, %v1668_v51 }
 0x460   :  { %7330 = vst [vmem:[%s16462_s2 + $0x8a0] sm:$0xff] %v4242_v3  ;;  %7245 = vst [vmem:[%s16462_s2 + $0x5f8] sm:$0xff] %v8959_v63  ;;  %v2690_v22 = vpop.permute.xlu0 %2689  ;;  %v928_v46 = vpop.permute.xlu1 %927  ;;  %v14206_v63 = vld [vmem:[%s16460_s0 + $0x600] sm:$0xff] }
 0x461   :  { %v4244_v25 = vpop.f32.mrf.mxu0  ;;  %v5865_v58 = vpop.f32.mrf.mxu1  ;;  %8098 = vmatmul.mubr.msk.f32.gmra.mxu0 %vm3016_vm1, %v2690_v22  ;;  %9071 = vmatprep.mubr.msk.f32.mxu1 %vm3016_vm1, %v2690_v22  ;;  %v1669_v34 = vsub.f32 %v13487_v35, %v928_v46 }
 0x462   :  { %7331 = vst [vmem:[%s16462_s2 + $0x8a8] sm:$0xff] %v4244_v25  ;;  %7242 = vst [vmem:[%s16462_s2 + $0x5e0] sm:$0xff] %v5865_v58  ;;  %4522 = vmatprep.mubr.f32.mxu0 %v16685_v59 }
 0x463   :  { %v4248_v56 = vpop.f32.mrf.mxu0  ;;  %985 = vrot.lane.b32.xlu1 %v14089_v11, %s9333_s13  ;;  %2725 = vrot.lane.b32.xlu0 %v1967_v28, %s9335_s23  ;;  %v8962_v10 = vpop.f32.mrf.mxu1  ;;  %v1969_v35 = vmul.f32 0.1, %v1669_v34 }
 0x464   :  { %7333 = vst [vmem:[%s16462_s2 + $0x8b8] sm:$0xff] %v4248_v56  ;;  %7251 = vst [vmem:[%s16462_s2 + $0x628] sm:$0xff] %v8962_v10  ;;  %v930_v15 = vpop.permute.xlu0 %929  ;;  %v2692_v39 = vpop.permute.xlu1 %2691  ;;  %v14227_v10 = vld [vmem:[%s16460_s0 + $0x608] sm:$0xff] }
 0x465   :  { %v4250_v37 = vpop.f32.mrf.mxu0  ;;  %v5875_v38 = vpop.f32.mrf.mxu1  ;;  %8099 = vmatmul.mubr.msk.f32.gmra.mxu0 %vm3016_vm1, %v2692_v39  ;;  %9072 = vmatmul.mubr.msk.f32.gmra.mxu1 %vm3016_vm1, %v2692_v39  ;;  %v1670_v17 = vsub.f32 %v13513_v44, %v930_v15 }
 0x466   :  { %7334 = vst [vmem:[%s16462_s2 + $0x8c0] sm:$0xff] %v4250_v37  ;;  %7248 = vst [vmem:[%s16462_s2 + $0x610] sm:$0xff] %v5875_v38  ;;  %4528 = vmatprep.mubr.f32.mxu0 %v16685_v59 }
 0x467   :  { %v4254_v19 = vpop.f32.mrf.mxu0  ;;  %2727 = vrot.lane.b32.xlu1 %v1968_v41, %s9335_s23  ;;  %987 = vrot.lane.b32.xlu0 %v14113_v16, %s9333_s13  ;;  %v8965_v43 = vpop.f32.mrf.mxu1  ;;  %v1970_v44 = vmul.f32 0.1, %v1670_v17 }
 0x468   :  { %7336 = vst [vmem:[%s16462_s2 + $0x8d0] sm:$0xff] %v4254_v19  ;;  %7257 = vst [vmem:[%s16462_s2 + $0x658] sm:$0xff] %v8965_v43  ;;  %v932_v45 = vpop.permute.xlu0 %931  ;;  %v934_v33 = vpop.permute.xlu1 %933  ;;  %v14251_v43 = vld [vmem:[%s16460_s0 + $0x610] sm:$0xff] }
 0x469   :  { %v4256_v2 = vpop.f32.mrf.mxu0  ;;  %v5885_v18 = vpop.f32.mrf.mxu1  ;;  %v1671_v52 = vsub.f32 %v13543_v62, %v932_v45  ;;  %v1672_v9 = vsub.f32 %v13548_v30, %v934_v33 }
 0x46a   :  { %7337 = vst [vmem:[%s16462_s2 + $0x8d8] sm:$0xff] %v4256_v2  ;;  %7254 = vst [vmem:[%s16462_s2 + $0x640] sm:$0xff] %v5885_v18 }
 0x46b   :  { %v4260_v14 = vpop.f32.mrf.mxu0  ;;  %989 = vrot.lane.b32.xlu1 %v14137_v20, %s9333_s13  ;;  %2729 = vrot.lane.b32.xlu0 %v1969_v35, %s9335_s23  ;;  %v8968_v1 = vpop.f32.mrf.mxu1  ;;  %v1971_v62 = vmul.f32 0.1, %v1671_v52  ;;  %v1972_v30 = vmul.f32 0.1, %v1672_v9 }
 0x46c   :  { %7339 = vst [vmem:[%s16462_s2 + $0x8e8] sm:$0xff] %v4260_v14  ;;  %7263 = vst [vmem:[%s16462_s2 + $0x688] sm:$0xff] %v8968_v1  ;;  %v2694_v48 = vpop.permute.xlu0 %2693  ;;  %v936_v49 = vpop.permute.xlu1 %935  ;;  %v14275_v1 = vld [vmem:[%s16460_s0 + $0x618] sm:$0xff] }
 0x46d   :  { %v4262_v55 = vpop.f32.mrf.mxu0  ;;  %v5895_v40 = vpop.f32.mrf.mxu1  ;;  %8100 = vmatmul.mubr.msk.f32.gmra.mxu0 %vm3016_vm1, %v2694_v48  ;;  %9074 = vmatprep.mubr.msk.f32.mxu1 %vm3016_vm1, %v2694_v48  ;;  %v1673_v3 = vsub.f32 %v13574_v4, %v936_v49 }
 0x46e   :  { %7340 = vst [vmem:[%s16462_s2 + $0x8f0] sm:$0xff] %v4262_v55  ;;  %7260 = vst [vmem:[%s16462_s2 + $0x670] sm:$0xff] %v5895_v40  ;;  %4534 = vmatprep.mubr.f32.mxu0 %v16685_v59 }
 0x46f   :  { %v4266_v12 = vpop.f32.mrf.mxu0  ;;  %991 = vrot.lane.b32.xlu0 %v14158_v32, %s9333_s13  ;;  %2731 = vrot.lane.b32.xlu1 %v1970_v44, %s9335_s23  ;;  %v8971_v24 = vpop.f32.mrf.mxu1  ;;  %v1973_v4 = vmul.f32 0.1, %v1673_v3 }
 0x470   :  { %7342 = vst [vmem:[%s16462_s2 + $0x900] sm:$0xff] %v4266_v12  ;;  %7269 = vst [vmem:[%s16462_s2 + $0x6b8] sm:$0xff] %v8971_v24  ;;  %v938_v54 = vpop.permute.xlu0 %937  ;;  %v2696_v27 = vpop.permute.xlu1 %2695  ;;  %v14298_v24 = vld [vmem:[%s16460_s0 + $0x620] sm:$0xff] }
 0x471   :  { %v4268_v47 = vpop.f32.mrf.mxu0  ;;  %v5905_v50 = vpop.f32.mrf.mxu1  ;;  %8101 = vmatmul.mubr.msk.f32.gmra.mxu0 %vm3016_vm1, %v2696_v27  ;;  %9075 = vmatmul.mubr.msk.f32.gmra.mxu1 %vm3016_vm1, %v2696_v27  ;;  %v1674_v56 = vsub.f32 %v13597_v53, %v938_v54 }
 0x472   :  { %7343 = vst [vmem:[%s16462_s2 + $0x908] sm:$0xff] %v4268_v47  ;;  %7266 = vst [vmem:[%s16462_s2 + $0x6a0] sm:$0xff] %v5905_v50  ;;  %4540 = vmatprep.mubr.f32.mxu0 %v16685_v59 }
 0x473   :  { %v4272_v8 = vpop.f32.mrf.mxu0  ;;  %993 = vrot.lane.b32.xlu1 %v14182_v5, %s9333_s13  ;;  %2733 = vrot.lane.b32.xlu0 %v1971_v62, %s9335_s23  ;;  %v8974_v28 = vpop.f32.mrf.mxu1  ;;  %v1974_v53 = vmul.f32 0.1, %v1674_v56 }
 0x474   :  { %7345 = vst [vmem:[%s16462_s2 + $0x918] sm:$0xff] %v4272_v8  ;;  %7275 = vst [vmem:[%s16462_s2 + $0x6e8] sm:$0xff] %v8974_v28  ;;  %v940_v51 = vpop.permute.xlu0 %939  ;;  %v942_v22 = vpop.permute.xlu1 %941  ;;  %v14324_v28 = vld [vmem:[%s16460_s0 + $0x628] sm:$0xff] }
 0x475   :  { %v4274_v46 = vpop.f32.mrf.mxu0  ;;  %v5915_v25 = vpop.f32.mrf.mxu1  ;;  %v1675_v19 = vsub.f32 %v13621_v31, %v940_v51  ;;  %v1676_v14 = vsub.f32 %v13626_v23, %v942_v22 }
 0x476   :  { %7346 = vst [vmem:[%s16462_s2 + $0x920] sm:$0xff] %v4274_v46  ;;  %7272 = vst [vmem:[%s16462_s2 + $0x6d0] sm:$0xff] %v5915_v25 }
 0x477   :  { %v4278_v58 = vpop.f32.mrf.mxu0  ;;  %2735 = vrot.lane.b32.xlu1 %v1972_v30, %s9335_s23  ;;  %995 = vrot.lane.b32.xlu0 %v14206_v63, %s9333_s13  ;;  %v8977_v41 = vpop.f32.mrf.mxu1  ;;  %v1975_v31 = vmul.f32 0.1, %v1675_v19  ;;  %v1976_v23 = vmul.f32 0.1, %v1676_v14 }
 0x478   :  { %7348 = vst [vmem:[%s16462_s2 + $0x930] sm:$0xff] %v4278_v58  ;;  %7281 = vst [vmem:[%s16462_s2 + $0x718] sm:$0xff] %v8977_v41  ;;  %v2698_v34 = vpop.permute.xlu0 %2697  ;;  %v944_v15 = vpop.permute.xlu1 %943  ;;  %v14350_v41 = vld [vmem:[%s16460_s0 + $0x630] sm:$0xff] }
 0x479   :  { %v4280_v39 = vpop.f32.mrf.mxu0  ;;  %v5925_v37 = vpop.f32.mrf.mxu1  ;;  %8102 = vmatmul.mubr.msk.f32.gmra.mxu0 %vm3016_vm1, %v2698_v34  ;;  %9077 = vmatprep.mubr.msk.f32.mxu1 %vm3016_vm1, %v2698_v34  ;;  %v1677_v12 = vsub.f32 %v13651_v26, %v944_v15 }
 0x47a   :  { %7349 = vst [vmem:[%s16462_s2 + $0x938] sm:$0xff] %v4280_v39  ;;  %7278 = vst [vmem:[%s16462_s2 + $0x700] sm:$0xff] %v5925_v37  ;;  %4546 = vmatprep.mubr.f32.mxu0 %v16685_v59 }
 0x47b   :  { %v4284_v38 = vpop.f32.mrf.mxu0  ;;  %997 = vrot.lane.b32.xlu1 %v14227_v10, %s9333_s13  ;;  %2737 = vrot.lane.b32.xlu0 %v1973_v4, %s9335_s23  ;;  %v8980_v35 = vpop.f32.mrf.mxu1  ;;  %v1977_v26 = vmul.f32 0.1, %v1677_v12 }
 0x47c   :  { %7351 = vst [vmem:[%s16462_s2 + $0x948] sm:$0xff] %v4284_v38  ;;  %7287 = vst [vmem:[%s16462_s2 + $0x748] sm:$0xff] %v8980_v35  ;;  %v946_v17 = vpop.permute.xlu0 %945  ;;  %v2700_v45 = vpop.permute.xlu1 %2699  ;;  %v14376_v35 = vld [vmem:[%s16460_s0 + $0x638] sm:$0xff] }
 0x47d   :  { %v4286_v33 = vpop.f32.mrf.mxu0  ;;  %v5935_v2 = vpop.f32.mrf.mxu1  ;;  %8103 = vmatmul.mubr.msk.f32.gmra.mxu0 %vm3016_vm1, %v2700_v45  ;;  %9078 = vmatmul.mubr.msk.f32.gmra.mxu1 %vm3016_vm1, %v2700_v45  ;;  %v1678_v8 = vsub.f32 %v13673_v61, %v946_v17 }
 0x47e   :  { %7352 = vst [vmem:[%s16462_s2 + $0x950] sm:$0xff] %v4286_v33  ;;  %7284 = vst [vmem:[%s16462_s2 + $0x730] sm:$0xff] %v5935_v2  ;;  %4552 = vmatprep.mubr.f32.mxu0 %v16685_v59 }
 0x47f   :  { %v4290_v18 = vpop.f32.mrf.mxu0  ;;  %999 = vrot.lane.b32.xlu0 %v14251_v43, %s9333_s13  ;;  %2739 = vrot.lane.b32.xlu1 %v1974_v53, %s9335_s23  ;;  %v8983_v44 = vpop.f32.mrf.mxu1  ;;  %v1978_v61 = vmul.f32 0.1, %v1678_v8 }
 0x480   :  { %7354 = vst [vmem:[%s16462_s2 + $0x960] sm:$0xff] %v4290_v18  ;;  %7293 = vst [vmem:[%s16462_s2 + $0x778] sm:$0xff] %v8983_v44  ;;  %v948_v52 = vpop.permute.xlu0 %947  ;;  %v14277_v48 = vpop.permute.xlu1 %949  ;;  %v14403_v44 = vld [vmem:[%s16460_s0 + $0x640] sm:$0xff] }
 0x481   :  { %v4292_v49 = vpop.f32.mrf.mxu0  ;;  %v5945_v55 = vpop.f32.mrf.mxu1  ;;  %v1679_v58 = vsub.f32 %v13698_v42, %v948_v52  ;;  %v1680_v38 = vsub.f32 %v13703_v36, %v14277_v48 }
 0x482   :  { %7355 = vst [vmem:[%s16462_s2 + $0x968] sm:$0xff] %v4292_v49  ;;  %7290 = vst [vmem:[%s16462_s2 + $0x760] sm:$0xff] %v5945_v55 }
 0x483   :  { %v4296_v40 = vpop.f32.mrf.mxu0  ;;  %1001 = vrot.lane.b32.xlu1 %v14275_v1, %s9333_s13  ;;  %2741 = vrot.lane.b32.xlu0 %v1975_v31, %s9335_s23  ;;  %v8986_v62 = vpop.f32.mrf.mxu1  ;;  %v1979_v42 = vmul.f32 0.1, %v1679_v58  ;;  %v1980_v36 = vmul.f32 0.1, %v1680_v38  ;;  %v14485_v58 = vld [vmem:[%s16460_s0 + $0x658] sm:$0xff]  ;;  %v9324_v38 = vld [vmem:[%s16460_s0 + $0x570] sm:$0xff] }
 0x484   :  { %7357 = vst [vmem:[%s16462_s2 + $0x978] sm:$0xff] %v4296_v40  ;;  %7299 = vst [vmem:[%s16462_s2 + $0x7a8] sm:$0xff] %v8986_v62  ;;  %v2702_v9 = vpop.permute.xlu0 %2701  ;;  %v14300_v54 = vpop.permute.xlu1 %951  ;;  %v14430_v62 = vld [vmem:[%s16460_s0 + $0x648] sm:$0xff] }
 0x485   :  { %v4298_v27 = vpop.f32.mrf.mxu0  ;;  %v5955_v47 = vpop.f32.mrf.mxu1  ;;  %8104 = vmatmul.mubr.msk.f32.gmra.mxu0 %vm3016_vm1, %v2702_v9  ;;  %9080 = vmatprep.mubr.msk.f32.mxu1 %vm3016_vm1, %v2702_v9  ;;  %v1681_v18 = vsub.f32 %v13723_v13, %v14300_v54 }
 0x486   :  { %7358 = vst [vmem:[%s16462_s2 + $0x980] sm:$0xff] %v4298_v27  ;;  %7296 = vst [vmem:[%s16462_s2 + $0x790] sm:$0xff] %v5955_v47  ;;  %4558 = vmatprep.mubr.f32.mxu0 %v16685_v59 }
 0x487   :  { %v4302_v50 = vpop.f32.mrf.mxu0  ;;  %2743 = vrot.lane.b32.xlu1 %v1976_v23, %s9335_s23  ;;  %1003 = vrot.lane.b32.xlu0 %v14298_v24, %s9333_s13  ;;  %v8989_v30 = vpop.f32.mrf.mxu1  ;;  %v1981_v13 = vmul.f32 0.1, %v1681_v18  ;;  %v9325_v18 = vld [vmem:[%s16460_s0 + $0x578] sm:$0xff] }
 0x488   :  { %7360 = vst [vmem:[%s16462_s2 + $0x990] sm:$0xff] %v4302_v50  ;;  %7305 = vst [vmem:[%s16462_s2 + $0x7d8] sm:$0xff] %v8989_v30  ;;  %v14326_v3 = vpop.permute.xlu0 %953  ;;  %v2704_v51 = vpop.permute.xlu1 %2703  ;;  %v14456_v30 = vld [vmem:[%s16460_s0 + $0x650] sm:$0xff] }
 0x489   :  { %v4304_v22 = vpop.f32.mrf.mxu0  ;;  %v5965_v46 = vpop.f32.mrf.mxu1  ;;  %8105 = vmatmul.mubr.msk.f32.gmra.mxu0 %vm3016_vm1, %v2704_v51  ;;  %9081 = vmatmul.mubr.msk.f32.gmra.mxu1 %vm3016_vm1, %v2704_v51  ;;  %v1682_v40 = vsub.f32 %v13747_v0, %v14326_v3 }
 0x48a   :  { %7361 = vst [vmem:[%s16462_s2 + $0x998] sm:$0xff] %v4304_v22  ;;  %7302 = vst [vmem:[%s16462_s2 + $0x7c0] sm:$0xff] %v5965_v46  ;;  %4564 = vmatprep.mubr.f32.mxu0 %v16685_v59 }
 0x48b   :  { %v4308_v25 = vpop.f32.mrf.mxu0  ;;  %1005 = vrot.lane.b32.xlu1 %v14324_v28, %s9333_s13  ;;  %2745 = vrot.lane.b32.xlu0 %v1977_v26, %s9335_s23  ;;  %v8992_v4 = vpop.f32.mrf.mxu1  ;;  %v1982_v0 = vmul.f32 0.1, %v1682_v40 }
 0x48c   :  { %7363 = vst [vmem:[%s16462_s2 + $0x9a8] sm:$0xff] %v4308_v25  ;;  %7311 = vst [vmem:[%s16462_s2 + $0x808] sm:$0xff] %v8992_v4  ;;  %v14352_v56 = vpop.permute.xlu0 %955  ;;  %v14354_v34 = vpop.permute.xlu1 %957  ;;  %v9323_v25 = vld [vmem:[%s16460_s0 + $0x568] sm:$0xff] }
 0x48d   :  { %v4310_v15 = vpop.f32.mrf.mxu0  ;;  %v5975_v39 = vpop.f32.mrf.mxu1  ;;  %v1683_v50 = vsub.f32 %v13765_v57, %v14352_v56  ;;  %v1684_v4 = vsub.f32 %v9323_v25, %v14354_v34 }
 0x48e   :  { %7364 = vst [vmem:[%s16462_s2 + $0x9b0] sm:$0xff] %v4310_v15  ;;  %7308 = vst [vmem:[%s16462_s2 + $0x7f0] sm:$0xff] %v5975_v39 }
 0x48f   :  { %v4314_v37 = vpop.f32.mrf.mxu0  ;;  %1007 = vrot.lane.b32.xlu0 %v14350_v41, %s9333_s13  ;;  %2747 = vrot.lane.b32.xlu1 %v1978_v61, %s9335_s23  ;;  %v8995_v53 = vpop.f32.mrf.mxu1  ;;  %v1983_v57 = vmul.f32 0.1, %v1683_v50  ;;  %v1984_v34 = vmul.f32 0.1, %v1684_v4  ;;  %v9328_v4 = vld [vmem:[%s16460_s0 + $0x590] sm:$0xff] }
 0x490   :  { %7366 = vst [vmem:[%s16462_s2 + $0x9c0] sm:$0xff] %v4314_v37  ;;  %7317 = vst [vmem:[%s16462_s2 + $0x838] sm:$0xff] %v8995_v53  ;;  %v2706_v19 = vpop.permute.xlu0 %2705  ;;  %v14378_v17 = vpop.permute.xlu1 %959 }
 0x491   :  { %v4316_v45 = vpop.f32.mrf.mxu0  ;;  %v5985_v33 = vpop.f32.mrf.mxu1  ;;  %8106 = vmatmul.mubr.msk.f32.gmra.mxu0 %vm3016_vm1, %v2706_v19  ;;  %9083 = vmatprep.mubr.msk.f32.mxu1 %vm3016_vm1, %v2706_v19  ;;  %v1685_v19 = vsub.f32 %v9324_v38, %v14378_v17 }
 0x492   :  { %7367 = vst [vmem:[%s16462_s2 + $0x9c8] sm:$0xff] %v4316_v45  ;;  %7314 = vst [vmem:[%s16462_s2 + $0x820] sm:$0xff] %v5985_v33  ;;  %4570 = vmatprep.mubr.f32.mxu0 %v16685_v59  ;;  %v14514_v45 = vld [vmem:[%s16460_s0 + $0x660] sm:$0xff] }
 0x493   :  { %v4320_v2 = vpop.f32.mrf.mxu0  ;;  %1009 = vrot.lane.b32.xlu1 %v14376_v35, %s9333_s13  ;;  %2749 = vrot.lane.b32.xlu0 %v1979_v42, %s9335_s23  ;;  %v8998_v31 = vpop.f32.mrf.mxu1  ;;  %v1985_v17 = vmul.f32 0.1, %v1685_v19 }
 0x494   :  { %7369 = vst [vmem:[%s16462_s2 + $0x9d8] sm:$0xff] %v4320_v2  ;;  %7323 = vst [vmem:[%s16462_s2 + $0x868] sm:$0xff] %v8998_v31  ;;  %v14405_v14 = vpop.permute.xlu0 %961  ;;  %v2708_v52 = vpop.permute.xlu1 %2707 }
 0x495   :  { %v4322_v48 = vpop.f32.mrf.mxu0  ;;  %v5995_v49 = vpop.f32.mrf.mxu1  ;;  %8107 = vmatmul.mubr.msk.f32.gmra.mxu0 %vm3016_vm1, %v2708_v52  ;;  %9084 = vmatmul.mubr.msk.f32.gmra.mxu1 %vm3016_vm1, %v2708_v52  ;;  %v1686_v52 = vsub.f32 %v9325_v18, %v14405_v14 }
 0x496   :  { %7370 = vst [vmem:[%s16462_s2 + $0x9e0] sm:$0xff] %v4322_v48  ;;  %7320 = vst [vmem:[%s16462_s2 + $0x850] sm:$0xff] %v5995_v49  ;;  %4576 = vmatprep.mubr.f32.mxu0 %v16685_v59  ;;  %v14540_v49 = vld [vmem:[%s16460_s0 + $0x668] sm:$0xff] }
 0x497   :  { %v4326_v55 = vpop.f32.mrf.mxu0  ;;  %2751 = vrot.lane.b32.xlu1 %v1980_v36, %s9335_s23  ;;  %1011 = vrot.lane.b32.xlu0 %v14403_v44, %s9333_s13  ;;  %v9001_v23 = vpop.f32.mrf.mxu1  ;;  %v1986_v14 = vmul.f32 0.1, %v1686_v52 }
 0x498   :  { %7372 = vst [vmem:[%s16462_s2 + $0x9f0] sm:$0xff] %v4326_v55  ;;  %7329 = vst [vmem:[%s16462_s2 + $0x898] sm:$0xff] %v9001_v23  ;;  %v14432_v12 = vpop.permute.xlu0 %963  ;;  %v14434_v9 = vpop.permute.xlu1 %965 }
 0x499   :  { %v4328_v54 = vpop.f32.mrf.mxu0  ;;  %v6005_v27 = vpop.f32.mrf.mxu1 }
 0x49a   :  { %7373 = vst [vmem:[%s16462_s2 + $0x9f8] sm:$0xff] %v4328_v54  ;;  %7326 = vst [vmem:[%s16462_s2 + $0x880] sm:$0xff] %v6005_v27  ;;  %v9326_v54 = vld [vmem:[%s16460_s0 + $0x580] sm:$0xff] }
 0x49b   :  { %v4332_v47 = vpop.f32.mrf.mxu0  ;;  %1013 = vrot.lane.b32.xlu1 %v14430_v62, %s9333_s13  ;;  %2753 = vrot.lane.b32.xlu0 %v1981_v13, %s9335_s23  ;;  %v9004_v26 = vpop.f32.mrf.mxu1  ;;  %v1687_v27 = vsub.f32 %v9326_v54, %v14432_v12 }
 0x49c   :  { %7375 = vst [vmem:[%s16462_s2 + $0xa08] sm:$0xff] %v4332_v47  ;;  %7335 = vst [vmem:[%s16462_s2 + $0x8c8] sm:$0xff] %v9004_v26  ;;  %v2710_v8 = vpop.permute.xlu0 %2709  ;;  %v14458_v3 = vpop.permute.xlu1 %967  ;;  %v14567_v47 = vld [vmem:[%s16460_s0 + $0x670] sm:$0xff] }
 0x49d   :  { %v4334_v51 = vpop.f32.mrf.mxu0  ;;  %v6015_v22 = vpop.f32.mrf.mxu1  ;;  %8108 = vmatmul.mubr.msk.f32.gmra.mxu0 %vm3016_vm1, %v2710_v8  ;;  %9086 = vmatprep.mubr.msk.f32.mxu1 %vm3016_vm1, %v2710_v8  ;;  %v1987_v12 = vmul.f32 0.1, %v1687_v27  ;;  %v9327_v8 = vld [vmem:[%s16460_s0 + $0x588] sm:$0xff] }
 0x49e   :  { %7376 = vst [vmem:[%s16462_s2 + $0xa10] sm:$0xff] %v4334_v51  ;;  %7332 = vst [vmem:[%s16462_s2 + $0x8b0] sm:$0xff] %v6015_v22  ;;  %4582 = vmatprep.mubr.f32.mxu0 %v16685_v59  ;;  %v1688_v51 = vsub.f32 %v9327_v8, %v14434_v9 }
 0x49f   :  { %v4338_v46 = vpop.f32.mrf.mxu0  ;;  %1015 = vrot.lane.b32.xlu0 %v14456_v30, %s9333_s13  ;;  %2755 = vrot.lane.b32.xlu1 %v1982_v0, %s9335_s23  ;;  %v9007_v61 = vpop.f32.mrf.mxu1 }
 0x4a0   :  { %7378 = vst [vmem:[%s16462_s2 + $0xa20] sm:$0xff] %v4338_v46  ;;  %7341 = vst [vmem:[%s16462_s2 + $0x8f8] sm:$0xff] %v9007_v61  ;;  %v14487_v56 = vpop.permute.xlu0 %969  ;;  %v2712_v15 = vpop.permute.xlu1 %2711  ;;  %v14591_v46 = vld [vmem:[%s16460_s0 + $0x678] sm:$0xff]  ;;  %v1988_v25 = vmul.f32 0.1, %v1688_v51  ;;  %v9331_v51 = vld [vmem:[%s16460_s0 + $0x5a8] sm:$0xff] }
 0x4a1   :  { %v4340_v39 = vpop.f32.mrf.mxu0  ;;  %v6025_v42 = vpop.f32.mrf.mxu1  ;;  %8109 = vmatmul.mubr.msk.f32.gmra.mxu0 %vm3016_vm1, %v2712_v15  ;;  %9087 = vmatmul.mubr.msk.f32.gmra.mxu1 %vm3016_vm1, %v2712_v15  ;;  %v1689_v15 = vsub.f32 %v9328_v4, %v14458_v3 }
 0x4a2   :  { %7379 = vst [vmem:[%s16462_s2 + $0xa28] sm:$0xff] %v4340_v39  ;;  %7338 = vst [vmem:[%s16462_s2 + $0x8e0] sm:$0xff] %v6025_v42  ;;  %4588 = vmatprep.mubr.f32.mxu0 %v16685_v59 }
 0x4a3   :  { %v4344_v37 = vpop.f32.mrf.mxu0  ;;  %1017 = vrot.lane.b32.xlu1 %v14485_v58, %s9333_s13  ;;  %2757 = vrot.lane.b32.xlu0 %v1983_v57, %s9335_s23  ;;  %v9010_v53 = vpop.f32.mrf.mxu1 }
 0x4a4   :  { %7381 = vst [vmem:[%s16462_s2 + $0xa38] sm:$0xff] %v4344_v37  ;;  %7347 = vst [vmem:[%s16462_s2 + $0x928] sm:$0xff] %v9010_v53  ;;  %v14516_v33 = vpop.permute.xlu0 %971  ;;  %v1989_v53 = vmul.f32 0.1, %v1689_v15  ;;  %v974_v52 = vpop.permute.xlu1 %973  ;;  %v14709_v15 = vld [vmem:[%s16460_s0 + $0x6a0] sm:$0xff] }
 0x4a5   :  { %v4346_v36 = vpop.f32.mrf.mxu0  ;;  %v6035_v2 = vpop.f32.mrf.mxu1 }
 0x4a6   :  { %7382 = vst [vmem:[%s16462_s2 + $0xa40] sm:$0xff] %v4346_v36  ;;  %7344 = vst [vmem:[%s16462_s2 + $0x910] sm:$0xff] %v6035_v2  ;;  %v14635_v36 = vld [vmem:[%s16460_s0 + $0x688] sm:$0xff]  ;;  %v9329_v2 = vld [vmem:[%s16460_s0 + $0x598] sm:$0xff] }
 0x4a7   :  { %v4350_v31 = vpop.f32.mrf.mxu0  ;;  %2759 = vrot.lane.b32.xlu1 %v1984_v34, %s9335_s23  ;;  %1019 = vrot.lane.b32.xlu0 %v14514_v45, %s9333_s13  ;;  %v9013_v48 = vpop.f32.mrf.mxu1  ;;  %v14615_v34 = vld [vmem:[%s16460_s0 + $0x680] sm:$0xff] }
 0x4a8   :  { %7384 = vst [vmem:[%s16462_s2 + $0xa50] sm:$0xff] %v4350_v31  ;;  %7353 = vst [vmem:[%s16462_s2 + $0x958] sm:$0xff] %v9013_v48  ;;  %v2714_v13 = vpop.permute.xlu0 %2713 }
 0x4a9   :  { %v4352_v55 = vpop.f32.mrf.mxu0  ;;  %v6045_v23 = vpop.f32.mrf.mxu1  ;;  %8110 = vmatmul.mubr.msk.f32.gmra.mxu0 %vm3016_vm1, %v2714_v13  ;;  %9089 = vmatprep.mubr.msk.f32.mxu1 %vm3016_vm1, %v2714_v13 }
 0x4aa   :  { %7385 = vst [vmem:[%s16462_s2 + $0xa58] sm:$0xff] %v4352_v55  ;;  %7350 = vst [vmem:[%s16462_s2 + $0x940] sm:$0xff] %v6045_v23  ;;  %4594 = vmatprep.mubr.f32.mxu0 %v16685_v59  ;;  %v9330_v23 = vld [vmem:[%s16460_s0 + $0x5a0] sm:$0xff] }
 0x4ab   :  { %v4356_v40 = vpop.f32.mrf.mxu0  ;;  %1021 = vrot.lane.b32.xlu1 %v14540_v49, %s9333_s13  ;;  %2761 = vrot.lane.b32.xlu0 %v1985_v17, %s9335_s23  ;;  %v9016_v0 = vpop.f32.mrf.mxu1  ;;  %v1690_v17 = vsub.f32 %v9329_v2, %v14487_v56  ;;  %v14659_v56 = vld [vmem:[%s16460_s0 + $0x690] sm:$0xff] }
 0x4ac   :  { %7387 = vst [vmem:[%s16462_s2 + $0xa68] sm:$0xff] %v4356_v40  ;;  %7359 = vst [vmem:[%s16462_s2 + $0x988] sm:$0xff] %v9016_v0 }
 0x4ad   :  { %v4358_v26 = vpop.f32.mrf.mxu0  ;;  %v6055_v50 = vpop.f32.mrf.mxu1  ;;  %v1990_v55 = vmul.f32 0.1, %v1690_v17 }
 0x4ae   :  { %7388 = vst [vmem:[%s16462_s2 + $0xa70] sm:$0xff] %v4358_v26  ;;  %7356 = vst [vmem:[%s16462_s2 + $0x970] sm:$0xff] %v6055_v50  ;;  %v14683_v26 = vld [vmem:[%s16460_s0 + $0x698] sm:$0xff] }
 0x4af   :  { %v4362_v22 = vpop.f32.mrf.mxu0  ;;  %1023 = vrot.lane.b32.xlu0 %v14567_v47, %s9333_s13  ;;  %2763 = vrot.lane.b32.xlu1 %v1986_v14, %s9335_s23  ;;  %v9019_v57 = vpop.f32.mrf.mxu1  ;;  %v1691_v14 = vsub.f32 %v9330_v23, %v14516_v33 }
 0x4b0   :  { %7390 = vst [vmem:[%s16462_s2 + $0xa80] sm:$0xff] %v4362_v22  ;;  %7365 = vst [vmem:[%s16462_s2 + $0x9b8] sm:$0xff] %v9019_v57  ;;  %v976_v33 = vpop.permute.xlu0 %975  ;;  %v1692_v22 = vsub.f32 %v9331_v51, %v974_v52  ;;  %v14783_v51 = vld [vmem:[%s16460_s0 + $0x6b8] sm:$0xff] }
 0x4b1   :  { %v4364_v9 = vpop.f32.mrf.mxu0  ;;  %v6065_v61 = vpop.f32.mrf.mxu1  ;;  %v1991_v50 = vmul.f32 0.1, %v1691_v14 }
 0x4b2   :  { %7391 = vst [vmem:[%s16462_s2 + $0xa88] sm:$0xff] %v4364_v9  ;;  %7362 = vst [vmem:[%s16462_s2 + $0x9a0] sm:$0xff] %v6065_v61 }
 0x4b3   :  { %v4368_v39 = vpop.f32.mrf.mxu0  ;;  %1025 = vrot.lane.b32.xlu1 %v14591_v46, %s9333_s13  ;;  %2765 = vrot.lane.b32.xlu0 %v1987_v12, %s9335_s23  ;;  %v9022_v42 = vpop.f32.mrf.mxu1 }
 0x4b4   :  { %7393 = vst [vmem:[%s16462_s2 + $0xa98] sm:$0xff] %v4368_v39  ;;  %7371 = vst [vmem:[%s16462_s2 + $0x9e8] sm:$0xff] %v9022_v42  ;;  %v1992_v39 = vmul.f32 0.1, %v1692_v22  ;;  %v9332_v42 = vld [vmem:[%s16460_s0 + $0x5b0] sm:$0xff] }
 0x4b5   :  { %v4370_v3 = vpop.f32.mrf.mxu0  ;;  %v6075_v37 = vpop.f32.mrf.mxu1 }
 0x4b6   :  { %7394 = vst [vmem:[%s16462_s2 + $0xaa0] sm:$0xff] %v4370_v3  ;;  %7368 = vst [vmem:[%s16462_s2 + $0x9d0] sm:$0xff] %v6075_v37  ;;  %v1693_v3 = vsub.f32 %v9332_v42, %v976_v33  ;;  %v14807_v42 = vld [vmem:[%s16460_s0 + $0x6c0] sm:$0xff] }
 0x4b7   :  { %v4374_v38 = vpop.f32.mrf.mxu0  ;;  %2767 = vrot.lane.b32.xlu1 %v1988_v25, %s9335_s23  ;;  %1027 = vrot.lane.b32.xlu0 %v14615_v34, %s9333_s13  ;;  %v9025_v19 = vpop.f32.mrf.mxu1 }
 0x4b8   :  { %7396 = vst [vmem:[%s16462_s2 + $0xab0] sm:$0xff] %v4374_v38  ;;  %7377 = vst [vmem:[%s16462_s2 + $0xa18] sm:$0xff] %v9025_v19 }
 0x4b9   :  { %v4376_v31 = vpop.f32.mrf.mxu0  ;;  %v6085_v18 = vpop.f32.mrf.mxu1 }
 0x4ba   :  { %7397 = vst [vmem:[%s16462_s2 + $0xab8] sm:$0xff] %v4376_v31  ;;  %7374 = vst [vmem:[%s16462_s2 + $0xa00] sm:$0xff] %v6085_v18  ;;  %v14735_v31 = vld [vmem:[%s16460_s0 + $0x6a8] sm:$0xff]  ;;  %v1993_v18 = vmul.f32 0.1, %v1693_v3 }
 0x4bb   :  { %v4380_v48 = vpop.f32.mrf.mxu0  ;;  %1029 = vrot.lane.b32.xlu1 %v14635_v36, %s9333_s13  ;;  %2769 = vrot.lane.b32.xlu0 %v1989_v53, %s9335_s23  ;;  %v9028_v13 = vpop.f32.mrf.mxu1 }
 0x4bc   :  { %7399 = vst [vmem:[%s16462_s2 + $0xac8] sm:$0xff] %v4380_v48  ;;  %7383 = vst [vmem:[%s16462_s2 + $0xa48] sm:$0xff] %v9028_v13 }
 0x4bd   :  { %v4382_v40 = vpop.f32.mrf.mxu0  ;;  %v6095_v54 = vpop.f32.mrf.mxu1 }
 0x4be   :  { %7400 = vst [vmem:[%s16462_s2 + $0xad0] sm:$0xff] %v4382_v40  ;;  %7380 = vst [vmem:[%s16462_s2 + $0xa30] sm:$0xff] %v6095_v54  ;;  %v14759_v40 = vld [vmem:[%s16460_s0 + $0x6b0] sm:$0xff] }
 0x4bf   :  { %v4386_v27 = vpop.f32.mrf.mxu0  ;;  %1031 = vrot.lane.b32.xlu0 %v14659_v56, %s9333_s13  ;;  %2771 = vrot.lane.b32.xlu1 %v1990_v55, %s9335_s23  ;;  %v9031_v0 = vpop.f32.mrf.mxu1 }
 0x4c0   :  { %7402 = vst [vmem:[%s16462_s2 + $0xae0] sm:$0xff] %v4386_v27  ;;  %7389 = vst [vmem:[%s16462_s2 + $0xa78] sm:$0xff] %v9031_v0 }
 0x4c1   :  { %v4388_v12 = vpop.f32.mrf.mxu0  ;;  %v2716_v8 = vpop.permute.xlu1 %2715 }
 0x4c2   :  { %7403 = vst [vmem:[%s16462_s2 + $0xae8] sm:$0xff] %v4388_v12  ;;  %8111 = vmatmul.mubr.msk.f32.gmra.mxu0 %vm3016_vm1, %v2716_v8  ;;  %v6105_v57 = vpop.f32.mrf.mxu1  ;;  %9090 = vmatmul.mubr.msk.f32.gmra.mxu1 %vm3016_vm1, %v2716_v8 }
 0x4c3   :  { %7386 = vst [vmem:[%s16462_s2 + $0xa60] sm:$0xff] %v6105_v57  ;;  %v4392_v9 = vpop.f32.mrf.mxu0  ;;  %1033 = vrot.lane.b32.xlu1 %v14683_v26, %s9333_s13  ;;  %2773 = vrot.lane.b32.xlu0 %v1991_v50, %s9335_s23 }
 0x4c4   :  { %7405 = vst [vmem:[%s16462_s2 + $0xaf8] sm:$0xff] %v4392_v9  ;;  %v9034_v61 = vpop.f32.mrf.mxu1  ;;  %4600 = vmatprep.mubr.f32.mxu0 %v16685_v59 }
 0x4c5   :  { %7395 = vst [vmem:[%s16462_s2 + $0xaa8] sm:$0xff] %v9034_v61  ;;  %v4394_v25 = vpop.f32.mrf.mxu0  ;;  %v978_v4 = vpop.permute.xlu1 %977 }
 0x4c6   :  { %7406 = vst [vmem:[%s16462_s2 + $0xb00] sm:$0xff] %v4394_v25  ;;  %v2718_v37 = vpop.permute.xlu0 %2717  ;;  %v6115_v53 = vpop.f32.mrf.mxu1  ;;  %v1694_v52 = vsub.f32 %v14004_v21, %v978_v4 }
 0x4c7   :  { %8112 = vmatmul.mubr.msk.f32.gmra.mxu0 %vm3016_vm1, %v2718_v37  ;;  %7392 = vst [vmem:[%s16462_s2 + $0xa90] sm:$0xff] %v6115_v53  ;;  %9092 = vmatprep.mubr.msk.f32.mxu1 %vm3016_vm1, %v2718_v37  ;;  %v4398_v38 = vpop.f32.mrf.mxu0 }
 0x4c8   :  { %7408 = vst [vmem:[%s16462_s2 + $0xb10] sm:$0xff] %v4398_v38  ;;  %2775 = vrot.lane.b32.xlu1 %v1992_v39, %s9335_s23  ;;  %1035 = vrot.lane.b32.xlu0 %v14709_v15, %s9333_s13  ;;  %v9037_v19 = vpop.f32.mrf.mxu1  ;;  %v1994_v54 = vmul.f32 0.1, %v1694_v52 }
 0x4c9   :  { %7401 = vst [vmem:[%s16462_s2 + $0xad8] sm:$0xff] %v9037_v19  ;;  %v4400_v2 = vpop.f32.mrf.mxu0  ;;  %v2720_v17 = vpop.permute.xlu1 %2719  ;;  %4606 = vmatprep.mubr.f32.mxu0 %v16685_v59 }
 0x4ca   :  { %7409 = vst [vmem:[%s16462_s2 + $0xb18] sm:$0xff] %v4400_v2  ;;  %v980_v48 = vpop.permute.xlu0 %979  ;;  %v6125_v13 = vpop.f32.mrf.mxu1  ;;  %9093 = vmatmul.mubr.msk.f32.gmra.mxu1 %vm3016_vm1, %v2720_v17 }
 0x4cb   :  { %8113 = vmatmul.mubr.msk.f32.gmra.mxu0 %vm3016_vm1, %v2720_v17  ;;  %7398 = vst [vmem:[%s16462_s2 + $0xac0] sm:$0xff] %v6125_v13  ;;  %v4404_v55 = vpop.f32.mrf.mxu0  ;;  %v1695_v27 = vsub.f32 %v14023_v29, %v980_v48  ;;  %v14828_v17 = vld [vmem:[%s16460_s0 + $0x6c8] sm:$0xff] }
 0x4cc   :  { %7411 = vst [vmem:[%s16462_s2 + $0xb28] sm:$0xff] %v4404_v55  ;;  %1037 = vrot.lane.b32.xlu1 %v14735_v31, %s9333_s13  ;;  %2777 = vrot.lane.b32.xlu0 %v1993_v18, %s9335_s23  ;;  %v9040_v21 = vpop.f32.mrf.mxu1 }
 0x4cd   :  { %7407 = vst [vmem:[%s16462_s2 + $0xb08] sm:$0xff] %v9040_v21  ;;  %v4406_v23 = vpop.f32.mrf.mxu0  ;;  %v982_v14 = vpop.permute.xlu1 %981  ;;  %4612 = vmatprep.mubr.f32.mxu0 %v16685_v59  ;;  %v1995_v22 = vmul.f32 0.1, %v1695_v27 }
 0x4ce   :  { %7412 = vst [vmem:[%s16462_s2 + $0xb30] sm:$0xff] %v4406_v23  ;;  %v2722_v0 = vpop.permute.xlu0 %2721  ;;  %v6135_v33 = vpop.f32.mrf.mxu1  ;;  %v1696_v57 = vsub.f32 %v14043_v60, %v982_v14  ;;  %v14849_v23 = vld [vmem:[%s16460_s0 + $0x6d0] sm:$0xff] }
 0x4cf   :  { %8114 = vmatmul.mubr.msk.f32.gmra.mxu0 %vm3016_vm1, %v2722_v0  ;;  %7404 = vst [vmem:[%s16462_s2 + $0xaf0] sm:$0xff] %v6135_v33  ;;  %9095 = vmatprep.mubr.msk.f32.mxu1 %vm3016_vm1, %v2722_v0  ;;  %v4410_v50 = vpop.f32.mrf.mxu0 }
 0x4d0   :  { %7414 = vst [vmem:[%s16462_s2 + $0xb40] sm:$0xff] %v4410_v50  ;;  %2779 = vrot.lane.b32.xlu1 %v1994_v54, %s9335_s23  ;;  %1039 = vrot.lane.b32.xlu0 %v14759_v40, %s9333_s13  ;;  %v9043_v29 = vpop.f32.mrf.mxu1  ;;  %v1996_v3 = vmul.f32 0.1, %v1696_v57  ;;  %v14870_v50 = vld [vmem:[%s16460_s0 + $0x6d8] sm:$0xff] }
 0x4d1   :  { %7413 = vst [vmem:[%s16462_s2 + $0xb38] sm:$0xff] %v9043_v29  ;;  %v4412_v12 = vpop.f32.mrf.mxu0  ;;  %v2724_v8 = vpop.permute.xlu1 %2723  ;;  %4618 = vmatprep.mubr.f32.mxu0 %v16685_v59 }
 0x4d2   :  { %7415 = vst [vmem:[%s16462_s2 + $0xb48] sm:$0xff] %v4412_v12  ;;  %v984_v9 = vpop.permute.xlu0 %983  ;;  %v6145_v61 = vpop.f32.mrf.mxu1  ;;  %9096 = vmatmul.mubr.msk.f32.gmra.mxu1 %vm3016_vm1, %v2724_v8 }
 0x4d3   :  { %8115 = vmatmul.mubr.msk.f32.gmra.mxu0 %vm3016_vm1, %v2724_v8  ;;  %7410 = vst [vmem:[%s16462_s2 + $0xb20] sm:$0xff] %v6145_v61  ;;  %v4416_v25 = vpop.f32.mrf.mxu0  ;;  %v1697_v37 = vsub.f32 %v14067_v6, %v984_v9 }
 0x4d4   :  { %7417 = vst [vmem:[%s16462_s2 + $0xb58] sm:$0xff] %v4416_v25  ;;  %1041 = vrot.lane.b32.xlu1 %v14783_v51, %s9333_s13  ;;  %2781 = vrot.lane.b32.xlu0 %v1995_v22, %s9335_s23  ;;  %v9046_v60 = vpop.f32.mrf.mxu1  ;;  %v14891_v25 = vld [vmem:[%s16460_s0 + $0x6e0] sm:$0xff] }
 0x4d5   :  { %7419 = vst [vmem:[%s16462_s2 + $0xb68] sm:$0xff] %v9046_v60  ;;  %v4418_v4 = vpop.f32.mrf.mxu0  ;;  %v986_v39 = vpop.permute.xlu1 %985  ;;  %4624 = vmatprep.mubr.f32.mxu0 %v16685_v59  ;;  %v1997_v18 = vmul.f32 0.1, %v1697_v37 }
 0x4d6   :  { %7418 = vst [vmem:[%s16462_s2 + $0xb60] sm:$0xff] %v4418_v4  ;;  %v2726_v53 = vpop.permute.xlu0 %2725  ;;  %v6155_v38 = vpop.f32.mrf.mxu1  ;;  %v1698_v52 = vsub.f32 %v14089_v11, %v986_v39 }
 0x4d7   :  { %8116 = vmatmul.mubr.msk.f32.gmra.mxu0 %vm3016_vm1, %v2726_v53  ;;  %7416 = vst [vmem:[%s16462_s2 + $0xb50] sm:$0xff] %v6155_v38  ;;  %9098 = vmatprep.mubr.msk.f32.mxu1 %vm3016_vm1, %v2726_v53  ;;  %v4422_v19 = vpop.f32.mrf.mxu0  ;;  %v14912_v53 = vld [vmem:[%s16460_s0 + $0x6e8] sm:$0xff] }
 0x4d8   :  { %7420 = vst [vmem:[%s16462_s2 + $0xb70] sm:$0xff] %v4422_v19  ;;  %2783 = vrot.lane.b32.xlu1 %v1996_v3, %s9335_s23  ;;  %1043 = vrot.lane.b32.xlu0 %v14807_v42, %s9333_s13  ;;  %v1998_v14 = vmul.f32 0.1, %v1698_v52 }
 0x4d9   :  { %v4424_v6 = vpop.f32.mrf.mxu0  ;;  %v2728_v2 = vpop.permute.xlu1 %2727  ;;  %4630 = vmatprep.mubr.f32.mxu0 %v16685_v59 }
 0x4da   :  { %7421 = vst [vmem:[%s16462_s2 + $0xb78] sm:$0xff] %v4424_v6  ;;  %v988_v48 = vpop.permute.xlu0 %987  ;;  %9099 = vmatmul.mubr.msk.f32.gmra.mxu1 %vm3016_vm1, %v2728_v2 }
 0x4db   :  { %8117 = vmatmul.mubr.msk.f32.gmra.mxu0 %vm3016_vm1, %v2728_v2  ;;  %v4428_v13 = vpop.f32.mrf.mxu0  ;;  %v9049_v55 = vpop.f32.mrf.mxu1  ;;  %v1699_v54 = vsub.f32 %v14113_v16, %v988_v48 }
 0x4dc   :  { %7423 = vst [vmem:[%s16462_s2 + $0xb88] sm:$0xff] %v4428_v13  ;;  %7425 = vst [vmem:[%s16462_s2 + $0xb98] sm:$0xff] %v9049_v55  ;;  %1045 = vrot.lane.b32.xlu1 %v14828_v17, %s9333_s13  ;;  %2785 = vrot.lane.b32.xlu0 %v1997_v18, %s9335_s23 }
 0x4dd   :  { %v4430_v11 = vpop.f32.mrf.mxu0  ;;  %v6165_v21 = vpop.f32.mrf.mxu1  ;;  %4636 = vmatprep.mubr.f32.mxu0 %v16685_v59  ;;  %v1999_v29 = vmul.f32 0.1, %v1699_v54  ;;  %v14933_v13 = vld [vmem:[%s16460_s0 + $0x6f0] sm:$0xff] }
 0x4de   :  { %7424 = vst [vmem:[%s16462_s2 + $0xb90] sm:$0xff] %v4430_v11  ;;  %7422 = vst [vmem:[%s16462_s2 + $0xb80] sm:$0xff] %v6165_v21  ;;  %v990_v27 = vpop.permute.xlu1 %989  ;;  %v2730_v0 = vpop.permute.xlu0 %2729 }
 0x4df   :  { %8118 = vmatmul.mubr.msk.f32.gmra.mxu0 %vm3016_vm1, %v2730_v0  ;;  %9101 = vmatprep.mubr.msk.f32.mxu1 %vm3016_vm1, %v2730_v0  ;;  %v4434_v33 = vpop.f32.mrf.mxu0  ;;  %v1700_v12 = vsub.f32 %v14137_v20, %v990_v27  ;;  %v14954_v27 = vld [vmem:[%s16460_s0 + $0x6f8] sm:$0xff] }
 0x4e0   :  { %7426 = vst [vmem:[%s16462_s2 + $0xba0] sm:$0xff] %v4434_v33  ;;  %2787 = vrot.lane.b32.xlu1 %v1998_v14, %s9335_s23  ;;  %1047 = vrot.lane.b32.xlu0 %v14849_v23, %s9333_s13 }
 0x4e1   :  { %v4436_v16 = vpop.f32.mrf.mxu0  ;;  %4642 = vmatprep.mubr.f32.mxu0 %v16685_v59  ;;  %v2000_v60 = vmul.f32 0.1, %v1700_v12 }
 0x4e2   :  { %7427 = vst [vmem:[%s16462_s2 + $0xba8] sm:$0xff] %v4436_v16  ;;  %v2732_v8 = vpop.permute.xlu1 %2731  ;;  %v992_v22 = vpop.permute.xlu0 %991 }
 0x4e3   :  { %8119 = vmatmul.mubr.msk.f32.gmra.mxu0 %vm3016_vm1, %v2732_v8  ;;  %9102 = vmatmul.mubr.msk.f32.gmra.mxu1 %vm3016_vm1, %v2732_v8  ;;  %v4440_v57 = vpop.f32.mrf.mxu0  ;;  %v9052_v9 = vpop.f32.mrf.mxu1  ;;  %v1701_v4 = vsub.f32 %v14158_v32, %v992_v22 }
 0x4e4   :  { %7429 = vst [vmem:[%s16462_s2 + $0xbb8] sm:$0xff] %v4440_v57  ;;  %7431 = vst [vmem:[%s16462_s2 + $0xbc8] sm:$0xff] %v9052_v9  ;;  %1049 = vrot.lane.b32.xlu1 %v14870_v50, %s9333_s13  ;;  %2789 = vrot.lane.b32.xlu0 %v1999_v29, %s9335_s23 }
 0x4e5   :  { %v4442_v20 = vpop.f32.mrf.mxu0  ;;  %v6175_v61 = vpop.f32.mrf.mxu1  ;;  %4648 = vmatprep.mubr.f32.mxu0 %v16685_v59  ;;  %v2001_v38 = vmul.f32 0.1, %v1701_v4  ;;  %v14975_v57 = vld [vmem:[%s16460_s0 + $0x700] sm:$0xff] }
 0x4e6   :  { %7430 = vst [vmem:[%s16462_s2 + $0xbc0] sm:$0xff] %v4442_v20  ;;  %7428 = vst [vmem:[%s16462_s2 + $0xbb0] sm:$0xff] %v6175_v61  ;;  %v994_v39 = vpop.permute.xlu1 %993  ;;  %v2734_v3 = vpop.permute.xlu0 %2733 }
 0x4e7   :  { %8120 = vmatmul.mubr.msk.f32.gmra.mxu0 %vm3016_vm1, %v2734_v3  ;;  %9104 = vmatprep.mubr.msk.f32.mxu1 %vm3016_vm1, %v2734_v3  ;;  %v4446_v37 = vpop.f32.mrf.mxu0  ;;  %v1702_v19 = vsub.f32 %v14182_v5, %v994_v39 }
 0x4e8   :  { %7432 = vst [vmem:[%s16462_s2 + $0xbd0] sm:$0xff] %v4446_v37  ;;  %2791 = vrot.lane.b32.xlu1 %v2000_v60, %s9335_s23  ;;  %1051 = vrot.lane.b32.xlu0 %v14891_v25, %s9333_s13 }
 0x4e9   :  { %v4448_v32 = vpop.f32.mrf.mxu0  ;;  %4654 = vmatprep.mubr.f32.mxu0 %v16685_v59  ;;  %v2002_v55 = vmul.f32 0.1, %v1702_v19 }
 0x4ea   :  { %7433 = vst [vmem:[%s16462_s2 + $0xbd8] sm:$0xff] %v4448_v32  ;;  %v2736_v6 = vpop.permute.xlu1 %2735  ;;  %v996_v2 = vpop.permute.xlu0 %995 }
 0x4eb   :  { %8121 = vmatmul.mubr.msk.f32.gmra.mxu0 %vm3016_vm1, %v2736_v6  ;;  %9105 = vmatmul.mubr.msk.f32.gmra.mxu1 %vm3016_vm1, %v2736_v6  ;;  %v4452_v18 = vpop.f32.mrf.mxu0  ;;  %v9055_v52 = vpop.f32.mrf.mxu1  ;;  %v1703_v11 = vsub.f32 %v14206_v63, %v996_v2 }
 0x4ec   :  { %7435 = vst [vmem:[%s16462_s2 + $0xbe8] sm:$0xff] %v4452_v18  ;;  %7437 = vst [vmem:[%s16462_s2 + $0xbf8] sm:$0xff] %v9055_v52  ;;  %1053 = vrot.lane.b32.xlu1 %v14912_v53, %s9333_s13  ;;  %2793 = vrot.lane.b32.xlu0 %v2001_v38, %s9335_s23 }
 0x4ed   :  { %v4454_v5 = vpop.f32.mrf.mxu0  ;;  %v6185_v48 = vpop.f32.mrf.mxu1  ;;  %4660 = vmatprep.mubr.f32.mxu0 %v16685_v59  ;;  %v2003_v0 = vmul.f32 0.1, %v1703_v11 }
 0x4ee   :  { %7436 = vst [vmem:[%s16462_s2 + $0xbf0] sm:$0xff] %v4454_v5  ;;  %7434 = vst [vmem:[%s16462_s2 + $0xbe0] sm:$0xff] %v6185_v48  ;;  %v998_v21 = vpop.permute.xlu1 %997  ;;  %v2738_v14 = vpop.permute.xlu0 %2737 }
 0x4ef   :  { %8122 = vmatmul.mubr.msk.f32.gmra.mxu0 %vm3016_vm1, %v2738_v14  ;;  %9107 = vmatprep.mubr.msk.f32.mxu1 %vm3016_vm1, %v2738_v14  ;;  %v4458_v54 = vpop.f32.mrf.mxu0  ;;  %v1704_v33 = vsub.f32 %v14227_v10, %v998_v21 }
 0x4f0   :  { %7438 = vst [vmem:[%s16462_s2 + $0xc00] sm:$0xff] %v4458_v54  ;;  %2795 = vrot.lane.b32.xlu1 %v2002_v55, %s9335_s23  ;;  %1055 = vrot.lane.b32.xlu0 %v14933_v13, %s9333_s13 }
 0x4f1   :  { %v4460_v63 = vpop.f32.mrf.mxu0  ;;  %4666 = vmatprep.mubr.f32.mxu0 %v16685_v59  ;;  %v2004_v9 = vmul.f32 0.1, %v1704_v33 }
 0x4f2   :  { %7439 = vst [vmem:[%s16462_s2 + $0xc08] sm:$0xff] %v4460_v63  ;;  %v2740_v16 = vpop.permute.xlu1 %2739  ;;  %v1000_v29 = vpop.permute.xlu0 %999 }
 0x4f3   :  { %8123 = vmatmul.mubr.msk.f32.gmra.mxu0 %vm3016_vm1, %v2740_v16  ;;  %9108 = vmatmul.mubr.msk.f32.gmra.mxu1 %vm3016_vm1, %v2740_v16  ;;  %v4464_v12 = vpop.f32.mrf.mxu0  ;;  %v9058_v8 = vpop.f32.mrf.mxu1  ;;  %v1705_v20 = vsub.f32 %v14251_v43, %v1000_v29 }
 0x4f4   :  { %7441 = vst [vmem:[%s16462_s2 + $0xc18] sm:$0xff] %v4464_v12  ;;  %7443 = vst [vmem:[%s16462_s2 + $0xc28] sm:$0xff] %v9058_v8  ;;  %1057 = vrot.lane.b32.xlu1 %v14954_v27, %s9333_s13  ;;  %2797 = vrot.lane.b32.xlu0 %v2003_v0, %s9335_s23 }
 0x4f5   :  { %v4466_v10 = vpop.f32.mrf.mxu0  ;;  %v6195_v22 = vpop.f32.mrf.mxu1  ;;  %4672 = vmatprep.mubr.f32.mxu0 %v16685_v59  ;;  %v2005_v37 = vmul.f32 0.1, %v1705_v20 }
 0x4f6   :  { %7442 = vst [vmem:[%s16462_s2 + $0xc20] sm:$0xff] %v4466_v10  ;;  %7440 = vst [vmem:[%s16462_s2 + $0xc10] sm:$0xff] %v6195_v22  ;;  %v1002_v61 = vpop.permute.xlu1 %1001  ;;  %v2742_v60 = vpop.permute.xlu0 %2741 }
 0x4f7   :  { %v1706_v4 = vsub.f32 %v14275_v1, %v1002_v61  ;;  %8124 = vmatmul.mubr.msk.f32.gmra.mxu0 %vm3016_vm1, %v2742_v60  ;;  %9110 = vmatprep.mubr.msk.f32.mxu1 %vm3016_vm1, %v2742_v60  ;;  %v4470_v39 = vpop.f32.mrf.mxu0 }
 0x4f8   :  { %7444 = vst [vmem:[%s16462_s2 + $0xc30] sm:$0xff] %v4470_v39  ;;  %2799 = vrot.lane.b32.xlu1 %v2004_v9, %s9335_s23  ;;  %1059 = vrot.lane.b32.xlu0 %v14975_v57, %s9333_s13 }
 0x4f9   :  { %v2006_v43 = vmul.f32 0.1, %v1706_v4  ;;  %v4472_v3 = vpop.f32.mrf.mxu0  ;;  %4678 = vmatprep.mubr.f32.mxu0 %v16685_v59 }
 0x4fa   :  { %7445 = vst [vmem:[%s16462_s2 + $0xc38] sm:$0xff] %v4472_v3  ;;  %v2744_v1 = vpop.permute.xlu1 %2743  ;;  %v1004_v32 = vpop.permute.xlu0 %1003 }
 0x4fb   :  { %v1707_v38 = vsub.f32 %v14298_v24, %v1004_v32  ;;  %8125 = vmatmul.mubr.msk.f32.gmra.mxu0 %vm3016_vm1, %v2744_v1  ;;  %9111 = vmatmul.mubr.msk.f32.gmra.mxu1 %vm3016_vm1, %v2744_v1  ;;  %v4476_v19 = vpop.f32.mrf.mxu0  ;;  %v9061_v6 = vpop.f32.mrf.mxu1 }
 0x4fc   :  { %7447 = vst [vmem:[%s16462_s2 + $0xc48] sm:$0xff] %v4476_v19  ;;  %7449 = vst [vmem:[%s16462_s2 + $0xc58] sm:$0xff] %v9061_v6  ;;  %2803 = vrot.lane.b32.xlu0 %v2006_v43, %s9335_s23  ;;  %2801 = vrot.lane.b32.xlu1 %v2005_v37, %s9335_s23 }
 0x4fd   :  { %v2007_v2 = vmul.f32 0.1, %v1707_v38  ;;  %v4478_v24 = vpop.f32.mrf.mxu0  ;;  %v6205_v18 = vpop.f32.mrf.mxu1  ;;  %4684 = vmatprep.mubr.f32.mxu0 %v16685_v59 }
 0x4fe   :  { %7448 = vst [vmem:[%s16462_s2 + $0xc50] sm:$0xff] %v4478_v24  ;;  %7446 = vst [vmem:[%s16462_s2 + $0xc40] sm:$0xff] %v6205_v18  ;;  %v1006_v52 = vpop.permute.xlu1 %1005  ;;  %v2746_v5 = vpop.permute.xlu0 %2745 }
 0x4ff   :  { %v1708_v48 = vsub.f32 %v14324_v28, %v1006_v52  ;;  %8126 = vmatmul.mubr.msk.f32.gmra.mxu0 %vm3016_vm1, %v2746_v5  ;;  %9113 = vmatprep.mubr.msk.f32.mxu1 %vm3016_vm1, %v2746_v5  ;;  %v4482_v55 = vpop.f32.mrf.mxu0 }
 0x500   :  { %7450 = vst [vmem:[%s16462_s2 + $0xc60] sm:$0xff] %v4482_v55  ;;  %2805 = vrot.lane.b32.xlu1 %v2007_v2, %s9335_s23  ;;  %4690 = vmatprep.mubr.f32.mxu0 %v16685_v59 }
 0x501   :  { %v2008_v11 = vmul.f32 0.1, %v1708_v48  ;;  %v4484_v21 = vpop.f32.mrf.mxu0 }
 0x502   :  { %7451 = vst [vmem:[%s16462_s2 + $0xc68] sm:$0xff] %v4484_v21  ;;  %v2748_v28 = vpop.permute.xlu1 %2747  ;;  %v1008_v14 = vpop.permute.xlu0 %1007 }
 0x503   :  { %v1709_v54 = vsub.f32 %v14350_v41, %v1008_v14  ;;  %2807 = vrot.lane.b32.xlu0 %v2008_v11, %s9335_s23  ;;  %8127 = vmatmul.mubr.msk.f32.gmra.mxu0 %vm3016_vm1, %v2748_v28  ;;  %v4488_v63 = vpop.f32.mrf.mxu0  ;;  %v9064_v0 = vpop.f32.mrf.mxu1 }
 0x504   :  { %9114 = vmatmul.mubr.msk.f32.gmra.mxu1 %vm3016_vm1, %v2748_v28  ;;  %7453 = vst [vmem:[%s16462_s2 + $0xc78] sm:$0xff] %v4488_v63  ;;  %7455 = vst [vmem:[%s16462_s2 + $0xc88] sm:$0xff] %v9064_v0  ;;  %4696 = vmatprep.mubr.f32.mxu0 %v16685_v59 }
 0x505   :  { %v2009_v33 = vmul.f32 0.1, %v1709_v54  ;;  %v4490_v41 = vpop.f32.mrf.mxu0  ;;  %v6215_v16 = vpop.f32.mrf.mxu1 }
 0x506   :  { %7454 = vst [vmem:[%s16462_s2 + $0xc80] sm:$0xff] %v4490_v41  ;;  %7452 = vst [vmem:[%s16462_s2 + $0xc70] sm:$0xff] %v6215_v16  ;;  %v1010_v29 = vpop.permute.xlu1 %1009  ;;  %v2750_v12 = vpop.permute.xlu0 %2749 }
 0x507   :  { %v1710_v8 = vsub.f32 %v14376_v35, %v1010_v29  ;;  %2809 = vrot.lane.b32.xlu1 %v2009_v33, %s9335_s23  ;;  %8128 = vmatmul.mubr.msk.f32.gmra.mxu0 %vm3016_vm1, %v2750_v12  ;;  %v4494_v10 = vpop.f32.mrf.mxu0 }
 0x508   :  { %9116 = vmatprep.mubr.msk.f32.mxu1 %vm3016_vm1, %v2750_v12  ;;  %7456 = vst [vmem:[%s16462_s2 + $0xc90] sm:$0xff] %v4494_v10  ;;  %4702 = vmatprep.mubr.f32.mxu0 %v16685_v59 }
 0x509   :  { %v2010_v22 = vmul.f32 0.1, %v1710_v8  ;;  %v4496_v9 = vpop.f32.mrf.mxu0 }
 0x50a   :  { %7457 = vst [vmem:[%s16462_s2 + $0xc98] sm:$0xff] %v4496_v9  ;;  %v2752_v35 = vpop.permute.xlu1 %2751  ;;  %v1012_v20 = vpop.permute.xlu0 %1011 }
 0x50b   :  { %v1711_v61 = vsub.f32 %v14403_v44, %v1012_v20  ;;  %2811 = vrot.lane.b32.xlu0 %v2010_v22, %s9335_s23  ;;  %8129 = vmatmul.mubr.msk.f32.gmra.mxu0 %vm3016_vm1, %v2752_v35 }
 0x50c   :  { %9117 = vmatmul.mubr.msk.f32.gmra.mxu1 %vm3016_vm1, %v2752_v35  ;;  %v4500_v60 = vpop.f32.mrf.mxu0  ;;  %v9067_v4 = vpop.f32.mrf.mxu1  ;;  %4708 = vmatprep.mubr.f32.mxu0 %v16685_v59 }
 0x50d   :  { %v2011_v39 = vmul.f32 0.1, %v1711_v61  ;;  %7459 = vst [vmem:[%s16462_s2 + $0xca8] sm:$0xff] %v4500_v60  ;;  %7461 = vst [vmem:[%s16462_s2 + $0xcb8] sm:$0xff] %v9067_v4 }
 0x50e   :  { %v1014_v44 = vpop.permute.xlu1 %1013  ;;  %v2754_v43 = vpop.permute.xlu0 %2753 }
 0x50f   :  { %v1712_v3 = vsub.f32 %v14430_v62, %v1014_v44  ;;  %2813 = vrot.lane.b32.xlu1 %v2011_v39, %s9335_s23  ;;  %8130 = vmatmul.mubr.msk.f32.gmra.mxu0 %vm3016_vm1, %v2754_v43  ;;  %v4502_v37 = vpop.f32.mrf.mxu0  ;;  %v6225_v1 = vpop.f32.mrf.mxu1 }
 0x510   :  { %9119 = vmatprep.mubr.msk.f32.mxu1 %vm3016_vm1, %v2754_v43  ;;  %7460 = vst [vmem:[%s16462_s2 + $0xcb0] sm:$0xff] %v4502_v37  ;;  %7458 = vst [vmem:[%s16462_s2 + $0xca0] sm:$0xff] %v6225_v1  ;;  %4714 = vmatprep.mubr.f32.mxu0 %v16685_v59 }
 0x511   :  { %v2012_v32 = vmul.f32 0.1, %v1712_v3 }
 0x512   :  { %v2756_v62 = vpop.permute.xlu1 %2755  ;;  %v1016_v38 = vpop.permute.xlu0 %1015 }
 0x513   :  { %v1713_v19 = vsub.f32 %v14456_v30, %v1016_v38  ;;  %2815 = vrot.lane.b32.xlu0 %v2012_v32, %s9335_s23  ;;  %8131 = vmatmul.mubr.msk.f32.gmra.mxu0 %vm3016_vm1, %v2756_v62 }
 0x514   :  { %9120 = vmatmul.mubr.msk.f32.gmra.mxu1 %vm3016_vm1, %v2756_v62  ;;  %v4506_v6 = vpop.f32.mrf.mxu0  ;;  %4720 = vmatprep.mubr.f32.mxu0 %v16685_v59 }
 0x515   :  { %v2013_v2 = vmul.f32 0.1, %v1713_v19  ;;  %7462 = vst [vmem:[%s16462_s2 + $0xcc0] sm:$0xff] %v4506_v6 }
 0x516   :  { %v1018_v24 = vpop.permute.xlu1 %1017  ;;  %v2758_v18 = vpop.permute.xlu0 %2757 }
 0x517   :  { %v1714_v52 = vsub.f32 %v14485_v58, %v1018_v24  ;;  %2817 = vrot.lane.b32.xlu1 %v2013_v2, %s9335_s23  ;;  %8132 = vmatmul.mubr.msk.f32.gmra.mxu0 %vm3016_vm1, %v2758_v18  ;;  %v4508_v30 = vpop.f32.mrf.mxu0 }
 0x518   :  { %9122 = vmatprep.mubr.msk.f32.mxu1 %vm3016_vm1, %v2758_v18  ;;  %7463 = vst [vmem:[%s16462_s2 + $0xcc8] sm:$0xff] %v4508_v30  ;;  %4726 = vmatprep.mubr.f32.mxu0 %v16685_v59 }
 0x519   :  { %v2014_v5 = vmul.f32 0.1, %v1714_v52  ;;  %v4512_v48 = vpop.f32.mrf.mxu0  ;;  %v9070_v55 = vpop.f32.mrf.mxu1 }
 0x51a   :  { %v2760_v11 = vpop.permute.xlu1 %2759  ;;  %v1020_v21 = vpop.permute.xlu0 %1019  ;;  %7465 = vst [vmem:[%s16462_s2 + $0xcd8] sm:$0xff] %v4512_v48  ;;  %7467 = vst [vmem:[%s16462_s2 + $0xce8] sm:$0xff] %v9070_v55 }
 0x51b   :  { %v1715_v58 = vsub.f32 %v14514_v45, %v1020_v21  ;;  %2819 = vrot.lane.b32.xlu0 %v2014_v5, %s9335_s23  ;;  %8133 = vmatmul.mubr.msk.f32.gmra.mxu0 %vm3016_vm1, %v2760_v11  ;;  %v4514_v28 = vpop.f32.mrf.mxu0  ;;  %v6235_v14 = vpop.f32.mrf.mxu1 }
 0x51c   :  { %9123 = vmatmul.mubr.msk.f32.gmra.mxu1 %vm3016_vm1, %v2760_v11  ;;  %4732 = vmatprep.mubr.f32.mxu0 %v16685_v59  ;;  %7466 = vst [vmem:[%s16462_s2 + $0xce0] sm:$0xff] %v4514_v28  ;;  %7464 = vst [vmem:[%s16462_s2 + $0xcd0] sm:$0xff] %v6235_v14 }
 0x51d   :  { %v2015_v54 = vmul.f32 0.1, %v1715_v58 }
 0x51e   :  { %v1022_v45 = vpop.permute.xlu1 %1021  ;;  %v2762_v63 = vpop.permute.xlu0 %2761 }
 0x51f   :  { %v1716_v0 = vsub.f32 %v14540_v49, %v1022_v45  ;;  %2821 = vrot.lane.b32.xlu1 %v2015_v54, %s9335_s23  ;;  %8134 = vmatmul.mubr.msk.f32.gmra.mxu0 %vm3016_vm1, %v2762_v63 }
 0x520   :  { %9125 = vmatprep.mubr.msk.f32.mxu1 %vm3016_vm1, %v2762_v63  ;;  %4738 = vmatprep.mubr.f32.mxu0 %v16685_v59 }
 0x521   :  { %v2016_v33 = vmul.f32 0.1, %v1716_v0  ;;  %v4518_v41 = vpop.f32.mrf.mxu0 }
 0x522   :  { %v2764_v16 = vpop.permute.xlu1 %2763  ;;  %v1024_v29 = vpop.permute.xlu0 %1023  ;;  %7468 = vst [vmem:[%s16462_s2 + $0xcf0] sm:$0xff] %v4518_v41 }
 0x523   :  { %v1717_v12 = vsub.f32 %v14567_v47, %v1024_v29  ;;  %2823 = vrot.lane.b32.xlu0 %v2016_v33, %s9335_s23  ;;  %8135 = vmatmul.mubr.msk.f32.gmra.mxu0 %vm3016_vm1, %v2764_v16  ;;  %v4520_v49 = vpop.f32.mrf.mxu0 }
 0x524   :  { %9126 = vmatmul.mubr.msk.f32.gmra.mxu1 %vm3016_vm1, %v2764_v16  ;;  %4744 = vmatprep.mubr.f32.mxu0 %v16685_v59  ;;  %7469 = vst [vmem:[%s16462_s2 + $0xcf8] sm:$0xff] %v4520_v49 }
 0x525   :  { %v2017_v8 = vmul.f32 0.1, %v1717_v12  ;;  %v4524_v10 = vpop.f32.mrf.mxu0  ;;  %v9073_v22 = vpop.f32.mrf.mxu1 }
 0x526   :  { %v1026_v9 = vpop.permute.xlu1 %1025  ;;  %v2766_v35 = vpop.permute.xlu0 %2765  ;;  %7471 = vst [vmem:[%s16462_s2 + $0xd08] sm:$0xff] %v4524_v10  ;;  %7473 = vst [vmem:[%s16462_s2 + $0xd18] sm:$0xff] %v9073_v22 }
 0x527   :  { %v1718_v47 = vsub.f32 %v14591_v46, %v1026_v9  ;;  %2825 = vrot.lane.b32.xlu1 %v2017_v8, %s9335_s23  ;;  %8136 = vmatmul.mubr.msk.f32.gmra.mxu0 %vm3016_vm1, %v2766_v35  ;;  %v4526_v20 = vpop.f32.mrf.mxu0  ;;  %v6245_v61 = vpop.f32.mrf.mxu1 }
 0x528   :  { %9128 = vmatprep.mubr.msk.f32.mxu1 %vm3016_vm1, %v2766_v35  ;;  %4750 = vmatprep.mubr.f32.mxu0 %v16685_v59  ;;  %7472 = vst [vmem:[%s16462_s2 + $0xd10] sm:$0xff] %v4526_v20  ;;  %7470 = vst [vmem:[%s16462_s2 + $0xd00] sm:$0xff] %v6245_v61 }
 0x529   :  { %v2018_v60 = vmul.f32 0.1, %v1718_v47 }
 0x52a   :  { %v2768_v46 = vpop.permute.xlu1 %2767  ;;  %v1028_v4 = vpop.permute.xlu0 %1027 }
 0x52b   :  { %v1719_v39 = vsub.f32 %v14615_v34, %v1028_v4  ;;  %2827 = vrot.lane.b32.xlu0 %v2018_v60, %s9335_s23  ;;  %8137 = vmatmul.mubr.msk.f32.gmra.mxu0 %vm3016_vm1, %v2768_v46 }
 0x52c   :  { %9129 = vmatmul.mubr.msk.f32.gmra.mxu1 %vm3016_vm1, %v2768_v46  ;;  %4756 = vmatprep.mubr.f32.mxu0 %v16685_v59 }
 0x52d   :  { %v2019_v44 = vmul.f32 0.1, %v1719_v39  ;;  %v4530_v43 = vpop.f32.mrf.mxu0 }
 0x52e   :  { %v1030_v3 = vpop.permute.xlu1 %1029  ;;  %v2770_v37 = vpop.permute.xlu0 %2769  ;;  %7474 = vst [vmem:[%s16462_s2 + $0xd20] sm:$0xff] %v4530_v43 }
 0x52f   :  { %v1720_v1 = vsub.f32 %v14635_v36, %v1030_v3  ;;  %2829 = vrot.lane.b32.xlu1 %v2019_v44, %s9335_s23  ;;  %8138 = vmatmul.mubr.msk.f32.gmra.mxu0 %vm3016_vm1, %v2770_v37  ;;  %v4532_v34 = vpop.f32.mrf.mxu0 }
 0x530   :  { %9131 = vmatprep.mubr.msk.f32.mxu1 %vm3016_vm1, %v2770_v37  ;;  %4762 = vmatprep.mubr.f32.mxu0 %v16685_v59  ;;  %7475 = vst [vmem:[%s16462_s2 + $0xd28] sm:$0xff] %v4532_v34 }
 0x531   :  { %v2020_v32 = vmul.f32 0.1, %v1720_v1  ;;  %v4536_v62 = vpop.f32.mrf.mxu0  ;;  %v9076_v38 = vpop.f32.mrf.mxu1 }
 0x532   :  { %v2772_v19 = vpop.permute.xlu1 %2771  ;;  %v1032_v6 = vpop.permute.xlu0 %1031  ;;  %7477 = vst [vmem:[%s16462_s2 + $0xd38] sm:$0xff] %v4536_v62  ;;  %7479 = vst [vmem:[%s16462_s2 + $0xd48] sm:$0xff] %v9076_v38 }
 0x533   :  { %v1721_v36 = vsub.f32 %v14659_v56, %v1032_v6  ;;  %2831 = vrot.lane.b32.xlu0 %v2020_v32, %s9335_s23  ;;  %8139 = vmatmul.mubr.msk.f32.gmra.mxu0 %vm3016_vm1, %v2772_v19  ;;  %v4538_v2 = vpop.f32.mrf.mxu0  ;;  %v6255_v24 = vpop.f32.mrf.mxu1 }
 0x534   :  { %9132 = vmatmul.mubr.msk.f32.gmra.mxu1 %vm3016_vm1, %v2772_v19  ;;  %4768 = vmatprep.mubr.f32.mxu0 %v16685_v59  ;;  %7478 = vst [vmem:[%s16462_s2 + $0xd40] sm:$0xff] %v4538_v2  ;;  %7476 = vst [vmem:[%s16462_s2 + $0xd30] sm:$0xff] %v6255_v24 }
 0x535   :  { %v2021_v18 = vmul.f32 0.1, %v1721_v36 }
 0x536   :  { %v1034_v56 = vpop.permute.xlu1 %1033  ;;  %v2774_v52 = vpop.permute.xlu0 %2773 }
 0x537   :  { %v1722_v30 = vsub.f32 %v14683_v26, %v1034_v56  ;;  %2833 = vrot.lane.b32.xlu1 %v2021_v18, %s9335_s23  ;;  %8140 = vmatmul.mubr.msk.f32.gmra.mxu0 %vm3016_vm1, %v2774_v52 }
 0x538   :  { %9134 = vmatprep.mubr.msk.f32.mxu1 %vm3016_vm1, %v2774_v52  ;;  %4774 = vmatprep.mubr.f32.mxu0 %v16685_v59 }
 0x539   :  { %v2022_v5 = vmul.f32 0.1, %v1722_v30  ;;  %v4542_v48 = vpop.f32.mrf.mxu0 }
 0x53a   :  { %v2776_v55 = vpop.permute.xlu1 %2775  ;;  %v1036_v11 = vpop.permute.xlu0 %1035  ;;  %7480 = vst [vmem:[%s16462_s2 + $0xd50] sm:$0xff] %v4542_v48 }
 0x53b   :  { %v1723_v21 = vsub.f32 %v14709_v15, %v1036_v11  ;;  %2835 = vrot.lane.b32.xlu0 %v2022_v5, %s9335_s23  ;;  %8141 = vmatmul.mubr.msk.f32.gmra.mxu0 %vm3016_vm1, %v2776_v55  ;;  %v4544_v26 = vpop.f32.mrf.mxu0 }
 0x53c   :  { %9135 = vmatmul.mubr.msk.f32.gmra.mxu1 %vm3016_vm1, %v2776_v55  ;;  %4780 = vmatprep.mubr.f32.mxu0 %v16685_v59  ;;  %7481 = vst [vmem:[%s16462_s2 + $0xd58] sm:$0xff] %v4544_v26 }
 0x53d   :  { %v2023_v58 = vmul.f32 0.1, %v1723_v21  ;;  %v4548_v28 = vpop.f32.mrf.mxu0  ;;  %v9079_v14 = vpop.f32.mrf.mxu1 }
 0x53e   :  { %v1038_v54 = vpop.permute.xlu1 %1037  ;;  %v2778_v45 = vpop.permute.xlu0 %2777  ;;  %7483 = vst [vmem:[%s16462_s2 + $0xd68] sm:$0xff] %v4548_v28  ;;  %7485 = vst [vmem:[%s16462_s2 + $0xd78] sm:$0xff] %v9079_v14 }
 0x53f   :  { %v1724_v15 = vsub.f32 %v14735_v31, %v1038_v54  ;;  %2837 = vrot.lane.b32.xlu1 %v2023_v58, %s9335_s23  ;;  %8142 = vmatmul.mubr.msk.f32.gmra.mxu0 %vm3016_vm1, %v2778_v45  ;;  %v4550_v63 = vpop.f32.mrf.mxu0  ;;  %v6265_v0 = vpop.f32.mrf.mxu1 }
 0x540   :  { %9137 = vmatprep.mubr.msk.f32.mxu1 %vm3016_vm1, %v2778_v45  ;;  %4786 = vmatprep.mubr.f32.mxu0 %v16685_v59  ;;  %7484 = vst [vmem:[%s16462_s2 + $0xd70] sm:$0xff] %v4550_v63  ;;  %7482 = vst [vmem:[%s16462_s2 + $0xd60] sm:$0xff] %v6265_v0 }
 0x541   :  { %v2024_v33 = vmul.f32 0.1, %v1724_v15 }
 0x542   :  { %v2780_v31 = vpop.permute.xlu1 %2779  ;;  %v1040_v41 = vpop.permute.xlu0 %1039 }
 0x543   :  { %v1725_v16 = vsub.f32 %v14759_v40, %v1040_v41  ;;  %2839 = vrot.lane.b32.xlu0 %v2024_v33, %s9335_s23  ;;  %8143 = vmatmul.mubr.msk.f32.gmra.mxu0 %vm3016_vm1, %v2780_v31 }
 0x544   :  { %9138 = vmatmul.mubr.msk.f32.gmra.mxu1 %vm3016_vm1, %v2780_v31  ;;  %4792 = vmatprep.mubr.f32.mxu0 %v16685_v59 }
 0x545   :  { %v2025_v29 = vmul.f32 0.1, %v1725_v16  ;;  %v4554_v12 = vpop.f32.mrf.mxu0 }
 0x546   :  { %v1042_v49 = vpop.permute.xlu1 %1041  ;;  %v2782_v8 = vpop.permute.xlu0 %2781  ;;  %7486 = vst [vmem:[%s16462_s2 + $0xd80] sm:$0xff] %v4554_v12 }
 0x547   :  { %v1726_v10 = vsub.f32 %v14783_v51, %v1042_v49  ;;  %2841 = vrot.lane.b32.xlu1 %v2025_v29, %s9335_s23  ;;  %8144 = vmatmul.mubr.msk.f32.gmra.mxu0 %vm3016_vm1, %v2782_v8  ;;  %v4556_v40 = vpop.f32.mrf.mxu0 }
 0x548   :  { %9140 = vmatprep.mubr.msk.f32.mxu1 %vm3016_vm1, %v2782_v8  ;;  %4798 = vmatprep.mubr.f32.mxu0 %v16685_v59  ;;  %7487 = vst [vmem:[%s16462_s2 + $0xd88] sm:$0xff] %v4556_v40 }
 0x549   :  { %v2026_v22 = vmul.f32 0.1, %v1726_v10  ;;  %v4560_v9 = vpop.f32.mrf.mxu0  ;;  %v9082_v35 = vpop.f32.mrf.mxu1 }
 0x54a   :  { %v2784_v47 = vpop.permute.xlu1 %2783  ;;  %v1044_v20 = vpop.permute.xlu0 %1043  ;;  %7489 = vst [vmem:[%s16462_s2 + $0xd98] sm:$0xff] %v4560_v9  ;;  %7491 = vst [vmem:[%s16462_s2 + $0xda8] sm:$0xff] %v9082_v35 }
 0x54b   :  { %v1727_v51 = vsub.f32 %v14807_v42, %v1044_v20  ;;  %2843 = vrot.lane.b32.xlu0 %v2026_v22, %s9335_s23  ;;  %8145 = vmatmul.mubr.msk.f32.gmra.mxu0 %vm3016_vm1, %v2784_v47  ;;  %v4562_v61 = vpop.f32.mrf.mxu0  ;;  %v6275_v60 = vpop.f32.mrf.mxu1 }
 0x54c   :  { %9141 = vmatmul.mubr.msk.f32.gmra.mxu1 %vm3016_vm1, %v2784_v47  ;;  %4804 = vmatprep.mubr.f32.mxu0 %v16685_v59  ;;  %7490 = vst [vmem:[%s16462_s2 + $0xda0] sm:$0xff] %v4562_v61  ;;  %7488 = vst [vmem:[%s16462_s2 + $0xd90] sm:$0xff] %v6275_v60 }
 0x54d   :  { %v2027_v46 = vmul.f32 0.1, %v1727_v51 }
 0x54e   :  { %v1046_v42 = vpop.permute.xlu1 %1045  ;;  %v2786_v4 = vpop.permute.xlu0 %2785 }
 0x54f   :  { %v1728_v39 = vsub.f32 %v14828_v17, %v1046_v42  ;;  %2845 = vrot.lane.b32.xlu1 %v2027_v46, %s9335_s23  ;;  %8146 = vmatmul.mubr.msk.f32.gmra.mxu0 %vm3016_vm1, %v2786_v4 }
 0x550   :  { %9143 = vmatprep.mubr.msk.f32.mxu1 %vm3016_vm1, %v2786_v4  ;;  %4810 = vmatprep.mubr.f32.mxu0 %v16685_v59 }
 0x551   :  { %v2028_v44 = vmul.f32 0.1, %v1728_v39  ;;  %v4566_v43 = vpop.f32.mrf.mxu0 }
 0x552   :  { %v2788_v3 = vpop.permute.xlu1 %2787  ;;  %v1048_v37 = vpop.permute.xlu0 %1047  ;;  %7492 = vst [vmem:[%s16462_s2 + $0xdb0] sm:$0xff] %v4566_v43 }
 0x553   :  { %v1729_v1 = vsub.f32 %v14849_v23, %v1048_v37  ;;  %2847 = vrot.lane.b32.xlu0 %v2028_v44, %s9335_s23  ;;  %8147 = vmatmul.mubr.msk.f32.gmra.mxu0 %vm3016_vm1, %v2788_v3  ;;  %v4568_v17 = vpop.f32.mrf.mxu0 }
 0x554   :  { %9144 = vmatmul.mubr.msk.f32.gmra.mxu1 %vm3016_vm1, %v2788_v3  ;;  %4816 = vmatprep.mubr.f32.mxu0 %v16685_v59  ;;  %7493 = vst [vmem:[%s16462_s2 + $0xdb8] sm:$0xff] %v4568_v17 }
 0x555   :  { %v2029_v34 = vmul.f32 0.1, %v1729_v1  ;;  %v4572_v32 = vpop.f32.mrf.mxu0  ;;  %v9085_v62 = vpop.f32.mrf.mxu1 }
 0x556   :  { %v1050_v38 = vpop.permute.xlu1 %1049  ;;  %v2790_v19 = vpop.permute.xlu0 %2789  ;;  %7495 = vst [vmem:[%s16462_s2 + $0xdc8] sm:$0xff] %v4572_v32  ;;  %7497 = vst [vmem:[%s16462_s2 + $0xdd8] sm:$0xff] %v9085_v62 }
 0x557   :  { %v1730_v23 = vsub.f32 %v14870_v50, %v1050_v38  ;;  %2849 = vrot.lane.b32.xlu1 %v2029_v34, %s9335_s23  ;;  %8148 = vmatmul.mubr.msk.f32.gmra.mxu0 %vm3016_vm1, %v2790_v19  ;;  %v4574_v6 = vpop.f32.mrf.mxu0  ;;  %v6285_v36 = vpop.f32.mrf.mxu1 }
 0x558   :  { %9146 = vmatprep.mubr.msk.f32.mxu1 %vm3016_vm1, %v2790_v19  ;;  %4822 = vmatprep.mubr.f32.mxu0 %v16685_v59  ;;  %7496 = vst [vmem:[%s16462_s2 + $0xdd0] sm:$0xff] %v4574_v6  ;;  %7494 = vst [vmem:[%s16462_s2 + $0xdc0] sm:$0xff] %v6285_v36 }
 0x559   :  { %v2030_v2 = vmul.f32 0.1, %v1730_v23 }
 0x55a   :  { %v2792_v50 = vpop.permute.xlu1 %2791  ;;  %v1052_v24 = vpop.permute.xlu0 %1051 }
 0x55b   :  { %v1731_v18 = vsub.f32 %v14891_v25, %v1052_v24  ;;  %2851 = vrot.lane.b32.xlu0 %v2030_v2, %s9335_s23  ;;  %8149 = vmatmul.mubr.msk.f32.gmra.mxu0 %vm3016_vm1, %v2792_v50 }
 0x55c   :  { %9147 = vmatmul.mubr.msk.f32.gmra.mxu1 %vm3016_vm1, %v2792_v50  ;;  %4828 = vmatprep.mubr.f32.mxu0 %v16685_v59 }
 0x55d   :  { %v2031_v56 = vmul.f32 0.1, %v1731_v18  ;;  %v4578_v52 = vpop.f32.mrf.mxu0 }
 0x55e   :  { %v1054_v30 = vpop.permute.xlu1 %1053  ;;  %v2794_v5 = vpop.permute.xlu0 %2793  ;;  %7498 = vst [vmem:[%s16462_s2 + $0xde0] sm:$0xff] %v4578_v52 }
 0x55f   :  { %v1732_v48 = vsub.f32 %v14912_v53, %v1054_v30  ;;  %2853 = vrot.lane.b32.xlu1 %v2031_v56, %s9335_s23  ;;  %8150 = vmatmul.mubr.msk.f32.gmra.mxu0 %vm3016_vm1, %v2794_v5  ;;  %v4580_v25 = vpop.f32.mrf.mxu0 }
 0x560   :  { %9149 = vmatprep.mubr.msk.f32.mxu1 %vm3016_vm1, %v2794_v5  ;;  %4834 = vmatprep.mubr.f32.mxu0 %v16685_v59  ;;  %7499 = vst [vmem:[%s16462_s2 + $0xde8] sm:$0xff] %v4580_v25 }
 0x561   :  { %v2032_v55 = vmul.f32 0.1, %v1732_v48  ;;  %v4584_v11 = vpop.f32.mrf.mxu0  ;;  %v9088_v21 = vpop.f32.mrf.mxu1 }
 0x562   :  { %v2796_v26 = vpop.permute.xlu1 %2795  ;;  %v1056_v58 = vpop.permute.xlu0 %1055  ;;  %7501 = vst [vmem:[%s16462_s2 + $0xdf8] sm:$0xff] %v4584_v11  ;;  %7503 = vst [vmem:[%s16462_s2 + $0xe08] sm:$0xff] %v9088_v21 }
 0x563   :  { %v1733_v53 = vsub.f32 %v14933_v13, %v1056_v58  ;;  %2855 = vrot.lane.b32.xlu0 %v2032_v55, %s9335_s23  ;;  %8151 = vmatmul.mubr.msk.f32.gmra.mxu0 %vm3016_vm1, %v2796_v26  ;;  %v4586_v28 = vpop.f32.mrf.mxu0  ;;  %v6295_v14 = vpop.f32.mrf.mxu1 }
 0x564   :  { %9150 = vmatmul.mubr.msk.f32.gmra.mxu1 %vm3016_vm1, %v2796_v26  ;;  %4840 = vmatprep.mubr.f32.mxu0 %v16685_v59  ;;  %7502 = vst [vmem:[%s16462_s2 + $0xe00] sm:$0xff] %v4586_v28  ;;  %7500 = vst [vmem:[%s16462_s2 + $0xdf0] sm:$0xff] %v6295_v14 }
 0x565   :  { %v2033_v54 = vmul.f32 0.1, %v1733_v53 }
 0x566   :  { %v1058_v13 = vpop.permute.xlu1 %1057  ;;  %v2798_v45 = vpop.permute.xlu0 %2797 }
 0x567   :  { %v1734_v15 = vsub.f32 %v14954_v27, %v1058_v13  ;;  %2857 = vrot.lane.b32.xlu1 %v2033_v54, %s9335_s23  ;;  %8152 = vmatmul.mubr.msk.f32.gmra.mxu0 %vm3016_vm1, %v2798_v45 }
 0x568   :  { %9152 = vmatprep.mubr.msk.f32.mxu1 %vm3016_vm1, %v2798_v45  ;;  %4846 = vmatprep.mubr.f32.mxu0 %v16685_v59 }
 0x569   :  { %v2034_v63 = vmul.f32 0.1, %v1734_v15  ;;  %v4590_v0 = vpop.f32.mrf.mxu0 }
 0x56a   :  { %v2800_v33 = vpop.permute.xlu1 %2799  ;;  %v1060_v31 = vpop.permute.xlu0 %1059  ;;  %7504 = vst [vmem:[%s16462_s2 + $0xe10] sm:$0xff] %v4590_v0 }
 0x56b   :  { %v1735_v41 = vsub.f32 %v14975_v57, %v1060_v31  ;;  %2859 = vrot.lane.b32.xlu0 %v2034_v63, %s9335_s23  ;;  %8153 = vmatmul.mubr.msk.f32.gmra.mxu0 %vm3016_vm1, %v2800_v33  ;;  %v4592_v27 = vpop.f32.mrf.mxu0 }
 0x56c   :  { %9153 = vmatmul.mubr.msk.f32.gmra.mxu1 %vm3016_vm1, %v2800_v33  ;;  %4852 = vmatprep.mubr.f32.mxu0 %v16685_v59  ;;  %7505 = vst [vmem:[%s16462_s2 + $0xe18] sm:$0xff] %v4592_v27 }
 0x56d   :  { %v2035_v16 = vmul.f32 0.1, %v1735_v41 }
 0x56e   :  { %v2802_v29 = vpop.permute.xlu1 %2801  ;;  %v2804_v12 = vpop.permute.xlu0 %2803 }
 0x56f   :  { %8154 = vmatmul.mubr.msk.f32.gmra.mxu0 %vm3016_vm1, %v2802_v29  ;;  %9155 = vmatprep.mubr.msk.f32.mxu1 %vm3016_vm1, %v2802_v29 }
 0x570   :  { %2861 = vrot.lane.b32.xlu1 %v2035_v16, %s9335_s23  ;;  %9156 = vmatmul.mubr.msk.f32.gmra.mxu1 %vm3016_vm1, %v2804_v12 }
 0x571   :  { %4858 = vmatprep.mubr.f32.mxu0 %v16685_v59 }
 0x572   :  { %v2806_v57 = vpop.permute.xlu1 %2805 }
 0x573   :  { %8155 = vmatmul.mubr.msk.f32.gmra.mxu0 %vm3016_vm1, %v2804_v12  ;;  %9158 = vmatprep.mubr.msk.f32.mxu1 %vm3016_vm1, %v2806_v57 }
 0x574   :  { %4864 = vmatprep.mubr.f32.mxu0 %v16685_v59 }
 0x575   :  { %v2808_v49 = vpop.permute.xlu0 %2807 }
 0x576   :  { %9159 = vmatmul.mubr.msk.f32.gmra.mxu1 %vm3016_vm1, %v2808_v49 }
 0x577   :  { %8156 = vmatmul.mubr.msk.f32.gmra.mxu0 %vm3016_vm1, %v2806_v57 }
 0x578   :  { %4870 = vmatprep.mubr.f32.mxu0 %v16685_v59 }
 0x579   :  { %v2810_v8 = vpop.permute.xlu1 %2809 }
 0x57a   :  { %9161 = vmatprep.mubr.msk.f32.mxu1 %vm3016_vm1, %v2810_v8 }
 0x57b   :  { %8157 = vmatmul.mubr.msk.f32.gmra.mxu0 %vm3016_vm1, %v2808_v49 }
 0x57c   :  { %4876 = vmatprep.mubr.f32.mxu0 %v16685_v59 }
 0x57d   :  { %v2812_v10 = vpop.permute.xlu0 %2811 }
 0x57e   :  { %9162 = vmatmul.mubr.msk.f32.gmra.mxu1 %vm3016_vm1, %v2812_v10 }
 0x57f   :  { %8158 = vmatmul.mubr.msk.f32.gmra.mxu0 %vm3016_vm1, %v2810_v8 }
 0x580   :  { %4882 = vmatprep.mubr.f32.mxu0 %v16685_v59 }
 0x581   :  { %v2814_v40 = vpop.permute.xlu1 %2813 }
 0x582   :  { %9164 = vmatprep.mubr.msk.f32.mxu1 %vm3016_vm1, %v2814_v40  ;;  %v4596_v22 = vpop.f32.mrf.mxu0  ;;  %v9091_v9 = vpop.f32.mrf.mxu1 }
 0x583   :  { %7507 = vst [vmem:[%s16462_s2 + $0xe28] sm:$0xff] %v4596_v22  ;;  %8159 = vmatmul.mubr.msk.f32.gmra.mxu0 %vm3016_vm1, %v2812_v10  ;;  %7509 = vst [vmem:[%s16462_s2 + $0xe38] sm:$0xff] %v9091_v9 }
 0x584   :  { %v4598_v35 = vpop.f32.mrf.mxu0  ;;  %v6305_v47 = vpop.f32.mrf.mxu1  ;;  %4888 = vmatprep.mubr.f32.mxu0 %v16685_v59 }
 0x585   :  { %7508 = vst [vmem:[%s16462_s2 + $0xe30] sm:$0xff] %v4598_v35  ;;  %7506 = vst [vmem:[%s16462_s2 + $0xe20] sm:$0xff] %v6305_v47  ;;  %v2816_v20 = vpop.permute.xlu0 %2815 }
 0x586   :  { %9165 = vmatmul.mubr.msk.f32.gmra.mxu1 %vm3016_vm1, %v2816_v20 }
 0x587   :  { %v4602_v51 = vpop.f32.mrf.mxu0  ;;  %8160 = vmatmul.mubr.msk.f32.gmra.mxu0 %vm3016_vm1, %v2814_v40 }
 0x588   :  { %7510 = vst [vmem:[%s16462_s2 + $0xe40] sm:$0xff] %v4602_v51  ;;  %4894 = vmatprep.mubr.f32.mxu0 %v16685_v59 }
 0x589   :  { %v4604_v61 = vpop.f32.mrf.mxu0  ;;  %v2818_v60 = vpop.permute.xlu1 %2817 }
 0x58a   :  { %7511 = vst [vmem:[%s16462_s2 + $0xe48] sm:$0xff] %v4604_v61  ;;  %9167 = vmatprep.mubr.msk.f32.mxu1 %vm3016_vm1, %v2818_v60  ;;  %v9094_v46 = vpop.f32.mrf.mxu1 }
 0x58b   :  { %v4608_v42 = vpop.f32.mrf.mxu0  ;;  %8161 = vmatmul.mubr.msk.f32.gmra.mxu0 %vm3016_vm1, %v2816_v20  ;;  %7515 = vst [vmem:[%s16462_s2 + $0xe68] sm:$0xff] %v9094_v46 }
 0x58c   :  { %7513 = vst [vmem:[%s16462_s2 + $0xe58] sm:$0xff] %v4608_v42  ;;  %v6315_v4 = vpop.f32.mrf.mxu1  ;;  %4900 = vmatprep.mubr.f32.mxu0 %v16685_v59 }
 0x58d   :  { %v4610_v39 = vpop.f32.mrf.mxu0  ;;  %7512 = vst [vmem:[%s16462_s2 + $0xe50] sm:$0xff] %v6315_v4  ;;  %v2820_v44 = vpop.permute.xlu0 %2819 }
 0x58e   :  { %7514 = vst [vmem:[%s16462_s2 + $0xe60] sm:$0xff] %v4610_v39  ;;  %9168 = vmatmul.mubr.msk.f32.gmra.mxu1 %vm3016_vm1, %v2820_v44 }
 0x58f   :  { %v4614_v43 = vpop.f32.mrf.mxu0  ;;  %8162 = vmatmul.mubr.msk.f32.gmra.mxu0 %vm3016_vm1, %v2818_v60 }
 0x590   :  { %7516 = vst [vmem:[%s16462_s2 + $0xe70] sm:$0xff] %v4614_v43  ;;  %4906 = vmatprep.mubr.f32.mxu0 %v16685_v59 }
 0x591   :  { %v4616_v3 = vpop.f32.mrf.mxu0  ;;  %v2822_v37 = vpop.permute.xlu1 %2821 }
 0x592   :  { %7517 = vst [vmem:[%s16462_s2 + $0xe78] sm:$0xff] %v4616_v3  ;;  %9170 = vmatprep.mubr.msk.f32.mxu1 %vm3016_vm1, %v2822_v37  ;;  %v9097_v1 = vpop.f32.mrf.mxu1 }
 0x593   :  { %v4620_v17 = vpop.f32.mrf.mxu0  ;;  %8163 = vmatmul.mubr.msk.f32.gmra.mxu0 %vm3016_vm1, %v2820_v44  ;;  %7521 = vst [vmem:[%s16462_s2 + $0xe98] sm:$0xff] %v9097_v1 }
 0x594   :  { %7519 = vst [vmem:[%s16462_s2 + $0xe88] sm:$0xff] %v4620_v17  ;;  %v6325_v34 = vpop.f32.mrf.mxu1  ;;  %4912 = vmatprep.mubr.f32.mxu0 %v16685_v59 }
 0x595   :  { %v4622_v32 = vpop.f32.mrf.mxu0  ;;  %7518 = vst [vmem:[%s16462_s2 + $0xe80] sm:$0xff] %v6325_v34  ;;  %v2824_v62 = vpop.permute.xlu0 %2823 }
 0x596   :  { %7520 = vst [vmem:[%s16462_s2 + $0xe90] sm:$0xff] %v4622_v32  ;;  %9171 = vmatmul.mubr.msk.f32.gmra.mxu1 %vm3016_vm1, %v2824_v62 }
 0x597   :  { %v4626_v38 = vpop.f32.mrf.mxu0  ;;  %8164 = vmatmul.mubr.msk.f32.gmra.mxu0 %vm3016_vm1, %v2822_v37 }
 0x598   :  { %7522 = vst [vmem:[%s16462_s2 + $0xea0] sm:$0xff] %v4626_v38  ;;  %4918 = vmatprep.mubr.f32.mxu0 %v16685_v59 }
 0x599   :  { %v4628_v19 = vpop.f32.mrf.mxu0  ;;  %v2826_v23 = vpop.permute.xlu1 %2825 }
 0x59a   :  { %7523 = vst [vmem:[%s16462_s2 + $0xea8] sm:$0xff] %v4628_v19  ;;  %9173 = vmatprep.mubr.msk.f32.mxu1 %vm3016_vm1, %v2826_v23  ;;  %v9100_v6 = vpop.f32.mrf.mxu1 }
 0x59b   :  { %v4632_v36 = vpop.f32.mrf.mxu0  ;;  %8165 = vmatmul.mubr.msk.f32.gmra.mxu0 %vm3016_vm1, %v2824_v62  ;;  %7527 = vst [vmem:[%s16462_s2 + $0xec8] sm:$0xff] %v9100_v6 }
 0x59c   :  { %7525 = vst [vmem:[%s16462_s2 + $0xeb8] sm:$0xff] %v4632_v36  ;;  %v6335_v2 = vpop.f32.mrf.mxu1  ;;  %4924 = vmatprep.mubr.f32.mxu0 %v16685_v59 }
 0x59d   :  { %v4634_v50 = vpop.f32.mrf.mxu0  ;;  %7524 = vst [vmem:[%s16462_s2 + $0xeb0] sm:$0xff] %v6335_v2  ;;  %v2828_v24 = vpop.permute.xlu0 %2827 }
 0x59e   :  { %7526 = vst [vmem:[%s16462_s2 + $0xec0] sm:$0xff] %v4634_v50  ;;  %9174 = vmatmul.mubr.msk.f32.gmra.mxu1 %vm3016_vm1, %v2828_v24 }
 0x59f   :  { %v4638_v18 = vpop.f32.mrf.mxu0  ;;  %8166 = vmatmul.mubr.msk.f32.gmra.mxu0 %vm3016_vm1, %v2826_v23 }
 0x5a0   :  { %7528 = vst [vmem:[%s16462_s2 + $0xed0] sm:$0xff] %v4638_v18  ;;  %4930 = vmatprep.mubr.f32.mxu0 %v16685_v59 }
 0x5a1   :  { %v4640_v56 = vpop.f32.mrf.mxu0  ;;  %v2830_v52 = vpop.permute.xlu1 %2829 }
 0x5a2   :  { %7529 = vst [vmem:[%s16462_s2 + $0xed8] sm:$0xff] %v4640_v56  ;;  %9176 = vmatprep.mubr.msk.f32.mxu1 %vm3016_vm1, %v2830_v52 }
 0x5a3   :  { %v4644_v30 = vpop.f32.mrf.mxu0  ;;  %8167 = vmatmul.mubr.msk.f32.gmra.mxu0 %vm3016_vm1, %v2828_v24  ;;  %v9103_v5 = vpop.f32.mrf.mxu1 }
 0x5a4   :  { %7531 = vst [vmem:[%s16462_s2 + $0xee8] sm:$0xff] %v4644_v30  ;;  %7533 = vst [vmem:[%s16462_s2 + $0xef8] sm:$0xff] %v9103_v5  ;;  %4936 = vmatprep.mubr.f32.mxu0 %v16685_v59 }
 0x5a5   :  { %v4646_v48 = vpop.f32.mrf.mxu0  ;;  %v6345_v25 = vpop.f32.mrf.mxu1 }
 0x5a6   :  { %7532 = vst [vmem:[%s16462_s2 + $0xef0] sm:$0xff] %v4646_v48  ;;  %7530 = vst [vmem:[%s16462_s2 + $0xee0] sm:$0xff] %v6345_v25  ;;  %v2832_v55 = vpop.permute.xlu0 %2831 }
 0x5a7   :  { %9177 = vmatmul.mubr.msk.f32.gmra.mxu1 %vm3016_vm1, %v2832_v55  ;;  %v4650_v11 = vpop.f32.mrf.mxu0  ;;  %8168 = vmatmul.mubr.msk.f32.gmra.mxu0 %vm3016_vm1, %v2830_v52 }
 0x5a8   :  { %7534 = vst [vmem:[%s16462_s2 + $0xf00] sm:$0xff] %v4650_v11  ;;  %4942 = vmatprep.mubr.f32.mxu0 %v16685_v59  ;;  %v16762_v11 = vld [vmem:[#allocation3_spill] sm:$0xff] }
 0x5a9   :  { %v4652_v21 = vpop.f32.mrf.mxu0  ;;  %v2834_v26 = vpop.permute.xlu1 %2833 }
 0x5aa   :  { %7535 = vst [vmem:[%s16462_s2 + $0xf08] sm:$0xff] %v4652_v21  ;;  %9179 = vmatprep.mubr.msk.f32.mxu1 %vm3016_vm1, %v2834_v26 }
 0x5ab   :  { %v4656_v58 = vpop.f32.mrf.mxu0  ;;  %8169 = vmatmul.mubr.msk.f32.gmra.mxu0 %vm3016_vm1, %v2832_v55  ;;  %v9106_v53 = vpop.f32.mrf.mxu1  ;;  %v16761_v55 = vld [vmem:[#allocation2_spill] sm:$0xff] }
 0x5ac   :  { %7537 = vst [vmem:[%s16462_s2 + $0xf18] sm:$0xff] %v4656_v58  ;;  %7539 = vst [vmem:[%s16462_s2 + $0xf28] sm:$0xff] %v9106_v53  ;;  %4948 = vmatprep.mubr.f32.mxu0 %v16685_v59  ;;  %v16764_v53 = vld [vmem:[#allocation5_spill] sm:$0xff] }
 0x5ad   :  { %v4658_v28 = vpop.f32.mrf.mxu0  ;;  %v6355_v14 = vpop.f32.mrf.mxu1 }
 0x5ae   :  { %7538 = vst [vmem:[%s16462_s2 + $0xf20] sm:$0xff] %v4658_v28  ;;  %7536 = vst [vmem:[%s16462_s2 + $0xf10] sm:$0xff] %v6355_v14  ;;  %v2836_v54 = vpop.permute.xlu0 %2835 }
 0x5af   :  { %9180 = vmatmul.mubr.msk.f32.gmra.mxu1 %vm3016_vm1, %v2836_v54  ;;  %v4662_v13 = vpop.f32.mrf.mxu0  ;;  %8170 = vmatmul.mubr.msk.f32.gmra.mxu0 %vm3016_vm1, %v2834_v26 }
 0x5b0   :  { %7540 = vst [vmem:[%s16462_s2 + $0xf30] sm:$0xff] %v4662_v13  ;;  %4954 = vmatprep.mubr.f32.mxu0 %v16685_v59  ;;  %v16765_v13 = vld [vmem:[#allocation6_spill] sm:$0xff] }
 0x5b1   :  { %v4664_v45 = vpop.f32.mrf.mxu0  ;;  %v2838_v15 = vpop.permute.xlu1 %2837 }
 0x5b2   :  { %7541 = vst [vmem:[%s16462_s2 + $0xf38] sm:$0xff] %v4664_v45  ;;  %9182 = vmatprep.mubr.msk.f32.mxu1 %vm3016_vm1, %v2838_v15  ;;  %v16766_v45 = vld [vmem:[#allocation7_spill] sm:$0xff] }
 0x5b3   :  { %v4668_v63 = vpop.f32.mrf.mxu0  ;;  %8171 = vmatmul.mubr.msk.f32.gmra.mxu0 %vm3016_vm1, %v2836_v54  ;;  %v9109_v0 = vpop.f32.mrf.mxu1 }
 0x5b4   :  { %7543 = vst [vmem:[%s16462_s2 + $0xf48] sm:$0xff] %v4668_v63  ;;  %7545 = vst [vmem:[%s16462_s2 + $0xf58] sm:$0xff] %v9109_v0  ;;  %4960 = vmatprep.mubr.f32.mxu0 %v16685_v59 }
 0x5b5   :  { %v4670_v33 = vpop.f32.mrf.mxu0  ;;  %v6365_v31 = vpop.f32.mrf.mxu1 }
 0x5b6   :  { %7544 = vst [vmem:[%s16462_s2 + $0xf50] sm:$0xff] %v4670_v33  ;;  %7542 = vst [vmem:[%s16462_s2 + $0xf40] sm:$0xff] %v6365_v31  ;;  %v2840_v41 = vpop.permute.xlu0 %2839  ;;  %v16767_v33 = vld [vmem:[#allocation8_spill] sm:$0xff]  ;;  %v16768_v31 = vld [vmem:[#allocation9_spill] sm:$0xff] }
 0x5b7   :  { %9183 = vmatmul.mubr.msk.f32.gmra.mxu1 %vm3016_vm1, %v2840_v41  ;;  %v4674_v27 = vpop.f32.mrf.mxu0  ;;  %8172 = vmatmul.mubr.msk.f32.gmra.mxu0 %vm3016_vm1, %v2838_v15 }
 0x5b8   :  { %7546 = vst [vmem:[%s16462_s2 + $0xf60] sm:$0xff] %v4674_v27  ;;  %4966 = vmatprep.mubr.f32.mxu0 %v16685_v59 }
 0x5b9   :  { %v4676_v16 = vpop.f32.mrf.mxu0  ;;  %v2842_v29 = vpop.permute.xlu1 %2841 }
 0x5ba   :  { %7547 = vst [vmem:[%s16462_s2 + $0xf68] sm:$0xff] %v4676_v16  ;;  %9185 = vmatprep.mubr.msk.f32.mxu1 %vm3016_vm1, %v2842_v29 }
 0x5bb   :  { %v4680_v12 = vpop.f32.mrf.mxu0  ;;  %8173 = vmatmul.mubr.msk.f32.gmra.mxu0 %vm3016_vm1, %v2840_v41  ;;  %v9112_v57 = vpop.f32.mrf.mxu1 }
 0x5bc   :  { %7549 = vst [vmem:[%s16462_s2 + $0xf78] sm:$0xff] %v4680_v12  ;;  %7551 = vst [vmem:[%s16462_s2 + $0xf88] sm:$0xff] %v9112_v57  ;;  %4972 = vmatprep.mubr.f32.mxu0 %v16685_v59  ;;  %v16770_v12 = vld [vmem:[#allocation11_spill] sm:$0xff] }
 0x5bd   :  { %v4682_v49 = vpop.f32.mrf.mxu0  ;;  %v6375_v8 = vpop.f32.mrf.mxu1 }
 0x5be   :  { %7550 = vst [vmem:[%s16462_s2 + $0xf80] sm:$0xff] %v4682_v49  ;;  %7548 = vst [vmem:[%s16462_s2 + $0xf70] sm:$0xff] %v6375_v8  ;;  %v2844_v10 = vpop.permute.xlu0 %2843 }
 0x5bf   :  { %9186 = vmatmul.mubr.msk.f32.gmra.mxu1 %vm3016_vm1, %v2844_v10  ;;  %v4686_v40 = vpop.f32.mrf.mxu0  ;;  %8174 = vmatmul.mubr.msk.f32.gmra.mxu0 %vm3016_vm1, %v2842_v29  ;;  %v16769_v29 = vld [vmem:[#allocation10_spill] sm:$0xff] }
 0x5c0   :  { %7552 = vst [vmem:[%s16462_s2 + $0xf90] sm:$0xff] %v4686_v40  ;;  %4978 = vmatprep.mubr.f32.mxu0 %v16685_v59  ;;  %v16772_v40 = vld [vmem:[#allocation13_spill] sm:$0xff] }
 0x5c1   :  { %v4688_v22 = vpop.f32.mrf.mxu0  ;;  %v2846_v9 = vpop.permute.xlu1 %2845 }
 0x5c2   :  { %7553 = vst [vmem:[%s16462_s2 + $0xf98] sm:$0xff] %v4688_v22  ;;  %9188 = vmatprep.mubr.msk.f32.mxu1 %vm3016_vm1, %v2846_v9 }
 0x5c3   :  { %v4692_v35 = vpop.f32.mrf.mxu0  ;;  %8175 = vmatmul.mubr.msk.f32.gmra.mxu0 %vm3016_vm1, %v2844_v10  ;;  %v16771_v10 = vld [vmem:[#allocation12_spill] sm:$0xff] }
 0x5c4   :  { %7555 = vst [vmem:[%s16462_s2 + $0xfa8] sm:$0xff] %v4692_v35  ;;  %v9115_v47 = vpop.f32.mrf.mxu1  ;;  %4984 = vmatprep.mubr.f32.mxu0 %v16685_v59 }
 0x5c5   :  { %7557 = vst [vmem:[%s16462_s2 + $0xfb8] sm:$0xff] %v9115_v47  ;;  %v4694_v20 = vpop.f32.mrf.mxu0  ;;  %v2848_v51 = vpop.permute.xlu0 %2847  ;;  %v16773_v47 = vld [vmem:[#allocation14_spill] sm:$0xff] }
 0x5c6   :  { %7556 = vst [vmem:[%s16462_s2 + $0xfb0] sm:$0xff] %v4694_v20  ;;  %v6385_v61 = vpop.f32.mrf.mxu1  ;;  %9189 = vmatmul.mubr.msk.f32.gmra.mxu1 %vm3016_vm1, %v2848_v51  ;;  %v16774_v20 = vld [vmem:[#allocation15_spill] sm:$0xff] }
 0x5c7   :  { %7554 = vst [vmem:[%s16462_s2 + $0xfa0] sm:$0xff] %v6385_v61  ;;  %v4698_v60 = vpop.f32.mrf.mxu0  ;;  %8176 = vmatmul.mubr.msk.f32.gmra.mxu0 %vm3016_vm1, %v2846_v9 }
 0x5c8   :  { %7558 = vst [vmem:[%s16462_s2 + $0xfc0] sm:$0xff] %v4698_v60  ;;  %4990 = vmatprep.mubr.f32.mxu0 %v16685_v59 }
 0x5c9   :  { %v4700_v46 = vpop.f32.mrf.mxu0  ;;  %v2850_v42 = vpop.permute.xlu1 %2849 }
 0x5ca   :  { %7559 = vst [vmem:[%s16462_s2 + $0xfc8] sm:$0xff] %v4700_v46  ;;  %9191 = vmatprep.mubr.msk.f32.mxu1 %vm3016_vm1, %v2850_v42  ;;  %v16775_v46 = vld [vmem:[#allocation16_spill] sm:$0xff] }
 0x5cb   :  { %v4704_v4 = vpop.f32.mrf.mxu0  ;;  %8177 = vmatmul.mubr.msk.f32.gmra.mxu0 %vm3016_vm1, %v2848_v51 }
 0x5cc   :  { %7561 = vst [vmem:[%s16462_s2 + $0xfd8] sm:$0xff] %v4704_v4  ;;  %v9118_v39 = vpop.f32.mrf.mxu1  ;;  %4996 = vmatprep.mubr.f32.mxu0 %v16685_v59 }
 0x5cd   :  { %7563 = vst [vmem:[%s16462_s2 + $0xfe8] sm:$0xff] %v9118_v39  ;;  %v4706_v44 = vpop.f32.mrf.mxu0  ;;  %v2852_v43 = vpop.permute.xlu0 %2851 }
 0x5ce   :  { %7562 = vst [vmem:[%s16462_s2 + $0xfe0] sm:$0xff] %v4706_v44  ;;  %v6395_v3 = vpop.f32.mrf.mxu1  ;;  %9192 = vmatmul.mubr.msk.f32.gmra.mxu1 %vm3016_vm1, %v2852_v43 }
 0x5cf   :  { %7560 = vst [vmem:[%s16462_s2 + $0xfd0] sm:$0xff] %v6395_v3  ;;  %v4710_v37 = vpop.f32.mrf.mxu0  ;;  %8178 = vmatmul.mubr.msk.f32.gmra.mxu0 %vm3016_vm1, %v2850_v42  ;;  %v16776_v42 = vld [vmem:[#allocation17_spill] sm:$0xff]  ;;  %v16778_v3 = vld [vmem:[#allocation19_spill] sm:$0xff] }
 0x5d0   :  { %7564 = vst [vmem:[%s16462_s2 + $0xff0] sm:$0xff] %v4710_v37  ;;  %5002 = vmatprep.mubr.f32.mxu0 %v16685_v59 }
 0x5d1   :  { %v4712_v1 = vpop.f32.mrf.mxu0  ;;  %v2854_v17 = vpop.permute.xlu1 %2853 }
 0x5d2   :  { %7565 = vst [vmem:[%s16462_s2 + $0xff8] sm:$0xff] %v4712_v1  ;;  %9194 = vmatprep.mubr.msk.f32.mxu1 %vm3016_vm1, %v2854_v17 }
 0x5d3   :  { %v4716_v34 = vpop.f32.mrf.mxu0  ;;  %8179 = vmatmul.mubr.msk.f32.gmra.mxu0 %vm3016_vm1, %v2852_v43  ;;  %v16777_v43 = vld [vmem:[#allocation18_spill] sm:$0xff] }
 0x5d4   :  { %7567 = vst [vmem:[%s16462_s2 + $0x1008] sm:$0xff] %v4716_v34  ;;  %v9121_v32 = vpop.f32.mrf.mxu1  ;;  %5008 = vmatprep.mubr.f32.mxu0 %v16685_v59  ;;  %v16779_v34 = vld [vmem:[#allocation20_spill] sm:$0xff] }
 0x5d5   :  { %7569 = vst [vmem:[%s16462_s2 + $0x1018] sm:$0xff] %v9121_v32  ;;  %v4718_v62 = vpop.f32.mrf.mxu0  ;;  %v2856_v38 = vpop.permute.xlu0 %2855  ;;  %v16780_v32 = vld [vmem:[#allocation21_spill] sm:$0xff] }
 0x5d6   :  { %7568 = vst [vmem:[%s16462_s2 + $0x1010] sm:$0xff] %v4718_v62  ;;  %v6405_v19 = vpop.f32.mrf.mxu1  ;;  %9195 = vmatmul.mubr.msk.f32.gmra.mxu1 %vm3016_vm1, %v2856_v38 }
 0x5d7   :  { %7566 = vst [vmem:[%s16462_s2 + $0x1000] sm:$0xff] %v6405_v19  ;;  %v4722_v23 = vpop.f32.mrf.mxu0  ;;  %8180 = vmatmul.mubr.msk.f32.gmra.mxu0 %vm3016_vm1, %v2854_v17 }
 0x5d8   :  { %7570 = vst [vmem:[%s16462_s2 + $0x1020] sm:$0xff] %v4722_v23  ;;  %5014 = vmatprep.mubr.f32.mxu0 %v16685_v59  ;;  %v16781_v23 = vld [vmem:[#allocation22_spill] sm:$0xff] }
 0x5d9   :  { %v4724_v6 = vpop.f32.mrf.mxu0  ;;  %v2858_v36 = vpop.permute.xlu1 %2857 }
 0x5da   :  { %7571 = vst [vmem:[%s16462_s2 + $0x1028] sm:$0xff] %v4724_v6  ;;  %9197 = vmatprep.mubr.msk.f32.mxu1 %vm3016_vm1, %v2858_v36  ;;  %v16782_v6 = vld [vmem:[#allocation23_spill] sm:$0xff] }
 0x5db   :  { %v4728_v2 = vpop.f32.mrf.mxu0  ;;  %8181 = vmatmul.mubr.msk.f32.gmra.mxu0 %vm3016_vm1, %v2856_v38 }
 0x5dc   :  { %7573 = vst [vmem:[%s16462_s2 + $0x1038] sm:$0xff] %v4728_v2  ;;  %v9124_v50 = vpop.f32.mrf.mxu1  ;;  %5020 = vmatprep.mubr.f32.mxu0 %v16685_v59 }
 0x5dd   :  { %7575 = vst [vmem:[%s16462_s2 + $0x1048] sm:$0xff] %v9124_v50  ;;  %v4730_v24 = vpop.f32.mrf.mxu0  ;;  %v2860_v18 = vpop.permute.xlu0 %2859 }
 0x5de   :  { %7574 = vst [vmem:[%s16462_s2 + $0x1040] sm:$0xff] %v4730_v24  ;;  %v6415_v56 = vpop.f32.mrf.mxu1  ;;  %9198 = vmatmul.mubr.msk.f32.gmra.mxu1 %vm3016_vm1, %v2860_v18  ;;  %v16783_v24 = vld [vmem:[#allocation25_spill] sm:$0xff] }
 0x5df   :  { %7572 = vst [vmem:[%s16462_s2 + $0x1030] sm:$0xff] %v6415_v56  ;;  %v4734_v52 = vpop.f32.mrf.mxu0  ;;  %8182 = vmatmul.mubr.msk.f32.gmra.mxu0 %vm3016_vm1, %v2858_v36 }
 0x5e0   :  { %7576 = vst [vmem:[%s16462_s2 + $0x1050] sm:$0xff] %v4734_v52  ;;  %5026 = vmatprep.mubr.f32.mxu0 %v16685_v59 }
 0x5e1   :  { %v4736_v30 = vpop.f32.mrf.mxu0 }
 0x5e2   :  { %7577 = vst [vmem:[%s16462_s2 + $0x1058] sm:$0xff] %v4736_v30  ;;  %v2862_v5 = vpop.permute.xlu1 %2861 }
 0x5e3   :  { %9200 = vmatprep.mubr.msk.f32.mxu1 %vm3016_vm1, %v2862_v5  ;;  %v4740_v48 = vpop.f32.mrf.mxu0  ;;  %8183 = vmatmul.mubr.msk.f32.gmra.mxu0 %vm3016_vm1, %v2860_v18  ;;  %v16784_v18 = vld [vmem:[#allocation27_spill] sm:$0xff] }
 0x5e4   :  { %7579 = vst [vmem:[%s16462_s2 + $0x1068] sm:$0xff] %v4740_v48  ;;  %v9127_v25 = vpop.f32.mrf.mxu1  ;;  %9201 = vmatmul.mubr.msk.f32.gmra.mxu1 %vm3016_vm1, %v16761_v55  ;;  %5032 = vmatprep.mubr.f32.mxu0 %v16685_v59  ;;  %v16763_v59 = vld [vmem:[#allocation4_spill] sm:$0xff]  ;;  %v16786_v48 = vld [vmem:[#allocation31_spill] sm:$0xff] }
 0x5e5   :  { %7581 = vst [vmem:[%s16462_s2 + $0x1078] sm:$0xff] %v9127_v25  ;;  %9203 = vmatprep.mubr.msk.f32.mxu1 %vm3016_vm1, %v16762_v11  ;;  %v4742_v21 = vpop.f32.mrf.mxu0 }
 0x5e6   :  { %7580 = vst [vmem:[%s16462_s2 + $0x1070] sm:$0xff] %v4742_v21  ;;  %v6425_v26 = vpop.f32.mrf.mxu1  ;;  %v16787_v21 = vld [vmem:[#allocation33_spill] sm:$0xff] }
 0x5e7   :  { %7578 = vst [vmem:[%s16462_s2 + $0x1060] sm:$0xff] %v6425_v26  ;;  %v4746_v58 = vpop.f32.mrf.mxu0  ;;  %8184 = vmatmul.mubr.msk.f32.gmra.mxu0 %vm3016_vm1, %v2862_v5  ;;  %v16785_v5 = vld [vmem:[#allocation29_spill] sm:$0xff]  ;;  %v16788_v26 = vld [vmem:[#allocation35_spill] sm:$0xff] }
 0x5e8   :  { %7582 = vst [vmem:[%s16462_s2 + $0x1080] sm:$0xff] %v4746_v58  ;;  %9204 = vmatmul.mubr.msk.f32.gmra.mxu1 %vm3016_vm1, %v16763_v59 }
 0x5e9   :  { %9206 = vmatprep.mubr.msk.f32.mxu1 %vm3016_vm1, %v16764_v53  ;;  %v4748_v28 = vpop.f32.mrf.mxu0 }
 0x5ea   :  { %7583 = vst [vmem:[%s16462_s2 + $0x1088] sm:$0xff] %v4748_v28  ;;  %v16789_v28 = vld [vmem:[#allocation37_spill] sm:$0xff] }
 0x5eb   :  { %v4752_v14 = vpop.f32.mrf.mxu0 }
 0x5ec   :  { %7585 = vst [vmem:[%s16462_s2 + $0x1098] sm:$0xff] %v4752_v14  ;;  %v9130_v54 = vpop.f32.mrf.mxu1  ;;  %9207 = vmatmul.mubr.msk.f32.gmra.mxu1 %vm3016_vm1, %v16765_v13  ;;  %v16790_v14 = vld [vmem:[#allocation39_spill] sm:$0xff] }
 0x5ed   :  { %7587 = vst [vmem:[%s16462_s2 + $0x10a8] sm:$0xff] %v9130_v54  ;;  %9209 = vmatprep.mubr.msk.f32.mxu1 %vm3016_vm1, %v16766_v45  ;;  %v4754_v15 = vpop.f32.mrf.mxu0 }
 0x5ee   :  { %7586 = vst [vmem:[%s16462_s2 + $0x10a0] sm:$0xff] %v4754_v15  ;;  %v6435_v63 = vpop.f32.mrf.mxu1  ;;  %v16791_v15 = vld [vmem:[#allocation41_spill] sm:$0xff] }
 0x5ef   :  { %7584 = vst [vmem:[%s16462_s2 + $0x1090] sm:$0xff] %v6435_v63  ;;  %v4758_v0 = vpop.f32.mrf.mxu0  ;;  %v16792_v63 = vld [vmem:[#allocation42_spill] sm:$0xff] }
 0x5f0   :  { %7588 = vst [vmem:[%s16462_s2 + $0x10b0] sm:$0xff] %v4758_v0  ;;  %9210 = vmatmul.mubr.msk.f32.gmra.mxu1 %vm3016_vm1, %v16767_v33 }
 0x5f1   :  { %9212 = vmatprep.mubr.msk.f32.mxu1 %vm3016_vm1, %v16768_v31  ;;  %v4760_v41 = vpop.f32.mrf.mxu0 }
 0x5f2   :  { %7589 = vst [vmem:[%s16462_s2 + $0x10b8] sm:$0xff] %v4760_v41  ;;  %v16793_v41 = vld [vmem:[#allocation44_spill] sm:$0xff] }
 0x5f3   :  { %v4764_v27 = vpop.f32.mrf.mxu0 }
 0x5f4   :  { %7591 = vst [vmem:[%s16462_s2 + $0x10c8] sm:$0xff] %v4764_v27  ;;  %v9133_v16 = vpop.f32.mrf.mxu1  ;;  %9213 = vmatmul.mubr.msk.f32.gmra.mxu1 %vm3016_vm1, %v16769_v29  ;;  %v16794_v27 = vld [vmem:[#allocation46_spill] sm:$0xff] }
 0x5f5   :  { %7593 = vst [vmem:[%s16462_s2 + $0x10d8] sm:$0xff] %v9133_v16  ;;  %9215 = vmatprep.mubr.msk.f32.mxu1 %vm3016_vm1, %v16770_v12  ;;  %v4766_v57 = vpop.f32.mrf.mxu0 }
 0x5f6   :  { %7592 = vst [vmem:[%s16462_s2 + $0x10d0] sm:$0xff] %v4766_v57  ;;  %v6445_v49 = vpop.f32.mrf.mxu1  ;;  %v16795_v57 = vld [vmem:[#allocation48_spill] sm:$0xff] }
 0x5f7   :  { %7590 = vst [vmem:[%s16462_s2 + $0x10c0] sm:$0xff] %v6445_v49  ;;  %v4770_v8 = vpop.f32.mrf.mxu0  ;;  %v16796_v49 = vld [vmem:[#allocation50_spill] sm:$0xff] }
 0x5f8   :  { %7594 = vst [vmem:[%s16462_s2 + $0x10e0] sm:$0xff] %v4770_v8  ;;  %9216 = vmatmul.mubr.msk.f32.gmra.mxu1 %vm3016_vm1, %v16771_v10 }
 0x5f9   :  { %9218 = vmatprep.mubr.msk.f32.mxu1 %vm3016_vm1, %v16772_v40  ;;  %v4772_v22 = vpop.f32.mrf.mxu0 }
 0x5fa   :  { %7595 = vst [vmem:[%s16462_s2 + $0x10e8] sm:$0xff] %v4772_v22  ;;  %v16797_v22 = vld [vmem:[#allocation52_spill] sm:$0xff] }
 0x5fb   :  { %v4776_v9 = vpop.f32.mrf.mxu0 }
 0x5fc   :  { %7597 = vst [vmem:[%s16462_s2 + $0x10f8] sm:$0xff] %v4776_v9  ;;  %v9136_v35 = vpop.f32.mrf.mxu1  ;;  %9219 = vmatmul.mubr.msk.f32.gmra.mxu1 %vm3016_vm1, %v16773_v47  ;;  %v16798_v9 = vld [vmem:[#allocation54_spill] sm:$0xff] }
 0x5fd   :  { %7599 = vst [vmem:[%s16462_s2 + $0x1108] sm:$0xff] %v9136_v35  ;;  %9221 = vmatprep.mubr.msk.f32.mxu1 %vm3016_vm1, %v16774_v20  ;;  %v4778_v51 = vpop.f32.mrf.mxu0 }
 0x5fe   :  { %7598 = vst [vmem:[%s16462_s2 + $0x1100] sm:$0xff] %v4778_v51  ;;  %v6455_v61 = vpop.f32.mrf.mxu1  ;;  %v16799_v51 = vld [vmem:[#allocation56_spill] sm:$0xff] }
 0x5ff   :  { %7596 = vst [vmem:[%s16462_s2 + $0x10f0] sm:$0xff] %v6455_v61  ;;  %v4782_v60 = vpop.f32.mrf.mxu0 }
 0x600   :  { %7600 = vst [vmem:[%s16462_s2 + $0x1110] sm:$0xff] %v4782_v60  ;;  %9222 = vmatmul.mubr.msk.f32.gmra.mxu1 %vm3016_vm1, %v16775_v46  ;;  %v16800_v60 = vld [vmem:[#allocation58_spill] sm:$0xff] }
 0x601   :  { %9224 = vmatprep.mubr.msk.f32.mxu1 %vm3016_vm1, %v16776_v42  ;;  %v4784_v4 = vpop.f32.mrf.mxu0 }
 0x602   :  { %7601 = vst [vmem:[%s16462_s2 + $0x1118] sm:$0xff] %v4784_v4 }
 0x603   :  { %v4788_v39 = vpop.f32.mrf.mxu0 }
 0x604   :  { %7603 = vst [vmem:[%s16462_s2 + $0x1128] sm:$0xff] %v4788_v39  ;;  %v9139_v44 = vpop.f32.mrf.mxu1  ;;  %9225 = vmatmul.mubr.msk.f32.gmra.mxu1 %vm3016_vm1, %v16777_v43  ;;  %v16801_v39 = vld [vmem:[#allocation60_spill] sm:$0xff] }
 0x605   :  { %7605 = vst [vmem:[%s16462_s2 + $0x1138] sm:$0xff] %v9139_v44  ;;  %9227 = vmatprep.mubr.msk.f32.mxu1 %vm3016_vm1, %v16778_v3  ;;  %v4790_v37 = vpop.f32.mrf.mxu0  ;;  %v16802_v44 = vld [vmem:[#allocation62_spill] sm:$0xff] }
 0x606   :  { %7604 = vst [vmem:[%s16462_s2 + $0x1130] sm:$0xff] %v4790_v37  ;;  %v6465_v1 = vpop.f32.mrf.mxu1 }
 0x607   :  { %7602 = vst [vmem:[%s16462_s2 + $0x1120] sm:$0xff] %v6465_v1  ;;  %v4794_v17 = vpop.f32.mrf.mxu0  ;;  %v16803_v1 = vld [vmem:[#allocation64_spill] sm:$0xff] }
 0x608   :  { %7606 = vst [vmem:[%s16462_s2 + $0x1140] sm:$0xff] %v4794_v17  ;;  %9228 = vmatmul.mubr.msk.f32.gmra.mxu1 %vm3016_vm1, %v16779_v34  ;;  %v16804_v34 = vld [vmem:[#allocation66_spill] sm:$0xff] }
 0x609   :  { %9230 = vmatprep.mubr.msk.f32.mxu1 %vm3016_vm1, %v16780_v32  ;;  %v4796_v62 = vpop.f32.mrf.mxu0 }
 0x60a   :  { %7607 = vst [vmem:[%s16462_s2 + $0x1148] sm:$0xff] %v4796_v62 }
 0x60b   :  { %v4800_v38 = vpop.f32.mrf.mxu0 }
 0x60c   :  { %7609 = vst [vmem:[%s16462_s2 + $0x1158] sm:$0xff] %v4800_v38  ;;  %v9142_v19 = vpop.f32.mrf.mxu1  ;;  %9231 = vmatmul.mubr.msk.f32.gmra.mxu1 %vm3016_vm1, %v16781_v23  ;;  %v16805_v38 = vld [vmem:[#allocation68_spill] sm:$0xff] }
 0x60d   :  { %7611 = vst [vmem:[%s16462_s2 + $0x1168] sm:$0xff] %v9142_v19  ;;  %9233 = vmatprep.mubr.msk.f32.mxu1 %vm3016_vm1, %v16782_v6  ;;  %v4802_v36 = vpop.f32.mrf.mxu0  ;;  %v16806_v19 = vld [vmem:[#allocation69_spill] sm:$0xff] }
 0x60e   :  { %7610 = vst [vmem:[%s16462_s2 + $0x1160] sm:$0xff] %v4802_v36  ;;  %v6475_v2 = vpop.f32.mrf.mxu1 }
 0x60f   :  { %7608 = vst [vmem:[%s16462_s2 + $0x1150] sm:$0xff] %v6475_v2  ;;  %v4806_v50 = vpop.f32.mrf.mxu0  ;;  %v16807_v2 = vld [vmem:[#allocation70_spill] sm:$0xff] }
 0x610   :  { %7612 = vst [vmem:[%s16462_s2 + $0x1170] sm:$0xff] %v4806_v50  ;;  %9234 = vmatmul.mubr.msk.f32.gmra.mxu1 %vm3016_vm1, %v16783_v24  ;;  %v16808_v24 = vld [vmem:[#allocation71_spill] sm:$0xff] }
 0x611   :  { %9236 = vmatprep.mubr.msk.f32.mxu1 %vm3016_vm1, %v16784_v18  ;;  %v4808_v56 = vpop.f32.mrf.mxu0 }
 0x612   :  { %7613 = vst [vmem:[%s16462_s2 + $0x1178] sm:$0xff] %v4808_v56 }
 0x613   :  { %v4812_v52 = vpop.f32.mrf.mxu0 }
 0x614   :  { %7615 = vst [vmem:[%s16462_s2 + $0x1188] sm:$0xff] %v4812_v52  ;;  %v9145_v30 = vpop.f32.mrf.mxu1  ;;  %9237 = vmatmul.mubr.msk.f32.gmra.mxu1 %vm3016_vm1, %v16785_v5  ;;  %v16809_v52 = vld [vmem:[#allocation72_spill] sm:$0xff] }
 0x615   :  { %7617 = vst [vmem:[%s16462_s2 + $0x1198] sm:$0xff] %v9145_v30  ;;  %9239 = vmatprep.mubr.msk.f32.mxu1 %vm3016_vm1, %v16786_v48  ;;  %v4814_v25 = vpop.f32.mrf.mxu0  ;;  %v16810_v30 = vld [vmem:[#allocation74_spill] sm:$0xff] }
 0x616   :  { %7616 = vst [vmem:[%s16462_s2 + $0x1190] sm:$0xff] %v4814_v25  ;;  %v6485_v55 = vpop.f32.mrf.mxu1 }
 0x617   :  { %7614 = vst [vmem:[%s16462_s2 + $0x1180] sm:$0xff] %v6485_v55  ;;  %v4818_v11 = vpop.f32.mrf.mxu0  ;;  %v16811_v55 = vld [vmem:[#allocation76_spill] sm:$0xff] }
 0x618   :  { %7618 = vst [vmem:[%s16462_s2 + $0x11a0] sm:$0xff] %v4818_v11  ;;  %9240 = vmatmul.mubr.msk.f32.gmra.mxu1 %vm3016_vm1, %v16787_v21  ;;  %v16812_v21 = vld [vmem:[#allocation78_spill] sm:$0xff] }
 0x619   :  { %9242 = vmatprep.mubr.msk.f32.mxu1 %vm3016_vm1, %v16788_v26  ;;  %v4820_v58 = vpop.f32.mrf.mxu0 }
 0x61a   :  { %7619 = vst [vmem:[%s16462_s2 + $0x11a8] sm:$0xff] %v4820_v58 }
 0x61b   :  { %v4824_v59 = vpop.f32.mrf.mxu0 }
 0x61c   :  { %7621 = vst [vmem:[%s16462_s2 + $0x11b8] sm:$0xff] %v4824_v59  ;;  %v9148_v53 = vpop.f32.mrf.mxu1  ;;  %9243 = vmatmul.mubr.msk.f32.gmra.mxu1 %vm3016_vm1, %v16789_v28  ;;  %v16813_v59 = vld [vmem:[#allocation80_spill] sm:$0xff] }
 0x61d   :  { %7623 = vst [vmem:[%s16462_s2 + $0x11c8] sm:$0xff] %v9148_v53  ;;  %9245 = vmatprep.mubr.msk.f32.mxu1 %vm3016_vm1, %v16790_v14  ;;  %v4826_v54 = vpop.f32.mrf.mxu0  ;;  %v16814_v53 = vld [vmem:[#allocation82_spill] sm:$0xff] }
 0x61e   :  { %7622 = vst [vmem:[%s16462_s2 + $0x11c0] sm:$0xff] %v4826_v54  ;;  %v6495_v13 = vpop.f32.mrf.mxu1 }
 0x61f   :  { %7620 = vst [vmem:[%s16462_s2 + $0x11b0] sm:$0xff] %v6495_v13  ;;  %v4830_v45 = vpop.f32.mrf.mxu0  ;;  %v16815_v13 = vld [vmem:[#allocation84_spill] sm:$0xff] }
 0x620   :  { %7624 = vst [vmem:[%s16462_s2 + $0x11d0] sm:$0xff] %v4830_v45  ;;  %9246 = vmatmul.mubr.msk.f32.gmra.mxu1 %vm3016_vm1, %v16791_v15  ;;  %v16816_v15 = vld [vmem:[#allocation86_spill] sm:$0xff] }
 0x621   :  { %9248 = vmatprep.mubr.msk.f32.mxu1 %vm3016_vm1, %v16792_v63  ;;  %v4832_v0 = vpop.f32.mrf.mxu0 }
 0x622   :  { %7625 = vst [vmem:[%s16462_s2 + $0x11d8] sm:$0xff] %v4832_v0 }
 0x623   :  { %v4836_v33 = vpop.f32.mrf.mxu0 }
 0x624   :  { %7627 = vst [vmem:[%s16462_s2 + $0x11e8] sm:$0xff] %v4836_v33  ;;  %v9151_v31 = vpop.f32.mrf.mxu1  ;;  %9249 = vmatmul.mubr.msk.f32.gmra.mxu1 %vm3016_vm1, %v16793_v41  ;;  %v16817_v33 = vld [vmem:[#allocation88_spill] sm:$0xff] }
 0x625   :  { %7629 = vst [vmem:[%s16462_s2 + $0x11f8] sm:$0xff] %v9151_v31  ;;  %9251 = vmatprep.mubr.msk.f32.mxu1 %vm3016_vm1, %v16794_v27  ;;  %v4838_v16 = vpop.f32.mrf.mxu0  ;;  %v16818_v31 = vld [vmem:[#allocation90_spill] sm:$0xff] }
 0x626   :  { %7628 = vst [vmem:[%s16462_s2 + $0x11f0] sm:$0xff] %v4838_v16  ;;  %v6505_v29 = vpop.f32.mrf.mxu1 }
 0x627   :  { %7626 = vst [vmem:[%s16462_s2 + $0x11e0] sm:$0xff] %v6505_v29  ;;  %v4842_v12 = vpop.f32.mrf.mxu0  ;;  %v16819_v29 = vld [vmem:[#allocation92_spill] sm:$0xff] }
 0x628   :  { %7630 = vst [vmem:[%s16462_s2 + $0x1200] sm:$0xff] %v4842_v12  ;;  %9252 = vmatmul.mubr.msk.f32.gmra.mxu1 %vm3016_vm1, %v16795_v57  ;;  %v16820_v57 = vld [vmem:[#allocation94_spill] sm:$0xff] }
 0x629   :  { %9254 = vmatprep.mubr.msk.f32.mxu1 %vm3016_vm1, %v16796_v49  ;;  %v4844_v8 = vpop.f32.mrf.mxu0 }
 0x62a   :  { %7631 = vst [vmem:[%s16462_s2 + $0x1208] sm:$0xff] %v4844_v8 }
 0x62b   :  { %v4848_v10 = vpop.f32.mrf.mxu0 }
 0x62c   :  { %7633 = vst [vmem:[%s16462_s2 + $0x1218] sm:$0xff] %v4848_v10  ;;  %v9154_v40 = vpop.f32.mrf.mxu1  ;;  %9255 = vmatmul.mubr.msk.f32.gmra.mxu1 %vm3016_vm1, %v16797_v22  ;;  %v16821_v10 = vld [vmem:[#allocation96_spill] sm:$0xff] }
 0x62d   :  { %7635 = vst [vmem:[%s16462_s2 + $0x1228] sm:$0xff] %v9154_v40  ;;  %9257 = vmatprep.mubr.msk.f32.mxu1 %vm3016_vm1, %v16798_v9  ;;  %v4850_v35 = vpop.f32.mrf.mxu0  ;;  %v16822_v40 = vld [vmem:[#allocation98_spill] sm:$0xff] }
 0x62e   :  { %7634 = vst [vmem:[%s16462_s2 + $0x1220] sm:$0xff] %v4850_v35  ;;  %v6515_v47 = vpop.f32.mrf.mxu1 }
 0x62f   :  { %7632 = vst [vmem:[%s16462_s2 + $0x1210] sm:$0xff] %v6515_v47  ;;  %v4854_v20 = vpop.f32.mrf.mxu0  ;;  %v16823_v47 = vld [vmem:[#allocation100_spill] sm:$0xff] }
 0x630   :  { %7636 = vst [vmem:[%s16462_s2 + $0x1230] sm:$0xff] %v4854_v20  ;;  %9258 = vmatmul.mubr.msk.f32.gmra.mxu1 %vm3016_vm1, %v16799_v51  ;;  %v9157_v61 = vpop.f32.mrf.mxu1  ;;  %v16824_v51 = vld [vmem:[#allocation102_spill] sm:$0xff] }
 0x631   :  { %7641 = vst [vmem:[%s16462_s2 + $0x1258] sm:$0xff] %v9157_v61  ;;  %9260 = vmatprep.mubr.msk.f32.mxu1 %vm3016_vm1, %v16800_v60  ;;  %v4856_v46 = vpop.f32.mrf.mxu0 }
 0x632   :  { %7637 = vst [vmem:[%s16462_s2 + $0x1238] sm:$0xff] %v4856_v46  ;;  %v6525_v42 = vpop.f32.mrf.mxu1  ;;  %v16825_v46 = vld [vmem:[#allocation104_spill] sm:$0xff] }
 0x633   :  { %7638 = vst [vmem:[%s16462_s2 + $0x1240] sm:$0xff] %v6525_v42  ;;  %v4860_v4 = vpop.f32.mrf.mxu0  ;;  %v16826_v42 = vld [vmem:[#allocation106_spill] sm:$0xff] }
 0x634   :  { %7639 = vst [vmem:[%s16462_s2 + $0x1248] sm:$0xff] %v4860_v4  ;;  %9261 = vmatmul.mubr.msk.f32.gmra.mxu1 %vm3016_vm1, %v16801_v39 }
 0x635   :  { %9263 = vmatprep.mubr.msk.f32.mxu1 %vm3016_vm1, %v16802_v44  ;;  %v4862_v43 = vpop.f32.mrf.mxu0 }
 0x636   :  { %7640 = vst [vmem:[%s16462_s2 + $0x1250] sm:$0xff] %v4862_v43  ;;  %v9160_v3 = vpop.f32.mrf.mxu1  ;;  %v16827_v43 = vld [vmem:[#allocation108_spill] sm:$0xff] }
 0x637   :  { %7647 = vst [vmem:[%s16462_s2 + $0x1288] sm:$0xff] %v9160_v3  ;;  %v4866_v37 = vpop.f32.mrf.mxu0 }
 0x638   :  { %7642 = vst [vmem:[%s16462_s2 + $0x1260] sm:$0xff] %v4866_v37  ;;  %9264 = vmatmul.mubr.msk.f32.gmra.mxu1 %vm3016_vm1, %v16803_v1  ;;  %v6535_v17 = vpop.f32.mrf.mxu1  ;;  %v16828_v37 = vld [vmem:[#allocation110_spill] sm:$0xff] }
 0x639   :  { %7644 = vst [vmem:[%s16462_s2 + $0x1270] sm:$0xff] %v6535_v17  ;;  %9266 = vmatprep.mubr.msk.f32.mxu1 %vm3016_vm1, %v16804_v34  ;;  %v4868_v32 = vpop.f32.mrf.mxu0  ;;  %v16829_v34 = vld [vmem:[#allocation112_spill] sm:$0xff] }
 0x63a   :  { %7643 = vst [vmem:[%s16462_s2 + $0x1268] sm:$0xff] %v4868_v32  ;;  %v16830_v32 = vld [vmem:[#allocation114_spill] sm:$0xff] }
 0x63b   :  { %v4872_v62 = vpop.f32.mrf.mxu0 }
 0x63c   :  { %7645 = vst [vmem:[%s16462_s2 + $0x1278] sm:$0xff] %v4872_v62  ;;  %9267 = vmatmul.mubr.msk.f32.gmra.mxu1 %vm3016_vm1, %v16805_v38 }
 0x63d   :  { %9269 = vmatprep.mubr.msk.f32.mxu1 %vm3016_vm1, %v16806_v19  ;;  %v4874_v23 = vpop.f32.mrf.mxu0 }
 0x63e   :  { %7646 = vst [vmem:[%s16462_s2 + $0x1280] sm:$0xff] %v4874_v23  ;;  %v9163_v6 = vpop.f32.mrf.mxu1  ;;  %v16831_v23 = vld [vmem:[#allocation116_spill] sm:$0xff] }
 0x63f   :  { %7653 = vst [vmem:[%s16462_s2 + $0x12b8] sm:$0xff] %v9163_v6  ;;  %v4878_v36 = vpop.f32.mrf.mxu0 }
 0x640   :  { %7648 = vst [vmem:[%s16462_s2 + $0x1290] sm:$0xff] %v4878_v36  ;;  %9270 = vmatmul.mubr.msk.f32.gmra.mxu1 %vm3016_vm1, %v16807_v2  ;;  %v6545_v50 = vpop.f32.mrf.mxu1  ;;  %v16832_v36 = vld [vmem:[#allocation118_spill] sm:$0xff] }
 0x641   :  { %7650 = vst [vmem:[%s16462_s2 + $0x12a0] sm:$0xff] %v6545_v50  ;;  %9272 = vmatprep.mubr.msk.f32.mxu1 %vm3016_vm1, %v16808_v24  ;;  %v4880_v18 = vpop.f32.mrf.mxu0  ;;  %v16833_v24 = vld [vmem:[#allocation120_spill] sm:$0xff] }
 0x642   :  { %7649 = vst [vmem:[%s16462_s2 + $0x1298] sm:$0xff] %v4880_v18  ;;  %v16834_v18 = vld [vmem:[#allocation123_spill] sm:$0xff] }
 0x643   :  { %v4884_v56 = vpop.f32.mrf.mxu0 }
 0x644   :  { %7651 = vst [vmem:[%s16462_s2 + $0x12a8] sm:$0xff] %v4884_v56  ;;  %9273 = vmatmul.mubr.msk.f32.gmra.mxu1 %vm3016_vm1, %v16809_v52 }
 0x645   :  { %9275 = vmatprep.mubr.msk.f32.mxu1 %vm3016_vm1, %v16810_v30  ;;  %v4886_v5 = vpop.f32.mrf.mxu0 }
 0x646   :  { %7652 = vst [vmem:[%s16462_s2 + $0x12b0] sm:$0xff] %v4886_v5  ;;  %v9166_v48 = vpop.f32.mrf.mxu1 }
 0x647   :  { %7659 = vst [vmem:[%s16462_s2 + $0x12e8] sm:$0xff] %v9166_v48  ;;  %v4890_v25 = vpop.f32.mrf.mxu0 }
 0x648   :  { %7654 = vst [vmem:[%s16462_s2 + $0x12c0] sm:$0xff] %v4890_v25  ;;  %9276 = vmatmul.mubr.msk.f32.gmra.mxu1 %vm3016_vm1, %v16811_v55  ;;  %v6555_v11 = vpop.f32.mrf.mxu1 }
 0x649   :  { %7656 = vst [vmem:[%s16462_s2 + $0x12d0] sm:$0xff] %v6555_v11  ;;  %9278 = vmatprep.mubr.msk.f32.mxu1 %vm3016_vm1, %v16812_v21  ;;  %v4892_v26 = vpop.f32.mrf.mxu0 }
 0x64a   :  { %7655 = vst [vmem:[%s16462_s2 + $0x12c8] sm:$0xff] %v4892_v26 }
 0x64b   :  { %v4896_v58 = vpop.f32.mrf.mxu0 }
 0x64c   :  { %7657 = vst [vmem:[%s16462_s2 + $0x12d8] sm:$0xff] %v4896_v58  ;;  %9279 = vmatmul.mubr.msk.f32.gmra.mxu1 %vm3016_vm1, %v16813_v59 }
 0x64d   :  { %9281 = vmatprep.mubr.msk.f32.mxu1 %vm3016_vm1, %v16814_v53  ;;  %v4898_v28 = vpop.f32.mrf.mxu0 }
 0x64e   :  { %7658 = vst [vmem:[%s16462_s2 + $0x12e0] sm:$0xff] %v4898_v28  ;;  %v9169_v14 = vpop.f32.mrf.mxu1 }
 0x64f   :  { %7665 = vst [vmem:[%s16462_s2 + $0x1318] sm:$0xff] %v9169_v14  ;;  %v4902_v54 = vpop.f32.mrf.mxu0 }
 0x650   :  { %7660 = vst [vmem:[%s16462_s2 + $0x12f0] sm:$0xff] %v4902_v54  ;;  %9282 = vmatmul.mubr.msk.f32.gmra.mxu1 %vm3016_vm1, %v16815_v13  ;;  %v6565_v45 = vpop.f32.mrf.mxu1 }
 0x651   :  { %7662 = vst [vmem:[%s16462_s2 + $0x1300] sm:$0xff] %v6565_v45  ;;  %9284 = vmatprep.mubr.msk.f32.mxu1 %vm3016_vm1, %v16816_v15  ;;  %v4904_v63 = vpop.f32.mrf.mxu0 }
 0x652   :  { %7661 = vst [vmem:[%s16462_s2 + $0x12f8] sm:$0xff] %v4904_v63 }
 0x653   :  { %v4908_v0 = vpop.f32.mrf.mxu0 }
 0x654   :  { %7663 = vst [vmem:[%s16462_s2 + $0x1308] sm:$0xff] %v4908_v0  ;;  %9285 = vmatmul.mubr.msk.f32.gmra.mxu1 %vm3016_vm1, %v16817_v33 }
 0x655   :  { %9287 = vmatprep.mubr.msk.f32.mxu1 %vm3016_vm1, %v16818_v31  ;;  %v4910_v41 = vpop.f32.mrf.mxu0 }
 0x656   :  { %7664 = vst [vmem:[%s16462_s2 + $0x1310] sm:$0xff] %v4910_v41  ;;  %v9172_v27 = vpop.f32.mrf.mxu1 }
 0x657   :  { %7671 = vst [vmem:[%s16462_s2 + $0x1348] sm:$0xff] %v9172_v27  ;;  %v4914_v16 = vpop.f32.mrf.mxu0 }
 0x658   :  { %7666 = vst [vmem:[%s16462_s2 + $0x1320] sm:$0xff] %v4914_v16  ;;  %9288 = vmatmul.mubr.msk.f32.gmra.mxu1 %vm3016_vm1, %v16819_v29  ;;  %v6575_v12 = vpop.f32.mrf.mxu1 }
 0x659   :  { %7668 = vst [vmem:[%s16462_s2 + $0x1330] sm:$0xff] %v6575_v12  ;;  %9290 = vmatprep.mubr.msk.f32.mxu1 %vm3016_vm1, %v16820_v57  ;;  %v4916_v49 = vpop.f32.mrf.mxu0 }
 0x65a   :  { %7667 = vst [vmem:[%s16462_s2 + $0x1328] sm:$0xff] %v4916_v49 }
 0x65b   :  { %v4920_v8 = vpop.f32.mrf.mxu0 }
 0x65c   :  { %7669 = vst [vmem:[%s16462_s2 + $0x1338] sm:$0xff] %v4920_v8  ;;  %9291 = vmatmul.mubr.msk.f32.gmra.mxu1 %vm3016_vm1, %v16821_v10 }
 0x65d   :  { %9293 = vmatprep.mubr.msk.f32.mxu1 %vm3016_vm1, %v16822_v40  ;;  %v4922_v22 = vpop.f32.mrf.mxu0 }
 0x65e   :  { %7670 = vst [vmem:[%s16462_s2 + $0x1340] sm:$0xff] %v4922_v22  ;;  %v9175_v9 = vpop.f32.mrf.mxu1 }
 0x65f   :  { %7677 = vst [vmem:[%s16462_s2 + $0x1378] sm:$0xff] %v9175_v9  ;;  %v4926_v35 = vpop.f32.mrf.mxu0 }
 0x660   :  { %7672 = vst [vmem:[%s16462_s2 + $0x1350] sm:$0xff] %v4926_v35  ;;  %9294 = vmatmul.mubr.msk.f32.gmra.mxu1 %vm3016_vm1, %v16823_v47  ;;  %v6585_v20 = vpop.f32.mrf.mxu1 }
 0x661   :  { %7674 = vst [vmem:[%s16462_s2 + $0x1360] sm:$0xff] %v6585_v20  ;;  %9296 = vmatprep.mubr.msk.f32.mxu1 %vm3016_vm1, %v16824_v51  ;;  %v4928_v61 = vpop.f32.mrf.mxu0 }
 0x662   :  { %7673 = vst [vmem:[%s16462_s2 + $0x1358] sm:$0xff] %v4928_v61 }
 0x663   :  { %v4932_v60 = vpop.f32.mrf.mxu0 }
 0x664   :  { %7675 = vst [vmem:[%s16462_s2 + $0x1368] sm:$0xff] %v4932_v60  ;;  %9297 = vmatmul.mubr.msk.f32.gmra.mxu1 %vm3016_vm1, %v16825_v46 }
 0x665   :  { %9299 = vmatprep.mubr.msk.f32.mxu1 %vm3016_vm1, %v16826_v42  ;;  %v4934_v4 = vpop.f32.mrf.mxu0 }
 0x666   :  { %7676 = vst [vmem:[%s16462_s2 + $0x1370] sm:$0xff] %v4934_v4 }
 0x667   :  { %v9178_v39 = vpop.f32.mrf.mxu1  ;;  %v4938_v44 = vpop.f32.mrf.mxu0 }
 0x668   :  { %7683 = vst [vmem:[%s16462_s2 + $0x13a8] sm:$0xff] %v9178_v39  ;;  %7678 = vst [vmem:[%s16462_s2 + $0x1380] sm:$0xff] %v4938_v44  ;;  %9300 = vmatmul.mubr.msk.f32.gmra.mxu1 %vm3016_vm1, %v16827_v43 }
 0x669   :  { %v6595_v3 = vpop.f32.mrf.mxu1  ;;  %9302 = vmatprep.mubr.msk.f32.mxu1 %vm3016_vm1, %v16828_v37  ;;  %v4940_v1 = vpop.f32.mrf.mxu0 }
 0x66a   :  { %7680 = vst [vmem:[%s16462_s2 + $0x1390] sm:$0xff] %v6595_v3  ;;  %7679 = vst [vmem:[%s16462_s2 + $0x1388] sm:$0xff] %v4940_v1 }
 0x66b   :  { %v4944_v17 = vpop.f32.mrf.mxu0 }
 0x66c   :  { %7681 = vst [vmem:[%s16462_s2 + $0x1398] sm:$0xff] %v4944_v17  ;;  %9303 = vmatmul.mubr.msk.f32.gmra.mxu1 %vm3016_vm1, %v16829_v34 }
 0x66d   :  { %9305 = vmatprep.mubr.msk.f32.mxu1 %vm3016_vm1, %v16830_v32  ;;  %v4946_v62 = vpop.f32.mrf.mxu0 }
 0x66e   :  { %7682 = vst [vmem:[%s16462_s2 + $0x13a0] sm:$0xff] %v4946_v62 }
 0x66f   :  { %v9181_v38 = vpop.f32.mrf.mxu1  ;;  %v4950_v19 = vpop.f32.mrf.mxu0 }
 0x670   :  { %7689 = vst [vmem:[%s16462_s2 + $0x13d8] sm:$0xff] %v9181_v38  ;;  %7684 = vst [vmem:[%s16462_s2 + $0x13b0] sm:$0xff] %v4950_v19  ;;  %9306 = vmatmul.mubr.msk.f32.gmra.mxu1 %vm3016_vm1, %v16831_v23 }
 0x671   :  { %v6605_v6 = vpop.f32.mrf.mxu1  ;;  %9308 = vmatprep.mubr.msk.f32.mxu1 %vm3016_vm1, %v16832_v36  ;;  %v4952_v2 = vpop.f32.mrf.mxu0 }
 0x672   :  { %7686 = vst [vmem:[%s16462_s2 + $0x13c0] sm:$0xff] %v6605_v6  ;;  %7685 = vst [vmem:[%s16462_s2 + $0x13b8] sm:$0xff] %v4952_v2 }
 0x673   :  { %v4956_v50 = vpop.f32.mrf.mxu0 }
 0x674   :  { %7687 = vst [vmem:[%s16462_s2 + $0x13c8] sm:$0xff] %v4956_v50  ;;  %9309 = vmatmul.mubr.msk.f32.gmra.mxu1 %vm3016_vm1, %v16833_v24 }
 0x675   :  { %9311 = vmatprep.mubr.msk.f32.mxu1 %vm3016_vm1, %v16834_v18  ;;  %v4958_v56 = vpop.f32.mrf.mxu0 }
 0x676   :  { %7688 = vst [vmem:[%s16462_s2 + $0x13d0] sm:$0xff] %v4958_v56 }
 0x677   :  { %v9184_v52 = vpop.f32.mrf.mxu1  ;;  %v4962_v30 = vpop.f32.mrf.mxu0 }
 0x678   :  { %7695 = vst [vmem:[%s16462_s2 + $0x1408] sm:$0xff] %v9184_v52  ;;  %7690 = vst [vmem:[%s16462_s2 + $0x13e0] sm:$0xff] %v4962_v30  ;;  %9312 = vmatmul.mubr.msk.f32.gmra.mxu1 %vm3016_vm1, %v12413_v7 }
 0x679   :  { %v6615_v5 = vpop.f32.mrf.mxu1  ;;  %v4964_v48 = vpop.f32.mrf.mxu0 }
 0x67a   :  { %7692 = vst [vmem:[%s16462_s2 + $0x13f0] sm:$0xff] %v6615_v5  ;;  %7691 = vst [vmem:[%s16462_s2 + $0x13e8] sm:$0xff] %v4964_v48 }
 0x67b   :  { %v4968_v25 = vpop.f32.mrf.mxu0 }
 0x67c   :  { %7693 = vst [vmem:[%s16462_s2 + $0x13f8] sm:$0xff] %v4968_v25 }
 0x67d   :  { %v4970_v55 = vpop.f32.mrf.mxu0 }
 0x67e   :  { %7694 = vst [vmem:[%s16462_s2 + $0x1400] sm:$0xff] %v4970_v55 }
 0x67f   :  { %v9187_v7 = vpop.f32.mrf.mxu1  ;;  %v4974_v11 = vpop.f32.mrf.mxu0 }
 0x680   :  { %7701 = vst [vmem:[%s16462_s2 + $0x1438] sm:$0xff] %v9187_v7  ;;  %7696 = vst [vmem:[%s16462_s2 + $0x1410] sm:$0xff] %v4974_v11 }
 0x681   :  { %v6625_v21 = vpop.f32.mrf.mxu1  ;;  %v4976_v26 = vpop.f32.mrf.mxu0 }
 0x682   :  { %7698 = vst [vmem:[%s16462_s2 + $0x1420] sm:$0xff] %v6625_v21  ;;  %7697 = vst [vmem:[%s16462_s2 + $0x1418] sm:$0xff] %v4976_v26 }
 0x683   :  { %v4980_v58 = vpop.f32.mrf.mxu0 }
 0x684   :  { %7699 = vst [vmem:[%s16462_s2 + $0x1428] sm:$0xff] %v4980_v58 }
 0x685   :  { %v4982_v59 = vpop.f32.mrf.mxu0 }
 0x686   :  { %7700 = vst [vmem:[%s16462_s2 + $0x1430] sm:$0xff] %v4982_v59  ;;  %v9190_v53 = vpop.f32.mrf.mxu1 }
 0x687   :  { %7707 = vst [vmem:[%s16462_s2 + $0x1468] sm:$0xff] %v9190_v53  ;;  %v4986_v28 = vpop.f32.mrf.mxu0 }
 0x688   :  { %7702 = vst [vmem:[%s16462_s2 + $0x1440] sm:$0xff] %v4986_v28  ;;  %v6635_v14 = vpop.f32.mrf.mxu1 }
 0x689   :  { %7704 = vst [vmem:[%s16462_s2 + $0x1450] sm:$0xff] %v6635_v14  ;;  %v4988_v54 = vpop.f32.mrf.mxu0 }
 0x68a   :  { %7703 = vst [vmem:[%s16462_s2 + $0x1448] sm:$0xff] %v4988_v54 }
 0x68b   :  { %v4992_v13 = vpop.f32.mrf.mxu0 }
 0x68c   :  { %7705 = vst [vmem:[%s16462_s2 + $0x1458] sm:$0xff] %v4992_v13 }
 0x68d   :  { %v4994_v45 = vpop.f32.mrf.mxu0 }
 0x68e   :  { %7706 = vst [vmem:[%s16462_s2 + $0x1460] sm:$0xff] %v4994_v45  ;;  %v9193_v15 = vpop.f32.mrf.mxu1 }
 0x68f   :  { %7713 = vst [vmem:[%s16462_s2 + $0x1498] sm:$0xff] %v9193_v15  ;;  %v4998_v63 = vpop.f32.mrf.mxu0 }
 0x690   :  { %7708 = vst [vmem:[%s16462_s2 + $0x1470] sm:$0xff] %v4998_v63  ;;  %v6645_v0 = vpop.f32.mrf.mxu1 }
 0x691   :  { %7710 = vst [vmem:[%s16462_s2 + $0x1480] sm:$0xff] %v6645_v0  ;;  %v5000_v33 = vpop.f32.mrf.mxu0 }
 0x692   :  { %7709 = vst [vmem:[%s16462_s2 + $0x1478] sm:$0xff] %v5000_v33 }
 0x693   :  { %v5004_v31 = vpop.f32.mrf.mxu0 }
 0x694   :  { %7711 = vst [vmem:[%s16462_s2 + $0x1488] sm:$0xff] %v5004_v31 }
 0x695   :  { %v5006_v41 = vpop.f32.mrf.mxu0 }
 0x696   :  { %7712 = vst [vmem:[%s16462_s2 + $0x1490] sm:$0xff] %v5006_v41  ;;  %v9196_v27 = vpop.f32.mrf.mxu1 }
 0x697   :  { %7719 = vst [vmem:[%s16462_s2 + $0x14c8] sm:$0xff] %v9196_v27  ;;  %v5010_v16 = vpop.f32.mrf.mxu0 }
 0x698   :  { %7714 = vst [vmem:[%s16462_s2 + $0x14a0] sm:$0xff] %v5010_v16  ;;  %v6655_v29 = vpop.f32.mrf.mxu1 }
 0x699   :  { %7716 = vst [vmem:[%s16462_s2 + $0x14b0] sm:$0xff] %v6655_v29  ;;  %v5012_v12 = vpop.f32.mrf.mxu0 }
 0x69a   :  { %7715 = vst [vmem:[%s16462_s2 + $0x14a8] sm:$0xff] %v5012_v12 }
 0x69b   :  { %v5016_v57 = vpop.f32.mrf.mxu0 }
 0x69c   :  { %7717 = vst [vmem:[%s16462_s2 + $0x14b8] sm:$0xff] %v5016_v57 }
 0x69d   :  { %v5018_v49 = vpop.f32.mrf.mxu0 }
 0x69e   :  { %7718 = vst [vmem:[%s16462_s2 + $0x14c0] sm:$0xff] %v5018_v49  ;;  %v9199_v8 = vpop.f32.mrf.mxu1 }
 0x69f   :  { %7725 = vst [vmem:[%s16462_s2 + $0x14f8] sm:$0xff] %v9199_v8  ;;  %v5022_v10 = vpop.f32.mrf.mxu0 }
 0x6a0   :  { %7720 = vst [vmem:[%s16462_s2 + $0x14d0] sm:$0xff] %v5022_v10  ;;  %v6665_v40 = vpop.f32.mrf.mxu1 }
 0x6a1   :  { %7722 = vst [vmem:[%s16462_s2 + $0x14e0] sm:$0xff] %v6665_v40  ;;  %v5024_v22 = vpop.f32.mrf.mxu0 }
 0x6a2   :  { %7721 = vst [vmem:[%s16462_s2 + $0x14d8] sm:$0xff] %v5024_v22 }
 0x6a3   :  { %v5028_v9 = vpop.f32.mrf.mxu0 }
 0x6a4   :  { %7723 = vst [vmem:[%s16462_s2 + $0x14e8] sm:$0xff] %v5028_v9  ;;  %v9202_v35 = vpop.f32.mrf.mxu1 }
 0x6a5   :  { %7731 = vst [vmem:[%s16462_s2 + $0x1528] sm:$0xff] %v9202_v35  ;;  %v5030_v47 = vpop.f32.mrf.mxu0 }
 0x6a6   :  { %7724 = vst [vmem:[%s16462_s2 + $0x14f0] sm:$0xff] %v5030_v47  ;;  %v6675_v20 = vpop.f32.mrf.mxu1 }
 0x6a7   :  { %7728 = vst [vmem:[%s16462_s2 + $0x1510] sm:$0xff] %v6675_v20  ;;  %v5034_v51 = vpop.f32.mrf.mxu0 }
 0x6a8   :  { %7726 = vst [vmem:[%s16462_s2 + $0x1500] sm:$0xff] %v5034_v51  ;;  %v9205_v61 = vpop.f32.mrf.mxu1 }
 0x6a9   :  { %7737 = vst [vmem:[%s16462_s2 + $0x1558] sm:$0xff] %v9205_v61  ;;  %v5036_v60 = vpop.f32.mrf.mxu0 }
 0x6aa   :  { %7727 = vst [vmem:[%s16462_s2 + $0x1508] sm:$0xff] %v5036_v60  ;;  %v6685_v46 = vpop.f32.mrf.mxu1 }
 0x6ab   :  { %7734 = vst [vmem:[%s16462_s2 + $0x1540] sm:$0xff] %v6685_v46 }
 0x6ac   :  { %v9208_v42 = vpop.f32.mrf.mxu1 }
 0x6ad   :  { %7743 = vst [vmem:[%s16462_s2 + $0x1588] sm:$0xff] %v9208_v42 }
 0x6ae   :  { %v6695_v4 = vpop.f32.mrf.mxu1 }
 0x6af   :  { %7740 = vst [vmem:[%s16462_s2 + $0x1570] sm:$0xff] %v6695_v4 }
 0x6b0   :  { %v9211_v39 = vpop.f32.mrf.mxu1 }
 0x6b1   :  { %7749 = vst [vmem:[%s16462_s2 + $0x15b8] sm:$0xff] %v9211_v39 }
 0x6b2   :  { %v6705_v44 = vpop.f32.mrf.mxu1 }
 0x6b3   :  { %7746 = vst [vmem:[%s16462_s2 + $0x15a0] sm:$0xff] %v6705_v44 }
 0x6b4   :  { %v9214_v43 = vpop.f32.mrf.mxu1 }
 0x6b5   :  { %7755 = vst [vmem:[%s16462_s2 + $0x15e8] sm:$0xff] %v9214_v43 }
 0x6b6   :  { %v6715_v3 = vpop.f32.mrf.mxu1 }
 0x6b7   :  { %7752 = vst [vmem:[%s16462_s2 + $0x15d0] sm:$0xff] %v6715_v3 }
 0x6b8   :  { %v9217_v37 = vpop.f32.mrf.mxu1 }
 0x6b9   :  { %7761 = vst [vmem:[%s16462_s2 + $0x1618] sm:$0xff] %v9217_v37 }
 0x6ba   :  { %v6725_v1 = vpop.f32.mrf.mxu1 }
 0x6bb   :  { %7758 = vst [vmem:[%s16462_s2 + $0x1600] sm:$0xff] %v6725_v1 }
 0x6bc   :  { %v9220_v17 = vpop.f32.mrf.mxu1 }
 0x6bd   :  { %7767 = vst [vmem:[%s16462_s2 + $0x1648] sm:$0xff] %v9220_v17 }
 0x6be   :  { %v6735_v34 = vpop.f32.mrf.mxu1 }
 0x6bf   :  { %7764 = vst [vmem:[%s16462_s2 + $0x1630] sm:$0xff] %v6735_v34 }
 0x6c0   :  { %v9223_v32 = vpop.f32.mrf.mxu1 }
 0x6c1   :  { %7773 = vst [vmem:[%s16462_s2 + $0x1678] sm:$0xff] %v9223_v32 }
 0x6c2   :  { %v6745_v62 = vpop.f32.mrf.mxu1 }
 0x6c3   :  { %7770 = vst [vmem:[%s16462_s2 + $0x1660] sm:$0xff] %v6745_v62 }
 0x6c4   :  { %v9226_v38 = vpop.f32.mrf.mxu1 }
 0x6c5   :  { %7779 = vst [vmem:[%s16462_s2 + $0x16a8] sm:$0xff] %v9226_v38 }
 0x6c6   :  { %v6755_v19 = vpop.f32.mrf.mxu1 }
 0x6c7   :  { %7776 = vst [vmem:[%s16462_s2 + $0x1690] sm:$0xff] %v6755_v19 }
 0x6c8   :  { %v9229_v23 = vpop.f32.mrf.mxu1 }
 0x6c9   :  { %7785 = vst [vmem:[%s16462_s2 + $0x16d8] sm:$0xff] %v9229_v23 }
 0x6ca   :  { %v6765_v6 = vpop.f32.mrf.mxu1 }
 0x6cb   :  { %7782 = vst [vmem:[%s16462_s2 + $0x16c0] sm:$0xff] %v6765_v6 }
 0x6cc   :  { %v9232_v36 = vpop.f32.mrf.mxu1 }
 0x6cd   :  { %7791 = vst [vmem:[%s16462_s2 + $0x1708] sm:$0xff] %v9232_v36 }
 0x6ce   :  { %v6775_v2 = vpop.f32.mrf.mxu1 }
 0x6cf   :  { %7788 = vst [vmem:[%s16462_s2 + $0x16f0] sm:$0xff] %v6775_v2 }
 0x6d0   :  { %v9235_v50 = vpop.f32.mrf.mxu1 }
 0x6d1   :  { %7797 = vst [vmem:[%s16462_s2 + $0x1738] sm:$0xff] %v9235_v50 }
 0x6d2   :  { %v6785_v24 = vpop.f32.mrf.mxu1 }
 0x6d3   :  { %7794 = vst [vmem:[%s16462_s2 + $0x1720] sm:$0xff] %v6785_v24 }
 0x6d4   :  { %v9238_v18 = vpop.f32.mrf.mxu1 }
 0x6d5   :  { %7803 = vst [vmem:[%s16462_s2 + $0x1768] sm:$0xff] %v9238_v18 }
 0x6d6   :  { %v6795_v56 = vpop.f32.mrf.mxu1 }
 0x6d7   :  { %7800 = vst [vmem:[%s16462_s2 + $0x1750] sm:$0xff] %v6795_v56 }
 0x6d8   :  { %v9241_v52 = vpop.f32.mrf.mxu1 }
 0x6d9   :  { %7809 = vst [vmem:[%s16462_s2 + $0x1798] sm:$0xff] %v9241_v52 }
 0x6da   :  { %v6805_v30 = vpop.f32.mrf.mxu1 }
 0x6db   :  { %7806 = vst [vmem:[%s16462_s2 + $0x1780] sm:$0xff] %v6805_v30 }
 0x6dc   :  { %v9244_v5 = vpop.f32.mrf.mxu1 }
 0x6dd   :  { %7815 = vst [vmem:[%s16462_s2 + $0x17c8] sm:$0xff] %v9244_v5 }
 0x6de   :  { %v6815_v48 = vpop.f32.mrf.mxu1 }
 0x6df   :  { %7812 = vst [vmem:[%s16462_s2 + $0x17b0] sm:$0xff] %v6815_v48 }
 0x6e0   :  { %v9247_v25 = vpop.f32.mrf.mxu1 }
 0x6e1   :  { %7821 = vst [vmem:[%s16462_s2 + $0x17f8] sm:$0xff] %v9247_v25 }
 0x6e2   :  { %v6825_v55 = vpop.f32.mrf.mxu1 }
 0x6e3   :  { %7818 = vst [vmem:[%s16462_s2 + $0x17e0] sm:$0xff] %v6825_v55 }
 0x6e4   :  { %v9250_v7 = vpop.f32.mrf.mxu1 }
 0x6e5   :  { %7827 = vst [vmem:[%s16462_s2 + $0x1828] sm:$0xff] %v9250_v7 }
 0x6e6   :  { %v6835_v11 = vpop.f32.mrf.mxu1 }
 0x6e7   :  { %7824 = vst [vmem:[%s16462_s2 + $0x1810] sm:$0xff] %v6835_v11 }
 0x6e8   :  { %v9253_v21 = vpop.f32.mrf.mxu1 }
 0x6e9   :  { %7833 = vst [vmem:[%s16462_s2 + $0x1858] sm:$0xff] %v9253_v21 }
 0x6ea   :  { %v6845_v26 = vpop.f32.mrf.mxu1 }
 0x6eb   :  { %7830 = vst [vmem:[%s16462_s2 + $0x1840] sm:$0xff] %v6845_v26 }
 0x6ec   :  { %v9256_v58 = vpop.f32.mrf.mxu1 }
 0x6ed   :  { %7839 = vst [vmem:[%s16462_s2 + $0x1888] sm:$0xff] %v9256_v58 }
 0x6ee   :  { %v6855_v59 = vpop.f32.mrf.mxu1 }
 0x6ef   :  { %7836 = vst [vmem:[%s16462_s2 + $0x1870] sm:$0xff] %v6855_v59 }
 0x6f0   :  { %v9259_v53 = vpop.f32.mrf.mxu1 }
 0x6f1   :  { %7845 = vst [vmem:[%s16462_s2 + $0x18b8] sm:$0xff] %v9259_v53 }
 0x6f2   :  { %v6865_v28 = vpop.f32.mrf.mxu1 }
 0x6f3   :  { %7842 = vst [vmem:[%s16462_s2 + $0x18a0] sm:$0xff] %v6865_v28 }
 0x6f4   :  { %v9262_v14 = vpop.f32.mrf.mxu1 }
 0x6f5   :  { %7851 = vst [vmem:[%s16462_s2 + $0x18e8] sm:$0xff] %v9262_v14 }
 0x6f6   :  { %v6875_v54 = vpop.f32.mrf.mxu1 }
 0x6f7   :  { %7848 = vst [vmem:[%s16462_s2 + $0x18d0] sm:$0xff] %v6875_v54 }
 0x6f8   :  { %v9265_v13 = vpop.f32.mrf.mxu1 }
 0x6f9   :  { %7857 = vst [vmem:[%s16462_s2 + $0x1918] sm:$0xff] %v9265_v13 }
 0x6fa   :  { %v6885_v45 = vpop.f32.mrf.mxu1 }
 0x6fb   :  { %7854 = vst [vmem:[%s16462_s2 + $0x1900] sm:$0xff] %v6885_v45 }
 0x6fc   :  { %v9268_v15 = vpop.f32.mrf.mxu1 }
 0x6fd   :  { %7863 = vst [vmem:[%s16462_s2 + $0x1948] sm:$0xff] %v9268_v15 }
 0x6fe   :  { %v6895_v63 = vpop.f32.mrf.mxu1 }
 0x6ff   :  { %7860 = vst [vmem:[%s16462_s2 + $0x1930] sm:$0xff] %v6895_v63 }
 0x700   :  { %v9271_v0 = vpop.f32.mrf.mxu1 }
 0x701   :  { %7869 = vst [vmem:[%s16462_s2 + $0x1978] sm:$0xff] %v9271_v0 }
 0x702   :  { %v6905_v33 = vpop.f32.mrf.mxu1 }
 0x703   :  { %7866 = vst [vmem:[%s16462_s2 + $0x1960] sm:$0xff] %v6905_v33 }
 0x704   :  { %v9274_v31 = vpop.f32.mrf.mxu1 }
 0x705   :  { %7875 = vst [vmem:[%s16462_s2 + $0x19a8] sm:$0xff] %v9274_v31 }
 0x706   :  { %v6915_v41 = vpop.f32.mrf.mxu1 }
 0x707   :  { %7872 = vst [vmem:[%s16462_s2 + $0x1990] sm:$0xff] %v6915_v41 }
 0x708   :  { %v9277_v27 = vpop.f32.mrf.mxu1 }
 0x709   :  { %7881 = vst [vmem:[%s16462_s2 + $0x19d8] sm:$0xff] %v9277_v27 }
 0x70a   :  { %v6925_v16 = vpop.f32.mrf.mxu1 }
 0x70b   :  { %7878 = vst [vmem:[%s16462_s2 + $0x19c0] sm:$0xff] %v6925_v16 }
 0x70c   :  { %v9280_v29 = vpop.f32.mrf.mxu1 }
 0x70d   :  { %7887 = vst [vmem:[%s16462_s2 + $0x1a08] sm:$0xff] %v9280_v29 }
 0x70e   :  { %v6935_v12 = vpop.f32.mrf.mxu1 }
 0x70f   :  { %7884 = vst [vmem:[%s16462_s2 + $0x19f0] sm:$0xff] %v6935_v12 }
 0x710   :  { %v9283_v57 = vpop.f32.mrf.mxu1 }
 0x711   :  { %7893 = vst [vmem:[%s16462_s2 + $0x1a38] sm:$0xff] %v9283_v57 }
 0x712   :  { %v6945_v49 = vpop.f32.mrf.mxu1 }
 0x713   :  { %7890 = vst [vmem:[%s16462_s2 + $0x1a20] sm:$0xff] %v6945_v49 }
 0x714   :  { %v9286_v8 = vpop.f32.mrf.mxu1 }
 0x715   :  { %7899 = vst [vmem:[%s16462_s2 + $0x1a68] sm:$0xff] %v9286_v8 }
 0x716   :  { %v6955_v10 = vpop.f32.mrf.mxu1 }
 0x717   :  { %7896 = vst [vmem:[%s16462_s2 + $0x1a50] sm:$0xff] %v6955_v10 }
 0x718   :  { %v9289_v40 = vpop.f32.mrf.mxu1 }
 0x719   :  { %7905 = vst [vmem:[%s16462_s2 + $0x1a98] sm:$0xff] %v9289_v40 }
 0x71a   :  { %v6965_v22 = vpop.f32.mrf.mxu1 }
 0x71b   :  { %7902 = vst [vmem:[%s16462_s2 + $0x1a80] sm:$0xff] %v6965_v22 }
 0x71c   :  { %v9292_v9 = vpop.f32.mrf.mxu1 }
 0x71d   :  { %7911 = vst [vmem:[%s16462_s2 + $0x1ac8] sm:$0xff] %v9292_v9 }
 0x71e   :  { %v6975_v35 = vpop.f32.mrf.mxu1 }
 0x71f   :  { %7908 = vst [vmem:[%s16462_s2 + $0x1ab0] sm:$0xff] %v6975_v35 }
 0x720   :  { %v9295_v47 = vpop.f32.mrf.mxu1 }
 0x721   :  { %7917 = vst [vmem:[%s16462_s2 + $0x1af8] sm:$0xff] %v9295_v47 }
 0x722   :  { %v6985_v20 = vpop.f32.mrf.mxu1 }
 0x723   :  { %7914 = vst [vmem:[%s16462_s2 + $0x1ae0] sm:$0xff] %v6985_v20 }
 0x724   :  { %v9298_v51 = vpop.f32.mrf.mxu1 }
 0x725   :  { %7923 = vst [vmem:[%s16462_s2 + $0x1b28] sm:$0xff] %v9298_v51 }
 0x726   :  { %v6995_v61 = vpop.f32.mrf.mxu1 }
 0x727   :  { %7920 = vst [vmem:[%s16462_s2 + $0x1b10] sm:$0xff] %v6995_v61 }
 0x728   :  { %v9301_v60 = vpop.f32.mrf.mxu1 }
 0x729   :  { %7929 = vst [vmem:[%s16462_s2 + $0x1b58] sm:$0xff] %v9301_v60 }
 0x72a   :  { %v7005_v46 = vpop.f32.mrf.mxu1 }
 0x72b   :  { %7926 = vst [vmem:[%s16462_s2 + $0x1b40] sm:$0xff] %v7005_v46 }
 0x72c   :  { %v9304_v42 = vpop.f32.mrf.mxu1 }
 0x72d   :  { %7935 = vst [vmem:[%s16462_s2 + $0x1b88] sm:$0xff] %v9304_v42 }
 0x72e   :  { %v7015_v4 = vpop.f32.mrf.mxu1 }
 0x72f   :  { %7932 = vst [vmem:[%s16462_s2 + $0x1b70] sm:$0xff] %v7015_v4 }
 0x730   :  { %v9307_v39 = vpop.f32.mrf.mxu1 }
 0x731   :  { %7941 = vst [vmem:[%s16462_s2 + $0x1bb8] sm:$0xff] %v9307_v39 }
 0x732   :  { %v7025_v44 = vpop.f32.mrf.mxu1 }
 0x733   :  { %7938 = vst [vmem:[%s16462_s2 + $0x1ba0] sm:$0xff] %v7025_v44 }
 0x734   :  { %v9310_v43 = vpop.f32.mrf.mxu1 }
 0x735   :  { %7947 = vst [vmem:[%s16462_s2 + $0x1be8] sm:$0xff] %v9310_v43 }
 0x736   :  { %v7035_v3 = vpop.f32.mrf.mxu1 }
 0x737   :  { %7944 = vst [vmem:[%s16462_s2 + $0x1bd0] sm:$0xff] %v7035_v3 }
 0x738   :  { %v9313_v37 = vpop.f32.mrf.mxu1 }
 0x739   :  { %7953 = vst [vmem:[%s16462_s2 + $0x1c18] sm:$0xff] %v9313_v37 }
 0x73a   :  { %v7045_v1 = vpop.f32.mrf.mxu1 }
 0x73b   :  { %7950 = vst [vmem:[%s16462_s2 + $0x1c00] sm:$0xff] %v7045_v1 }

</bundles_post_ra>
